<compile_context>
chip_gen: v5e
topology: v5e:2x2
jax: 0.10.0
libtpu: 0.0.40
codegen_flags: <defaults>
</compile_context>

<pallas_src>
import jax
import jax.numpy as jnp
from jax.experimental import pallas as pl

# ----------------------------- model hyper-params ---------------------------
VOCAB = 32          # vocab_size
EMB = 16            # embedding_dim
HID = 32            # hidden_dim
NUM_LAYERS = 2      # num_layers
ENC_HID = 2 * HID   # encoder_hidden_dim (bidirectional concat)
VOCAB_PAD = 128     # lane-dense logits; sliced back to VOCAB outside the kernel
BP = 8              # batch padded to the f32 sublane count


# ------------------------- shared in-kernel gate math ------------------------
def _g_lane_mask(shape, H):
    """Boolean mask of the 'g' (cell-candidate) lanes for PyTorch gate order
    i,f,g,o repeated every 4H lanes."""
    lane = jax.lax.broadcasted_iota(jnp.int32, shape, 1)
    pos = lane % (4 * H)
    return (pos >= 2 * H) & (pos < 3 * H)


def _lstm_cell(gates, c, is_g, H):
    """gates: (B, n*4H) pre-activations, c: (B, n*H).
    One sigmoid pass over the full vreg using tanh(x) = 2*sigmoid(2x) - 1."""
    scaled = jnp.where(is_g, 2.0 * gates, gates)
    s = jax.nn.sigmoid(scaled)
    act = jnp.where(is_g, 2.0 * s - 1.0, s)
    n = gates.shape[-1] // (4 * H)
    h_parts, c_parts = [], []
    for d in range(n):
        off = d * 4 * H
        i_g = act[:, off:off + H]
        f_g = act[:, off + H:off + 2 * H]
        g_g = act[:, off + 2 * H:off + 3 * H]
        o_g = act[:, off + 3 * H:off + 4 * H]
        c_d = c[:, d * H:(d + 1) * H]
        c_new = f_g * c_d + i_g * g_g
        h_new = o_g * jnp.tanh(c_new)
        h_parts.append(h_new)
        c_parts.append(c_new)
    return h_parts, c_parts


# --------------------------- fully fused seq2seq kernel ----------------------
def _seq2seq_kernel(src_ref, mask_ref, demb_ref,
                    eW0_ref, eU0_ref, eb0_ref,
                    eW1_ref, eU1_ref, eb1_ref,
                    ihW_ref, ihb_ref, icW_ref, icb_ref,
                    dW0_ref, dU0_ref, db0_ref,
                    dWU1_ref, db1_ref,
                    oW_ref, ob_ref,
                    logits_ref):
    H = HID
    T = mask_ref.shape[0]
    Tm1 = demb_ref.shape[0] // BP

    mask = mask_ref[...]                              # (T, BP, H)
    # lane masks hoisted out of the unrolled loops (broadcast_in_dim is not CSE'd)
    enc_gmask = _g_lane_mask((BP, 8 * H), H)
    dec_gmask = _g_lane_mask((BP, 4 * H), H)

    # ---------------- bidirectional encoder layer (fused fwd/bwd) ------------
    def bi_layer(x2d, Wih, Whh_bd, b):
        # hoisted input->gates projection: all T steps, both directions, one matmul
        gx = jnp.dot(x2d, Wih, preferred_element_type=jnp.float32) + b  # (T*BP, 8H)
        h = jnp.zeros((BP, 2 * H), jnp.float32)       # [h_fwd | h_bwd]
        c = jnp.zeros((BP, 2 * H), jnp.float32)
        out_f = [None] * T
        out_b = [None] * T
        for s in range(T):                            # static, fully unrolled
            tf, tb = s, T - 1 - s                     # fwd time / bwd time
            gxd = jnp.concatenate(
                [gx[tf * BP:(tf + 1) * BP, 0:4 * H],
                 gx[tb * BP:(tb + 1) * BP, 4 * H:8 * H]], axis=1)
            gates = gxd + jnp.dot(h, Whh_bd, preferred_element_type=jnp.float32)
            h_p, c_p = _lstm_cell(gates, c, enc_gmask, H)
            m_f = mask[tf]
            m_b = mask[tb]
            # TODO(synk): pack_padded_sequence has no Pallas equivalent; its
            # semantics (freeze state / zero outputs past each length) are
            # reproduced with this mask.
            h = jnp.concatenate(
                [m_f * h_p[0] + (1.0 - m_f) * h[:, 0:H],
                 m_b * h_p[1] + (1.0 - m_b) * h[:, H:2 * H]], axis=1)
            c = jnp.concatenate(
                [m_f * c_p[0] + (1.0 - m_f) * c[:, 0:H],
                 m_b * c_p[1] + (1.0 - m_b) * c[:, H:2 * H]], axis=1)
            out_f[tf] = m_f * h_p[0]
            out_b[tb] = m_b * h_p[1]
        x_next = jnp.concatenate(
            [jnp.concatenate([out_f[t], out_b[t]], axis=1) for t in range(T)],
            axis=0)                                   # (T*BP, 2H)
        return x_next, h, c

    x1, _, _ = bi_layer(src_ref[...], eW0_ref[...], eU0_ref[...], eb0_ref[...])
    _, h_fin, c_fin = bi_layer(x1, eW1_ref[...], eU1_ref[...], eb1_ref[...])

    # --------- init_hidden / init_cell (same state seeds both layers, as in
    # the reference's .unsqueeze(0).repeat(num_layers, 1, 1); no tanh) --------
    h0 = jnp.dot(h_fin, ihW_ref[...], preferred_element_type=jnp.float32) + ihb_ref[...]
    c0 = jnp.dot(c_fin, icW_ref[...], preferred_element_type=jnp.float32) + icb_ref[...]

    # ------------------------------- decoder ---------------------------------
    # layer-0 input projection hoisted out of the recurrence (emb is loop-invariant)
    gx_dec = (jnp.dot(demb_ref[...], dW0_ref[...], preferred_element_type=jnp.float32)
              + db0_ref[...])                          # (Tm1*BP, 4H)
    dU0 = dU0_ref[...]
    dWU1 = dWU1_ref[...]
    db1 = db1_ref[...]

    h_l = [h0, h0]
    c_l = [c0, c0]
    tops = [None] * Tm1
    for s in range(Tm1):                               # static, fully unrolled
        gates0 = gx_dec[s * BP:(s + 1) * BP] + jnp.dot(
            h_l[0], dU0, preferred_element_type=jnp.float32)
        hp, cp = _lstm_cell(gates0, c_l[0], dec_gmask, H)
        h_l[0], c_l[0] = hp[0], cp[0]

        xh = jnp.concatenate([h_l[0], h_l[1]], axis=1)   # [x_t | h_{t-1}]  (BP, 2H)
        gates1 = jnp.dot(xh, dWU1, preferred_element_type=jnp.float32) + db1
        hp, cp = _lstm_cell(gates1, c_l[1], dec_gmask, H)
        h_l[1], c_l[1] = hp[0], cp[0]
        tops[s] = h_l[1]

    # hoisted output projection: one matmul + one lane-dense store
    top = jnp.concatenate(tops, axis=0)                # (Tm1*BP, H)
    logits_ref[...] = (jnp.dot(top, oW_ref[...], preferred_element_type=jnp.float32)
                       + ob_ref[...])


# ------------------------------ full forward ---------------------------------
def seq2seq_forward(pp, source, target, source_lengths, target_lengths):
    del target_lengths                     # unused in the reference forward
    B, T_t = target.shape
    _, T_s = source.shape
    Tm1 = T_t - 1
    pad_b = BP - B

    source_p = jnp.pad(source, ((0, pad_b), (0, 0)))          # (BP, T_s)
    target_p = jnp.pad(target, ((0, pad_b), (0, 0)))          # (BP, T_t)
    lengths_p = jnp.pad(source_lengths, (0, pad_b))

    # time-major embedding gathers (no float transpose needed afterwards)
    src_idx = jnp.transpose(source_p).reshape(T_s * BP)
    src_emb = jnp.take(pp['enc_emb'], src_idx, axis=0)        # (T_s*BP, EMB)
    dec_idx = jnp.transpose(target_p[:, :Tm1]).reshape(Tm1 * BP)
    dec_emb = jnp.take(pp['dec_emb'], dec_idx, axis=0)        # (Tm1*BP, EMB)

    mask = (jnp.arange(T_s)[:, None] < lengths_p[None, :]).astype(jnp.float32)
    mask_b = jnp.broadcast_to(mask[:, :, None], (T_s, BP, HID))

    logits2d = pl.pallas_call(
        _seq2seq_kernel,
        out_shape=jax.ShapeDtypeStruct((Tm1 * BP, VOCAB_PAD), jnp.float32),
    )(src_emb, mask_b, dec_emb,
      pp['eW0'], pp['eU0'], pp['eb0'],
      pp['eW1'], pp['eU1'], pp['eb1'],
      pp['ihW'], pp['ihb'], pp['icW'], pp['icb'],
      pp['dW0'], pp['dU0'], pp['db0'],
      pp['dWU1'], pp['db1'],
      pp['oW'], pp['ob'])

    logits = logits2d.reshape(Tm1, BP, VOCAB_PAD)
    logits = jnp.transpose(logits, (1, 0, 2))[:B, :, :VOCAB]  # (B, T_t-1, V)
    # outputs[:, 0, :] stays zero, exactly like the torch.zeros + loop fill
    return jnp.pad(logits, ((0, 0), (1, 0), (0, 0)))          # (B, T_t, V)


# ------------------------------- params init ---------------------------------
def init_params(key):
    keys = iter(jax.random.split(key, 128))

    def w(shape, scale=0.1):
        return (scale * jax.random.normal(next(keys), shape)).astype(jnp.float32)

    p = {}
    p['enc_emb'] = w((VOCAB, EMB)).at[0].set(0.0)   # padding_idx=0
    p['dec_emb'] = w((VOCAB, EMB)).at[0].set(0.0)
    for l in range(NUM_LAYERS):                     # encoder: bidirectional
        in_dim = EMB if l == 0 else 2 * HID
        for d in ('fwd', 'bwd'):
            p[f'enc_l{l}_{d}_Wih'] = w((in_dim, 4 * HID))
            p[f'enc_l{l}_{d}_Whh'] = w((HID, 4 * HID))
            p[f'enc_l{l}_{d}_b'] = w((4 * HID,))    # b_ih + b_hh combined
    for l in range(NUM_LAYERS):                     # decoder (no attention)
        in_dim = EMB if l == 0 else HID
        p[f'dec_l{l}_Wih'] = w((in_dim, 4 * HID))
        p[f'dec_l{l}_Whh'] = w((HID, 4 * HID))
        p[f'dec_l{l}_b'] = w((4 * HID,))
    p['out_W'] = w((HID, VOCAB))
    p['out_b'] = w((VOCAB,))
    p['init_h_W'] = w((ENC_HID, HID))
    p['init_h_b'] = w((HID,))
    p['init_c_W'] = w((ENC_HID, HID))
    p['init_c_b'] = w((HID,))
    return p


def pack_params(p):
    """One-time packing into the kernel layout (done outside the jitted
    forward so no per-call XLA glue ops remain)."""
    pp = {'enc_emb': p['enc_emb'], 'dec_emb': p['dec_emb']}
    for l in range(NUM_LAYERS):
        Wf, Wb = p[f'enc_l{l}_fwd_Wih'], p[f'enc_l{l}_bwd_Wih']
        pp[f'eW{l}'] = jnp.concatenate([Wf, Wb], axis=1)            # (Din, 8H)
        Uf, Ub = p[f'enc_l{l}_fwd_Whh'], p[f'enc_l{l}_bwd_Whh']
        Z = jnp.zeros_like(Uf)
        pp[f'eU{l}'] = jnp.concatenate(                             # block-diag (2H, 8H)
            [jnp.concatenate([Uf, Z], axis=1),
             jnp.concatenate([Z, Ub], axis=1)], axis=0)
        pp[f'eb{l}'] = jnp.concatenate(
            [p[f'enc_l{l}_fwd_b'], p[f'enc_l{l}_bwd_b']]).reshape(1, -1)
    pp['ihW'] = p['init_h_W']
    pp['ihb'] = p['init_h_b'].reshape(1, -1)
    pp['icW'] = p['init_c_W']
    pp['icb'] = p['init_c_b'].reshape(1, -1)
    pp['dW0'] = p['dec_l0_Wih']
    pp['dU0'] = p['dec_l0_Whh']
    pp['db0'] = p['dec_l0_b'].reshape(1, -1)
    pp['dWU1'] = jnp.concatenate([p['dec_l1_Wih'], p['dec_l1_Whh']], axis=0)  # (2H,4H)
    pp['db1'] = p['dec_l1_b'].reshape(1, -1)
    pp['oW'] = jnp.pad(p['out_W'], ((0, 0), (0, VOCAB_PAD - VOCAB)))
    pp['ob'] = jnp.pad(p['out_b'], (0, VOCAB_PAD - VOCAB)).reshape(1, -1)
    return pp


# ----------------------------------- main ------------------------------------
if __name__ == "__main__":
    key = jax.random.PRNGKey(0)
    k_param, k_src, k_tgt = jax.random.split(key, 3)

    params = pack_params(init_params(k_param))

    B, T_src, T_tgt = 2, 8, 6
    source = jax.random.randint(k_src, (B, T_src), 1, VOCAB, dtype=jnp.int32)
    target = jax.random.randint(k_tgt, (B, T_tgt), 1, VOCAB, dtype=jnp.int32)
    source_lengths = jnp.array([8, 5], dtype=jnp.int32)
    target_lengths = jnp.array([6, 4], dtype=jnp.int32)
    # zero out padded source positions (padding_idx = 0)
    pad_mask = jnp.arange(T_src)[None, :] < source_lengths[:, None]
    source = jnp.where(pad_mask, source, 0)

    fwd = jax.jit(seq2seq_forward)
    outputs = fwd(params, source, target, source_lengths, target_lengths)
    jax.block_until_ready(outputs)
    assert outputs.shape == (B, T_tgt, VOCAB)
    print("KERNEL_OK")
</pallas_src>

<mosaic_0001>
module attributes {stable_mosaic.version = 11 : i64} {
  func.func @_seq2seq_kernel(%arg0: memref<64x16xf32, #tpu.memory_space<vmem>>, %arg1: memref<8x8x32xf32, #tpu.memory_space<vmem>>, %arg2: memref<40x16xf32, #tpu.memory_space<vmem>>, %arg3: memref<16x256xf32, #tpu.memory_space<vmem>>, %arg4: memref<64x256xf32, #tpu.memory_space<vmem>>, %arg5: memref<1x256xf32, #tpu.memory_space<vmem>>, %arg6: memref<64x256xf32, #tpu.memory_space<vmem>>, %arg7: memref<64x256xf32, #tpu.memory_space<vmem>>, %arg8: memref<1x256xf32, #tpu.memory_space<vmem>>, %arg9: memref<64x32xf32, #tpu.memory_space<vmem>>, %arg10: memref<1x32xf32, #tpu.memory_space<vmem>>, %arg11: memref<64x32xf32, #tpu.memory_space<vmem>>, %arg12: memref<1x32xf32, #tpu.memory_space<vmem>>, %arg13: memref<16x128xf32, #tpu.memory_space<vmem>>, %arg14: memref<32x128xf32, #tpu.memory_space<vmem>>, %arg15: memref<1x128xf32, #tpu.memory_space<vmem>>, %arg16: memref<64x128xf32, #tpu.memory_space<vmem>>, %arg17: memref<1x128xf32, #tpu.memory_space<vmem>>, %arg18: memref<32x128xf32, #tpu.memory_space<vmem>>, %arg19: memref<1x128xf32, #tpu.memory_space<vmem>>, %arg20: memref<40x128xf32, #tpu.memory_space<vmem>>) attributes {dimension_semantics = [], scalar_prefetch = 0 : i64, scratch_operands = 0 : i64, tpu.core_type = #tpu.core_type<tc>} {
    %c0 = arith.constant 0 : index
    %c0_0 = arith.constant 0 : index
    %c0_1 = arith.constant 0 : index
    %0 = vector.load %arg1[%c0, %c0_0, %c0_1] : memref<8x8x32xf32, #tpu.memory_space<vmem>>, vector<8x8x32xf32>
    %1 = tpu.iota {dimensions = array<i32: 1>} : vector<8x256xi32>
    %c128_i32 = arith.constant 128 : i32
    %c0_i32 = arith.constant 0 : i32
    %2 = arith.cmpi eq, %c128_i32, %c0_i32 : i32
    %c1_i32 = arith.constant 1 : i32
    %3 = arith.select %2, %c1_i32, %c128_i32 : i32
    %4 = vector.broadcast %3 : i32 to vector<8x256xi32>
    %5 = arith.remsi %1, %4 : vector<8x256xi32>
    %c0_i32_2 = arith.constant 0 : i32
    %6 = vector.broadcast %c0_i32_2 : i32 to vector<8x256xi32>
    %7 = arith.cmpi ne, %5, %6 : vector<8x256xi32>
    %c0_i32_3 = arith.constant 0 : i32
    %8 = vector.broadcast %c0_i32_3 : i32 to vector<8x256xi32>
    %9 = arith.cmpi slt, %5, %8 : vector<8x256xi32>
    %c0_i32_4 = arith.constant 0 : i32
    %10 = arith.cmpi slt, %3, %c0_i32_4 : i32
    %11 = vector.broadcast %10 : i1 to vector<8x256xi1>
    %12 = vector.broadcast %11 : vector<8x256xi1> to vector<8x256xi1>
    %13 = arith.xori %9, %12 : vector<8x256xi1>
    %14 = arith.andi %13, %7 : vector<8x256xi1>
    %15 = vector.broadcast %3 : i32 to vector<8x256xi32>
    %16 = arith.addi %5, %15 : vector<8x256xi32>
    %17 = arith.select %14, %16, %5 : vector<8x256xi1>, vector<8x256xi32>
    %c64_i32 = arith.constant 64 : i32
    %18 = vector.broadcast %c64_i32 : i32 to vector<8x256xi32>
    %19 = arith.cmpi sge, %17, %18 : vector<8x256xi32>
    %c96_i32 = arith.constant 96 : i32
    %20 = vector.broadcast %c96_i32 : i32 to vector<8x256xi32>
    %21 = arith.cmpi slt, %17, %20 : vector<8x256xi32>
    %22 = arith.andi %19, %21 : vector<8x256xi1>
    %23 = tpu.iota {dimensions = array<i32: 1>} : vector<8x128xi32>
    %c128_i32_5 = arith.constant 128 : i32
    %c0_i32_6 = arith.constant 0 : i32
    %24 = arith.cmpi eq, %c128_i32_5, %c0_i32_6 : i32
    %c1_i32_7 = arith.constant 1 : i32
    %25 = arith.select %24, %c1_i32_7, %c128_i32_5 : i32
    %26 = vector.broadcast %25 : i32 to vector<8x128xi32>
    %27 = arith.remsi %23, %26 : vector<8x128xi32>
    %c0_i32_8 = arith.constant 0 : i32
    %28 = vector.broadcast %c0_i32_8 : i32 to vector<8x128xi32>
    %29 = arith.cmpi ne, %27, %28 : vector<8x128xi32>
    %c0_i32_9 = arith.constant 0 : i32
    %30 = vector.broadcast %c0_i32_9 : i32 to vector<8x128xi32>
    %31 = arith.cmpi slt, %27, %30 : vector<8x128xi32>
    %c0_i32_10 = arith.constant 0 : i32
    %32 = arith.cmpi slt, %25, %c0_i32_10 : i32
    %33 = vector.broadcast %32 : i1 to vector<8x128xi1>
    %34 = vector.broadcast %33 : vector<8x128xi1> to vector<8x128xi1>
    %35 = arith.xori %31, %34 : vector<8x128xi1>
    %36 = arith.andi %35, %29 : vector<8x128xi1>
    %37 = vector.broadcast %25 : i32 to vector<8x128xi32>
    %38 = arith.addi %27, %37 : vector<8x128xi32>
    %39 = arith.select %36, %38, %27 : vector<8x128xi1>, vector<8x128xi32>
    %c64_i32_11 = arith.constant 64 : i32
    %40 = vector.broadcast %c64_i32_11 : i32 to vector<8x128xi32>
    %41 = arith.cmpi sge, %39, %40 : vector<8x128xi32>
    %c96_i32_12 = arith.constant 96 : i32
    %42 = vector.broadcast %c96_i32_12 : i32 to vector<8x128xi32>
    %43 = arith.cmpi slt, %39, %42 : vector<8x128xi32>
    %44 = arith.andi %41, %43 : vector<8x128xi1>
    %c0_13 = arith.constant 0 : index
    %c0_14 = arith.constant 0 : index
    %45 = vector.load %arg0[%c0_13, %c0_14] : memref<64x16xf32, #tpu.memory_space<vmem>>, vector<64x16xf32>
    %c0_15 = arith.constant 0 : index
    %c0_16 = arith.constant 0 : index
    %46 = vector.load %arg3[%c0_15, %c0_16] : memref<16x256xf32, #tpu.memory_space<vmem>>, vector<16x256xf32>
    %c0_17 = arith.constant 0 : index
    %c0_18 = arith.constant 0 : index
    %47 = vector.load %arg4[%c0_17, %c0_18] : memref<64x256xf32, #tpu.memory_space<vmem>>, vector<64x256xf32>
    %c0_19 = arith.constant 0 : index
    %c0_20 = arith.constant 0 : index
    %48 = vector.load %arg5[%c0_19, %c0_20] : memref<1x256xf32, #tpu.memory_space<vmem>>, vector<1x256xf32>
    %cst = arith.constant dense<0.000000e+00> : vector<64x256xf32>
    %49 = tpu.matmul %45, %46, %cst {dimension_numbers = #tpu.dot_dimension_numbers<[1], [0], [0], [1], [0, 0, 1, 1], [], []>} : vector<64x16xf32>, vector<16x256xf32>, vector<64x256xf32> -> vector<64x256xf32>
    %50 = vector.broadcast %48 : vector<1x256xf32> to vector<64x256xf32>
    %51 = arith.addf %49, %50 : vector<64x256xf32>
    %cst_21 = arith.constant 0.000000e+00 : f32
    %52 = vector.broadcast %cst_21 : f32 to vector<8x64xf32>
    %cst_22 = arith.constant 0.000000e+00 : f32
    %53 = vector.broadcast %cst_22 : f32 to vector<8x64xf32>
    %54 = vector.extract_strided_slice %51 {offsets = [0, 0], sizes = [8, 128], strides = [1, 1]} : vector<64x256xf32> to vector<8x128xf32>
    %55 = vector.extract_strided_slice %51 {offsets = [56, 128], sizes = [8, 128], strides = [1, 1]} : vector<64x256xf32> to vector<8x128xf32>
    %56 = tpu.concatenate %54, %55 in 1 : vector<8x128xf32>, vector<8x128xf32> -> vector<8x256xf32>
    %cst_23 = arith.constant dense<0.000000e+00> : vector<8x256xf32>
    %57 = tpu.matmul %52, %47, %cst_23 {dimension_numbers = #tpu.dot_dimension_numbers<[1], [0], [0], [1], [0, 0, 1, 1], [], []>} : vector<8x64xf32>, vector<64x256xf32>, vector<8x256xf32> -> vector<8x256xf32>
    %58 = arith.addf %56, %57 : vector<8x256xf32>
    %cst_24 = arith.constant 2.000000e+00 : f32
    %59 = vector.broadcast %cst_24 : f32 to vector<8x256xf32>
    %60 = arith.mulf %59, %58 : vector<8x256xf32>
    %61 = arith.select %22, %60, %58 : vector<8x256xi1>, vector<8x256xf32>
    %62 = arith.negf %61 : vector<8x256xf32>
    %63 = math.exp %62 : vector<8x256xf32>
    %cst_25 = arith.constant 1.000000e+00 : f32
    %64 = vector.broadcast %cst_25 : f32 to vector<8x256xf32>
    %65 = arith.addf %64, %63 : vector<8x256xf32>
    %66 = arith.divf %64, %65 : vector<8x256xf32>
    %cst_26 = arith.constant 2.000000e+00 : f32
    %67 = vector.broadcast %cst_26 : f32 to vector<8x256xf32>
    %68 = arith.mulf %67, %66 : vector<8x256xf32>
    %cst_27 = arith.constant 1.000000e+00 : f32
    %69 = vector.broadcast %cst_27 : f32 to vector<8x256xf32>
    %70 = arith.subf %68, %69 : vector<8x256xf32>
    %71 = arith.select %22, %70, %66 : vector<8x256xi1>, vector<8x256xf32>
    %72 = vector.extract_strided_slice %71 {offsets = [0, 0], sizes = [8, 32], strides = [1, 1]} : vector<8x256xf32> to vector<8x32xf32>
    %73 = vector.extract_strided_slice %71 {offsets = [0, 32], sizes = [8, 32], strides = [1, 1]} : vector<8x256xf32> to vector<8x32xf32>
    %74 = vector.extract_strided_slice %71 {offsets = [0, 64], sizes = [8, 32], strides = [1, 1]} : vector<8x256xf32> to vector<8x32xf32>
    %75 = vector.extract_strided_slice %71 {offsets = [0, 96], sizes = [8, 32], strides = [1, 1]} : vector<8x256xf32> to vector<8x32xf32>
    %76 = vector.extract_strided_slice %53 {offsets = [0, 0], sizes = [8, 32], strides = [1, 1]} : vector<8x64xf32> to vector<8x32xf32>
    %77 = arith.mulf %73, %76 : vector<8x32xf32>
    %78 = arith.mulf %72, %74 : vector<8x32xf32>
    %79 = arith.addf %77, %78 : vector<8x32xf32>
    %80 = math.tanh %79 : vector<8x32xf32>
    %81 = arith.mulf %75, %80 : vector<8x32xf32>
    %82 = vector.extract_strided_slice %71 {offsets = [0, 128], sizes = [8, 32], strides = [1, 1]} : vector<8x256xf32> to vector<8x32xf32>
    %83 = vector.extract_strided_slice %71 {offsets = [0, 160], sizes = [8, 32], strides = [1, 1]} : vector<8x256xf32> to vector<8x32xf32>
    %84 = vector.extract_strided_slice %71 {offsets = [0, 192], sizes = [8, 32], strides = [1, 1]} : vector<8x256xf32> to vector<8x32xf32>
    %85 = vector.extract_strided_slice %71 {offsets = [0, 224], sizes = [8, 32], strides = [1, 1]} : vector<8x256xf32> to vector<8x32xf32>
    %86 = vector.extract_strided_slice %53 {offsets = [0, 32], sizes = [8, 32], strides = [1, 1]} : vector<8x64xf32> to vector<8x32xf32>
    %87 = arith.mulf %83, %86 : vector<8x32xf32>
    %88 = arith.mulf %82, %84 : vector<8x32xf32>
    %89 = arith.addf %87, %88 : vector<8x32xf32>
    %90 = math.tanh %89 : vector<8x32xf32>
    %91 = arith.mulf %85, %90 : vector<8x32xf32>
    %92 = vector.extract_strided_slice %0 {offsets = [0, 0, 0], sizes = [1, 8, 32], strides = [1, 1, 1]} : vector<8x8x32xf32> to vector<1x8x32xf32>
    %93 = vector.shape_cast %92 : vector<1x8x32xf32> to vector<8x32xf32>
    %94 = vector.extract_strided_slice %0 {offsets = [7, 0, 0], sizes = [1, 8, 32], strides = [1, 1, 1]} : vector<8x8x32xf32> to vector<1x8x32xf32>
    %95 = vector.shape_cast %94 : vector<1x8x32xf32> to vector<8x32xf32>
    %96 = arith.mulf %93, %81 : vector<8x32xf32>
    %cst_28 = arith.constant 1.000000e+00 : f32
    %97 = vector.broadcast %cst_28 : f32 to vector<8x32xf32>
    %98 = arith.subf %97, %93 : vector<8x32xf32>
    %99 = vector.extract_strided_slice %52 {offsets = [0, 0], sizes = [8, 32], strides = [1, 1]} : vector<8x64xf32> to vector<8x32xf32>
    %100 = arith.mulf %98, %99 : vector<8x32xf32>
    %101 = arith.addf %96, %100 : vector<8x32xf32>
    %102 = arith.mulf %95, %91 : vector<8x32xf32>
    %cst_29 = arith.constant 1.000000e+00 : f32
    %103 = vector.broadcast %cst_29 : f32 to vector<8x32xf32>
    %104 = arith.subf %103, %95 : vector<8x32xf32>
    %105 = vector.extract_strided_slice %52 {offsets = [0, 32], sizes = [8, 32], strides = [1, 1]} : vector<8x64xf32> to vector<8x32xf32>
    %106 = arith.mulf %104, %105 : vector<8x32xf32>
    %107 = arith.addf %102, %106 : vector<8x32xf32>
    %108 = tpu.concatenate %101, %107 in 1 : vector<8x32xf32>, vector<8x32xf32> -> vector<8x64xf32>
    %109 = arith.mulf %93, %79 : vector<8x32xf32>
    %cst_30 = arith.constant 1.000000e+00 : f32
    %110 = vector.broadcast %cst_30 : f32 to vector<8x32xf32>
    %111 = arith.subf %110, %93 : vector<8x32xf32>
    %112 = vector.extract_strided_slice %53 {offsets = [0, 0], sizes = [8, 32], strides = [1, 1]} : vector<8x64xf32> to vector<8x32xf32>
    %113 = arith.mulf %111, %112 : vector<8x32xf32>
    %114 = arith.addf %109, %113 : vector<8x32xf32>
    %115 = arith.mulf %95, %89 : vector<8x32xf32>
    %cst_31 = arith.constant 1.000000e+00 : f32
    %116 = vector.broadcast %cst_31 : f32 to vector<8x32xf32>
    %117 = arith.subf %116, %95 : vector<8x32xf32>
    %118 = vector.extract_strided_slice %53 {offsets = [0, 32], sizes = [8, 32], strides = [1, 1]} : vector<8x64xf32> to vector<8x32xf32>
    %119 = arith.mulf %117, %118 : vector<8x32xf32>
    %120 = arith.addf %115, %119 : vector<8x32xf32>
    %121 = tpu.concatenate %114, %120 in 1 : vector<8x32xf32>, vector<8x32xf32> -> vector<8x64xf32>
    %122 = arith.mulf %93, %81 : vector<8x32xf32>
    %123 = arith.mulf %95, %91 : vector<8x32xf32>
    %124 = vector.extract_strided_slice %51 {offsets = [8, 0], sizes = [8, 128], strides = [1, 1]} : vector<64x256xf32> to vector<8x128xf32>
    %125 = vector.extract_strided_slice %51 {offsets = [48, 128], sizes = [8, 128], strides = [1, 1]} : vector<64x256xf32> to vector<8x128xf32>
    %126 = tpu.concatenate %124, %125 in 1 : vector<8x128xf32>, vector<8x128xf32> -> vector<8x256xf32>
    %cst_32 = arith.constant dense<0.000000e+00> : vector<8x256xf32>
    %127 = tpu.matmul %108, %47, %cst_32 {dimension_numbers = #tpu.dot_dimension_numbers<[1], [0], [0], [1], [0, 0, 1, 1], [], []>} : vector<8x64xf32>, vector<64x256xf32>, vector<8x256xf32> -> vector<8x256xf32>
    %128 = arith.addf %126, %127 : vector<8x256xf32>
    %cst_33 = arith.constant 2.000000e+00 : f32
    %129 = vector.broadcast %cst_33 : f32 to vector<8x256xf32>
    %130 = arith.mulf %129, %128 : vector<8x256xf32>
    %131 = arith.select %22, %130, %128 : vector<8x256xi1>, vector<8x256xf32>
    %132 = arith.negf %131 : vector<8x256xf32>
    %133 = math.exp %132 : vector<8x256xf32>
    %cst_34 = arith.constant 1.000000e+00 : f32
    %134 = vector.broadcast %cst_34 : f32 to vector<8x256xf32>
    %135 = arith.addf %134, %133 : vector<8x256xf32>
    %136 = arith.divf %134, %135 : vector<8x256xf32>
    %cst_35 = arith.constant 2.000000e+00 : f32
    %137 = vector.broadcast %cst_35 : f32 to vector<8x256xf32>
    %138 = arith.mulf %137, %136 : vector<8x256xf32>
    %cst_36 = arith.constant 1.000000e+00 : f32
    %139 = vector.broadcast %cst_36 : f32 to vector<8x256xf32>
    %140 = arith.subf %138, %139 : vector<8x256xf32>
    %141 = arith.select %22, %140, %136 : vector<8x256xi1>, vector<8x256xf32>
    %142 = vector.extract_strided_slice %141 {offsets = [0, 0], sizes = [8, 32], strides = [1, 1]} : vector<8x256xf32> to vector<8x32xf32>
    %143 = vector.extract_strided_slice %141 {offsets = [0, 32], sizes = [8, 32], strides = [1, 1]} : vector<8x256xf32> to vector<8x32xf32>
    %144 = vector.extract_strided_slice %141 {offsets = [0, 64], sizes = [8, 32], strides = [1, 1]} : vector<8x256xf32> to vector<8x32xf32>
    %145 = vector.extract_strided_slice %141 {offsets = [0, 96], sizes = [8, 32], strides = [1, 1]} : vector<8x256xf32> to vector<8x32xf32>
    %146 = vector.extract_strided_slice %121 {offsets = [0, 0], sizes = [8, 32], strides = [1, 1]} : vector<8x64xf32> to vector<8x32xf32>
    %147 = arith.mulf %143, %146 : vector<8x32xf32>
    %148 = arith.mulf %142, %144 : vector<8x32xf32>
    %149 = arith.addf %147, %148 : vector<8x32xf32>
    %150 = math.tanh %149 : vector<8x32xf32>
    %151 = arith.mulf %145, %150 : vector<8x32xf32>
    %152 = vector.extract_strided_slice %141 {offsets = [0, 128], sizes = [8, 32], strides = [1, 1]} : vector<8x256xf32> to vector<8x32xf32>
    %153 = vector.extract_strided_slice %141 {offsets = [0, 160], sizes = [8, 32], strides = [1, 1]} : vector<8x256xf32> to vector<8x32xf32>
    %154 = vector.extract_strided_slice %141 {offsets = [0, 192], sizes = [8, 32], strides = [1, 1]} : vector<8x256xf32> to vector<8x32xf32>
    %155 = vector.extract_strided_slice %141 {offsets = [0, 224], sizes = [8, 32], strides = [1, 1]} : vector<8x256xf32> to vector<8x32xf32>
    %156 = vector.extract_strided_slice %121 {offsets = [0, 32], sizes = [8, 32], strides = [1, 1]} : vector<8x64xf32> to vector<8x32xf32>
    %157 = arith.mulf %153, %156 : vector<8x32xf32>
    %158 = arith.mulf %152, %154 : vector<8x32xf32>
    %159 = arith.addf %157, %158 : vector<8x32xf32>
    %160 = math.tanh %159 : vector<8x32xf32>
    %161 = arith.mulf %155, %160 : vector<8x32xf32>
    %162 = vector.extract_strided_slice %0 {offsets = [1, 0, 0], sizes = [1, 8, 32], strides = [1, 1, 1]} : vector<8x8x32xf32> to vector<1x8x32xf32>
    %163 = vector.shape_cast %162 : vector<1x8x32xf32> to vector<8x32xf32>
    %164 = vector.extract_strided_slice %0 {offsets = [6, 0, 0], sizes = [1, 8, 32], strides = [1, 1, 1]} : vector<8x8x32xf32> to vector<1x8x32xf32>
    %165 = vector.shape_cast %164 : vector<1x8x32xf32> to vector<8x32xf32>
    %166 = arith.mulf %163, %151 : vector<8x32xf32>
    %cst_37 = arith.constant 1.000000e+00 : f32
    %167 = vector.broadcast %cst_37 : f32 to vector<8x32xf32>
    %168 = arith.subf %167, %163 : vector<8x32xf32>
    %169 = vector.extract_strided_slice %108 {offsets = [0, 0], sizes = [8, 32], strides = [1, 1]} : vector<8x64xf32> to vector<8x32xf32>
    %170 = arith.mulf %168, %169 : vector<8x32xf32>
    %171 = arith.addf %166, %170 : vector<8x32xf32>
    %172 = arith.mulf %165, %161 : vector<8x32xf32>
    %cst_38 = arith.constant 1.000000e+00 : f32
    %173 = vector.broadcast %cst_38 : f32 to vector<8x32xf32>
    %174 = arith.subf %173, %165 : vector<8x32xf32>
    %175 = vector.extract_strided_slice %108 {offsets = [0, 32], sizes = [8, 32], strides = [1, 1]} : vector<8x64xf32> to vector<8x32xf32>
    %176 = arith.mulf %174, %175 : vector<8x32xf32>
    %177 = arith.addf %172, %176 : vector<8x32xf32>
    %178 = tpu.concatenate %171, %177 in 1 : vector<8x32xf32>, vector<8x32xf32> -> vector<8x64xf32>
    %179 = arith.mulf %163, %149 : vector<8x32xf32>
    %cst_39 = arith.constant 1.000000e+00 : f32
    %180 = vector.broadcast %cst_39 : f32 to vector<8x32xf32>
    %181 = arith.subf %180, %163 : vector<8x32xf32>
    %182 = vector.extract_strided_slice %121 {offsets = [0, 0], sizes = [8, 32], strides = [1, 1]} : vector<8x64xf32> to vector<8x32xf32>
    %183 = arith.mulf %181, %182 : vector<8x32xf32>
    %184 = arith.addf %179, %183 : vector<8x32xf32>
    %185 = arith.mulf %165, %159 : vector<8x32xf32>
    %cst_40 = arith.constant 1.000000e+00 : f32
    %186 = vector.broadcast %cst_40 : f32 to vector<8x32xf32>
    %187 = arith.subf %186, %165 : vector<8x32xf32>
    %188 = vector.extract_strided_slice %121 {offsets = [0, 32], sizes = [8, 32], strides = [1, 1]} : vector<8x64xf32> to vector<8x32xf32>
    %189 = arith.mulf %187, %188 : vector<8x32xf32>
    %190 = arith.addf %185, %189 : vector<8x32xf32>
    %191 = tpu.concatenate %184, %190 in 1 : vector<8x32xf32>, vector<8x32xf32> -> vector<8x64xf32>
    %192 = arith.mulf %163, %151 : vector<8x32xf32>
    %193 = arith.mulf %165, %161 : vector<8x32xf32>
    %194 = vector.extract_strided_slice %51 {offsets = [16, 0], sizes = [8, 128], strides = [1, 1]} : vector<64x256xf32> to vector<8x128xf32>
    %195 = vector.extract_strided_slice %51 {offsets = [40, 128], sizes = [8, 128], strides = [1, 1]} : vector<64x256xf32> to vector<8x128xf32>
    %196 = tpu.concatenate %194, %195 in 1 : vector<8x128xf32>, vector<8x128xf32> -> vector<8x256xf32>
    %cst_41 = arith.constant dense<0.000000e+00> : vector<8x256xf32>
    %197 = tpu.matmul %178, %47, %cst_41 {dimension_numbers = #tpu.dot_dimension_numbers<[1], [0], [0], [1], [0, 0, 1, 1], [], []>} : vector<8x64xf32>, vector<64x256xf32>, vector<8x256xf32> -> vector<8x256xf32>
    %198 = arith.addf %196, %197 : vector<8x256xf32>
    %cst_42 = arith.constant 2.000000e+00 : f32
    %199 = vector.broadcast %cst_42 : f32 to vector<8x256xf32>
    %200 = arith.mulf %199, %198 : vector<8x256xf32>
    %201 = arith.select %22, %200, %198 : vector<8x256xi1>, vector<8x256xf32>
    %202 = arith.negf %201 : vector<8x256xf32>
    %203 = math.exp %202 : vector<8x256xf32>
    %cst_43 = arith.constant 1.000000e+00 : f32
    %204 = vector.broadcast %cst_43 : f32 to vector<8x256xf32>
    %205 = arith.addf %204, %203 : vector<8x256xf32>
    %206 = arith.divf %204, %205 : vector<8x256xf32>
    %cst_44 = arith.constant 2.000000e+00 : f32
    %207 = vector.broadcast %cst_44 : f32 to vector<8x256xf32>
    %208 = arith.mulf %207, %206 : vector<8x256xf32>
    %cst_45 = arith.constant 1.000000e+00 : f32
    %209 = vector.broadcast %cst_45 : f32 to vector<8x256xf32>
    %210 = arith.subf %208, %209 : vector<8x256xf32>
    %211 = arith.select %22, %210, %206 : vector<8x256xi1>, vector<8x256xf32>
    %212 = vector.extract_strided_slice %211 {offsets = [0, 0], sizes = [8, 32], strides = [1, 1]} : vector<8x256xf32> to vector<8x32xf32>
    %213 = vector.extract_strided_slice %211 {offsets = [0, 32], sizes = [8, 32], strides = [1, 1]} : vector<8x256xf32> to vector<8x32xf32>
    %214 = vector.extract_strided_slice %211 {offsets = [0, 64], sizes = [8, 32], strides = [1, 1]} : vector<8x256xf32> to vector<8x32xf32>
    %215 = vector.extract_strided_slice %211 {offsets = [0, 96], sizes = [8, 32], strides = [1, 1]} : vector<8x256xf32> to vector<8x32xf32>
    %216 = vector.extract_strided_slice %191 {offsets = [0, 0], sizes = [8, 32], strides = [1, 1]} : vector<8x64xf32> to vector<8x32xf32>
    %217 = arith.mulf %213, %216 : vector<8x32xf32>
    %218 = arith.mulf %212, %214 : vector<8x32xf32>
    %219 = arith.addf %217, %218 : vector<8x32xf32>
    %220 = math.tanh %219 : vector<8x32xf32>
    %221 = arith.mulf %215, %220 : vector<8x32xf32>
    %222 = vector.extract_strided_slice %211 {offsets = [0, 128], sizes = [8, 32], strides = [1, 1]} : vector<8x256xf32> to vector<8x32xf32>
    %223 = vector.extract_strided_slice %211 {offsets = [0, 160], sizes = [8, 32], strides = [1, 1]} : vector<8x256xf32> to vector<8x32xf32>
    %224 = vector.extract_strided_slice %211 {offsets = [0, 192], sizes = [8, 32], strides = [1, 1]} : vector<8x256xf32> to vector<8x32xf32>
    %225 = vector.extract_strided_slice %211 {offsets = [0, 224], sizes = [8, 32], strides = [1, 1]} : vector<8x256xf32> to vector<8x32xf32>
    %226 = vector.extract_strided_slice %191 {offsets = [0, 32], sizes = [8, 32], strides = [1, 1]} : vector<8x64xf32> to vector<8x32xf32>
    %227 = arith.mulf %223, %226 : vector<8x32xf32>
    %228 = arith.mulf %222, %224 : vector<8x32xf32>
    %229 = arith.addf %227, %228 : vector<8x32xf32>
    %230 = math.tanh %229 : vector<8x32xf32>
    %231 = arith.mulf %225, %230 : vector<8x32xf32>
    %232 = vector.extract_strided_slice %0 {offsets = [2, 0, 0], sizes = [1, 8, 32], strides = [1, 1, 1]} : vector<8x8x32xf32> to vector<1x8x32xf32>
    %233 = vector.shape_cast %232 : vector<1x8x32xf32> to vector<8x32xf32>
    %234 = vector.extract_strided_slice %0 {offsets = [5, 0, 0], sizes = [1, 8, 32], strides = [1, 1, 1]} : vector<8x8x32xf32> to vector<1x8x32xf32>
    %235 = vector.shape_cast %234 : vector<1x8x32xf32> to vector<8x32xf32>
    %236 = arith.mulf %233, %221 : vector<8x32xf32>
    %cst_46 = arith.constant 1.000000e+00 : f32
    %237 = vector.broadcast %cst_46 : f32 to vector<8x32xf32>
    %238 = arith.subf %237, %233 : vector<8x32xf32>
    %239 = vector.extract_strided_slice %178 {offsets = [0, 0], sizes = [8, 32], strides = [1, 1]} : vector<8x64xf32> to vector<8x32xf32>
    %240 = arith.mulf %238, %239 : vector<8x32xf32>
    %241 = arith.addf %236, %240 : vector<8x32xf32>
    %242 = arith.mulf %235, %231 : vector<8x32xf32>
    %cst_47 = arith.constant 1.000000e+00 : f32
    %243 = vector.broadcast %cst_47 : f32 to vector<8x32xf32>
    %244 = arith.subf %243, %235 : vector<8x32xf32>
    %245 = vector.extract_strided_slice %178 {offsets = [0, 32], sizes = [8, 32], strides = [1, 1]} : vector<8x64xf32> to vector<8x32xf32>
    %246 = arith.mulf %244, %245 : vector<8x32xf32>
    %247 = arith.addf %242, %246 : vector<8x32xf32>
    %248 = tpu.concatenate %241, %247 in 1 : vector<8x32xf32>, vector<8x32xf32> -> vector<8x64xf32>
    %249 = arith.mulf %233, %219 : vector<8x32xf32>
    %cst_48 = arith.constant 1.000000e+00 : f32
    %250 = vector.broadcast %cst_48 : f32 to vector<8x32xf32>
    %251 = arith.subf %250, %233 : vector<8x32xf32>
    %252 = vector.extract_strided_slice %191 {offsets = [0, 0], sizes = [8, 32], strides = [1, 1]} : vector<8x64xf32> to vector<8x32xf32>
    %253 = arith.mulf %251, %252 : vector<8x32xf32>
    %254 = arith.addf %249, %253 : vector<8x32xf32>
    %255 = arith.mulf %235, %229 : vector<8x32xf32>
    %cst_49 = arith.constant 1.000000e+00 : f32
    %256 = vector.broadcast %cst_49 : f32 to vector<8x32xf32>
    %257 = arith.subf %256, %235 : vector<8x32xf32>
    %258 = vector.extract_strided_slice %191 {offsets = [0, 32], sizes = [8, 32], strides = [1, 1]} : vector<8x64xf32> to vector<8x32xf32>
    %259 = arith.mulf %257, %258 : vector<8x32xf32>
    %260 = arith.addf %255, %259 : vector<8x32xf32>
    %261 = tpu.concatenate %254, %260 in 1 : vector<8x32xf32>, vector<8x32xf32> -> vector<8x64xf32>
    %262 = arith.mulf %233, %221 : vector<8x32xf32>
    %263 = arith.mulf %235, %231 : vector<8x32xf32>
    %264 = vector.extract_strided_slice %51 {offsets = [24, 0], sizes = [8, 128], strides = [1, 1]} : vector<64x256xf32> to vector<8x128xf32>
    %265 = vector.extract_strided_slice %51 {offsets = [32, 128], sizes = [8, 128], strides = [1, 1]} : vector<64x256xf32> to vector<8x128xf32>
    %266 = tpu.concatenate %264, %265 in 1 : vector<8x128xf32>, vector<8x128xf32> -> vector<8x256xf32>
    %cst_50 = arith.constant dense<0.000000e+00> : vector<8x256xf32>
    %267 = tpu.matmul %248, %47, %cst_50 {dimension_numbers = #tpu.dot_dimension_numbers<[1], [0], [0], [1], [0, 0, 1, 1], [], []>} : vector<8x64xf32>, vector<64x256xf32>, vector<8x256xf32> -> vector<8x256xf32>
    %268 = arith.addf %266, %267 : vector<8x256xf32>
    %cst_51 = arith.constant 2.000000e+00 : f32
    %269 = vector.broadcast %cst_51 : f32 to vector<8x256xf32>
    %270 = arith.mulf %269, %268 : vector<8x256xf32>
    %271 = arith.select %22, %270, %268 : vector<8x256xi1>, vector<8x256xf32>
    %272 = arith.negf %271 : vector<8x256xf32>
    %273 = math.exp %272 : vector<8x256xf32>
    %cst_52 = arith.constant 1.000000e+00 : f32
    %274 = vector.broadcast %cst_52 : f32 to vector<8x256xf32>
    %275 = arith.addf %274, %273 : vector<8x256xf32>
    %276 = arith.divf %274, %275 : vector<8x256xf32>
    %cst_53 = arith.constant 2.000000e+00 : f32
    %277 = vector.broadcast %cst_53 : f32 to vector<8x256xf32>
    %278 = arith.mulf %277, %276 : vector<8x256xf32>
    %cst_54 = arith.constant 1.000000e+00 : f32
    %279 = vector.broadcast %cst_54 : f32 to vector<8x256xf32>
    %280 = arith.subf %278, %279 : vector<8x256xf32>
    %281 = arith.select %22, %280, %276 : vector<8x256xi1>, vector<8x256xf32>
    %282 = vector.extract_strided_slice %281 {offsets = [0, 0], sizes = [8, 32], strides = [1, 1]} : vector<8x256xf32> to vector<8x32xf32>
    %283 = vector.extract_strided_slice %281 {offsets = [0, 32], sizes = [8, 32], strides = [1, 1]} : vector<8x256xf32> to vector<8x32xf32>
    %284 = vector.extract_strided_slice %281 {offsets = [0, 64], sizes = [8, 32], strides = [1, 1]} : vector<8x256xf32> to vector<8x32xf32>
    %285 = vector.extract_strided_slice %281 {offsets = [0, 96], sizes = [8, 32], strides = [1, 1]} : vector<8x256xf32> to vector<8x32xf32>
    %286 = vector.extract_strided_slice %261 {offsets = [0, 0], sizes = [8, 32], strides = [1, 1]} : vector<8x64xf32> to vector<8x32xf32>
    %287 = arith.mulf %283, %286 : vector<8x32xf32>
    %288 = arith.mulf %282, %284 : vector<8x32xf32>
    %289 = arith.addf %287, %288 : vector<8x32xf32>
    %290 = math.tanh %289 : vector<8x32xf32>
    %291 = arith.mulf %285, %290 : vector<8x32xf32>
    %292 = vector.extract_strided_slice %281 {offsets = [0, 128], sizes = [8, 32], strides = [1, 1]} : vector<8x256xf32> to vector<8x32xf32>
    %293 = vector.extract_strided_slice %281 {offsets = [0, 160], sizes = [8, 32], strides = [1, 1]} : vector<8x256xf32> to vector<8x32xf32>
    %294 = vector.extract_strided_slice %281 {offsets = [0, 192], sizes = [8, 32], strides = [1, 1]} : vector<8x256xf32> to vector<8x32xf32>
    %295 = vector.extract_strided_slice %281 {offsets = [0, 224], sizes = [8, 32], strides = [1, 1]} : vector<8x256xf32> to vector<8x32xf32>
    %296 = vector.extract_strided_slice %261 {offsets = [0, 32], sizes = [8, 32], strides = [1, 1]} : vector<8x64xf32> to vector<8x32xf32>
    %297 = arith.mulf %293, %296 : vector<8x32xf32>
    %298 = arith.mulf %292, %294 : vector<8x32xf32>
    %299 = arith.addf %297, %298 : vector<8x32xf32>
    %300 = math.tanh %299 : vector<8x32xf32>
    %301 = arith.mulf %295, %300 : vector<8x32xf32>
    %302 = vector.extract_strided_slice %0 {offsets = [3, 0, 0], sizes = [1, 8, 32], strides = [1, 1, 1]} : vector<8x8x32xf32> to vector<1x8x32xf32>
    %303 = vector.shape_cast %302 : vector<1x8x32xf32> to vector<8x32xf32>
    %304 = vector.extract_strided_slice %0 {offsets = [4, 0, 0], sizes = [1, 8, 32], strides = [1, 1, 1]} : vector<8x8x32xf32> to vector<1x8x32xf32>
    %305 = vector.shape_cast %304 : vector<1x8x32xf32> to vector<8x32xf32>
    %306 = arith.mulf %303, %291 : vector<8x32xf32>
    %cst_55 = arith.constant 1.000000e+00 : f32
    %307 = vector.broadcast %cst_55 : f32 to vector<8x32xf32>
    %308 = arith.subf %307, %303 : vector<8x32xf32>
    %309 = vector.extract_strided_slice %248 {offsets = [0, 0], sizes = [8, 32], strides = [1, 1]} : vector<8x64xf32> to vector<8x32xf32>
    %310 = arith.mulf %308, %309 : vector<8x32xf32>
    %311 = arith.addf %306, %310 : vector<8x32xf32>
    %312 = arith.mulf %305, %301 : vector<8x32xf32>
    %cst_56 = arith.constant 1.000000e+00 : f32
    %313 = vector.broadcast %cst_56 : f32 to vector<8x32xf32>
    %314 = arith.subf %313, %305 : vector<8x32xf32>
    %315 = vector.extract_strided_slice %248 {offsets = [0, 32], sizes = [8, 32], strides = [1, 1]} : vector<8x64xf32> to vector<8x32xf32>
    %316 = arith.mulf %314, %315 : vector<8x32xf32>
    %317 = arith.addf %312, %316 : vector<8x32xf32>
    %318 = tpu.concatenate %311, %317 in 1 : vector<8x32xf32>, vector<8x32xf32> -> vector<8x64xf32>
    %319 = arith.mulf %303, %289 : vector<8x32xf32>
    %cst_57 = arith.constant 1.000000e+00 : f32
    %320 = vector.broadcast %cst_57 : f32 to vector<8x32xf32>
    %321 = arith.subf %320, %303 : vector<8x32xf32>
    %322 = vector.extract_strided_slice %261 {offsets = [0, 0], sizes = [8, 32], strides = [1, 1]} : vector<8x64xf32> to vector<8x32xf32>
    %323 = arith.mulf %321, %322 : vector<8x32xf32>
    %324 = arith.addf %319, %323 : vector<8x32xf32>
    %325 = arith.mulf %305, %299 : vector<8x32xf32>
    %cst_58 = arith.constant 1.000000e+00 : f32
    %326 = vector.broadcast %cst_58 : f32 to vector<8x32xf32>
    %327 = arith.subf %326, %305 : vector<8x32xf32>
    %328 = vector.extract_strided_slice %261 {offsets = [0, 32], sizes = [8, 32], strides = [1, 1]} : vector<8x64xf32> to vector<8x32xf32>
    %329 = arith.mulf %327, %328 : vector<8x32xf32>
    %330 = arith.addf %325, %329 : vector<8x32xf32>
    %331 = tpu.concatenate %324, %330 in 1 : vector<8x32xf32>, vector<8x32xf32> -> vector<8x64xf32>
    %332 = arith.mulf %303, %291 : vector<8x32xf32>
    %333 = arith.mulf %305, %301 : vector<8x32xf32>
    %334 = vector.extract_strided_slice %51 {offsets = [32, 0], sizes = [8, 128], strides = [1, 1]} : vector<64x256xf32> to vector<8x128xf32>
    %335 = vector.extract_strided_slice %51 {offsets = [24, 128], sizes = [8, 128], strides = [1, 1]} : vector<64x256xf32> to vector<8x128xf32>
    %336 = tpu.concatenate %334, %335 in 1 : vector<8x128xf32>, vector<8x128xf32> -> vector<8x256xf32>
    %cst_59 = arith.constant dense<0.000000e+00> : vector<8x256xf32>
    %337 = tpu.matmul %318, %47, %cst_59 {dimension_numbers = #tpu.dot_dimension_numbers<[1], [0], [0], [1], [0, 0, 1, 1], [], []>} : vector<8x64xf32>, vector<64x256xf32>, vector<8x256xf32> -> vector<8x256xf32>
    %338 = arith.addf %336, %337 : vector<8x256xf32>
    %cst_60 = arith.constant 2.000000e+00 : f32
    %339 = vector.broadcast %cst_60 : f32 to vector<8x256xf32>
    %340 = arith.mulf %339, %338 : vector<8x256xf32>
    %341 = arith.select %22, %340, %338 : vector<8x256xi1>, vector<8x256xf32>
    %342 = arith.negf %341 : vector<8x256xf32>
    %343 = math.exp %342 : vector<8x256xf32>
    %cst_61 = arith.constant 1.000000e+00 : f32
    %344 = vector.broadcast %cst_61 : f32 to vector<8x256xf32>
    %345 = arith.addf %344, %343 : vector<8x256xf32>
    %346 = arith.divf %344, %345 : vector<8x256xf32>
    %cst_62 = arith.constant 2.000000e+00 : f32
    %347 = vector.broadcast %cst_62 : f32 to vector<8x256xf32>
    %348 = arith.mulf %347, %346 : vector<8x256xf32>
    %cst_63 = arith.constant 1.000000e+00 : f32
    %349 = vector.broadcast %cst_63 : f32 to vector<8x256xf32>
    %350 = arith.subf %348, %349 : vector<8x256xf32>
    %351 = arith.select %22, %350, %346 : vector<8x256xi1>, vector<8x256xf32>
    %352 = vector.extract_strided_slice %351 {offsets = [0, 0], sizes = [8, 32], strides = [1, 1]} : vector<8x256xf32> to vector<8x32xf32>
    %353 = vector.extract_strided_slice %351 {offsets = [0, 32], sizes = [8, 32], strides = [1, 1]} : vector<8x256xf32> to vector<8x32xf32>
    %354 = vector.extract_strided_slice %351 {offsets = [0, 64], sizes = [8, 32], strides = [1, 1]} : vector<8x256xf32> to vector<8x32xf32>
    %355 = vector.extract_strided_slice %351 {offsets = [0, 96], sizes = [8, 32], strides = [1, 1]} : vector<8x256xf32> to vector<8x32xf32>
    %356 = vector.extract_strided_slice %331 {offsets = [0, 0], sizes = [8, 32], strides = [1, 1]} : vector<8x64xf32> to vector<8x32xf32>
    %357 = arith.mulf %353, %356 : vector<8x32xf32>
    %358 = arith.mulf %352, %354 : vector<8x32xf32>
    %359 = arith.addf %357, %358 : vector<8x32xf32>
    %360 = math.tanh %359 : vector<8x32xf32>
    %361 = arith.mulf %355, %360 : vector<8x32xf32>
    %362 = vector.extract_strided_slice %351 {offsets = [0, 128], sizes = [8, 32], strides = [1, 1]} : vector<8x256xf32> to vector<8x32xf32>
    %363 = vector.extract_strided_slice %351 {offsets = [0, 160], sizes = [8, 32], strides = [1, 1]} : vector<8x256xf32> to vector<8x32xf32>
    %364 = vector.extract_strided_slice %351 {offsets = [0, 192], sizes = [8, 32], strides = [1, 1]} : vector<8x256xf32> to vector<8x32xf32>
    %365 = vector.extract_strided_slice %351 {offsets = [0, 224], sizes = [8, 32], strides = [1, 1]} : vector<8x256xf32> to vector<8x32xf32>
    %366 = vector.extract_strided_slice %331 {offsets = [0, 32], sizes = [8, 32], strides = [1, 1]} : vector<8x64xf32> to vector<8x32xf32>
    %367 = arith.mulf %363, %366 : vector<8x32xf32>
    %368 = arith.mulf %362, %364 : vector<8x32xf32>
    %369 = arith.addf %367, %368 : vector<8x32xf32>
    %370 = math.tanh %369 : vector<8x32xf32>
    %371 = arith.mulf %365, %370 : vector<8x32xf32>
    %372 = vector.extract_strided_slice %0 {offsets = [4, 0, 0], sizes = [1, 8, 32], strides = [1, 1, 1]} : vector<8x8x32xf32> to vector<1x8x32xf32>
    %373 = vector.shape_cast %372 : vector<1x8x32xf32> to vector<8x32xf32>
    %374 = vector.extract_strided_slice %0 {offsets = [3, 0, 0], sizes = [1, 8, 32], strides = [1, 1, 1]} : vector<8x8x32xf32> to vector<1x8x32xf32>
    %375 = vector.shape_cast %374 : vector<1x8x32xf32> to vector<8x32xf32>
    %376 = arith.mulf %373, %361 : vector<8x32xf32>
    %cst_64 = arith.constant 1.000000e+00 : f32
    %377 = vector.broadcast %cst_64 : f32 to vector<8x32xf32>
    %378 = arith.subf %377, %373 : vector<8x32xf32>
    %379 = vector.extract_strided_slice %318 {offsets = [0, 0], sizes = [8, 32], strides = [1, 1]} : vector<8x64xf32> to vector<8x32xf32>
    %380 = arith.mulf %378, %379 : vector<8x32xf32>
    %381 = arith.addf %376, %380 : vector<8x32xf32>
    %382 = arith.mulf %375, %371 : vector<8x32xf32>
    %cst_65 = arith.constant 1.000000e+00 : f32
    %383 = vector.broadcast %cst_65 : f32 to vector<8x32xf32>
    %384 = arith.subf %383, %375 : vector<8x32xf32>
    %385 = vector.extract_strided_slice %318 {offsets = [0, 32], sizes = [8, 32], strides = [1, 1]} : vector<8x64xf32> to vector<8x32xf32>
    %386 = arith.mulf %384, %385 : vector<8x32xf32>
    %387 = arith.addf %382, %386 : vector<8x32xf32>
    %388 = tpu.concatenate %381, %387 in 1 : vector<8x32xf32>, vector<8x32xf32> -> vector<8x64xf32>
    %389 = arith.mulf %373, %359 : vector<8x32xf32>
    %cst_66 = arith.constant 1.000000e+00 : f32
    %390 = vector.broadcast %cst_66 : f32 to vector<8x32xf32>
    %391 = arith.subf %390, %373 : vector<8x32xf32>
    %392 = vector.extract_strided_slice %331 {offsets = [0, 0], sizes = [8, 32], strides = [1, 1]} : vector<8x64xf32> to vector<8x32xf32>
    %393 = arith.mulf %391, %392 : vector<8x32xf32>
    %394 = arith.addf %389, %393 : vector<8x32xf32>
    %395 = arith.mulf %375, %369 : vector<8x32xf32>
    %cst_67 = arith.constant 1.000000e+00 : f32
    %396 = vector.broadcast %cst_67 : f32 to vector<8x32xf32>
    %397 = arith.subf %396, %375 : vector<8x32xf32>
    %398 = vector.extract_strided_slice %331 {offsets = [0, 32], sizes = [8, 32], strides = [1, 1]} : vector<8x64xf32> to vector<8x32xf32>
    %399 = arith.mulf %397, %398 : vector<8x32xf32>
    %400 = arith.addf %395, %399 : vector<8x32xf32>
    %401 = tpu.concatenate %394, %400 in 1 : vector<8x32xf32>, vector<8x32xf32> -> vector<8x64xf32>
    %402 = arith.mulf %373, %361 : vector<8x32xf32>
    %403 = arith.mulf %375, %371 : vector<8x32xf32>
    %404 = vector.extract_strided_slice %51 {offsets = [40, 0], sizes = [8, 128], strides = [1, 1]} : vector<64x256xf32> to vector<8x128xf32>
    %405 = vector.extract_strided_slice %51 {offsets = [16, 128], sizes = [8, 128], strides = [1, 1]} : vector<64x256xf32> to vector<8x128xf32>
    %406 = tpu.concatenate %404, %405 in 1 : vector<8x128xf32>, vector<8x128xf32> -> vector<8x256xf32>
    %cst_68 = arith.constant dense<0.000000e+00> : vector<8x256xf32>
    %407 = tpu.matmul %388, %47, %cst_68 {dimension_numbers = #tpu.dot_dimension_numbers<[1], [0], [0], [1], [0, 0, 1, 1], [], []>} : vector<8x64xf32>, vector<64x256xf32>, vector<8x256xf32> -> vector<8x256xf32>
    %408 = arith.addf %406, %407 : vector<8x256xf32>
    %cst_69 = arith.constant 2.000000e+00 : f32
    %409 = vector.broadcast %cst_69 : f32 to vector<8x256xf32>
    %410 = arith.mulf %409, %408 : vector<8x256xf32>
    %411 = arith.select %22, %410, %408 : vector<8x256xi1>, vector<8x256xf32>
    %412 = arith.negf %411 : vector<8x256xf32>
    %413 = math.exp %412 : vector<8x256xf32>
    %cst_70 = arith.constant 1.000000e+00 : f32
    %414 = vector.broadcast %cst_70 : f32 to vector<8x256xf32>
    %415 = arith.addf %414, %413 : vector<8x256xf32>
    %416 = arith.divf %414, %415 : vector<8x256xf32>
    %cst_71 = arith.constant 2.000000e+00 : f32
    %417 = vector.broadcast %cst_71 : f32 to vector<8x256xf32>
    %418 = arith.mulf %417, %416 : vector<8x256xf32>
    %cst_72 = arith.constant 1.000000e+00 : f32
    %419 = vector.broadcast %cst_72 : f32 to vector<8x256xf32>
    %420 = arith.subf %418, %419 : vector<8x256xf32>
    %421 = arith.select %22, %420, %416 : vector<8x256xi1>, vector<8x256xf32>
    %422 = vector.extract_strided_slice %421 {offsets = [0, 0], sizes = [8, 32], strides = [1, 1]} : vector<8x256xf32> to vector<8x32xf32>
    %423 = vector.extract_strided_slice %421 {offsets = [0, 32], sizes = [8, 32], strides = [1, 1]} : vector<8x256xf32> to vector<8x32xf32>
    %424 = vector.extract_strided_slice %421 {offsets = [0, 64], sizes = [8, 32], strides = [1, 1]} : vector<8x256xf32> to vector<8x32xf32>
    %425 = vector.extract_strided_slice %421 {offsets = [0, 96], sizes = [8, 32], strides = [1, 1]} : vector<8x256xf32> to vector<8x32xf32>
    %426 = vector.extract_strided_slice %401 {offsets = [0, 0], sizes = [8, 32], strides = [1, 1]} : vector<8x64xf32> to vector<8x32xf32>
    %427 = arith.mulf %423, %426 : vector<8x32xf32>
    %428 = arith.mulf %422, %424 : vector<8x32xf32>
    %429 = arith.addf %427, %428 : vector<8x32xf32>
    %430 = math.tanh %429 : vector<8x32xf32>
    %431 = arith.mulf %425, %430 : vector<8x32xf32>
    %432 = vector.extract_strided_slice %421 {offsets = [0, 128], sizes = [8, 32], strides = [1, 1]} : vector<8x256xf32> to vector<8x32xf32>
    %433 = vector.extract_strided_slice %421 {offsets = [0, 160], sizes = [8, 32], strides = [1, 1]} : vector<8x256xf32> to vector<8x32xf32>
    %434 = vector.extract_strided_slice %421 {offsets = [0, 192], sizes = [8, 32], strides = [1, 1]} : vector<8x256xf32> to vector<8x32xf32>
    %435 = vector.extract_strided_slice %421 {offsets = [0, 224], sizes = [8, 32], strides = [1, 1]} : vector<8x256xf32> to vector<8x32xf32>
    %436 = vector.extract_strided_slice %401 {offsets = [0, 32], sizes = [8, 32], strides = [1, 1]} : vector<8x64xf32> to vector<8x32xf32>
    %437 = arith.mulf %433, %436 : vector<8x32xf32>
    %438 = arith.mulf %432, %434 : vector<8x32xf32>
    %439 = arith.addf %437, %438 : vector<8x32xf32>
    %440 = math.tanh %439 : vector<8x32xf32>
    %441 = arith.mulf %435, %440 : vector<8x32xf32>
    %442 = vector.extract_strided_slice %0 {offsets = [5, 0, 0], sizes = [1, 8, 32], strides = [1, 1, 1]} : vector<8x8x32xf32> to vector<1x8x32xf32>
    %443 = vector.shape_cast %442 : vector<1x8x32xf32> to vector<8x32xf32>
    %444 = vector.extract_strided_slice %0 {offsets = [2, 0, 0], sizes = [1, 8, 32], strides = [1, 1, 1]} : vector<8x8x32xf32> to vector<1x8x32xf32>
    %445 = vector.shape_cast %444 : vector<1x8x32xf32> to vector<8x32xf32>
    %446 = arith.mulf %443, %431 : vector<8x32xf32>
    %cst_73 = arith.constant 1.000000e+00 : f32
    %447 = vector.broadcast %cst_73 : f32 to vector<8x32xf32>
    %448 = arith.subf %447, %443 : vector<8x32xf32>
    %449 = vector.extract_strided_slice %388 {offsets = [0, 0], sizes = [8, 32], strides = [1, 1]} : vector<8x64xf32> to vector<8x32xf32>
    %450 = arith.mulf %448, %449 : vector<8x32xf32>
    %451 = arith.addf %446, %450 : vector<8x32xf32>
    %452 = arith.mulf %445, %441 : vector<8x32xf32>
    %cst_74 = arith.constant 1.000000e+00 : f32
    %453 = vector.broadcast %cst_74 : f32 to vector<8x32xf32>
    %454 = arith.subf %453, %445 : vector<8x32xf32>
    %455 = vector.extract_strided_slice %388 {offsets = [0, 32], sizes = [8, 32], strides = [1, 1]} : vector<8x64xf32> to vector<8x32xf32>
    %456 = arith.mulf %454, %455 : vector<8x32xf32>
    %457 = arith.addf %452, %456 : vector<8x32xf32>
    %458 = tpu.concatenate %451, %457 in 1 : vector<8x32xf32>, vector<8x32xf32> -> vector<8x64xf32>
    %459 = arith.mulf %443, %429 : vector<8x32xf32>
    %cst_75 = arith.constant 1.000000e+00 : f32
    %460 = vector.broadcast %cst_75 : f32 to vector<8x32xf32>
    %461 = arith.subf %460, %443 : vector<8x32xf32>
    %462 = vector.extract_strided_slice %401 {offsets = [0, 0], sizes = [8, 32], strides = [1, 1]} : vector<8x64xf32> to vector<8x32xf32>
    %463 = arith.mulf %461, %462 : vector<8x32xf32>
    %464 = arith.addf %459, %463 : vector<8x32xf32>
    %465 = arith.mulf %445, %439 : vector<8x32xf32>
    %cst_76 = arith.constant 1.000000e+00 : f32
    %466 = vector.broadcast %cst_76 : f32 to vector<8x32xf32>
    %467 = arith.subf %466, %445 : vector<8x32xf32>
    %468 = vector.extract_strided_slice %401 {offsets = [0, 32], sizes = [8, 32], strides = [1, 1]} : vector<8x64xf32> to vector<8x32xf32>
    %469 = arith.mulf %467, %468 : vector<8x32xf32>
    %470 = arith.addf %465, %469 : vector<8x32xf32>
    %471 = tpu.concatenate %464, %470 in 1 : vector<8x32xf32>, vector<8x32xf32> -> vector<8x64xf32>
    %472 = arith.mulf %443, %431 : vector<8x32xf32>
    %473 = arith.mulf %445, %441 : vector<8x32xf32>
    %474 = vector.extract_strided_slice %51 {offsets = [48, 0], sizes = [8, 128], strides = [1, 1]} : vector<64x256xf32> to vector<8x128xf32>
    %475 = vector.extract_strided_slice %51 {offsets = [8, 128], sizes = [8, 128], strides = [1, 1]} : vector<64x256xf32> to vector<8x128xf32>
    %476 = tpu.concatenate %474, %475 in 1 : vector<8x128xf32>, vector<8x128xf32> -> vector<8x256xf32>
    %cst_77 = arith.constant dense<0.000000e+00> : vector<8x256xf32>
    %477 = tpu.matmul %458, %47, %cst_77 {dimension_numbers = #tpu.dot_dimension_numbers<[1], [0], [0], [1], [0, 0, 1, 1], [], []>} : vector<8x64xf32>, vector<64x256xf32>, vector<8x256xf32> -> vector<8x256xf32>
    %478 = arith.addf %476, %477 : vector<8x256xf32>
    %cst_78 = arith.constant 2.000000e+00 : f32
    %479 = vector.broadcast %cst_78 : f32 to vector<8x256xf32>
    %480 = arith.mulf %479, %478 : vector<8x256xf32>
    %481 = arith.select %22, %480, %478 : vector<8x256xi1>, vector<8x256xf32>
    %482 = arith.negf %481 : vector<8x256xf32>
    %483 = math.exp %482 : vector<8x256xf32>
    %cst_79 = arith.constant 1.000000e+00 : f32
    %484 = vector.broadcast %cst_79 : f32 to vector<8x256xf32>
    %485 = arith.addf %484, %483 : vector<8x256xf32>
    %486 = arith.divf %484, %485 : vector<8x256xf32>
    %cst_80 = arith.constant 2.000000e+00 : f32
    %487 = vector.broadcast %cst_80 : f32 to vector<8x256xf32>
    %488 = arith.mulf %487, %486 : vector<8x256xf32>
    %cst_81 = arith.constant 1.000000e+00 : f32
    %489 = vector.broadcast %cst_81 : f32 to vector<8x256xf32>
    %490 = arith.subf %488, %489 : vector<8x256xf32>
    %491 = arith.select %22, %490, %486 : vector<8x256xi1>, vector<8x256xf32>
    %492 = vector.extract_strided_slice %491 {offsets = [0, 0], sizes = [8, 32], strides = [1, 1]} : vector<8x256xf32> to vector<8x32xf32>
    %493 = vector.extract_strided_slice %491 {offsets = [0, 32], sizes = [8, 32], strides = [1, 1]} : vector<8x256xf32> to vector<8x32xf32>
    %494 = vector.extract_strided_slice %491 {offsets = [0, 64], sizes = [8, 32], strides = [1, 1]} : vector<8x256xf32> to vector<8x32xf32>
    %495 = vector.extract_strided_slice %491 {offsets = [0, 96], sizes = [8, 32], strides = [1, 1]} : vector<8x256xf32> to vector<8x32xf32>
    %496 = vector.extract_strided_slice %471 {offsets = [0, 0], sizes = [8, 32], strides = [1, 1]} : vector<8x64xf32> to vector<8x32xf32>
    %497 = arith.mulf %493, %496 : vector<8x32xf32>
    %498 = arith.mulf %492, %494 : vector<8x32xf32>
    %499 = arith.addf %497, %498 : vector<8x32xf32>
    %500 = math.tanh %499 : vector<8x32xf32>
    %501 = arith.mulf %495, %500 : vector<8x32xf32>
    %502 = vector.extract_strided_slice %491 {offsets = [0, 128], sizes = [8, 32], strides = [1, 1]} : vector<8x256xf32> to vector<8x32xf32>
    %503 = vector.extract_strided_slice %491 {offsets = [0, 160], sizes = [8, 32], strides = [1, 1]} : vector<8x256xf32> to vector<8x32xf32>
    %504 = vector.extract_strided_slice %491 {offsets = [0, 192], sizes = [8, 32], strides = [1, 1]} : vector<8x256xf32> to vector<8x32xf32>
    %505 = vector.extract_strided_slice %491 {offsets = [0, 224], sizes = [8, 32], strides = [1, 1]} : vector<8x256xf32> to vector<8x32xf32>
    %506 = vector.extract_strided_slice %471 {offsets = [0, 32], sizes = [8, 32], strides = [1, 1]} : vector<8x64xf32> to vector<8x32xf32>
    %507 = arith.mulf %503, %506 : vector<8x32xf32>
    %508 = arith.mulf %502, %504 : vector<8x32xf32>
    %509 = arith.addf %507, %508 : vector<8x32xf32>
    %510 = math.tanh %509 : vector<8x32xf32>
    %511 = arith.mulf %505, %510 : vector<8x32xf32>
    %512 = vector.extract_strided_slice %0 {offsets = [6, 0, 0], sizes = [1, 8, 32], strides = [1, 1, 1]} : vector<8x8x32xf32> to vector<1x8x32xf32>
    %513 = vector.shape_cast %512 : vector<1x8x32xf32> to vector<8x32xf32>
    %514 = vector.extract_strided_slice %0 {offsets = [1, 0, 0], sizes = [1, 8, 32], strides = [1, 1, 1]} : vector<8x8x32xf32> to vector<1x8x32xf32>
    %515 = vector.shape_cast %514 : vector<1x8x32xf32> to vector<8x32xf32>
    %516 = arith.mulf %513, %501 : vector<8x32xf32>
    %cst_82 = arith.constant 1.000000e+00 : f32
    %517 = vector.broadcast %cst_82 : f32 to vector<8x32xf32>
    %518 = arith.subf %517, %513 : vector<8x32xf32>
    %519 = vector.extract_strided_slice %458 {offsets = [0, 0], sizes = [8, 32], strides = [1, 1]} : vector<8x64xf32> to vector<8x32xf32>
    %520 = arith.mulf %518, %519 : vector<8x32xf32>
    %521 = arith.addf %516, %520 : vector<8x32xf32>
    %522 = arith.mulf %515, %511 : vector<8x32xf32>
    %cst_83 = arith.constant 1.000000e+00 : f32
    %523 = vector.broadcast %cst_83 : f32 to vector<8x32xf32>
    %524 = arith.subf %523, %515 : vector<8x32xf32>
    %525 = vector.extract_strided_slice %458 {offsets = [0, 32], sizes = [8, 32], strides = [1, 1]} : vector<8x64xf32> to vector<8x32xf32>
    %526 = arith.mulf %524, %525 : vector<8x32xf32>
    %527 = arith.addf %522, %526 : vector<8x32xf32>
    %528 = tpu.concatenate %521, %527 in 1 : vector<8x32xf32>, vector<8x32xf32> -> vector<8x64xf32>
    %529 = arith.mulf %513, %499 : vector<8x32xf32>
    %cst_84 = arith.constant 1.000000e+00 : f32
    %530 = vector.broadcast %cst_84 : f32 to vector<8x32xf32>
    %531 = arith.subf %530, %513 : vector<8x32xf32>
    %532 = vector.extract_strided_slice %471 {offsets = [0, 0], sizes = [8, 32], strides = [1, 1]} : vector<8x64xf32> to vector<8x32xf32>
    %533 = arith.mulf %531, %532 : vector<8x32xf32>
    %534 = arith.addf %529, %533 : vector<8x32xf32>
    %535 = arith.mulf %515, %509 : vector<8x32xf32>
    %cst_85 = arith.constant 1.000000e+00 : f32
    %536 = vector.broadcast %cst_85 : f32 to vector<8x32xf32>
    %537 = arith.subf %536, %515 : vector<8x32xf32>
    %538 = vector.extract_strided_slice %471 {offsets = [0, 32], sizes = [8, 32], strides = [1, 1]} : vector<8x64xf32> to vector<8x32xf32>
    %539 = arith.mulf %537, %538 : vector<8x32xf32>
    %540 = arith.addf %535, %539 : vector<8x32xf32>
    %541 = tpu.concatenate %534, %540 in 1 : vector<8x32xf32>, vector<8x32xf32> -> vector<8x64xf32>
    %542 = arith.mulf %513, %501 : vector<8x32xf32>
    %543 = arith.mulf %515, %511 : vector<8x32xf32>
    %544 = vector.extract_strided_slice %51 {offsets = [56, 0], sizes = [8, 128], strides = [1, 1]} : vector<64x256xf32> to vector<8x128xf32>
    %545 = vector.extract_strided_slice %51 {offsets = [0, 128], sizes = [8, 128], strides = [1, 1]} : vector<64x256xf32> to vector<8x128xf32>
    %546 = tpu.concatenate %544, %545 in 1 : vector<8x128xf32>, vector<8x128xf32> -> vector<8x256xf32>
    %cst_86 = arith.constant dense<0.000000e+00> : vector<8x256xf32>
    %547 = tpu.matmul %528, %47, %cst_86 {dimension_numbers = #tpu.dot_dimension_numbers<[1], [0], [0], [1], [0, 0, 1, 1], [], []>} : vector<8x64xf32>, vector<64x256xf32>, vector<8x256xf32> -> vector<8x256xf32>
    %548 = arith.addf %546, %547 : vector<8x256xf32>
    %cst_87 = arith.constant 2.000000e+00 : f32
    %549 = vector.broadcast %cst_87 : f32 to vector<8x256xf32>
    %550 = arith.mulf %549, %548 : vector<8x256xf32>
    %551 = arith.select %22, %550, %548 : vector<8x256xi1>, vector<8x256xf32>
    %552 = arith.negf %551 : vector<8x256xf32>
    %553 = math.exp %552 : vector<8x256xf32>
    %cst_88 = arith.constant 1.000000e+00 : f32
    %554 = vector.broadcast %cst_88 : f32 to vector<8x256xf32>
    %555 = arith.addf %554, %553 : vector<8x256xf32>
    %556 = arith.divf %554, %555 : vector<8x256xf32>
    %cst_89 = arith.constant 2.000000e+00 : f32
    %557 = vector.broadcast %cst_89 : f32 to vector<8x256xf32>
    %558 = arith.mulf %557, %556 : vector<8x256xf32>
    %cst_90 = arith.constant 1.000000e+00 : f32
    %559 = vector.broadcast %cst_90 : f32 to vector<8x256xf32>
    %560 = arith.subf %558, %559 : vector<8x256xf32>
    %561 = arith.select %22, %560, %556 : vector<8x256xi1>, vector<8x256xf32>
    %562 = vector.extract_strided_slice %561 {offsets = [0, 0], sizes = [8, 32], strides = [1, 1]} : vector<8x256xf32> to vector<8x32xf32>
    %563 = vector.extract_strided_slice %561 {offsets = [0, 32], sizes = [8, 32], strides = [1, 1]} : vector<8x256xf32> to vector<8x32xf32>
    %564 = vector.extract_strided_slice %561 {offsets = [0, 64], sizes = [8, 32], strides = [1, 1]} : vector<8x256xf32> to vector<8x32xf32>
    %565 = vector.extract_strided_slice %561 {offsets = [0, 96], sizes = [8, 32], strides = [1, 1]} : vector<8x256xf32> to vector<8x32xf32>
    %566 = vector.extract_strided_slice %541 {offsets = [0, 0], sizes = [8, 32], strides = [1, 1]} : vector<8x64xf32> to vector<8x32xf32>
    %567 = arith.mulf %563, %566 : vector<8x32xf32>
    %568 = arith.mulf %562, %564 : vector<8x32xf32>
    %569 = arith.addf %567, %568 : vector<8x32xf32>
    %570 = math.tanh %569 : vector<8x32xf32>
    %571 = arith.mulf %565, %570 : vector<8x32xf32>
    %572 = vector.extract_strided_slice %561 {offsets = [0, 128], sizes = [8, 32], strides = [1, 1]} : vector<8x256xf32> to vector<8x32xf32>
    %573 = vector.extract_strided_slice %561 {offsets = [0, 160], sizes = [8, 32], strides = [1, 1]} : vector<8x256xf32> to vector<8x32xf32>
    %574 = vector.extract_strided_slice %561 {offsets = [0, 192], sizes = [8, 32], strides = [1, 1]} : vector<8x256xf32> to vector<8x32xf32>
    %575 = vector.extract_strided_slice %561 {offsets = [0, 224], sizes = [8, 32], strides = [1, 1]} : vector<8x256xf32> to vector<8x32xf32>
    %576 = vector.extract_strided_slice %541 {offsets = [0, 32], sizes = [8, 32], strides = [1, 1]} : vector<8x64xf32> to vector<8x32xf32>
    %577 = arith.mulf %573, %576 : vector<8x32xf32>
    %578 = arith.mulf %572, %574 : vector<8x32xf32>
    %579 = arith.addf %577, %578 : vector<8x32xf32>
    %580 = math.tanh %579 : vector<8x32xf32>
    %581 = arith.mulf %575, %580 : vector<8x32xf32>
    %582 = vector.extract_strided_slice %0 {offsets = [7, 0, 0], sizes = [1, 8, 32], strides = [1, 1, 1]} : vector<8x8x32xf32> to vector<1x8x32xf32>
    %583 = vector.shape_cast %582 : vector<1x8x32xf32> to vector<8x32xf32>
    %584 = vector.extract_strided_slice %0 {offsets = [0, 0, 0], sizes = [1, 8, 32], strides = [1, 1, 1]} : vector<8x8x32xf32> to vector<1x8x32xf32>
    %585 = vector.shape_cast %584 : vector<1x8x32xf32> to vector<8x32xf32>
    %586 = arith.mulf %583, %571 : vector<8x32xf32>
    %587 = arith.mulf %585, %581 : vector<8x32xf32>
    %588 = tpu.concatenate %122, %587 in 1 : vector<8x32xf32>, vector<8x32xf32> -> vector<8x64xf32>
    %589 = tpu.concatenate %192, %543 in 1 : vector<8x32xf32>, vector<8x32xf32> -> vector<8x64xf32>
    %590 = tpu.concatenate %262, %473 in 1 : vector<8x32xf32>, vector<8x32xf32> -> vector<8x64xf32>
    %591 = tpu.concatenate %332, %403 in 1 : vector<8x32xf32>, vector<8x32xf32> -> vector<8x64xf32>
    %592 = tpu.concatenate %402, %333 in 1 : vector<8x32xf32>, vector<8x32xf32> -> vector<8x64xf32>
    %593 = tpu.concatenate %472, %263 in 1 : vector<8x32xf32>, vector<8x32xf32> -> vector<8x64xf32>
    %594 = tpu.concatenate %542, %193 in 1 : vector<8x32xf32>, vector<8x32xf32> -> vector<8x64xf32>
    %595 = tpu.concatenate %586, %123 in 1 : vector<8x32xf32>, vector<8x32xf32> -> vector<8x64xf32>
    %596 = tpu.concatenate %588, %589, %590, %591, %592, %593, %594, %595 in 0 : vector<8x64xf32>, vector<8x64xf32>, vector<8x64xf32>, vector<8x64xf32>, vector<8x64xf32>, vector<8x64xf32>, vector<8x64xf32>, vector<8x64xf32> -> vector<64x64xf32>
    %c0_91 = arith.constant 0 : index
    %c0_92 = arith.constant 0 : index
    %597 = vector.load %arg6[%c0_91, %c0_92] : memref<64x256xf32, #tpu.memory_space<vmem>>, vector<64x256xf32>
    %c0_93 = arith.constant 0 : index
    %c0_94 = arith.constant 0 : index
    %598 = vector.load %arg7[%c0_93, %c0_94] : memref<64x256xf32, #tpu.memory_space<vmem>>, vector<64x256xf32>
    %c0_95 = arith.constant 0 : index
    %c0_96 = arith.constant 0 : index
    %599 = vector.load %arg8[%c0_95, %c0_96] : memref<1x256xf32, #tpu.memory_space<vmem>>, vector<1x256xf32>
    %cst_97 = arith.constant dense<0.000000e+00> : vector<64x256xf32>
    %600 = tpu.matmul %596, %597, %cst_97 {dimension_numbers = #tpu.dot_dimension_numbers<[1], [0], [0], [1], [0, 0, 1, 1], [], []>} : vector<64x64xf32>, vector<64x256xf32>, vector<64x256xf32> -> vector<64x256xf32>
    %601 = vector.broadcast %599 : vector<1x256xf32> to vector<64x256xf32>
    %602 = arith.addf %600, %601 : vector<64x256xf32>
    %cst_98 = arith.constant 0.000000e+00 : f32
    %603 = vector.broadcast %cst_98 : f32 to vector<8x64xf32>
    %cst_99 = arith.constant 0.000000e+00 : f32
    %604 = vector.broadcast %cst_99 : f32 to vector<8x64xf32>
    %605 = vector.extract_strided_slice %602 {offsets = [0, 0], sizes = [8, 128], strides = [1, 1]} : vector<64x256xf32> to vector<8x128xf32>
    %606 = vector.extract_strided_slice %602 {offsets = [56, 128], sizes = [8, 128], strides = [1, 1]} : vector<64x256xf32> to vector<8x128xf32>
    %607 = tpu.concatenate %605, %606 in 1 : vector<8x128xf32>, vector<8x128xf32> -> vector<8x256xf32>
    %cst_100 = arith.constant dense<0.000000e+00> : vector<8x256xf32>
    %608 = tpu.matmul %603, %598, %cst_100 {dimension_numbers = #tpu.dot_dimension_numbers<[1], [0], [0], [1], [0, 0, 1, 1], [], []>} : vector<8x64xf32>, vector<64x256xf32>, vector<8x256xf32> -> vector<8x256xf32>
    %609 = arith.addf %607, %608 : vector<8x256xf32>
    %cst_101 = arith.constant 2.000000e+00 : f32
    %610 = vector.broadcast %cst_101 : f32 to vector<8x256xf32>
    %611 = arith.mulf %610, %609 : vector<8x256xf32>
    %612 = arith.select %22, %611, %609 : vector<8x256xi1>, vector<8x256xf32>
    %613 = arith.negf %612 : vector<8x256xf32>
    %614 = math.exp %613 : vector<8x256xf32>
    %cst_102 = arith.constant 1.000000e+00 : f32
    %615 = vector.broadcast %cst_102 : f32 to vector<8x256xf32>
    %616 = arith.addf %615, %614 : vector<8x256xf32>
    %617 = arith.divf %615, %616 : vector<8x256xf32>
    %cst_103 = arith.constant 2.000000e+00 : f32
    %618 = vector.broadcast %cst_103 : f32 to vector<8x256xf32>
    %619 = arith.mulf %618, %617 : vector<8x256xf32>
    %cst_104 = arith.constant 1.000000e+00 : f32
    %620 = vector.broadcast %cst_104 : f32 to vector<8x256xf32>
    %621 = arith.subf %619, %620 : vector<8x256xf32>
    %622 = arith.select %22, %621, %617 : vector<8x256xi1>, vector<8x256xf32>
    %623 = vector.extract_strided_slice %622 {offsets = [0, 0], sizes = [8, 32], strides = [1, 1]} : vector<8x256xf32> to vector<8x32xf32>
    %624 = vector.extract_strided_slice %622 {offsets = [0, 32], sizes = [8, 32], strides = [1, 1]} : vector<8x256xf32> to vector<8x32xf32>
    %625 = vector.extract_strided_slice %622 {offsets = [0, 64], sizes = [8, 32], strides = [1, 1]} : vector<8x256xf32> to vector<8x32xf32>
    %626 = vector.extract_strided_slice %622 {offsets = [0, 96], sizes = [8, 32], strides = [1, 1]} : vector<8x256xf32> to vector<8x32xf32>
    %627 = vector.extract_strided_slice %604 {offsets = [0, 0], sizes = [8, 32], strides = [1, 1]} : vector<8x64xf32> to vector<8x32xf32>
    %628 = arith.mulf %624, %627 : vector<8x32xf32>
    %629 = arith.mulf %623, %625 : vector<8x32xf32>
    %630 = arith.addf %628, %629 : vector<8x32xf32>
    %631 = math.tanh %630 : vector<8x32xf32>
    %632 = arith.mulf %626, %631 : vector<8x32xf32>
    %633 = vector.extract_strided_slice %622 {offsets = [0, 128], sizes = [8, 32], strides = [1, 1]} : vector<8x256xf32> to vector<8x32xf32>
    %634 = vector.extract_strided_slice %622 {offsets = [0, 160], sizes = [8, 32], strides = [1, 1]} : vector<8x256xf32> to vector<8x32xf32>
    %635 = vector.extract_strided_slice %622 {offsets = [0, 192], sizes = [8, 32], strides = [1, 1]} : vector<8x256xf32> to vector<8x32xf32>
    %636 = vector.extract_strided_slice %622 {offsets = [0, 224], sizes = [8, 32], strides = [1, 1]} : vector<8x256xf32> to vector<8x32xf32>
    %637 = vector.extract_strided_slice %604 {offsets = [0, 32], sizes = [8, 32], strides = [1, 1]} : vector<8x64xf32> to vector<8x32xf32>
    %638 = arith.mulf %634, %637 : vector<8x32xf32>
    %639 = arith.mulf %633, %635 : vector<8x32xf32>
    %640 = arith.addf %638, %639 : vector<8x32xf32>
    %641 = math.tanh %640 : vector<8x32xf32>
    %642 = arith.mulf %636, %641 : vector<8x32xf32>
    %643 = vector.extract_strided_slice %0 {offsets = [0, 0, 0], sizes = [1, 8, 32], strides = [1, 1, 1]} : vector<8x8x32xf32> to vector<1x8x32xf32>
    %644 = vector.shape_cast %643 : vector<1x8x32xf32> to vector<8x32xf32>
    %645 = vector.extract_strided_slice %0 {offsets = [7, 0, 0], sizes = [1, 8, 32], strides = [1, 1, 1]} : vector<8x8x32xf32> to vector<1x8x32xf32>
    %646 = vector.shape_cast %645 : vector<1x8x32xf32> to vector<8x32xf32>
    %647 = arith.mulf %644, %632 : vector<8x32xf32>
    %cst_105 = arith.constant 1.000000e+00 : f32
    %648 = vector.broadcast %cst_105 : f32 to vector<8x32xf32>
    %649 = arith.subf %648, %644 : vector<8x32xf32>
    %650 = vector.extract_strided_slice %603 {offsets = [0, 0], sizes = [8, 32], strides = [1, 1]} : vector<8x64xf32> to vector<8x32xf32>
    %651 = arith.mulf %649, %650 : vector<8x32xf32>
    %652 = arith.addf %647, %651 : vector<8x32xf32>
    %653 = arith.mulf %646, %642 : vector<8x32xf32>
    %cst_106 = arith.constant 1.000000e+00 : f32
    %654 = vector.broadcast %cst_106 : f32 to vector<8x32xf32>
    %655 = arith.subf %654, %646 : vector<8x32xf32>
    %656 = vector.extract_strided_slice %603 {offsets = [0, 32], sizes = [8, 32], strides = [1, 1]} : vector<8x64xf32> to vector<8x32xf32>
    %657 = arith.mulf %655, %656 : vector<8x32xf32>
    %658 = arith.addf %653, %657 : vector<8x32xf32>
    %659 = tpu.concatenate %652, %658 in 1 : vector<8x32xf32>, vector<8x32xf32> -> vector<8x64xf32>
    %660 = arith.mulf %644, %630 : vector<8x32xf32>
    %cst_107 = arith.constant 1.000000e+00 : f32
    %661 = vector.broadcast %cst_107 : f32 to vector<8x32xf32>
    %662 = arith.subf %661, %644 : vector<8x32xf32>
    %663 = vector.extract_strided_slice %604 {offsets = [0, 0], sizes = [8, 32], strides = [1, 1]} : vector<8x64xf32> to vector<8x32xf32>
    %664 = arith.mulf %662, %663 : vector<8x32xf32>
    %665 = arith.addf %660, %664 : vector<8x32xf32>
    %666 = arith.mulf %646, %640 : vector<8x32xf32>
    %cst_108 = arith.constant 1.000000e+00 : f32
    %667 = vector.broadcast %cst_108 : f32 to vector<8x32xf32>
    %668 = arith.subf %667, %646 : vector<8x32xf32>
    %669 = vector.extract_strided_slice %604 {offsets = [0, 32], sizes = [8, 32], strides = [1, 1]} : vector<8x64xf32> to vector<8x32xf32>
    %670 = arith.mulf %668, %669 : vector<8x32xf32>
    %671 = arith.addf %666, %670 : vector<8x32xf32>
    %672 = tpu.concatenate %665, %671 in 1 : vector<8x32xf32>, vector<8x32xf32> -> vector<8x64xf32>
    %673 = vector.extract_strided_slice %602 {offsets = [8, 0], sizes = [8, 128], strides = [1, 1]} : vector<64x256xf32> to vector<8x128xf32>
    %674 = vector.extract_strided_slice %602 {offsets = [48, 128], sizes = [8, 128], strides = [1, 1]} : vector<64x256xf32> to vector<8x128xf32>
    %675 = tpu.concatenate %673, %674 in 1 : vector<8x128xf32>, vector<8x128xf32> -> vector<8x256xf32>
    %cst_109 = arith.constant dense<0.000000e+00> : vector<8x256xf32>
    %676 = tpu.matmul %659, %598, %cst_109 {dimension_numbers = #tpu.dot_dimension_numbers<[1], [0], [0], [1], [0, 0, 1, 1], [], []>} : vector<8x64xf32>, vector<64x256xf32>, vector<8x256xf32> -> vector<8x256xf32>
    %677 = arith.addf %675, %676 : vector<8x256xf32>
    %cst_110 = arith.constant 2.000000e+00 : f32
    %678 = vector.broadcast %cst_110 : f32 to vector<8x256xf32>
    %679 = arith.mulf %678, %677 : vector<8x256xf32>
    %680 = arith.select %22, %679, %677 : vector<8x256xi1>, vector<8x256xf32>
    %681 = arith.negf %680 : vector<8x256xf32>
    %682 = math.exp %681 : vector<8x256xf32>
    %cst_111 = arith.constant 1.000000e+00 : f32
    %683 = vector.broadcast %cst_111 : f32 to vector<8x256xf32>
    %684 = arith.addf %683, %682 : vector<8x256xf32>
    %685 = arith.divf %683, %684 : vector<8x256xf32>
    %cst_112 = arith.constant 2.000000e+00 : f32
    %686 = vector.broadcast %cst_112 : f32 to vector<8x256xf32>
    %687 = arith.mulf %686, %685 : vector<8x256xf32>
    %cst_113 = arith.constant 1.000000e+00 : f32
    %688 = vector.broadcast %cst_113 : f32 to vector<8x256xf32>
    %689 = arith.subf %687, %688 : vector<8x256xf32>
    %690 = arith.select %22, %689, %685 : vector<8x256xi1>, vector<8x256xf32>
    %691 = vector.extract_strided_slice %690 {offsets = [0, 0], sizes = [8, 32], strides = [1, 1]} : vector<8x256xf32> to vector<8x32xf32>
    %692 = vector.extract_strided_slice %690 {offsets = [0, 32], sizes = [8, 32], strides = [1, 1]} : vector<8x256xf32> to vector<8x32xf32>
    %693 = vector.extract_strided_slice %690 {offsets = [0, 64], sizes = [8, 32], strides = [1, 1]} : vector<8x256xf32> to vector<8x32xf32>
    %694 = vector.extract_strided_slice %690 {offsets = [0, 96], sizes = [8, 32], strides = [1, 1]} : vector<8x256xf32> to vector<8x32xf32>
    %695 = vector.extract_strided_slice %672 {offsets = [0, 0], sizes = [8, 32], strides = [1, 1]} : vector<8x64xf32> to vector<8x32xf32>
    %696 = arith.mulf %692, %695 : vector<8x32xf32>
    %697 = arith.mulf %691, %693 : vector<8x32xf32>
    %698 = arith.addf %696, %697 : vector<8x32xf32>
    %699 = math.tanh %698 : vector<8x32xf32>
    %700 = arith.mulf %694, %699 : vector<8x32xf32>
    %701 = vector.extract_strided_slice %690 {offsets = [0, 128], sizes = [8, 32], strides = [1, 1]} : vector<8x256xf32> to vector<8x32xf32>
    %702 = vector.extract_strided_slice %690 {offsets = [0, 160], sizes = [8, 32], strides = [1, 1]} : vector<8x256xf32> to vector<8x32xf32>
    %703 = vector.extract_strided_slice %690 {offsets = [0, 192], sizes = [8, 32], strides = [1, 1]} : vector<8x256xf32> to vector<8x32xf32>
    %704 = vector.extract_strided_slice %690 {offsets = [0, 224], sizes = [8, 32], strides = [1, 1]} : vector<8x256xf32> to vector<8x32xf32>
    %705 = vector.extract_strided_slice %672 {offsets = [0, 32], sizes = [8, 32], strides = [1, 1]} : vector<8x64xf32> to vector<8x32xf32>
    %706 = arith.mulf %702, %705 : vector<8x32xf32>
    %707 = arith.mulf %701, %703 : vector<8x32xf32>
    %708 = arith.addf %706, %707 : vector<8x32xf32>
    %709 = math.tanh %708 : vector<8x32xf32>
    %710 = arith.mulf %704, %709 : vector<8x32xf32>
    %711 = vector.extract_strided_slice %0 {offsets = [1, 0, 0], sizes = [1, 8, 32], strides = [1, 1, 1]} : vector<8x8x32xf32> to vector<1x8x32xf32>
    %712 = vector.shape_cast %711 : vector<1x8x32xf32> to vector<8x32xf32>
    %713 = vector.extract_strided_slice %0 {offsets = [6, 0, 0], sizes = [1, 8, 32], strides = [1, 1, 1]} : vector<8x8x32xf32> to vector<1x8x32xf32>
    %714 = vector.shape_cast %713 : vector<1x8x32xf32> to vector<8x32xf32>
    %715 = arith.mulf %712, %700 : vector<8x32xf32>
    %cst_114 = arith.constant 1.000000e+00 : f32
    %716 = vector.broadcast %cst_114 : f32 to vector<8x32xf32>
    %717 = arith.subf %716, %712 : vector<8x32xf32>
    %718 = vector.extract_strided_slice %659 {offsets = [0, 0], sizes = [8, 32], strides = [1, 1]} : vector<8x64xf32> to vector<8x32xf32>
    %719 = arith.mulf %717, %718 : vector<8x32xf32>
    %720 = arith.addf %715, %719 : vector<8x32xf32>
    %721 = arith.mulf %714, %710 : vector<8x32xf32>
    %cst_115 = arith.constant 1.000000e+00 : f32
    %722 = vector.broadcast %cst_115 : f32 to vector<8x32xf32>
    %723 = arith.subf %722, %714 : vector<8x32xf32>
    %724 = vector.extract_strided_slice %659 {offsets = [0, 32], sizes = [8, 32], strides = [1, 1]} : vector<8x64xf32> to vector<8x32xf32>
    %725 = arith.mulf %723, %724 : vector<8x32xf32>
    %726 = arith.addf %721, %725 : vector<8x32xf32>
    %727 = tpu.concatenate %720, %726 in 1 : vector<8x32xf32>, vector<8x32xf32> -> vector<8x64xf32>
    %728 = arith.mulf %712, %698 : vector<8x32xf32>
    %cst_116 = arith.constant 1.000000e+00 : f32
    %729 = vector.broadcast %cst_116 : f32 to vector<8x32xf32>
    %730 = arith.subf %729, %712 : vector<8x32xf32>
    %731 = vector.extract_strided_slice %672 {offsets = [0, 0], sizes = [8, 32], strides = [1, 1]} : vector<8x64xf32> to vector<8x32xf32>
    %732 = arith.mulf %730, %731 : vector<8x32xf32>
    %733 = arith.addf %728, %732 : vector<8x32xf32>
    %734 = arith.mulf %714, %708 : vector<8x32xf32>
    %cst_117 = arith.constant 1.000000e+00 : f32
    %735 = vector.broadcast %cst_117 : f32 to vector<8x32xf32>
    %736 = arith.subf %735, %714 : vector<8x32xf32>
    %737 = vector.extract_strided_slice %672 {offsets = [0, 32], sizes = [8, 32], strides = [1, 1]} : vector<8x64xf32> to vector<8x32xf32>
    %738 = arith.mulf %736, %737 : vector<8x32xf32>
    %739 = arith.addf %734, %738 : vector<8x32xf32>
    %740 = tpu.concatenate %733, %739 in 1 : vector<8x32xf32>, vector<8x32xf32> -> vector<8x64xf32>
    %741 = vector.extract_strided_slice %602 {offsets = [16, 0], sizes = [8, 128], strides = [1, 1]} : vector<64x256xf32> to vector<8x128xf32>
    %742 = vector.extract_strided_slice %602 {offsets = [40, 128], sizes = [8, 128], strides = [1, 1]} : vector<64x256xf32> to vector<8x128xf32>
    %743 = tpu.concatenate %741, %742 in 1 : vector<8x128xf32>, vector<8x128xf32> -> vector<8x256xf32>
    %cst_118 = arith.constant dense<0.000000e+00> : vector<8x256xf32>
    %744 = tpu.matmul %727, %598, %cst_118 {dimension_numbers = #tpu.dot_dimension_numbers<[1], [0], [0], [1], [0, 0, 1, 1], [], []>} : vector<8x64xf32>, vector<64x256xf32>, vector<8x256xf32> -> vector<8x256xf32>
    %745 = arith.addf %743, %744 : vector<8x256xf32>
    %cst_119 = arith.constant 2.000000e+00 : f32
    %746 = vector.broadcast %cst_119 : f32 to vector<8x256xf32>
    %747 = arith.mulf %746, %745 : vector<8x256xf32>
    %748 = arith.select %22, %747, %745 : vector<8x256xi1>, vector<8x256xf32>
    %749 = arith.negf %748 : vector<8x256xf32>
    %750 = math.exp %749 : vector<8x256xf32>
    %cst_120 = arith.constant 1.000000e+00 : f32
    %751 = vector.broadcast %cst_120 : f32 to vector<8x256xf32>
    %752 = arith.addf %751, %750 : vector<8x256xf32>
    %753 = arith.divf %751, %752 : vector<8x256xf32>
    %cst_121 = arith.constant 2.000000e+00 : f32
    %754 = vector.broadcast %cst_121 : f32 to vector<8x256xf32>
    %755 = arith.mulf %754, %753 : vector<8x256xf32>
    %cst_122 = arith.constant 1.000000e+00 : f32
    %756 = vector.broadcast %cst_122 : f32 to vector<8x256xf32>
    %757 = arith.subf %755, %756 : vector<8x256xf32>
    %758 = arith.select %22, %757, %753 : vector<8x256xi1>, vector<8x256xf32>
    %759 = vector.extract_strided_slice %758 {offsets = [0, 0], sizes = [8, 32], strides = [1, 1]} : vector<8x256xf32> to vector<8x32xf32>
    %760 = vector.extract_strided_slice %758 {offsets = [0, 32], sizes = [8, 32], strides = [1, 1]} : vector<8x256xf32> to vector<8x32xf32>
    %761 = vector.extract_strided_slice %758 {offsets = [0, 64], sizes = [8, 32], strides = [1, 1]} : vector<8x256xf32> to vector<8x32xf32>
    %762 = vector.extract_strided_slice %758 {offsets = [0, 96], sizes = [8, 32], strides = [1, 1]} : vector<8x256xf32> to vector<8x32xf32>
    %763 = vector.extract_strided_slice %740 {offsets = [0, 0], sizes = [8, 32], strides = [1, 1]} : vector<8x64xf32> to vector<8x32xf32>
    %764 = arith.mulf %760, %763 : vector<8x32xf32>
    %765 = arith.mulf %759, %761 : vector<8x32xf32>
    %766 = arith.addf %764, %765 : vector<8x32xf32>
    %767 = math.tanh %766 : vector<8x32xf32>
    %768 = arith.mulf %762, %767 : vector<8x32xf32>
    %769 = vector.extract_strided_slice %758 {offsets = [0, 128], sizes = [8, 32], strides = [1, 1]} : vector<8x256xf32> to vector<8x32xf32>
    %770 = vector.extract_strided_slice %758 {offsets = [0, 160], sizes = [8, 32], strides = [1, 1]} : vector<8x256xf32> to vector<8x32xf32>
    %771 = vector.extract_strided_slice %758 {offsets = [0, 192], sizes = [8, 32], strides = [1, 1]} : vector<8x256xf32> to vector<8x32xf32>
    %772 = vector.extract_strided_slice %758 {offsets = [0, 224], sizes = [8, 32], strides = [1, 1]} : vector<8x256xf32> to vector<8x32xf32>
    %773 = vector.extract_strided_slice %740 {offsets = [0, 32], sizes = [8, 32], strides = [1, 1]} : vector<8x64xf32> to vector<8x32xf32>
    %774 = arith.mulf %770, %773 : vector<8x32xf32>
    %775 = arith.mulf %769, %771 : vector<8x32xf32>
    %776 = arith.addf %774, %775 : vector<8x32xf32>
    %777 = math.tanh %776 : vector<8x32xf32>
    %778 = arith.mulf %772, %777 : vector<8x32xf32>
    %779 = vector.extract_strided_slice %0 {offsets = [2, 0, 0], sizes = [1, 8, 32], strides = [1, 1, 1]} : vector<8x8x32xf32> to vector<1x8x32xf32>
    %780 = vector.shape_cast %779 : vector<1x8x32xf32> to vector<8x32xf32>
    %781 = vector.extract_strided_slice %0 {offsets = [5, 0, 0], sizes = [1, 8, 32], strides = [1, 1, 1]} : vector<8x8x32xf32> to vector<1x8x32xf32>
    %782 = vector.shape_cast %781 : vector<1x8x32xf32> to vector<8x32xf32>
    %783 = arith.mulf %780, %768 : vector<8x32xf32>
    %cst_123 = arith.constant 1.000000e+00 : f32
    %784 = vector.broadcast %cst_123 : f32 to vector<8x32xf32>
    %785 = arith.subf %784, %780 : vector<8x32xf32>
    %786 = vector.extract_strided_slice %727 {offsets = [0, 0], sizes = [8, 32], strides = [1, 1]} : vector<8x64xf32> to vector<8x32xf32>
    %787 = arith.mulf %785, %786 : vector<8x32xf32>
    %788 = arith.addf %783, %787 : vector<8x32xf32>
    %789 = arith.mulf %782, %778 : vector<8x32xf32>
    %cst_124 = arith.constant 1.000000e+00 : f32
    %790 = vector.broadcast %cst_124 : f32 to vector<8x32xf32>
    %791 = arith.subf %790, %782 : vector<8x32xf32>
    %792 = vector.extract_strided_slice %727 {offsets = [0, 32], sizes = [8, 32], strides = [1, 1]} : vector<8x64xf32> to vector<8x32xf32>
    %793 = arith.mulf %791, %792 : vector<8x32xf32>
    %794 = arith.addf %789, %793 : vector<8x32xf32>
    %795 = tpu.concatenate %788, %794 in 1 : vector<8x32xf32>, vector<8x32xf32> -> vector<8x64xf32>
    %796 = arith.mulf %780, %766 : vector<8x32xf32>
    %cst_125 = arith.constant 1.000000e+00 : f32
    %797 = vector.broadcast %cst_125 : f32 to vector<8x32xf32>
    %798 = arith.subf %797, %780 : vector<8x32xf32>
    %799 = vector.extract_strided_slice %740 {offsets = [0, 0], sizes = [8, 32], strides = [1, 1]} : vector<8x64xf32> to vector<8x32xf32>
    %800 = arith.mulf %798, %799 : vector<8x32xf32>
    %801 = arith.addf %796, %800 : vector<8x32xf32>
    %802 = arith.mulf %782, %776 : vector<8x32xf32>
    %cst_126 = arith.constant 1.000000e+00 : f32
    %803 = vector.broadcast %cst_126 : f32 to vector<8x32xf32>
    %804 = arith.subf %803, %782 : vector<8x32xf32>
    %805 = vector.extract_strided_slice %740 {offsets = [0, 32], sizes = [8, 32], strides = [1, 1]} : vector<8x64xf32> to vector<8x32xf32>
    %806 = arith.mulf %804, %805 : vector<8x32xf32>
    %807 = arith.addf %802, %806 : vector<8x32xf32>
    %808 = tpu.concatenate %801, %807 in 1 : vector<8x32xf32>, vector<8x32xf32> -> vector<8x64xf32>
    %809 = vector.extract_strided_slice %602 {offsets = [24, 0], sizes = [8, 128], strides = [1, 1]} : vector<64x256xf32> to vector<8x128xf32>
    %810 = vector.extract_strided_slice %602 {offsets = [32, 128], sizes = [8, 128], strides = [1, 1]} : vector<64x256xf32> to vector<8x128xf32>
    %811 = tpu.concatenate %809, %810 in 1 : vector<8x128xf32>, vector<8x128xf32> -> vector<8x256xf32>
    %cst_127 = arith.constant dense<0.000000e+00> : vector<8x256xf32>
    %812 = tpu.matmul %795, %598, %cst_127 {dimension_numbers = #tpu.dot_dimension_numbers<[1], [0], [0], [1], [0, 0, 1, 1], [], []>} : vector<8x64xf32>, vector<64x256xf32>, vector<8x256xf32> -> vector<8x256xf32>
    %813 = arith.addf %811, %812 : vector<8x256xf32>
    %cst_128 = arith.constant 2.000000e+00 : f32
    %814 = vector.broadcast %cst_128 : f32 to vector<8x256xf32>
    %815 = arith.mulf %814, %813 : vector<8x256xf32>
    %816 = arith.select %22, %815, %813 : vector<8x256xi1>, vector<8x256xf32>
    %817 = arith.negf %816 : vector<8x256xf32>
    %818 = math.exp %817 : vector<8x256xf32>
    %cst_129 = arith.constant 1.000000e+00 : f32
    %819 = vector.broadcast %cst_129 : f32 to vector<8x256xf32>
    %820 = arith.addf %819, %818 : vector<8x256xf32>
    %821 = arith.divf %819, %820 : vector<8x256xf32>
    %cst_130 = arith.constant 2.000000e+00 : f32
    %822 = vector.broadcast %cst_130 : f32 to vector<8x256xf32>
    %823 = arith.mulf %822, %821 : vector<8x256xf32>
    %cst_131 = arith.constant 1.000000e+00 : f32
    %824 = vector.broadcast %cst_131 : f32 to vector<8x256xf32>
    %825 = arith.subf %823, %824 : vector<8x256xf32>
    %826 = arith.select %22, %825, %821 : vector<8x256xi1>, vector<8x256xf32>
    %827 = vector.extract_strided_slice %826 {offsets = [0, 0], sizes = [8, 32], strides = [1, 1]} : vector<8x256xf32> to vector<8x32xf32>
    %828 = vector.extract_strided_slice %826 {offsets = [0, 32], sizes = [8, 32], strides = [1, 1]} : vector<8x256xf32> to vector<8x32xf32>
    %829 = vector.extract_strided_slice %826 {offsets = [0, 64], sizes = [8, 32], strides = [1, 1]} : vector<8x256xf32> to vector<8x32xf32>
    %830 = vector.extract_strided_slice %826 {offsets = [0, 96], sizes = [8, 32], strides = [1, 1]} : vector<8x256xf32> to vector<8x32xf32>
    %831 = vector.extract_strided_slice %808 {offsets = [0, 0], sizes = [8, 32], strides = [1, 1]} : vector<8x64xf32> to vector<8x32xf32>
    %832 = arith.mulf %828, %831 : vector<8x32xf32>
    %833 = arith.mulf %827, %829 : vector<8x32xf32>
    %834 = arith.addf %832, %833 : vector<8x32xf32>
    %835 = math.tanh %834 : vector<8x32xf32>
    %836 = arith.mulf %830, %835 : vector<8x32xf32>
    %837 = vector.extract_strided_slice %826 {offsets = [0, 128], sizes = [8, 32], strides = [1, 1]} : vector<8x256xf32> to vector<8x32xf32>
    %838 = vector.extract_strided_slice %826 {offsets = [0, 160], sizes = [8, 32], strides = [1, 1]} : vector<8x256xf32> to vector<8x32xf32>
    %839 = vector.extract_strided_slice %826 {offsets = [0, 192], sizes = [8, 32], strides = [1, 1]} : vector<8x256xf32> to vector<8x32xf32>
    %840 = vector.extract_strided_slice %826 {offsets = [0, 224], sizes = [8, 32], strides = [1, 1]} : vector<8x256xf32> to vector<8x32xf32>
    %841 = vector.extract_strided_slice %808 {offsets = [0, 32], sizes = [8, 32], strides = [1, 1]} : vector<8x64xf32> to vector<8x32xf32>
    %842 = arith.mulf %838, %841 : vector<8x32xf32>
    %843 = arith.mulf %837, %839 : vector<8x32xf32>
    %844 = arith.addf %842, %843 : vector<8x32xf32>
    %845 = math.tanh %844 : vector<8x32xf32>
    %846 = arith.mulf %840, %845 : vector<8x32xf32>
    %847 = vector.extract_strided_slice %0 {offsets = [3, 0, 0], sizes = [1, 8, 32], strides = [1, 1, 1]} : vector<8x8x32xf32> to vector<1x8x32xf32>
    %848 = vector.shape_cast %847 : vector<1x8x32xf32> to vector<8x32xf32>
    %849 = vector.extract_strided_slice %0 {offsets = [4, 0, 0], sizes = [1, 8, 32], strides = [1, 1, 1]} : vector<8x8x32xf32> to vector<1x8x32xf32>
    %850 = vector.shape_cast %849 : vector<1x8x32xf32> to vector<8x32xf32>
    %851 = arith.mulf %848, %836 : vector<8x32xf32>
    %cst_132 = arith.constant 1.000000e+00 : f32
    %852 = vector.broadcast %cst_132 : f32 to vector<8x32xf32>
    %853 = arith.subf %852, %848 : vector<8x32xf32>
    %854 = vector.extract_strided_slice %795 {offsets = [0, 0], sizes = [8, 32], strides = [1, 1]} : vector<8x64xf32> to vector<8x32xf32>
    %855 = arith.mulf %853, %854 : vector<8x32xf32>
    %856 = arith.addf %851, %855 : vector<8x32xf32>
    %857 = arith.mulf %850, %846 : vector<8x32xf32>
    %cst_133 = arith.constant 1.000000e+00 : f32
    %858 = vector.broadcast %cst_133 : f32 to vector<8x32xf32>
    %859 = arith.subf %858, %850 : vector<8x32xf32>
    %860 = vector.extract_strided_slice %795 {offsets = [0, 32], sizes = [8, 32], strides = [1, 1]} : vector<8x64xf32> to vector<8x32xf32>
    %861 = arith.mulf %859, %860 : vector<8x32xf32>
    %862 = arith.addf %857, %861 : vector<8x32xf32>
    %863 = tpu.concatenate %856, %862 in 1 : vector<8x32xf32>, vector<8x32xf32> -> vector<8x64xf32>
    %864 = arith.mulf %848, %834 : vector<8x32xf32>
    %cst_134 = arith.constant 1.000000e+00 : f32
    %865 = vector.broadcast %cst_134 : f32 to vector<8x32xf32>
    %866 = arith.subf %865, %848 : vector<8x32xf32>
    %867 = vector.extract_strided_slice %808 {offsets = [0, 0], sizes = [8, 32], strides = [1, 1]} : vector<8x64xf32> to vector<8x32xf32>
    %868 = arith.mulf %866, %867 : vector<8x32xf32>
    %869 = arith.addf %864, %868 : vector<8x32xf32>
    %870 = arith.mulf %850, %844 : vector<8x32xf32>
    %cst_135 = arith.constant 1.000000e+00 : f32
    %871 = vector.broadcast %cst_135 : f32 to vector<8x32xf32>
    %872 = arith.subf %871, %850 : vector<8x32xf32>
    %873 = vector.extract_strided_slice %808 {offsets = [0, 32], sizes = [8, 32], strides = [1, 1]} : vector<8x64xf32> to vector<8x32xf32>
    %874 = arith.mulf %872, %873 : vector<8x32xf32>
    %875 = arith.addf %870, %874 : vector<8x32xf32>
    %876 = tpu.concatenate %869, %875 in 1 : vector<8x32xf32>, vector<8x32xf32> -> vector<8x64xf32>
    %877 = vector.extract_strided_slice %602 {offsets = [32, 0], sizes = [8, 128], strides = [1, 1]} : vector<64x256xf32> to vector<8x128xf32>
    %878 = vector.extract_strided_slice %602 {offsets = [24, 128], sizes = [8, 128], strides = [1, 1]} : vector<64x256xf32> to vector<8x128xf32>
    %879 = tpu.concatenate %877, %878 in 1 : vector<8x128xf32>, vector<8x128xf32> -> vector<8x256xf32>
    %cst_136 = arith.constant dense<0.000000e+00> : vector<8x256xf32>
    %880 = tpu.matmul %863, %598, %cst_136 {dimension_numbers = #tpu.dot_dimension_numbers<[1], [0], [0], [1], [0, 0, 1, 1], [], []>} : vector<8x64xf32>, vector<64x256xf32>, vector<8x256xf32> -> vector<8x256xf32>
    %881 = arith.addf %879, %880 : vector<8x256xf32>
    %cst_137 = arith.constant 2.000000e+00 : f32
    %882 = vector.broadcast %cst_137 : f32 to vector<8x256xf32>
    %883 = arith.mulf %882, %881 : vector<8x256xf32>
    %884 = arith.select %22, %883, %881 : vector<8x256xi1>, vector<8x256xf32>
    %885 = arith.negf %884 : vector<8x256xf32>
    %886 = math.exp %885 : vector<8x256xf32>
    %cst_138 = arith.constant 1.000000e+00 : f32
    %887 = vector.broadcast %cst_138 : f32 to vector<8x256xf32>
    %888 = arith.addf %887, %886 : vector<8x256xf32>
    %889 = arith.divf %887, %888 : vector<8x256xf32>
    %cst_139 = arith.constant 2.000000e+00 : f32
    %890 = vector.broadcast %cst_139 : f32 to vector<8x256xf32>
    %891 = arith.mulf %890, %889 : vector<8x256xf32>
    %cst_140 = arith.constant 1.000000e+00 : f32
    %892 = vector.broadcast %cst_140 : f32 to vector<8x256xf32>
    %893 = arith.subf %891, %892 : vector<8x256xf32>
    %894 = arith.select %22, %893, %889 : vector<8x256xi1>, vector<8x256xf32>
    %895 = vector.extract_strided_slice %894 {offsets = [0, 0], sizes = [8, 32], strides = [1, 1]} : vector<8x256xf32> to vector<8x32xf32>
    %896 = vector.extract_strided_slice %894 {offsets = [0, 32], sizes = [8, 32], strides = [1, 1]} : vector<8x256xf32> to vector<8x32xf32>
    %897 = vector.extract_strided_slice %894 {offsets = [0, 64], sizes = [8, 32], strides = [1, 1]} : vector<8x256xf32> to vector<8x32xf32>
    %898 = vector.extract_strided_slice %894 {offsets = [0, 96], sizes = [8, 32], strides = [1, 1]} : vector<8x256xf32> to vector<8x32xf32>
    %899 = vector.extract_strided_slice %876 {offsets = [0, 0], sizes = [8, 32], strides = [1, 1]} : vector<8x64xf32> to vector<8x32xf32>
    %900 = arith.mulf %896, %899 : vector<8x32xf32>
    %901 = arith.mulf %895, %897 : vector<8x32xf32>
    %902 = arith.addf %900, %901 : vector<8x32xf32>
    %903 = math.tanh %902 : vector<8x32xf32>
    %904 = arith.mulf %898, %903 : vector<8x32xf32>
    %905 = vector.extract_strided_slice %894 {offsets = [0, 128], sizes = [8, 32], strides = [1, 1]} : vector<8x256xf32> to vector<8x32xf32>
    %906 = vector.extract_strided_slice %894 {offsets = [0, 160], sizes = [8, 32], strides = [1, 1]} : vector<8x256xf32> to vector<8x32xf32>
    %907 = vector.extract_strided_slice %894 {offsets = [0, 192], sizes = [8, 32], strides = [1, 1]} : vector<8x256xf32> to vector<8x32xf32>
    %908 = vector.extract_strided_slice %894 {offsets = [0, 224], sizes = [8, 32], strides = [1, 1]} : vector<8x256xf32> to vector<8x32xf32>
    %909 = vector.extract_strided_slice %876 {offsets = [0, 32], sizes = [8, 32], strides = [1, 1]} : vector<8x64xf32> to vector<8x32xf32>
    %910 = arith.mulf %906, %909 : vector<8x32xf32>
    %911 = arith.mulf %905, %907 : vector<8x32xf32>
    %912 = arith.addf %910, %911 : vector<8x32xf32>
    %913 = math.tanh %912 : vector<8x32xf32>
    %914 = arith.mulf %908, %913 : vector<8x32xf32>
    %915 = vector.extract_strided_slice %0 {offsets = [4, 0, 0], sizes = [1, 8, 32], strides = [1, 1, 1]} : vector<8x8x32xf32> to vector<1x8x32xf32>
    %916 = vector.shape_cast %915 : vector<1x8x32xf32> to vector<8x32xf32>
    %917 = vector.extract_strided_slice %0 {offsets = [3, 0, 0], sizes = [1, 8, 32], strides = [1, 1, 1]} : vector<8x8x32xf32> to vector<1x8x32xf32>
    %918 = vector.shape_cast %917 : vector<1x8x32xf32> to vector<8x32xf32>
    %919 = arith.mulf %916, %904 : vector<8x32xf32>
    %cst_141 = arith.constant 1.000000e+00 : f32
    %920 = vector.broadcast %cst_141 : f32 to vector<8x32xf32>
    %921 = arith.subf %920, %916 : vector<8x32xf32>
    %922 = vector.extract_strided_slice %863 {offsets = [0, 0], sizes = [8, 32], strides = [1, 1]} : vector<8x64xf32> to vector<8x32xf32>
    %923 = arith.mulf %921, %922 : vector<8x32xf32>
    %924 = arith.addf %919, %923 : vector<8x32xf32>
    %925 = arith.mulf %918, %914 : vector<8x32xf32>
    %cst_142 = arith.constant 1.000000e+00 : f32
    %926 = vector.broadcast %cst_142 : f32 to vector<8x32xf32>
    %927 = arith.subf %926, %918 : vector<8x32xf32>
    %928 = vector.extract_strided_slice %863 {offsets = [0, 32], sizes = [8, 32], strides = [1, 1]} : vector<8x64xf32> to vector<8x32xf32>
    %929 = arith.mulf %927, %928 : vector<8x32xf32>
    %930 = arith.addf %925, %929 : vector<8x32xf32>
    %931 = tpu.concatenate %924, %930 in 1 : vector<8x32xf32>, vector<8x32xf32> -> vector<8x64xf32>
    %932 = arith.mulf %916, %902 : vector<8x32xf32>
    %cst_143 = arith.constant 1.000000e+00 : f32
    %933 = vector.broadcast %cst_143 : f32 to vector<8x32xf32>
    %934 = arith.subf %933, %916 : vector<8x32xf32>
    %935 = vector.extract_strided_slice %876 {offsets = [0, 0], sizes = [8, 32], strides = [1, 1]} : vector<8x64xf32> to vector<8x32xf32>
    %936 = arith.mulf %934, %935 : vector<8x32xf32>
    %937 = arith.addf %932, %936 : vector<8x32xf32>
    %938 = arith.mulf %918, %912 : vector<8x32xf32>
    %cst_144 = arith.constant 1.000000e+00 : f32
    %939 = vector.broadcast %cst_144 : f32 to vector<8x32xf32>
    %940 = arith.subf %939, %918 : vector<8x32xf32>
    %941 = vector.extract_strided_slice %876 {offsets = [0, 32], sizes = [8, 32], strides = [1, 1]} : vector<8x64xf32> to vector<8x32xf32>
    %942 = arith.mulf %940, %941 : vector<8x32xf32>
    %943 = arith.addf %938, %942 : vector<8x32xf32>
    %944 = tpu.concatenate %937, %943 in 1 : vector<8x32xf32>, vector<8x32xf32> -> vector<8x64xf32>
    %945 = vector.extract_strided_slice %602 {offsets = [40, 0], sizes = [8, 128], strides = [1, 1]} : vector<64x256xf32> to vector<8x128xf32>
    %946 = vector.extract_strided_slice %602 {offsets = [16, 128], sizes = [8, 128], strides = [1, 1]} : vector<64x256xf32> to vector<8x128xf32>
    %947 = tpu.concatenate %945, %946 in 1 : vector<8x128xf32>, vector<8x128xf32> -> vector<8x256xf32>
    %cst_145 = arith.constant dense<0.000000e+00> : vector<8x256xf32>
    %948 = tpu.matmul %931, %598, %cst_145 {dimension_numbers = #tpu.dot_dimension_numbers<[1], [0], [0], [1], [0, 0, 1, 1], [], []>} : vector<8x64xf32>, vector<64x256xf32>, vector<8x256xf32> -> vector<8x256xf32>
    %949 = arith.addf %947, %948 : vector<8x256xf32>
    %cst_146 = arith.constant 2.000000e+00 : f32
    %950 = vector.broadcast %cst_146 : f32 to vector<8x256xf32>
    %951 = arith.mulf %950, %949 : vector<8x256xf32>
    %952 = arith.select %22, %951, %949 : vector<8x256xi1>, vector<8x256xf32>
    %953 = arith.negf %952 : vector<8x256xf32>
    %954 = math.exp %953 : vector<8x256xf32>
    %cst_147 = arith.constant 1.000000e+00 : f32
    %955 = vector.broadcast %cst_147 : f32 to vector<8x256xf32>
    %956 = arith.addf %955, %954 : vector<8x256xf32>
    %957 = arith.divf %955, %956 : vector<8x256xf32>
    %cst_148 = arith.constant 2.000000e+00 : f32
    %958 = vector.broadcast %cst_148 : f32 to vector<8x256xf32>
    %959 = arith.mulf %958, %957 : vector<8x256xf32>
    %cst_149 = arith.constant 1.000000e+00 : f32
    %960 = vector.broadcast %cst_149 : f32 to vector<8x256xf32>
    %961 = arith.subf %959, %960 : vector<8x256xf32>
    %962 = arith.select %22, %961, %957 : vector<8x256xi1>, vector<8x256xf32>
    %963 = vector.extract_strided_slice %962 {offsets = [0, 0], sizes = [8, 32], strides = [1, 1]} : vector<8x256xf32> to vector<8x32xf32>
    %964 = vector.extract_strided_slice %962 {offsets = [0, 32], sizes = [8, 32], strides = [1, 1]} : vector<8x256xf32> to vector<8x32xf32>
    %965 = vector.extract_strided_slice %962 {offsets = [0, 64], sizes = [8, 32], strides = [1, 1]} : vector<8x256xf32> to vector<8x32xf32>
    %966 = vector.extract_strided_slice %962 {offsets = [0, 96], sizes = [8, 32], strides = [1, 1]} : vector<8x256xf32> to vector<8x32xf32>
    %967 = vector.extract_strided_slice %944 {offsets = [0, 0], sizes = [8, 32], strides = [1, 1]} : vector<8x64xf32> to vector<8x32xf32>
    %968 = arith.mulf %964, %967 : vector<8x32xf32>
    %969 = arith.mulf %963, %965 : vector<8x32xf32>
    %970 = arith.addf %968, %969 : vector<8x32xf32>
    %971 = math.tanh %970 : vector<8x32xf32>
    %972 = arith.mulf %966, %971 : vector<8x32xf32>
    %973 = vector.extract_strided_slice %962 {offsets = [0, 128], sizes = [8, 32], strides = [1, 1]} : vector<8x256xf32> to vector<8x32xf32>
    %974 = vector.extract_strided_slice %962 {offsets = [0, 160], sizes = [8, 32], strides = [1, 1]} : vector<8x256xf32> to vector<8x32xf32>
    %975 = vector.extract_strided_slice %962 {offsets = [0, 192], sizes = [8, 32], strides = [1, 1]} : vector<8x256xf32> to vector<8x32xf32>
    %976 = vector.extract_strided_slice %962 {offsets = [0, 224], sizes = [8, 32], strides = [1, 1]} : vector<8x256xf32> to vector<8x32xf32>
    %977 = vector.extract_strided_slice %944 {offsets = [0, 32], sizes = [8, 32], strides = [1, 1]} : vector<8x64xf32> to vector<8x32xf32>
    %978 = arith.mulf %974, %977 : vector<8x32xf32>
    %979 = arith.mulf %973, %975 : vector<8x32xf32>
    %980 = arith.addf %978, %979 : vector<8x32xf32>
    %981 = math.tanh %980 : vector<8x32xf32>
    %982 = arith.mulf %976, %981 : vector<8x32xf32>
    %983 = vector.extract_strided_slice %0 {offsets = [5, 0, 0], sizes = [1, 8, 32], strides = [1, 1, 1]} : vector<8x8x32xf32> to vector<1x8x32xf32>
    %984 = vector.shape_cast %983 : vector<1x8x32xf32> to vector<8x32xf32>
    %985 = vector.extract_strided_slice %0 {offsets = [2, 0, 0], sizes = [1, 8, 32], strides = [1, 1, 1]} : vector<8x8x32xf32> to vector<1x8x32xf32>
    %986 = vector.shape_cast %985 : vector<1x8x32xf32> to vector<8x32xf32>
    %987 = arith.mulf %984, %972 : vector<8x32xf32>
    %cst_150 = arith.constant 1.000000e+00 : f32
    %988 = vector.broadcast %cst_150 : f32 to vector<8x32xf32>
    %989 = arith.subf %988, %984 : vector<8x32xf32>
    %990 = vector.extract_strided_slice %931 {offsets = [0, 0], sizes = [8, 32], strides = [1, 1]} : vector<8x64xf32> to vector<8x32xf32>
    %991 = arith.mulf %989, %990 : vector<8x32xf32>
    %992 = arith.addf %987, %991 : vector<8x32xf32>
    %993 = arith.mulf %986, %982 : vector<8x32xf32>
    %cst_151 = arith.constant 1.000000e+00 : f32
    %994 = vector.broadcast %cst_151 : f32 to vector<8x32xf32>
    %995 = arith.subf %994, %986 : vector<8x32xf32>
    %996 = vector.extract_strided_slice %931 {offsets = [0, 32], sizes = [8, 32], strides = [1, 1]} : vector<8x64xf32> to vector<8x32xf32>
    %997 = arith.mulf %995, %996 : vector<8x32xf32>
    %998 = arith.addf %993, %997 : vector<8x32xf32>
    %999 = tpu.concatenate %992, %998 in 1 : vector<8x32xf32>, vector<8x32xf32> -> vector<8x64xf32>
    %1000 = arith.mulf %984, %970 : vector<8x32xf32>
    %cst_152 = arith.constant 1.000000e+00 : f32
    %1001 = vector.broadcast %cst_152 : f32 to vector<8x32xf32>
    %1002 = arith.subf %1001, %984 : vector<8x32xf32>
    %1003 = vector.extract_strided_slice %944 {offsets = [0, 0], sizes = [8, 32], strides = [1, 1]} : vector<8x64xf32> to vector<8x32xf32>
    %1004 = arith.mulf %1002, %1003 : vector<8x32xf32>
    %1005 = arith.addf %1000, %1004 : vector<8x32xf32>
    %1006 = arith.mulf %986, %980 : vector<8x32xf32>
    %cst_153 = arith.constant 1.000000e+00 : f32
    %1007 = vector.broadcast %cst_153 : f32 to vector<8x32xf32>
    %1008 = arith.subf %1007, %986 : vector<8x32xf32>
    %1009 = vector.extract_strided_slice %944 {offsets = [0, 32], sizes = [8, 32], strides = [1, 1]} : vector<8x64xf32> to vector<8x32xf32>
    %1010 = arith.mulf %1008, %1009 : vector<8x32xf32>
    %1011 = arith.addf %1006, %1010 : vector<8x32xf32>
    %1012 = tpu.concatenate %1005, %1011 in 1 : vector<8x32xf32>, vector<8x32xf32> -> vector<8x64xf32>
    %1013 = vector.extract_strided_slice %602 {offsets = [48, 0], sizes = [8, 128], strides = [1, 1]} : vector<64x256xf32> to vector<8x128xf32>
    %1014 = vector.extract_strided_slice %602 {offsets = [8, 128], sizes = [8, 128], strides = [1, 1]} : vector<64x256xf32> to vector<8x128xf32>
    %1015 = tpu.concatenate %1013, %1014 in 1 : vector<8x128xf32>, vector<8x128xf32> -> vector<8x256xf32>
    %cst_154 = arith.constant dense<0.000000e+00> : vector<8x256xf32>
    %1016 = tpu.matmul %999, %598, %cst_154 {dimension_numbers = #tpu.dot_dimension_numbers<[1], [0], [0], [1], [0, 0, 1, 1], [], []>} : vector<8x64xf32>, vector<64x256xf32>, vector<8x256xf32> -> vector<8x256xf32>
    %1017 = arith.addf %1015, %1016 : vector<8x256xf32>
    %cst_155 = arith.constant 2.000000e+00 : f32
    %1018 = vector.broadcast %cst_155 : f32 to vector<8x256xf32>
    %1019 = arith.mulf %1018, %1017 : vector<8x256xf32>
    %1020 = arith.select %22, %1019, %1017 : vector<8x256xi1>, vector<8x256xf32>
    %1021 = arith.negf %1020 : vector<8x256xf32>
    %1022 = math.exp %1021 : vector<8x256xf32>
    %cst_156 = arith.constant 1.000000e+00 : f32
    %1023 = vector.broadcast %cst_156 : f32 to vector<8x256xf32>
    %1024 = arith.addf %1023, %1022 : vector<8x256xf32>
    %1025 = arith.divf %1023, %1024 : vector<8x256xf32>
    %cst_157 = arith.constant 2.000000e+00 : f32
    %1026 = vector.broadcast %cst_157 : f32 to vector<8x256xf32>
    %1027 = arith.mulf %1026, %1025 : vector<8x256xf32>
    %cst_158 = arith.constant 1.000000e+00 : f32
    %1028 = vector.broadcast %cst_158 : f32 to vector<8x256xf32>
    %1029 = arith.subf %1027, %1028 : vector<8x256xf32>
    %1030 = arith.select %22, %1029, %1025 : vector<8x256xi1>, vector<8x256xf32>
    %1031 = vector.extract_strided_slice %1030 {offsets = [0, 0], sizes = [8, 32], strides = [1, 1]} : vector<8x256xf32> to vector<8x32xf32>
    %1032 = vector.extract_strided_slice %1030 {offsets = [0, 32], sizes = [8, 32], strides = [1, 1]} : vector<8x256xf32> to vector<8x32xf32>
    %1033 = vector.extract_strided_slice %1030 {offsets = [0, 64], sizes = [8, 32], strides = [1, 1]} : vector<8x256xf32> to vector<8x32xf32>
    %1034 = vector.extract_strided_slice %1030 {offsets = [0, 96], sizes = [8, 32], strides = [1, 1]} : vector<8x256xf32> to vector<8x32xf32>
    %1035 = vector.extract_strided_slice %1012 {offsets = [0, 0], sizes = [8, 32], strides = [1, 1]} : vector<8x64xf32> to vector<8x32xf32>
    %1036 = arith.mulf %1032, %1035 : vector<8x32xf32>
    %1037 = arith.mulf %1031, %1033 : vector<8x32xf32>
    %1038 = arith.addf %1036, %1037 : vector<8x32xf32>
    %1039 = math.tanh %1038 : vector<8x32xf32>
    %1040 = arith.mulf %1034, %1039 : vector<8x32xf32>
    %1041 = vector.extract_strided_slice %1030 {offsets = [0, 128], sizes = [8, 32], strides = [1, 1]} : vector<8x256xf32> to vector<8x32xf32>
    %1042 = vector.extract_strided_slice %1030 {offsets = [0, 160], sizes = [8, 32], strides = [1, 1]} : vector<8x256xf32> to vector<8x32xf32>
    %1043 = vector.extract_strided_slice %1030 {offsets = [0, 192], sizes = [8, 32], strides = [1, 1]} : vector<8x256xf32> to vector<8x32xf32>
    %1044 = vector.extract_strided_slice %1030 {offsets = [0, 224], sizes = [8, 32], strides = [1, 1]} : vector<8x256xf32> to vector<8x32xf32>
    %1045 = vector.extract_strided_slice %1012 {offsets = [0, 32], sizes = [8, 32], strides = [1, 1]} : vector<8x64xf32> to vector<8x32xf32>
    %1046 = arith.mulf %1042, %1045 : vector<8x32xf32>
    %1047 = arith.mulf %1041, %1043 : vector<8x32xf32>
    %1048 = arith.addf %1046, %1047 : vector<8x32xf32>
    %1049 = math.tanh %1048 : vector<8x32xf32>
    %1050 = arith.mulf %1044, %1049 : vector<8x32xf32>
    %1051 = vector.extract_strided_slice %0 {offsets = [6, 0, 0], sizes = [1, 8, 32], strides = [1, 1, 1]} : vector<8x8x32xf32> to vector<1x8x32xf32>
    %1052 = vector.shape_cast %1051 : vector<1x8x32xf32> to vector<8x32xf32>
    %1053 = vector.extract_strided_slice %0 {offsets = [1, 0, 0], sizes = [1, 8, 32], strides = [1, 1, 1]} : vector<8x8x32xf32> to vector<1x8x32xf32>
    %1054 = vector.shape_cast %1053 : vector<1x8x32xf32> to vector<8x32xf32>
    %1055 = arith.mulf %1052, %1040 : vector<8x32xf32>
    %cst_159 = arith.constant 1.000000e+00 : f32
    %1056 = vector.broadcast %cst_159 : f32 to vector<8x32xf32>
    %1057 = arith.subf %1056, %1052 : vector<8x32xf32>
    %1058 = vector.extract_strided_slice %999 {offsets = [0, 0], sizes = [8, 32], strides = [1, 1]} : vector<8x64xf32> to vector<8x32xf32>
    %1059 = arith.mulf %1057, %1058 : vector<8x32xf32>
    %1060 = arith.addf %1055, %1059 : vector<8x32xf32>
    %1061 = arith.mulf %1054, %1050 : vector<8x32xf32>
    %cst_160 = arith.constant 1.000000e+00 : f32
    %1062 = vector.broadcast %cst_160 : f32 to vector<8x32xf32>
    %1063 = arith.subf %1062, %1054 : vector<8x32xf32>
    %1064 = vector.extract_strided_slice %999 {offsets = [0, 32], sizes = [8, 32], strides = [1, 1]} : vector<8x64xf32> to vector<8x32xf32>
    %1065 = arith.mulf %1063, %1064 : vector<8x32xf32>
    %1066 = arith.addf %1061, %1065 : vector<8x32xf32>
    %1067 = tpu.concatenate %1060, %1066 in 1 : vector<8x32xf32>, vector<8x32xf32> -> vector<8x64xf32>
    %1068 = arith.mulf %1052, %1038 : vector<8x32xf32>
    %cst_161 = arith.constant 1.000000e+00 : f32
    %1069 = vector.broadcast %cst_161 : f32 to vector<8x32xf32>
    %1070 = arith.subf %1069, %1052 : vector<8x32xf32>
    %1071 = vector.extract_strided_slice %1012 {offsets = [0, 0], sizes = [8, 32], strides = [1, 1]} : vector<8x64xf32> to vector<8x32xf32>
    %1072 = arith.mulf %1070, %1071 : vector<8x32xf32>
    %1073 = arith.addf %1068, %1072 : vector<8x32xf32>
    %1074 = arith.mulf %1054, %1048 : vector<8x32xf32>
    %cst_162 = arith.constant 1.000000e+00 : f32
    %1075 = vector.broadcast %cst_162 : f32 to vector<8x32xf32>
    %1076 = arith.subf %1075, %1054 : vector<8x32xf32>
    %1077 = vector.extract_strided_slice %1012 {offsets = [0, 32], sizes = [8, 32], strides = [1, 1]} : vector<8x64xf32> to vector<8x32xf32>
    %1078 = arith.mulf %1076, %1077 : vector<8x32xf32>
    %1079 = arith.addf %1074, %1078 : vector<8x32xf32>
    %1080 = tpu.concatenate %1073, %1079 in 1 : vector<8x32xf32>, vector<8x32xf32> -> vector<8x64xf32>
    %1081 = vector.extract_strided_slice %602 {offsets = [56, 0], sizes = [8, 128], strides = [1, 1]} : vector<64x256xf32> to vector<8x128xf32>
    %1082 = vector.extract_strided_slice %602 {offsets = [0, 128], sizes = [8, 128], strides = [1, 1]} : vector<64x256xf32> to vector<8x128xf32>
    %1083 = tpu.concatenate %1081, %1082 in 1 : vector<8x128xf32>, vector<8x128xf32> -> vector<8x256xf32>
    %cst_163 = arith.constant dense<0.000000e+00> : vector<8x256xf32>
    %1084 = tpu.matmul %1067, %598, %cst_163 {dimension_numbers = #tpu.dot_dimension_numbers<[1], [0], [0], [1], [0, 0, 1, 1], [], []>} : vector<8x64xf32>, vector<64x256xf32>, vector<8x256xf32> -> vector<8x256xf32>
    %1085 = arith.addf %1083, %1084 : vector<8x256xf32>
    %cst_164 = arith.constant 2.000000e+00 : f32
    %1086 = vector.broadcast %cst_164 : f32 to vector<8x256xf32>
    %1087 = arith.mulf %1086, %1085 : vector<8x256xf32>
    %1088 = arith.select %22, %1087, %1085 : vector<8x256xi1>, vector<8x256xf32>
    %1089 = arith.negf %1088 : vector<8x256xf32>
    %1090 = math.exp %1089 : vector<8x256xf32>
    %cst_165 = arith.constant 1.000000e+00 : f32
    %1091 = vector.broadcast %cst_165 : f32 to vector<8x256xf32>
    %1092 = arith.addf %1091, %1090 : vector<8x256xf32>
    %1093 = arith.divf %1091, %1092 : vector<8x256xf32>
    %cst_166 = arith.constant 2.000000e+00 : f32
    %1094 = vector.broadcast %cst_166 : f32 to vector<8x256xf32>
    %1095 = arith.mulf %1094, %1093 : vector<8x256xf32>
    %cst_167 = arith.constant 1.000000e+00 : f32
    %1096 = vector.broadcast %cst_167 : f32 to vector<8x256xf32>
    %1097 = arith.subf %1095, %1096 : vector<8x256xf32>
    %1098 = arith.select %22, %1097, %1093 : vector<8x256xi1>, vector<8x256xf32>
    %1099 = vector.extract_strided_slice %1098 {offsets = [0, 0], sizes = [8, 32], strides = [1, 1]} : vector<8x256xf32> to vector<8x32xf32>
    %1100 = vector.extract_strided_slice %1098 {offsets = [0, 32], sizes = [8, 32], strides = [1, 1]} : vector<8x256xf32> to vector<8x32xf32>
    %1101 = vector.extract_strided_slice %1098 {offsets = [0, 64], sizes = [8, 32], strides = [1, 1]} : vector<8x256xf32> to vector<8x32xf32>
    %1102 = vector.extract_strided_slice %1098 {offsets = [0, 96], sizes = [8, 32], strides = [1, 1]} : vector<8x256xf32> to vector<8x32xf32>
    %1103 = vector.extract_strided_slice %1080 {offsets = [0, 0], sizes = [8, 32], strides = [1, 1]} : vector<8x64xf32> to vector<8x32xf32>
    %1104 = arith.mulf %1100, %1103 : vector<8x32xf32>
    %1105 = arith.mulf %1099, %1101 : vector<8x32xf32>
    %1106 = arith.addf %1104, %1105 : vector<8x32xf32>
    %1107 = math.tanh %1106 : vector<8x32xf32>
    %1108 = arith.mulf %1102, %1107 : vector<8x32xf32>
    %1109 = vector.extract_strided_slice %1098 {offsets = [0, 128], sizes = [8, 32], strides = [1, 1]} : vector<8x256xf32> to vector<8x32xf32>
    %1110 = vector.extract_strided_slice %1098 {offsets = [0, 160], sizes = [8, 32], strides = [1, 1]} : vector<8x256xf32> to vector<8x32xf32>
    %1111 = vector.extract_strided_slice %1098 {offsets = [0, 192], sizes = [8, 32], strides = [1, 1]} : vector<8x256xf32> to vector<8x32xf32>
    %1112 = vector.extract_strided_slice %1098 {offsets = [0, 224], sizes = [8, 32], strides = [1, 1]} : vector<8x256xf32> to vector<8x32xf32>
    %1113 = vector.extract_strided_slice %1080 {offsets = [0, 32], sizes = [8, 32], strides = [1, 1]} : vector<8x64xf32> to vector<8x32xf32>
    %1114 = arith.mulf %1110, %1113 : vector<8x32xf32>
    %1115 = arith.mulf %1109, %1111 : vector<8x32xf32>
    %1116 = arith.addf %1114, %1115 : vector<8x32xf32>
    %1117 = math.tanh %1116 : vector<8x32xf32>
    %1118 = arith.mulf %1112, %1117 : vector<8x32xf32>
    %1119 = vector.extract_strided_slice %0 {offsets = [7, 0, 0], sizes = [1, 8, 32], strides = [1, 1, 1]} : vector<8x8x32xf32> to vector<1x8x32xf32>
    %1120 = vector.shape_cast %1119 : vector<1x8x32xf32> to vector<8x32xf32>
    %1121 = vector.extract_strided_slice %0 {offsets = [0, 0, 0], sizes = [1, 8, 32], strides = [1, 1, 1]} : vector<8x8x32xf32> to vector<1x8x32xf32>
    %1122 = vector.shape_cast %1121 : vector<1x8x32xf32> to vector<8x32xf32>
    %1123 = arith.mulf %1120, %1108 : vector<8x32xf32>
    %cst_168 = arith.constant 1.000000e+00 : f32
    %1124 = vector.broadcast %cst_168 : f32 to vector<8x32xf32>
    %1125 = arith.subf %1124, %1120 : vector<8x32xf32>
    %1126 = vector.extract_strided_slice %1067 {offsets = [0, 0], sizes = [8, 32], strides = [1, 1]} : vector<8x64xf32> to vector<8x32xf32>
    %1127 = arith.mulf %1125, %1126 : vector<8x32xf32>
    %1128 = arith.addf %1123, %1127 : vector<8x32xf32>
    %1129 = arith.mulf %1122, %1118 : vector<8x32xf32>
    %cst_169 = arith.constant 1.000000e+00 : f32
    %1130 = vector.broadcast %cst_169 : f32 to vector<8x32xf32>
    %1131 = arith.subf %1130, %1122 : vector<8x32xf32>
    %1132 = vector.extract_strided_slice %1067 {offsets = [0, 32], sizes = [8, 32], strides = [1, 1]} : vector<8x64xf32> to vector<8x32xf32>
    %1133 = arith.mulf %1131, %1132 : vector<8x32xf32>
    %1134 = arith.addf %1129, %1133 : vector<8x32xf32>
    %1135 = tpu.concatenate %1128, %1134 in 1 : vector<8x32xf32>, vector<8x32xf32> -> vector<8x64xf32>
    %1136 = arith.mulf %1120, %1106 : vector<8x32xf32>
    %cst_170 = arith.constant 1.000000e+00 : f32
    %1137 = vector.broadcast %cst_170 : f32 to vector<8x32xf32>
    %1138 = arith.subf %1137, %1120 : vector<8x32xf32>
    %1139 = vector.extract_strided_slice %1080 {offsets = [0, 0], sizes = [8, 32], strides = [1, 1]} : vector<8x64xf32> to vector<8x32xf32>
    %1140 = arith.mulf %1138, %1139 : vector<8x32xf32>
    %1141 = arith.addf %1136, %1140 : vector<8x32xf32>
    %1142 = arith.mulf %1122, %1116 : vector<8x32xf32>
    %cst_171 = arith.constant 1.000000e+00 : f32
    %1143 = vector.broadcast %cst_171 : f32 to vector<8x32xf32>
    %1144 = arith.subf %1143, %1122 : vector<8x32xf32>
    %1145 = vector.extract_strided_slice %1080 {offsets = [0, 32], sizes = [8, 32], strides = [1, 1]} : vector<8x64xf32> to vector<8x32xf32>
    %1146 = arith.mulf %1144, %1145 : vector<8x32xf32>
    %1147 = arith.addf %1142, %1146 : vector<8x32xf32>
    %1148 = tpu.concatenate %1141, %1147 in 1 : vector<8x32xf32>, vector<8x32xf32> -> vector<8x64xf32>
    %c0_172 = arith.constant 0 : index
    %c0_173 = arith.constant 0 : index
    %1149 = vector.load %arg9[%c0_172, %c0_173] : memref<64x32xf32, #tpu.memory_space<vmem>>, vector<64x32xf32>
    %cst_174 = arith.constant dense<0.000000e+00> : vector<8x32xf32>
    %1150 = tpu.matmul %1135, %1149, %cst_174 {dimension_numbers = #tpu.dot_dimension_numbers<[1], [0], [0], [1], [0, 0, 1, 1], [], []>} : vector<8x64xf32>, vector<64x32xf32>, vector<8x32xf32> -> vector<8x32xf32>
    %c0_175 = arith.constant 0 : index
    %c0_176 = arith.constant 0 : index
    %1151 = vector.load %arg10[%c0_175, %c0_176] : memref<1x32xf32, #tpu.memory_space<vmem>>, vector<1x32xf32>
    %1152 = vector.broadcast %1151 : vector<1x32xf32> to vector<8x32xf32>
    %1153 = arith.addf %1150, %1152 : vector<8x32xf32>
    %c0_177 = arith.constant 0 : index
    %c0_178 = arith.constant 0 : index
    %1154 = vector.load %arg11[%c0_177, %c0_178] : memref<64x32xf32, #tpu.memory_space<vmem>>, vector<64x32xf32>
    %cst_179 = arith.constant dense<0.000000e+00> : vector<8x32xf32>
    %1155 = tpu.matmul %1148, %1154, %cst_179 {dimension_numbers = #tpu.dot_dimension_numbers<[1], [0], [0], [1], [0, 0, 1, 1], [], []>} : vector<8x64xf32>, vector<64x32xf32>, vector<8x32xf32> -> vector<8x32xf32>
    %c0_180 = arith.constant 0 : index
    %c0_181 = arith.constant 0 : index
    %1156 = vector.load %arg12[%c0_180, %c0_181] : memref<1x32xf32, #tpu.memory_space<vmem>>, vector<1x32xf32>
    %1157 = vector.broadcast %1156 : vector<1x32xf32> to vector<8x32xf32>
    %1158 = arith.addf %1155, %1157 : vector<8x32xf32>
    %c0_182 = arith.constant 0 : index
    %c0_183 = arith.constant 0 : index
    %1159 = vector.load %arg2[%c0_182, %c0_183] : memref<40x16xf32, #tpu.memory_space<vmem>>, vector<40x16xf32>
    %c0_184 = arith.constant 0 : index
    %c0_185 = arith.constant 0 : index
    %1160 = vector.load %arg13[%c0_184, %c0_185] : memref<16x128xf32, #tpu.memory_space<vmem>>, vector<16x128xf32>
    %cst_186 = arith.constant dense<0.000000e+00> : vector<40x128xf32>
    %1161 = tpu.matmul %1159, %1160, %cst_186 {dimension_numbers = #tpu.dot_dimension_numbers<[1], [0], [0], [1], [0, 0, 1, 1], [], []>} : vector<40x16xf32>, vector<16x128xf32>, vector<40x128xf32> -> vector<40x128xf32>
    %c0_187 = arith.constant 0 : index
    %c0_188 = arith.constant 0 : index
    %1162 = vector.load %arg15[%c0_187, %c0_188] : memref<1x128xf32, #tpu.memory_space<vmem>>, vector<1x128xf32>
    %1163 = vector.broadcast %1162 : vector<1x128xf32> to vector<40x128xf32>
    %1164 = arith.addf %1161, %1163 : vector<40x128xf32>
    %c0_189 = arith.constant 0 : index
    %c0_190 = arith.constant 0 : index
    %1165 = vector.load %arg14[%c0_189, %c0_190] : memref<32x128xf32, #tpu.memory_space<vmem>>, vector<32x128xf32>
    %c0_191 = arith.constant 0 : index
    %c0_192 = arith.constant 0 : index
    %1166 = vector.load %arg16[%c0_191, %c0_192] : memref<64x128xf32, #tpu.memory_space<vmem>>, vector<64x128xf32>
    %c0_193 = arith.constant 0 : index
    %c0_194 = arith.constant 0 : index
    %1167 = vector.load %arg17[%c0_193, %c0_194] : memref<1x128xf32, #tpu.memory_space<vmem>>, vector<1x128xf32>
    %1168 = vector.extract_strided_slice %1164 {offsets = [0, 0], sizes = [8, 128], strides = [1, 1]} : vector<40x128xf32> to vector<8x128xf32>
    %cst_195 = arith.constant dense<0.000000e+00> : vector<8x128xf32>
    %1169 = tpu.matmul %1153, %1165, %cst_195 {dimension_numbers = #tpu.dot_dimension_numbers<[1], [0], [0], [1], [0, 0, 1, 1], [], []>} : vector<8x32xf32>, vector<32x128xf32>, vector<8x128xf32> -> vector<8x128xf32>
    %1170 = arith.addf %1168, %1169 : vector<8x128xf32>
    %cst_196 = arith.constant 2.000000e+00 : f32
    %1171 = vector.broadcast %cst_196 : f32 to vector<8x128xf32>
    %1172 = arith.mulf %1171, %1170 : vector<8x128xf32>
    %1173 = arith.select %44, %1172, %1170 : vector<8x128xi1>, vector<8x128xf32>
    %1174 = arith.negf %1173 : vector<8x128xf32>
    %1175 = math.exp %1174 : vector<8x128xf32>
    %cst_197 = arith.constant 1.000000e+00 : f32
    %1176 = vector.broadcast %cst_197 : f32 to vector<8x128xf32>
    %1177 = arith.addf %1176, %1175 : vector<8x128xf32>
    %1178 = arith.divf %1176, %1177 : vector<8x128xf32>
    %cst_198 = arith.constant 2.000000e+00 : f32
    %1179 = vector.broadcast %cst_198 : f32 to vector<8x128xf32>
    %1180 = arith.mulf %1179, %1178 : vector<8x128xf32>
    %cst_199 = arith.constant 1.000000e+00 : f32
    %1181 = vector.broadcast %cst_199 : f32 to vector<8x128xf32>
    %1182 = arith.subf %1180, %1181 : vector<8x128xf32>
    %1183 = arith.select %44, %1182, %1178 : vector<8x128xi1>, vector<8x128xf32>
    %1184 = vector.extract_strided_slice %1183 {offsets = [0, 0], sizes = [8, 32], strides = [1, 1]} : vector<8x128xf32> to vector<8x32xf32>
    %1185 = vector.extract_strided_slice %1183 {offsets = [0, 32], sizes = [8, 32], strides = [1, 1]} : vector<8x128xf32> to vector<8x32xf32>
    %1186 = vector.extract_strided_slice %1183 {offsets = [0, 64], sizes = [8, 32], strides = [1, 1]} : vector<8x128xf32> to vector<8x32xf32>
    %1187 = vector.extract_strided_slice %1183 {offsets = [0, 96], sizes = [8, 32], strides = [1, 1]} : vector<8x128xf32> to vector<8x32xf32>
    %1188 = arith.mulf %1185, %1158 : vector<8x32xf32>
    %1189 = arith.mulf %1184, %1186 : vector<8x32xf32>
    %1190 = arith.addf %1188, %1189 : vector<8x32xf32>
    %1191 = math.tanh %1190 : vector<8x32xf32>
    %1192 = arith.mulf %1187, %1191 : vector<8x32xf32>
    %1193 = tpu.concatenate %1192, %1153 in 1 : vector<8x32xf32>, vector<8x32xf32> -> vector<8x64xf32>
    %cst_200 = arith.constant dense<0.000000e+00> : vector<8x128xf32>
    %1194 = tpu.matmul %1193, %1166, %cst_200 {dimension_numbers = #tpu.dot_dimension_numbers<[1], [0], [0], [1], [0, 0, 1, 1], [], []>} : vector<8x64xf32>, vector<64x128xf32>, vector<8x128xf32> -> vector<8x128xf32>
    %1195 = vector.broadcast %1167 : vector<1x128xf32> to vector<8x128xf32>
    %1196 = arith.addf %1194, %1195 : vector<8x128xf32>
    %cst_201 = arith.constant 2.000000e+00 : f32
    %1197 = vector.broadcast %cst_201 : f32 to vector<8x128xf32>
    %1198 = arith.mulf %1197, %1196 : vector<8x128xf32>
    %1199 = arith.select %44, %1198, %1196 : vector<8x128xi1>, vector<8x128xf32>
    %1200 = arith.negf %1199 : vector<8x128xf32>
    %1201 = math.exp %1200 : vector<8x128xf32>
    %cst_202 = arith.constant 1.000000e+00 : f32
    %1202 = vector.broadcast %cst_202 : f32 to vector<8x128xf32>
    %1203 = arith.addf %1202, %1201 : vector<8x128xf32>
    %1204 = arith.divf %1202, %1203 : vector<8x128xf32>
    %cst_203 = arith.constant 2.000000e+00 : f32
    %1205 = vector.broadcast %cst_203 : f32 to vector<8x128xf32>
    %1206 = arith.mulf %1205, %1204 : vector<8x128xf32>
    %cst_204 = arith.constant 1.000000e+00 : f32
    %1207 = vector.broadcast %cst_204 : f32 to vector<8x128xf32>
    %1208 = arith.subf %1206, %1207 : vector<8x128xf32>
    %1209 = arith.select %44, %1208, %1204 : vector<8x128xi1>, vector<8x128xf32>
    %1210 = vector.extract_strided_slice %1209 {offsets = [0, 0], sizes = [8, 32], strides = [1, 1]} : vector<8x128xf32> to vector<8x32xf32>
    %1211 = vector.extract_strided_slice %1209 {offsets = [0, 32], sizes = [8, 32], strides = [1, 1]} : vector<8x128xf32> to vector<8x32xf32>
    %1212 = vector.extract_strided_slice %1209 {offsets = [0, 64], sizes = [8, 32], strides = [1, 1]} : vector<8x128xf32> to vector<8x32xf32>
    %1213 = vector.extract_strided_slice %1209 {offsets = [0, 96], sizes = [8, 32], strides = [1, 1]} : vector<8x128xf32> to vector<8x32xf32>
    %1214 = arith.mulf %1211, %1158 : vector<8x32xf32>
    %1215 = arith.mulf %1210, %1212 : vector<8x32xf32>
    %1216 = arith.addf %1214, %1215 : vector<8x32xf32>
    %1217 = math.tanh %1216 : vector<8x32xf32>
    %1218 = arith.mulf %1213, %1217 : vector<8x32xf32>
    %1219 = vector.extract_strided_slice %1164 {offsets = [8, 0], sizes = [8, 128], strides = [1, 1]} : vector<40x128xf32> to vector<8x128xf32>
    %cst_205 = arith.constant dense<0.000000e+00> : vector<8x128xf32>
    %1220 = tpu.matmul %1192, %1165, %cst_205 {dimension_numbers = #tpu.dot_dimension_numbers<[1], [0], [0], [1], [0, 0, 1, 1], [], []>} : vector<8x32xf32>, vector<32x128xf32>, vector<8x128xf32> -> vector<8x128xf32>
    %1221 = arith.addf %1219, %1220 : vector<8x128xf32>
    %cst_206 = arith.constant 2.000000e+00 : f32
    %1222 = vector.broadcast %cst_206 : f32 to vector<8x128xf32>
    %1223 = arith.mulf %1222, %1221 : vector<8x128xf32>
    %1224 = arith.select %44, %1223, %1221 : vector<8x128xi1>, vector<8x128xf32>
    %1225 = arith.negf %1224 : vector<8x128xf32>
    %1226 = math.exp %1225 : vector<8x128xf32>
    %cst_207 = arith.constant 1.000000e+00 : f32
    %1227 = vector.broadcast %cst_207 : f32 to vector<8x128xf32>
    %1228 = arith.addf %1227, %1226 : vector<8x128xf32>
    %1229 = arith.divf %1227, %1228 : vector<8x128xf32>
    %cst_208 = arith.constant 2.000000e+00 : f32
    %1230 = vector.broadcast %cst_208 : f32 to vector<8x128xf32>
    %1231 = arith.mulf %1230, %1229 : vector<8x128xf32>
    %cst_209 = arith.constant 1.000000e+00 : f32
    %1232 = vector.broadcast %cst_209 : f32 to vector<8x128xf32>
    %1233 = arith.subf %1231, %1232 : vector<8x128xf32>
    %1234 = arith.select %44, %1233, %1229 : vector<8x128xi1>, vector<8x128xf32>
    %1235 = vector.extract_strided_slice %1234 {offsets = [0, 0], sizes = [8, 32], strides = [1, 1]} : vector<8x128xf32> to vector<8x32xf32>
    %1236 = vector.extract_strided_slice %1234 {offsets = [0, 32], sizes = [8, 32], strides = [1, 1]} : vector<8x128xf32> to vector<8x32xf32>
    %1237 = vector.extract_strided_slice %1234 {offsets = [0, 64], sizes = [8, 32], strides = [1, 1]} : vector<8x128xf32> to vector<8x32xf32>
    %1238 = vector.extract_strided_slice %1234 {offsets = [0, 96], sizes = [8, 32], strides = [1, 1]} : vector<8x128xf32> to vector<8x32xf32>
    %1239 = arith.mulf %1236, %1190 : vector<8x32xf32>
    %1240 = arith.mulf %1235, %1237 : vector<8x32xf32>
    %1241 = arith.addf %1239, %1240 : vector<8x32xf32>
    %1242 = math.tanh %1241 : vector<8x32xf32>
    %1243 = arith.mulf %1238, %1242 : vector<8x32xf32>
    %1244 = tpu.concatenate %1243, %1218 in 1 : vector<8x32xf32>, vector<8x32xf32> -> vector<8x64xf32>
    %cst_210 = arith.constant dense<0.000000e+00> : vector<8x128xf32>
    %1245 = tpu.matmul %1244, %1166, %cst_210 {dimension_numbers = #tpu.dot_dimension_numbers<[1], [0], [0], [1], [0, 0, 1, 1], [], []>} : vector<8x64xf32>, vector<64x128xf32>, vector<8x128xf32> -> vector<8x128xf32>
    %1246 = vector.broadcast %1167 : vector<1x128xf32> to vector<8x128xf32>
    %1247 = arith.addf %1245, %1246 : vector<8x128xf32>
    %cst_211 = arith.constant 2.000000e+00 : f32
    %1248 = vector.broadcast %cst_211 : f32 to vector<8x128xf32>
    %1249 = arith.mulf %1248, %1247 : vector<8x128xf32>
    %1250 = arith.select %44, %1249, %1247 : vector<8x128xi1>, vector<8x128xf32>
    %1251 = arith.negf %1250 : vector<8x128xf32>
    %1252 = math.exp %1251 : vector<8x128xf32>
    %cst_212 = arith.constant 1.000000e+00 : f32
    %1253 = vector.broadcast %cst_212 : f32 to vector<8x128xf32>
    %1254 = arith.addf %1253, %1252 : vector<8x128xf32>
    %1255 = arith.divf %1253, %1254 : vector<8x128xf32>
    %cst_213 = arith.constant 2.000000e+00 : f32
    %1256 = vector.broadcast %cst_213 : f32 to vector<8x128xf32>
    %1257 = arith.mulf %1256, %1255 : vector<8x128xf32>
    %cst_214 = arith.constant 1.000000e+00 : f32
    %1258 = vector.broadcast %cst_214 : f32 to vector<8x128xf32>
    %1259 = arith.subf %1257, %1258 : vector<8x128xf32>
    %1260 = arith.select %44, %1259, %1255 : vector<8x128xi1>, vector<8x128xf32>
    %1261 = vector.extract_strided_slice %1260 {offsets = [0, 0], sizes = [8, 32], strides = [1, 1]} : vector<8x128xf32> to vector<8x32xf32>
    %1262 = vector.extract_strided_slice %1260 {offsets = [0, 32], sizes = [8, 32], strides = [1, 1]} : vector<8x128xf32> to vector<8x32xf32>
    %1263 = vector.extract_strided_slice %1260 {offsets = [0, 64], sizes = [8, 32], strides = [1, 1]} : vector<8x128xf32> to vector<8x32xf32>
    %1264 = vector.extract_strided_slice %1260 {offsets = [0, 96], sizes = [8, 32], strides = [1, 1]} : vector<8x128xf32> to vector<8x32xf32>
    %1265 = arith.mulf %1262, %1216 : vector<8x32xf32>
    %1266 = arith.mulf %1261, %1263 : vector<8x32xf32>
    %1267 = arith.addf %1265, %1266 : vector<8x32xf32>
    %1268 = math.tanh %1267 : vector<8x32xf32>
    %1269 = arith.mulf %1264, %1268 : vector<8x32xf32>
    %1270 = vector.extract_strided_slice %1164 {offsets = [16, 0], sizes = [8, 128], strides = [1, 1]} : vector<40x128xf32> to vector<8x128xf32>
    %cst_215 = arith.constant dense<0.000000e+00> : vector<8x128xf32>
    %1271 = tpu.matmul %1243, %1165, %cst_215 {dimension_numbers = #tpu.dot_dimension_numbers<[1], [0], [0], [1], [0, 0, 1, 1], [], []>} : vector<8x32xf32>, vector<32x128xf32>, vector<8x128xf32> -> vector<8x128xf32>
    %1272 = arith.addf %1270, %1271 : vector<8x128xf32>
    %cst_216 = arith.constant 2.000000e+00 : f32
    %1273 = vector.broadcast %cst_216 : f32 to vector<8x128xf32>
    %1274 = arith.mulf %1273, %1272 : vector<8x128xf32>
    %1275 = arith.select %44, %1274, %1272 : vector<8x128xi1>, vector<8x128xf32>
    %1276 = arith.negf %1275 : vector<8x128xf32>
    %1277 = math.exp %1276 : vector<8x128xf32>
    %cst_217 = arith.constant 1.000000e+00 : f32
    %1278 = vector.broadcast %cst_217 : f32 to vector<8x128xf32>
    %1279 = arith.addf %1278, %1277 : vector<8x128xf32>
    %1280 = arith.divf %1278, %1279 : vector<8x128xf32>
    %cst_218 = arith.constant 2.000000e+00 : f32
    %1281 = vector.broadcast %cst_218 : f32 to vector<8x128xf32>
    %1282 = arith.mulf %1281, %1280 : vector<8x128xf32>
    %cst_219 = arith.constant 1.000000e+00 : f32
    %1283 = vector.broadcast %cst_219 : f32 to vector<8x128xf32>
    %1284 = arith.subf %1282, %1283 : vector<8x128xf32>
    %1285 = arith.select %44, %1284, %1280 : vector<8x128xi1>, vector<8x128xf32>
    %1286 = vector.extract_strided_slice %1285 {offsets = [0, 0], sizes = [8, 32], strides = [1, 1]} : vector<8x128xf32> to vector<8x32xf32>
    %1287 = vector.extract_strided_slice %1285 {offsets = [0, 32], sizes = [8, 32], strides = [1, 1]} : vector<8x128xf32> to vector<8x32xf32>
    %1288 = vector.extract_strided_slice %1285 {offsets = [0, 64], sizes = [8, 32], strides = [1, 1]} : vector<8x128xf32> to vector<8x32xf32>
    %1289 = vector.extract_strided_slice %1285 {offsets = [0, 96], sizes = [8, 32], strides = [1, 1]} : vector<8x128xf32> to vector<8x32xf32>
    %1290 = arith.mulf %1287, %1241 : vector<8x32xf32>
    %1291 = arith.mulf %1286, %1288 : vector<8x32xf32>
    %1292 = arith.addf %1290, %1291 : vector<8x32xf32>
    %1293 = math.tanh %1292 : vector<8x32xf32>
    %1294 = arith.mulf %1289, %1293 : vector<8x32xf32>
    %1295 = tpu.concatenate %1294, %1269 in 1 : vector<8x32xf32>, vector<8x32xf32> -> vector<8x64xf32>
    %cst_220 = arith.constant dense<0.000000e+00> : vector<8x128xf32>
    %1296 = tpu.matmul %1295, %1166, %cst_220 {dimension_numbers = #tpu.dot_dimension_numbers<[1], [0], [0], [1], [0, 0, 1, 1], [], []>} : vector<8x64xf32>, vector<64x128xf32>, vector<8x128xf32> -> vector<8x128xf32>
    %1297 = vector.broadcast %1167 : vector<1x128xf32> to vector<8x128xf32>
    %1298 = arith.addf %1296, %1297 : vector<8x128xf32>
    %cst_221 = arith.constant 2.000000e+00 : f32
    %1299 = vector.broadcast %cst_221 : f32 to vector<8x128xf32>
    %1300 = arith.mulf %1299, %1298 : vector<8x128xf32>
    %1301 = arith.select %44, %1300, %1298 : vector<8x128xi1>, vector<8x128xf32>
    %1302 = arith.negf %1301 : vector<8x128xf32>
    %1303 = math.exp %1302 : vector<8x128xf32>
    %cst_222 = arith.constant 1.000000e+00 : f32
    %1304 = vector.broadcast %cst_222 : f32 to vector<8x128xf32>
    %1305 = arith.addf %1304, %1303 : vector<8x128xf32>
    %1306 = arith.divf %1304, %1305 : vector<8x128xf32>
    %cst_223 = arith.constant 2.000000e+00 : f32
    %1307 = vector.broadcast %cst_223 : f32 to vector<8x128xf32>
    %1308 = arith.mulf %1307, %1306 : vector<8x128xf32>
    %cst_224 = arith.constant 1.000000e+00 : f32
    %1309 = vector.broadcast %cst_224 : f32 to vector<8x128xf32>
    %1310 = arith.subf %1308, %1309 : vector<8x128xf32>
    %1311 = arith.select %44, %1310, %1306 : vector<8x128xi1>, vector<8x128xf32>
    %1312 = vector.extract_strided_slice %1311 {offsets = [0, 0], sizes = [8, 32], strides = [1, 1]} : vector<8x128xf32> to vector<8x32xf32>
    %1313 = vector.extract_strided_slice %1311 {offsets = [0, 32], sizes = [8, 32], strides = [1, 1]} : vector<8x128xf32> to vector<8x32xf32>
    %1314 = vector.extract_strided_slice %1311 {offsets = [0, 64], sizes = [8, 32], strides = [1, 1]} : vector<8x128xf32> to vector<8x32xf32>
    %1315 = vector.extract_strided_slice %1311 {offsets = [0, 96], sizes = [8, 32], strides = [1, 1]} : vector<8x128xf32> to vector<8x32xf32>
    %1316 = arith.mulf %1313, %1267 : vector<8x32xf32>
    %1317 = arith.mulf %1312, %1314 : vector<8x32xf32>
    %1318 = arith.addf %1316, %1317 : vector<8x32xf32>
    %1319 = math.tanh %1318 : vector<8x32xf32>
    %1320 = arith.mulf %1315, %1319 : vector<8x32xf32>
    %1321 = vector.extract_strided_slice %1164 {offsets = [24, 0], sizes = [8, 128], strides = [1, 1]} : vector<40x128xf32> to vector<8x128xf32>
    %cst_225 = arith.constant dense<0.000000e+00> : vector<8x128xf32>
    %1322 = tpu.matmul %1294, %1165, %cst_225 {dimension_numbers = #tpu.dot_dimension_numbers<[1], [0], [0], [1], [0, 0, 1, 1], [], []>} : vector<8x32xf32>, vector<32x128xf32>, vector<8x128xf32> -> vector<8x128xf32>
    %1323 = arith.addf %1321, %1322 : vector<8x128xf32>
    %cst_226 = arith.constant 2.000000e+00 : f32
    %1324 = vector.broadcast %cst_226 : f32 to vector<8x128xf32>
    %1325 = arith.mulf %1324, %1323 : vector<8x128xf32>
    %1326 = arith.select %44, %1325, %1323 : vector<8x128xi1>, vector<8x128xf32>
    %1327 = arith.negf %1326 : vector<8x128xf32>
    %1328 = math.exp %1327 : vector<8x128xf32>
    %cst_227 = arith.constant 1.000000e+00 : f32
    %1329 = vector.broadcast %cst_227 : f32 to vector<8x128xf32>
    %1330 = arith.addf %1329, %1328 : vector<8x128xf32>
    %1331 = arith.divf %1329, %1330 : vector<8x128xf32>
    %cst_228 = arith.constant 2.000000e+00 : f32
    %1332 = vector.broadcast %cst_228 : f32 to vector<8x128xf32>
    %1333 = arith.mulf %1332, %1331 : vector<8x128xf32>
    %cst_229 = arith.constant 1.000000e+00 : f32
    %1334 = vector.broadcast %cst_229 : f32 to vector<8x128xf32>
    %1335 = arith.subf %1333, %1334 : vector<8x128xf32>
    %1336 = arith.select %44, %1335, %1331 : vector<8x128xi1>, vector<8x128xf32>
    %1337 = vector.extract_strided_slice %1336 {offsets = [0, 0], sizes = [8, 32], strides = [1, 1]} : vector<8x128xf32> to vector<8x32xf32>
    %1338 = vector.extract_strided_slice %1336 {offsets = [0, 32], sizes = [8, 32], strides = [1, 1]} : vector<8x128xf32> to vector<8x32xf32>
    %1339 = vector.extract_strided_slice %1336 {offsets = [0, 64], sizes = [8, 32], strides = [1, 1]} : vector<8x128xf32> to vector<8x32xf32>
    %1340 = vector.extract_strided_slice %1336 {offsets = [0, 96], sizes = [8, 32], strides = [1, 1]} : vector<8x128xf32> to vector<8x32xf32>
    %1341 = arith.mulf %1338, %1292 : vector<8x32xf32>
    %1342 = arith.mulf %1337, %1339 : vector<8x32xf32>
    %1343 = arith.addf %1341, %1342 : vector<8x32xf32>
    %1344 = math.tanh %1343 : vector<8x32xf32>
    %1345 = arith.mulf %1340, %1344 : vector<8x32xf32>
    %1346 = tpu.concatenate %1345, %1320 in 1 : vector<8x32xf32>, vector<8x32xf32> -> vector<8x64xf32>
    %cst_230 = arith.constant dense<0.000000e+00> : vector<8x128xf32>
    %1347 = tpu.matmul %1346, %1166, %cst_230 {dimension_numbers = #tpu.dot_dimension_numbers<[1], [0], [0], [1], [0, 0, 1, 1], [], []>} : vector<8x64xf32>, vector<64x128xf32>, vector<8x128xf32> -> vector<8x128xf32>
    %1348 = vector.broadcast %1167 : vector<1x128xf32> to vector<8x128xf32>
    %1349 = arith.addf %1347, %1348 : vector<8x128xf32>
    %cst_231 = arith.constant 2.000000e+00 : f32
    %1350 = vector.broadcast %cst_231 : f32 to vector<8x128xf32>
    %1351 = arith.mulf %1350, %1349 : vector<8x128xf32>
    %1352 = arith.select %44, %1351, %1349 : vector<8x128xi1>, vector<8x128xf32>
    %1353 = arith.negf %1352 : vector<8x128xf32>
    %1354 = math.exp %1353 : vector<8x128xf32>
    %cst_232 = arith.constant 1.000000e+00 : f32
    %1355 = vector.broadcast %cst_232 : f32 to vector<8x128xf32>
    %1356 = arith.addf %1355, %1354 : vector<8x128xf32>
    %1357 = arith.divf %1355, %1356 : vector<8x128xf32>
    %cst_233 = arith.constant 2.000000e+00 : f32
    %1358 = vector.broadcast %cst_233 : f32 to vector<8x128xf32>
    %1359 = arith.mulf %1358, %1357 : vector<8x128xf32>
    %cst_234 = arith.constant 1.000000e+00 : f32
    %1360 = vector.broadcast %cst_234 : f32 to vector<8x128xf32>
    %1361 = arith.subf %1359, %1360 : vector<8x128xf32>
    %1362 = arith.select %44, %1361, %1357 : vector<8x128xi1>, vector<8x128xf32>
    %1363 = vector.extract_strided_slice %1362 {offsets = [0, 0], sizes = [8, 32], strides = [1, 1]} : vector<8x128xf32> to vector<8x32xf32>
    %1364 = vector.extract_strided_slice %1362 {offsets = [0, 32], sizes = [8, 32], strides = [1, 1]} : vector<8x128xf32> to vector<8x32xf32>
    %1365 = vector.extract_strided_slice %1362 {offsets = [0, 64], sizes = [8, 32], strides = [1, 1]} : vector<8x128xf32> to vector<8x32xf32>
    %1366 = vector.extract_strided_slice %1362 {offsets = [0, 96], sizes = [8, 32], strides = [1, 1]} : vector<8x128xf32> to vector<8x32xf32>
    %1367 = arith.mulf %1364, %1318 : vector<8x32xf32>
    %1368 = arith.mulf %1363, %1365 : vector<8x32xf32>
    %1369 = arith.addf %1367, %1368 : vector<8x32xf32>
    %1370 = math.tanh %1369 : vector<8x32xf32>
    %1371 = arith.mulf %1366, %1370 : vector<8x32xf32>
    %1372 = vector.extract_strided_slice %1164 {offsets = [32, 0], sizes = [8, 128], strides = [1, 1]} : vector<40x128xf32> to vector<8x128xf32>
    %cst_235 = arith.constant dense<0.000000e+00> : vector<8x128xf32>
    %1373 = tpu.matmul %1345, %1165, %cst_235 {dimension_numbers = #tpu.dot_dimension_numbers<[1], [0], [0], [1], [0, 0, 1, 1], [], []>} : vector<8x32xf32>, vector<32x128xf32>, vector<8x128xf32> -> vector<8x128xf32>
    %1374 = arith.addf %1372, %1373 : vector<8x128xf32>
    %cst_236 = arith.constant 2.000000e+00 : f32
    %1375 = vector.broadcast %cst_236 : f32 to vector<8x128xf32>
    %1376 = arith.mulf %1375, %1374 : vector<8x128xf32>
    %1377 = arith.select %44, %1376, %1374 : vector<8x128xi1>, vector<8x128xf32>
    %1378 = arith.negf %1377 : vector<8x128xf32>
    %1379 = math.exp %1378 : vector<8x128xf32>
    %cst_237 = arith.constant 1.000000e+00 : f32
    %1380 = vector.broadcast %cst_237 : f32 to vector<8x128xf32>
    %1381 = arith.addf %1380, %1379 : vector<8x128xf32>
    %1382 = arith.divf %1380, %1381 : vector<8x128xf32>
    %cst_238 = arith.constant 2.000000e+00 : f32
    %1383 = vector.broadcast %cst_238 : f32 to vector<8x128xf32>
    %1384 = arith.mulf %1383, %1382 : vector<8x128xf32>
    %cst_239 = arith.constant 1.000000e+00 : f32
    %1385 = vector.broadcast %cst_239 : f32 to vector<8x128xf32>
    %1386 = arith.subf %1384, %1385 : vector<8x128xf32>
    %1387 = arith.select %44, %1386, %1382 : vector<8x128xi1>, vector<8x128xf32>
    %1388 = vector.extract_strided_slice %1387 {offsets = [0, 0], sizes = [8, 32], strides = [1, 1]} : vector<8x128xf32> to vector<8x32xf32>
    %1389 = vector.extract_strided_slice %1387 {offsets = [0, 32], sizes = [8, 32], strides = [1, 1]} : vector<8x128xf32> to vector<8x32xf32>
    %1390 = vector.extract_strided_slice %1387 {offsets = [0, 64], sizes = [8, 32], strides = [1, 1]} : vector<8x128xf32> to vector<8x32xf32>
    %1391 = vector.extract_strided_slice %1387 {offsets = [0, 96], sizes = [8, 32], strides = [1, 1]} : vector<8x128xf32> to vector<8x32xf32>
    %1392 = arith.mulf %1389, %1343 : vector<8x32xf32>
    %1393 = arith.mulf %1388, %1390 : vector<8x32xf32>
    %1394 = arith.addf %1392, %1393 : vector<8x32xf32>
    %1395 = math.tanh %1394 : vector<8x32xf32>
    %1396 = arith.mulf %1391, %1395 : vector<8x32xf32>
    %1397 = tpu.concatenate %1396, %1371 in 1 : vector<8x32xf32>, vector<8x32xf32> -> vector<8x64xf32>
    %cst_240 = arith.constant dense<0.000000e+00> : vector<8x128xf32>
    %1398 = tpu.matmul %1397, %1166, %cst_240 {dimension_numbers = #tpu.dot_dimension_numbers<[1], [0], [0], [1], [0, 0, 1, 1], [], []>} : vector<8x64xf32>, vector<64x128xf32>, vector<8x128xf32> -> vector<8x128xf32>
    %1399 = vector.broadcast %1167 : vector<1x128xf32> to vector<8x128xf32>
    %1400 = arith.addf %1398, %1399 : vector<8x128xf32>
    %cst_241 = arith.constant 2.000000e+00 : f32
    %1401 = vector.broadcast %cst_241 : f32 to vector<8x128xf32>
    %1402 = arith.mulf %1401, %1400 : vector<8x128xf32>
    %1403 = arith.select %44, %1402, %1400 : vector<8x128xi1>, vector<8x128xf32>
    %1404 = arith.negf %1403 : vector<8x128xf32>
    %1405 = math.exp %1404 : vector<8x128xf32>
    %cst_242 = arith.constant 1.000000e+00 : f32
    %1406 = vector.broadcast %cst_242 : f32 to vector<8x128xf32>
    %1407 = arith.addf %1406, %1405 : vector<8x128xf32>
    %1408 = arith.divf %1406, %1407 : vector<8x128xf32>
    %cst_243 = arith.constant 2.000000e+00 : f32
    %1409 = vector.broadcast %cst_243 : f32 to vector<8x128xf32>
    %1410 = arith.mulf %1409, %1408 : vector<8x128xf32>
    %cst_244 = arith.constant 1.000000e+00 : f32
    %1411 = vector.broadcast %cst_244 : f32 to vector<8x128xf32>
    %1412 = arith.subf %1410, %1411 : vector<8x128xf32>
    %1413 = arith.select %44, %1412, %1408 : vector<8x128xi1>, vector<8x128xf32>
    %1414 = vector.extract_strided_slice %1413 {offsets = [0, 0], sizes = [8, 32], strides = [1, 1]} : vector<8x128xf32> to vector<8x32xf32>
    %1415 = vector.extract_strided_slice %1413 {offsets = [0, 32], sizes = [8, 32], strides = [1, 1]} : vector<8x128xf32> to vector<8x32xf32>
    %1416 = vector.extract_strided_slice %1413 {offsets = [0, 64], sizes = [8, 32], strides = [1, 1]} : vector<8x128xf32> to vector<8x32xf32>
    %1417 = vector.extract_strided_slice %1413 {offsets = [0, 96], sizes = [8, 32], strides = [1, 1]} : vector<8x128xf32> to vector<8x32xf32>
    %1418 = arith.mulf %1415, %1369 : vector<8x32xf32>
    %1419 = arith.mulf %1414, %1416 : vector<8x32xf32>
    %1420 = arith.addf %1418, %1419 : vector<8x32xf32>
    %1421 = math.tanh %1420 : vector<8x32xf32>
    %1422 = arith.mulf %1417, %1421 : vector<8x32xf32>
    %1423 = tpu.concatenate %1218, %1269, %1320, %1371, %1422 in 0 : vector<8x32xf32>, vector<8x32xf32>, vector<8x32xf32>, vector<8x32xf32>, vector<8x32xf32> -> vector<40x32xf32>
    %c0_245 = arith.constant 0 : index
    %c0_246 = arith.constant 0 : index
    %1424 = vector.load %arg18[%c0_245, %c0_246] : memref<32x128xf32, #tpu.memory_space<vmem>>, vector<32x128xf32>
    %cst_247 = arith.constant dense<0.000000e+00> : vector<40x128xf32>
    %1425 = tpu.matmul %1423, %1424, %cst_247 {dimension_numbers = #tpu.dot_dimension_numbers<[1], [0], [0], [1], [0, 0, 1, 1], [], []>} : vector<40x32xf32>, vector<32x128xf32>, vector<40x128xf32> -> vector<40x128xf32>
    %c0_248 = arith.constant 0 : index
    %c0_249 = arith.constant 0 : index
    %1426 = vector.load %arg19[%c0_248, %c0_249] : memref<1x128xf32, #tpu.memory_space<vmem>>, vector<1x128xf32>
    %1427 = vector.broadcast %1426 : vector<1x128xf32> to vector<40x128xf32>
    %1428 = arith.addf %1425, %1427 : vector<40x128xf32>
    %c0_250 = arith.constant 0 : index
    %c0_251 = arith.constant 0 : index
    %1429 = vector.load %arg20[%c0_250, %c0_251] : memref<40x128xf32, #tpu.memory_space<vmem>>, vector<40x128xf32>
    tpu.vector_store %arg20[%c0_250, %c0_251], %1428 {strides = array<i32>} : memref<40x128xf32, #tpu.memory_space<vmem>>, vector<40x128xf32>,
    return
  }
}

</mosaic_0001>

<bundles_post_ra>
// kernel: seq2seq_forward.1
= control target key start
LH: loop header
LB: loop body
LE: loop exit
PB: predicated region body
PF: predicated region fallthrough
CT: control target
= control target key end

     0   :  { %vm140_vm0 = vcmask 130048   ;;  %v4539_v24 = vmov 0.0   ;;  %v73_v40 = vlaneseq  ;;  %s4540_s27 = smov 64   ;;  %s4541_s28 = smov 32   ;;  %vm395_vm15 = vcmask 261120   ;;  %s6550_s3 = inlined_call_operand.vmem [shape: f32[16,256], index: 3, kind: input, shape index: {}]   ;;  %s6551_s0 = inlined_call_operand.vmem [shape: f32[64,16], index: 0, kind: input, shape index: {}]   ;;  %s6552_s4 = inlined_call_operand.vmem [shape: f32[64,256], index: 4, kind: input, shape index: {}]   ;;  %s6553_s5 = inlined_call_operand.vmem [shape: f32[1,256], index: 5, kind: input, shape index: {}]   ;;  %s6554_s1 = inlined_call_operand.vmem [shape: f32[8,8,32], index: 1, kind: input, shape index: {}]   ;;  %s6555_s7 = inlined_call_operand.vmem [shape: f32[64,256], index: 7, kind: input, shape index: {}]   ;;  %s6556_s6 = inlined_call_operand.vmem [shape: f32[64,256], index: 6, kind: input, shape index: {}]   ;;  %s6557_s8 = inlined_call_operand.vmem [shape: f32[1,256], index: 8, kind: input, shape index: {}]   ;;  %s6558_s10 = inlined_call_operand.vmem [shape: f32[1,32], index: 10, kind: input, shape index: {}]   ;;  %s6559_s9 = inlined_call_operand.vmem [shape: f32[64,32], index: 9, kind: input, shape index: {}]   ;;  %s6560_s11 = inlined_call_operand.vmem [shape: f32[64,32], index: 11, kind: input, shape index: {}]   ;;  %s6561_s13 = inlined_call_operand.vmem [shape: f32[16,128], index: 13, kind: input, shape index: {}]   ;;  %s6562_s14 = inlined_call_operand.vmem [shape: f32[32,128], index: 14, kind: input, shape index: {}]   ;;  %s6563_s12 = inlined_call_operand.vmem [shape: f32[1,32], index: 12, kind: input, shape index: {}]   ;;  %s6564_s2 = inlined_call_operand.vmem [shape: f32[40,16], index: 2, kind: input, shape index: {}]   ;;  %s6565_s15 = inlined_call_operand.vmem [shape: f32[1,128], index: 15, kind: input, shape index: {}]   ;;  %s6566_s16 = inlined_call_operand.vmem [shape: f32[64,128], index: 16, kind: input, shape index: {}]   ;;  %s6567_s17 = inlined_call_operand.vmem [shape: f32[1,128], index: 17, kind: input, shape index: {}]   ;;  %s6568_s18 = inlined_call_operand.vmem [shape: f32[32,128], index: 18, kind: input, shape index: {}]   ;;  %s6569_s19 = inlined_call_operand.vmem [shape: f32[1,128], index: 19, kind: input, shape index: {}]   ;;  %s6570_s20 = inlined_call_operand.vmem [shape: f32[40,128], index: 20, kind: output, shape index: {}]  }
   0x1   :  { %6575 = sst [smem:[#allocation2_spill]] %s6550_s3  ;;  %v4012_v51 = vld [vmem:[%s6568_s18 + $0x8] sm:$0xff] }
   0x2   :  { %6576 = sst [smem:[#allocation3_spill]] %s6551_s0  ;;  %v74_v46 = vand.u32 127, %v73_v40 }
   0x3   :  { %6577 = sst [smem:[#allocation4_spill]] %s6552_s4 }
   0x4   :  { %6578 = sst [smem:[#allocation5_spill]] %s6553_s5  ;;  %vm100_vm1 = vcmp.ge.s32.totalorder %v74_v46, 64  ;;  %vm102_vm2 = vcmp.lt.s32.totalorder %v74_v46, 96  ;;  %v75_v58 = vadd.s32 128, %v74_v46 }
   0x5   :  { %6579 = sst [smem:[#allocation6_spill]] %s6554_s1  ;;  %vm4900_vm3 = vmand %vm100_vm1, %vm102_vm2  ;;  %s4542_s1 = smov 96   ;;  %vm247_vm1 = vcmask 523264  }
   0x6   :  { %s6580_s23 = sld [smem:[#allocation2_spill]]  ;;  %v87_v59 = vand.u32 127, %v75_v58 }
   0x7   :  { %s6581_s26 = sld [smem:[#allocation3_spill]] }
   0x8   :  { %s6582_s25 = sld [smem:[#allocation4_spill]]  ;;  %vm101_vm4 = vcmp.ge.s32.totalorder %v87_v59, 64  ;;  %vm103_vm5 = vcmp.lt.s32.totalorder %v87_v59, 96 }
   0x9   :  { %s6583_s5 = sld [smem:[#allocation5_spill]]  ;;  %vm4915_vm6 = vmand %vm101_vm4, %vm103_vm5 }
   0xa   :  { %s6588_s3 = sld [smem:[#allocation6_spill]] }
   0xc   :  { %v116_v0 = vld [vmem:[%s6580_s23 + $0x10] sm:$0xff]  ;;  %v114_v1 = vld [vmem:[%s6580_s23] sm:$0xff]  ;;  %v117_v3 = vld [vmem:[%s6580_s23 + $0x18] sm:$0xff] }
   0xd   :  { %4247 = vmatpush.msra.mxu1 %v116_v0  ;;  %v4657_v2 = vld [vmem:[%s6581_s26 + $0x28] sm:$0xff]  ;;  %4248 = vmatpush.msra.mxu3 %v116_v0  ;;  %v106_v5 = vld [vmem:[%s6581_s26] sm:$0xff]  ;;  %v4678_v7 = vld [vmem:[%s6581_s26 + $0x30] sm:$0xff] }
   0xe   :  { %179 = vmatpush.msra.mxu0 %v116_v0  ;;  %v115_v4 = vld [vmem:[%s6580_s23 + $0x8] sm:$0xff]  ;;  %v4683_v8 = vld [vmem:[%s6582_s25 + $0x78] sm:$0xff]  ;;  %v108_v10 = vld [vmem:[%s6581_s26 + $0x10] sm:$0xff] }
   0xf   :  { %4249 = vmatpush.msra.mxu1 %v114_v1  ;;  %4250 = vmatpush.msra.mxu3 %v114_v1  ;;  %v107_v6 = vld [vmem:[%s6581_s26 + $0x8] sm:$0xff]  ;;  %v4704_v11 = vld [vmem:[%s6582_s25 + $0x58] sm:$0xff]  ;;  %v4720_v14 = vld [vmem:[%s6582_s25 + $0x70] sm:$0xff] }
  0x10   :  { %4086 = vmatmul.msk.f32.vlgmr.msra.gmra.mxu1 %vm140_vm0, %v4657_v2  ;;  %180 = vmatpush.msra.mxu0 %v114_v1  ;;  %v4690_v9 = vld [vmem:[%s6582_s25 + $0x68] sm:$0xff]  ;;  %v4714_v13 = vld [vmem:[%s6581_s26 + $0x38] sm:$0xff]  ;;  %v4734_v16 = vld [vmem:[%s6582_s25 + $0x60] sm:$0xff] }
  0x11   :  { %220 = vmatpush.msrb.mxu1 %v117_v3  ;;  %4081 = vmatmul.msk.f32.vlgmr.msra.gmra.mxu0 %vm140_vm0, %v106_v5  ;;  %v4709_v12 = vld [vmem:[%s6582_s25 + $0x48] sm:$0xff]  ;;  %v4728_v15 = vld [vmem:[%s6582_s25 + $0x38] sm:$0xff]  ;;  %v4759_v19 = vld [vmem:[%s6582_s25 + $0x50] sm:$0xff] }
  0x12   :  { %4087 = vmatmul.msk.f32.vlgmr.msra.gmra.mxu3 %vm140_vm0, %v4678_v7  ;;  %259 = vmatpush.msra.mxu2 %v4720_v14  ;;  %v4741_v17 = vld [vmem:[%s6582_s25 + $0x28] sm:$0xff]  ;;  %v4754_v18 = vld [vmem:[%s6582_s25 + $0x18] sm:$0xff]  ;;  %v4774_v22 = vld [vmem:[%s6582_s25 + $0x40] sm:$0xff] }
  0x13   :  { %221 = vmatpush.msrb.mxu1 %v115_v4  ;;  %279 = vmatpush.msrb.mxu3 %v4683_v8  ;;  %v4764_v20 = vld [vmem:[%s6582_s25 + $0x8] sm:$0xff]  ;;  %v109_v21 = vld [vmem:[%s6581_s26 + $0x18] sm:$0xff]  ;;  %v4779_v23 = vld [vmem:[%s6582_s25 + $0x30] sm:$0xff] }
  0x14   :  { %260 = vmatpush.msra.mxu2 %v4734_v16  ;;  %956 = vmatpush.msrb.mxu0 %v4720_v14  ;;  %v4789_v25 = vld [vmem:[%s6582_s25 + $0x20] sm:$0xff]  ;;  %v4802_v26 = vld [vmem:[%s6582_s25 + $0x10] sm:$0xff] }
  0x15   :  { %976 = vmatpush.msra.mxu1 %v4683_v8  ;;  %280 = vmatpush.msrb.mxu3 %v4690_v9  ;;  %v4807_v27 = vld [vmem:[%s6582_s25] sm:$0xff] }
  0x16   :  { %957 = vmatpush.msrb.mxu0 %v4734_v16  ;;  %261 = vmatpush.msra.mxu2 %v4759_v19  ;;  %v110_v28 = vld [vmem:[%s6581_s26 + $0x20] sm:$0xff] }
  0x17   :  { %977 = vmatpush.msra.mxu1 %v4690_v9  ;;  %281 = vmatpush.msrb.mxu3 %v4704_v11  ;;  %v134_v31 = vld [vmem:[%s6583_s5] sm:$0x3] }
  0x18   :  { %4089 = vmatmul.msk.f32.vlgmr.msrb.gmra.mxu1 %vm140_vm0, %v106_v5  ;;  %262 = vmatpush.msra.mxu2 %v4774_v22  ;;  %v4881_v32 = vperm.slane %v134_v31, 1  ;;  %v4892_v39 = vperm.slane %v134_v31, 0 }
  0x19   :  { %4082 = vmatmul.msk.f32.gmra.mxu0 %vm140_vm0, %v107_v6  ;;  %282 = vmatpush.msrb.mxu3 %v4709_v12 }
  0x1a   :  { %4088 = vmatmul.msk.f32.gmra.mxu3 %vm140_vm0, %v4714_v13  ;;  %978 = vmatpush.msra.mxu1 %v4704_v11 }
  0x1b   :  { %283 = vmatpush.msrb.mxu3 %v4728_v15  ;;  %263 = vmatpush.msra.mxu2 %v4779_v23 }
  0x1c   :  { %979 = vmatpush.msra.mxu1 %v4709_v12  ;;  %958 = vmatpush.msrb.mxu0 %v4759_v19 }
  0x1d   :  { %284 = vmatpush.msrb.mxu3 %v4741_v17  ;;  %264 = vmatpush.msra.mxu2 %v4789_v25 }
  0x1e   :  { %980 = vmatpush.msra.mxu1 %v4728_v15  ;;  %959 = vmatpush.msrb.mxu0 %v4774_v22 }
  0x1f   :  { %285 = vmatpush.msrb.mxu3 %v4754_v18  ;;  %265 = vmatpush.msra.mxu2 %v4802_v26 }
  0x20   :  { %4090 = vmatmul.msk.f32.gmra.mxu1 %vm140_vm0, %v107_v6  ;;  %960 = vmatpush.msrb.mxu0 %v4779_v23 }
  0x21   :  { %4083 = vmatmul.msk.f32.gmra.mxu0 %vm140_vm0, %v108_v10  ;;  %981 = vmatpush.msra.mxu1 %v4741_v17 }
  0x22   :  { %286 = vmatpush.msrb.mxu3 %v4764_v20  ;;  %266 = vmatpush.msra.mxu2 %v4807_v27 }
  0x23   :  { %287 = vmatmul.f32.vlgmr.msrb.gmra.mxu3 %v4539_v24  ;;  %982 = vmatpush.msra.mxu1 %v4754_v18 }
  0x24   :  { %445 = vmatpush.msra.mxu3 %v4683_v8  ;;  %267 = vmatmul.f32.vlgmr.msra.gmra.mxu2 %v4539_v24 }
  0x25   :  { %983 = vmatpush.msra.mxu1 %v4764_v20  ;;  %425 = vmatpush.msrb.mxu2 %v4720_v14 }
  0x26   :  { %446 = vmatpush.msra.mxu3 %v4690_v9  ;;  %961 = vmatpush.msrb.mxu0 %v4789_v25 }
  0x27   :  { %1326 = vmatpush.msrb.mxu1 %v4683_v8  ;;  %426 = vmatpush.msrb.mxu2 %v4734_v16 }
  0x28   :  { %4091 = vmatmul.msk.f32.gmra.mxu1 %vm140_vm0, %v108_v10  ;;  %447 = vmatpush.msra.mxu3 %v4704_v11 }
  0x29   :  { %4084 = vmatmul.msk.f32.gmra.mxu0 %vm140_vm0, %v109_v21  ;;  %1327 = vmatpush.msrb.mxu1 %v4690_v9 }
  0x2a   :  { %448 = vmatpush.msra.mxu3 %v4709_v12  ;;  %962 = vmatpush.msrb.mxu0 %v4802_v26 }
  0x2b   :  { %427 = vmatpush.msrb.mxu2 %v4759_v19  ;;  %1328 = vmatpush.msrb.mxu1 %v4704_v11 }
  0x2c   :  { %449 = vmatpush.msra.mxu3 %v4728_v15  ;;  %963 = vmatpush.msrb.mxu0 %v4807_v27 }
  0x2d   :  { %428 = vmatpush.msrb.mxu2 %v4774_v22  ;;  %1329 = vmatpush.msrb.mxu1 %v4709_v12 }
  0x2e   :  { %450 = vmatpush.msra.mxu3 %v4741_v17  ;;  %1306 = vmatpush.msra.mxu0 %v4720_v14 }
  0x2f   :  { %429 = vmatpush.msrb.mxu2 %v4779_v23  ;;  %1330 = vmatpush.msrb.mxu1 %v4728_v15 }
  0x30   :  { %4092 = vmatmul.msk.f32.gmra.mxu1 %vm140_vm0, %v109_v21  ;;  %451 = vmatpush.msra.mxu3 %v4754_v18 }
  0x31   :  { %4085 = vmatmul.msk.f32.gmra.mxu0 %vm140_vm0, %v110_v28  ;;  %430 = vmatpush.msrb.mxu2 %v4789_v25 }
  0x32   :  { %452 = vmatpush.msra.mxu3 %v4764_v20  ;;  %1307 = vmatpush.msra.mxu0 %v4734_v16 }
  0x33   :  { %431 = vmatpush.msrb.mxu2 %v4802_v26  ;;  %1331 = vmatpush.msrb.mxu1 %v4741_v17 }
  0x34   :  { %622 = vmatpush.msrb.mxu3 %v4683_v8  ;;  %1308 = vmatpush.msra.mxu0 %v4759_v19 }
  0x35   :  { %432 = vmatpush.msrb.mxu2 %v4807_v27  ;;  %1332 = vmatpush.msrb.mxu1 %v4754_v18 }
  0x36   :  { %623 = vmatpush.msrb.mxu3 %v4690_v9  ;;  %1309 = vmatpush.msra.mxu0 %v4774_v22 }
  0x37   :  { %602 = vmatpush.msra.mxu2 %v4720_v14  ;;  %1333 = vmatpush.msrb.mxu1 %v4764_v20 }
  0x38   :  { %4093 = vmatmul.msk.f32.gmra.mxu1 %vm140_vm0, %v110_v28  ;;  %624 = vmatpush.msrb.mxu3 %v4704_v11 }
  0x39   :  { %1310 = vmatpush.msra.mxu0 %v4779_v23  ;;  %603 = vmatpush.msra.mxu2 %v4734_v16 }
  0x3a   :  { %625 = vmatpush.msrb.mxu3 %v4709_v12 }
  0x3b   :  { %1311 = vmatpush.msra.mxu0 %v4789_v25  ;;  %604 = vmatpush.msra.mxu2 %v4759_v19 }
  0x3c   :  { %626 = vmatpush.msrb.mxu3 %v4728_v15 }
  0x3d   :  { %1312 = vmatpush.msra.mxu0 %v4802_v26  ;;  %605 = vmatpush.msra.mxu2 %v4774_v22 }
  0x3e   :  { %627 = vmatpush.msrb.mxu3 %v4741_v17 }
  0x3f   :  { %1313 = vmatpush.msra.mxu0 %v4807_v27  ;;  %606 = vmatpush.msra.mxu2 %v4779_v23 }
  0x40   :  { %4094 = vmatmul.msk.f32.gmra.mxu1 %vm140_vm0, %v4657_v2  ;;  %628 = vmatpush.msrb.mxu3 %v4754_v18 }
  0x41   :  { %607 = vmatpush.msra.mxu2 %v4789_v25 }
  0x42   :  { %629 = vmatpush.msrb.mxu3 %v4764_v20 }
  0x43   :  { %608 = vmatpush.msra.mxu2 %v4802_v26 }
  0x45   :  { %609 = vmatpush.msra.mxu2 %v4807_v27 }
  0x48   :  { %4095 = vmatmul.msk.f32.gmra.mxu1 %vm140_vm0, %v4678_v7 }
  0x50   :  { %4096 = vmatmul.msk.f32.gmra.mxu1 %vm140_vm0, %v4714_v13 }
  0x8d   :  { %v4874_v29 = vpop.f32.mrf.mxu1 }
  0x8e   :  { %v182_v42 = vpop.f32.mrf.mxu0 }
  0x8f   :  { %v183_v44 = vadd.f32 %v182_v42, %v4892_v39 }
  0x95   :  { %v4876_v30 = vpop.f32.mrf.mxu1  ;;  %v4898_v48 = vpop.f32.mrf.mxu3 }
  0x9d   :  { %v226_v33 = vpop.f32.mrf.mxu1  ;;  %v4909_v54 = vpop.f32.mrf.mxu3 }
  0x9e   :  { %v4884_v34 = vadd.f32 %v226_v33, %v4881_v32 }
  0xa5   :  { %v229_v35 = vpop.f32.mrf.mxu1 }
  0xa6   :  { %v4887_v36 = vadd.f32 %v229_v35, %v4881_v32  ;;  %v288_v62 = vpop.f32.mrf.mxu3 }
  0xa7   :  { %v268_v45 = vpop.f32.mrf.mxu2 }
  0xa8   :  { %v291_v47 = vadd.f32 %v268_v45, %v183_v44 }
  0xaa   :  { %v293_v49 = vmul.f32 2.0, %v291_v47 }
  0xac   :  { %v295_v53 = vsel %vm4900_vm3, %v293_v49, %v291_v47 }
  0xad   :  { %v232_v37 = vpop.f32.mrf.mxu1  ;;  %v4097_v55 = vmul.f32 -1.442695, %v295_v53 }
  0xae   :  { %v4890_v38 = vadd.f32 %v232_v37, %v4881_v32 }
  0xaf   :  { %4260 = vpow2.f32 %v4097_v55 }
  0xb5   :  { %v235_v41 = vpop.f32.mrf.mxu1  ;;  %v4261_v60 = vpop.eup %4260 }
  0xb6   :  { %v4895_v43 = vadd.f32 %v235_v41, %v4881_v32  ;;  %v303_v1 = vadd.f32 1.0, %v4261_v60 }
  0xb8   :  { %4262 = vrcp.f32 %v303_v1  ;;  %vm310_vm7 = vweird.f32 %v303_v1  ;;  %v316_v35 = vand.u32 2147483648, %v303_v1  ;;  %v314_v41 = vand.u32 2147483647, %v303_v1 }
  0xba   :  { %v317_v46 = vor.u32 1.1754944e-38, %v316_v35  ;;  %vm315_vm12 = vcmp.eq.f32.partialorder %v314_v41, 8.507059e+37  ;;  %v72_v41 = vld [vmem:[%s6588_s3 + $0x38] sm:$0xff] }
  0xbd   :  { %v238_v50 = vpop.f32.mrf.mxu1 }
  0xbe   :  { %v4905_v52 = vadd.f32 %v238_v50, %v4881_v32  ;;  %v4263_v6 = vpop.eup %4262 }
  0xbf   :  { %v306_v10 = vmul.f32 %v4263_v6, %v303_v1  ;;  %vm311_vm8 = vweird.f32 %v4263_v6 }
  0xc0   :  { %vm312_vm9 = vmor %vm310_vm7, %vm311_vm8 }
  0xc1   :  { %v307_v21 = vsub.f32 1.0, %v306_v10 }
  0xc3   :  { %v308_v28 = vmul.f32 %v4263_v6, %v307_v21 }
  0xc5   :  { %v241_v56 = vpop.f32.mrf.mxu1  ;;  %v309_v40 = vadd.f32 %v4263_v6, %v308_v28 }
  0xc6   :  { %v4912_v57 = vadd.f32 %v241_v56, %v4881_v32 }
  0xc7   :  { %v313_v49 = vsel %vm312_vm9, %v4263_v6, %v309_v40 }
  0xc8   :  { %v318_v56 = vsel %vm315_vm12, %v317_v46, %v313_v49 }
  0xc9   :  { %v335_v60 = vmul.f32 2.0, %v318_v56 }
  0xcd   :  { %v244_v61 = vpop.f32.mrf.mxu1 }
  0xce   :  { %v245_v63 = vadd.f32 %v244_v61, %v4881_v32 }
  0xd0   :  { %v292_v0 = vadd.f32 %v288_v62, %v245_v63  ;;  %v4099_v62 = vadd.f32 -1.0, %v335_v60 }
  0xd2   :  { %v294_v3 = vmul.f32 2.0, %v292_v0  ;;  %v339_v63 = vsel %vm4900_vm3, %v4099_v62, %v318_v56 }
  0xd3   :  { %v341_v10 = vmul.f32 0.0, %v339_v63 }
  0xd4   :  { %v296_v4 = vsel %vm4915_vm6, %v294_v3, %v292_v0 }
  0xd5   :  { %v4098_v5 = vmul.f32 -1.442695, %v296_v4 }
  0xd7   :  { %4264 = vpow2.f32 %v4098_v5 }
  0xdd   :  { %v4265_v7 = vpop.eup %4264 }
  0xde   :  { %v304_v13 = vadd.f32 1.0, %v4265_v7 }
  0xe0   :  { %4266 = vrcp.f32 %v304_v13  ;;  %v331_v42 = vand.u32 2147483648, %v304_v13  ;;  %v329_v45 = vand.u32 2147483647, %v304_v13  ;;  %vm325_vm11 = vweird.f32 %v304_v13 }
  0xe2   :  { %v332_v50 = vor.u32 1.1754944e-38, %v331_v42  ;;  %vm330_vm14 = vcmp.eq.f32.partialorder %v329_v45, 8.507059e+37  ;;  %v4937_v42 = vsub.f32 1.0, %v72_v41 }
  0xe6   :  { %v4267_v31 = vpop.eup %4266 }
  0xe7   :  { %v321_v33 = vmul.f32 %v4267_v31, %v304_v13  ;;  %vm326_vm10 = vweird.f32 %v4267_v31 }
  0xe8   :  { %vm327_vm13 = vmor %vm325_vm11, %vm326_vm10 }
  0xe9   :  { %v322_v37 = vsub.f32 1.0, %v321_v33 }
  0xeb   :  { %v323_v44 = vmul.f32 %v4267_v31, %v322_v37 }
  0xed   :  { %v324_v47 = vadd.f32 %v4267_v31, %v323_v44  ;;  %v4940_v44 = vmul.f32 0.0, %v4937_v42 }
  0xef   :  { %v328_v53 = vsel %vm327_vm13, %v4267_v31, %v324_v47 }
  0xf0   :  { %v333_v55 = vsel %vm330_vm14, %v332_v50, %v328_v53 }
  0xf1   :  { %v336_v58 = vmul.f32 2.0, %v333_v55 }
  0xf3   :  { %v4100_v59 = vadd.f32 -1.0, %v336_v58 }
  0xf5   :  { %v340_v61 = vsel %vm4915_vm6, %v4100_v59, %v333_v55  ;;  %v65_v55 = vld [vmem:[%s6588_s3] sm:$0xff] }
  0xf6   :  { %360 = vrot.lane.b32.xlu0 %v340_v61, %s4540_s27  ;;  %v358_v5 = vmul.f32 0.0, %v340_v61  ;;  %v4953_v56 = vsub.f32 1.0, %v65_v55 }
  0xf8   :  { %v4956_v59 = vmul.f32 0.0, %v4953_v56 }
  0xfe   :  { %343 = vrot.lane.b32.xlu0 %v339_v63, %s4540_s27 }
 0x168   :  { %v361_v0 = vpop.permute.xlu0 %360 }
 0x169   :  { %v363_v1 = vmul.f32 %v361_v0, %v340_v61 }
 0x16b   :  { %365 = vrot.lane.b32.xlu1 %v363_v1, %s4541_s28 }
 0x170   :  { %v344_v3 = vpop.permute.xlu0 %343 }
 0x171   :  { %v346_v4 = vmul.f32 %v344_v3, %v339_v63 }
 0x173   :  { %348 = vrot.lane.b32.xlu1 %v346_v4, %s4541_s28 }
 0x1dd   :  { %v366_v6 = vpop.permute.xlu1 %365 }
 0x1de   :  { %v368_v7 = vadd.f32 %v366_v6, %v358_v5  ;;  %v185_v6 = vpop.f32.mrf.mxu0 }
 0x1e0   :  { %4268 = vtanh.f32 %v368_v7 }
 0x1e5   :  { %v349_v13 = vpop.permute.xlu1 %348 }
 0x1e6   :  { %v4269_v21 = vpop.eup %4268  ;;  %v351_v28 = vadd.f32 %v349_v13, %v341_v10 }
 0x1e7   :  { %371 = vrot.lane.b32.xlu2 %v4269_v21, %s4540_s27 }
 0x1e8   :  { %4270 = vtanh.f32 %v351_v28 }
 0x1ee   :  { %v4271_v31 = vpop.eup %4270 }
 0x1ef   :  { %354 = vrot.lane.b32.xlu2 %v4271_v31, %s4540_s27 }
 0x241   :  { %v372_v33 = vpop.permute.xlu2 %371 }
 0x242   :  { %v374_v35 = vmul.f32 %v372_v33, %v340_v61 }
 0x244   :  { %384 = vrot.lane.b32.xlu0 %v374_v35, %s4541_s28 }
 0x249   :  { %v355_v37 = vpop.permute.xlu2 %354 }
 0x24a   :  { %v357_v40 = vmul.f32 %v355_v37, %v339_v63 }
 0x24c   :  { %404 = vrot.lane.b32.xlu0 %v368_v7, %s4542_s1  ;;  %376 = vrot.lane.b32.xlu1 %v357_v40, %s4541_s28  ;;  %v186_v7 = vadd.f32 %v185_v6, %v4892_v39 }
 0x2b6   :  { %v385_v45 = vpop.permute.xlu0 %384 }
 0x2b7   :  { %v4942_v46 = vmul.f32 %v385_v45, %v72_v41 }
 0x2b9   :  { %v390_v47 = vadd.f32 %v4940_v44, %v4942_v46 }
 0x2bb   :  { %392 = vrot.lane.b32.xlu2 %v390_v47, %s4541_s28 }
 0x2be   :  { %v405_v49 = vpop.permute.xlu0 %404  ;;  %v377_v58 = vpop.permute.xlu1 %376 }
 0x2bf   :  { %v407_v50 = vmul.f32 %v405_v49, %v72_v41  ;;  %v4958_v60 = vmul.f32 %v377_v58, %v65_v55 }
 0x2c1   :  { %v408_v53 = vadd.f32 %v407_v50, %v4940_v44  ;;  %v382_v61 = vadd.f32 %v4956_v59, %v4958_v60 }
 0x2c3   :  { %410 = vrot.lane.b32.xlu0 %v408_v53, %s4541_s28  ;;  %398 = vrot.lane.b32.xlu2 %v351_v28, %s4542_s1 }
 0x315   :  { %v393_v62 = vpop.permute.xlu2 %392 }
 0x316   :  { %v4963_v63 = vsel %vm395_vm15, %v382_v61, %v393_v62 }
 0x317   :  { %4101 = vmatmul.msk.f32.vlgmr.msrb.gmra.mxu2 %vm247_vm1, %v4963_v63  ;;  %4102 = vmatmul.msk.f32.vlgmr.msra.gmra.mxu3 %vm247_vm1, %v4963_v63 }
 0x318   :  { %779 = vmatpush.msrb.mxu2 %v4720_v14  ;;  %799 = vmatpush.msra.mxu3 %v4683_v8 }
 0x31a   :  { %780 = vmatpush.msrb.mxu2 %v4734_v16  ;;  %800 = vmatpush.msra.mxu3 %v4690_v9 }
 0x31c   :  { %781 = vmatpush.msrb.mxu2 %v4759_v19  ;;  %801 = vmatpush.msra.mxu3 %v4704_v11 }
 0x31d   :  { %v399_v0 = vpop.permute.xlu2 %398 }
 0x31e   :  { %782 = vmatpush.msrb.mxu2 %v4774_v22  ;;  %802 = vmatpush.msra.mxu3 %v4709_v12  ;;  %v401_v1 = vmul.f32 %v399_v0, %v65_v55 }
 0x320   :  { %783 = vmatpush.msrb.mxu2 %v4779_v23  ;;  %803 = vmatpush.msra.mxu3 %v4728_v15  ;;  %v402_v3 = vadd.f32 %v401_v1, %v4956_v59 }
 0x322   :  { %784 = vmatpush.msrb.mxu2 %v4789_v25  ;;  %804 = vmatpush.msra.mxu3 %v4741_v17 }
 0x324   :  { %785 = vmatpush.msrb.mxu2 %v4802_v26  ;;  %805 = vmatpush.msra.mxu3 %v4754_v18 }
 0x326   :  { %786 = vmatpush.msrb.mxu2 %v4807_v27  ;;  %806 = vmatpush.msra.mxu3 %v4764_v20 }
 0x335   :  { %v411_v4 = vpop.permute.xlu0 %410 }
 0x336   :  { %v4987_v5 = vsel %vm395_vm15, %v402_v3, %v411_v4 }
 0x337   :  { %508 = vrot.lane.b32.xlu0 %v4987_v5, %s4541_s28 }
 0x39a   :  { %v434_v10 = vpop.f32.mrf.mxu2  ;;  %v454_v13 = vpop.f32.mrf.mxu3 }
 0x39b   :  { %v457_v21 = vadd.f32 %v434_v10, %v186_v7  ;;  %v458_v28 = vadd.f32 %v454_v13, %v4912_v57 }
 0x39d   :  { %v459_v31 = vmul.f32 2.0, %v457_v21  ;;  %v460_v33 = vmul.f32 2.0, %v458_v28 }
 0x39f   :  { %v461_v35 = vsel %vm4900_vm3, %v459_v31, %v457_v21  ;;  %v462_v37 = vsel %vm4915_vm6, %v460_v33, %v458_v28 }
 0x3a0   :  { %v4103_v40 = vmul.f32 -1.442695, %v461_v35  ;;  %v4104_v41 = vmul.f32 -1.442695, %v462_v37 }
 0x3a2   :  { %4272 = vpow2.f32 %v4103_v40 }
 0x3a3   :  { %4274 = vpow2.f32 %v4104_v41 }
 0x3a8   :  { %v4273_v45 = vpop.eup %4272 }
 0x3a9   :  { %v4275_v47 = vpop.eup %4274  ;;  %v469_v49 = vadd.f32 1.0, %v4273_v45 }
 0x3aa   :  { %v470_v50 = vadd.f32 1.0, %v4275_v47 }
 0x3ab   :  { %4276 = vrcp.f32 %v469_v49  ;;  %vm476_vm5 = vweird.f32 %v469_v49  ;;  %v482_v7 = vand.u32 2147483648, %v469_v49  ;;  %v480_v10 = vand.u32 2147483647, %v469_v49 }
 0x3ac   :  { %4278 = vrcp.f32 %v470_v50  ;;  %v497_v1 = vand.u32 2147483648, %v470_v50  ;;  %v495_v4 = vand.u32 2147483647, %v470_v50  ;;  %vm491_vm8 = vweird.f32 %v470_v50 }
 0x3ad   :  { %v483_v33 = vor.u32 1.1754944e-38, %v482_v7  ;;  %vm481_vm11 = vcmp.eq.f32.partialorder %v480_v10, 8.507059e+37 }
 0x3ae   :  { %v498_v21 = vor.u32 1.1754944e-38, %v497_v1  ;;  %vm496_vm10 = vcmp.eq.f32.partialorder %v495_v4, 8.507059e+37 }
 0x3b1   :  { %v4277_v53 = vpop.eup %4276 }
 0x3b2   :  { %v4279_v57 = vpop.eup %4278  ;;  %v472_v55 = vmul.f32 %v4277_v53, %v469_v49  ;;  %vm477_vm2 = vweird.f32 %v4277_v53 }
 0x3b3   :  { %v487_v58 = vmul.f32 %v4279_v57, %v470_v50  ;;  %vm492_vm4 = vweird.f32 %v4279_v57  ;;  %vm478_vm7 = vmor %vm476_vm5, %vm477_vm2 }
 0x3b4   :  { %v473_v61 = vsub.f32 1.0, %v472_v55  ;;  %vm493_vm9 = vmor %vm491_vm8, %vm492_vm4 }
 0x3b5   :  { %v488_v62 = vsub.f32 1.0, %v487_v58 }
 0x3b6   :  { %v474_v0 = vmul.f32 %v4277_v53, %v473_v61 }
 0x3b7   :  { %v489_v3 = vmul.f32 %v4279_v57, %v488_v62 }
 0x3b8   :  { %v475_v6 = vadd.f32 %v4277_v53, %v474_v0 }
 0x3b9   :  { %v490_v13 = vadd.f32 %v4279_v57, %v489_v3  ;;  %v509_v3 = vpop.permute.xlu0 %508 }
 0x3ba   :  { %v479_v28 = vsel %vm478_vm7, %v4277_v53, %v475_v6 }
 0x3bb   :  { %v494_v31 = vsel %vm493_vm9, %v4279_v57, %v490_v13  ;;  %v484_v40 = vsel %vm481_vm11, %v483_v33, %v479_v28  ;;  %v71_v33 = vld [vmem:[%s6588_s3 + $0x30] sm:$0xff] }
 0x3bc   :  { %v499_v35 = vsel %vm496_vm10, %v498_v21, %v494_v31  ;;  %v501_v45 = vmul.f32 2.0, %v484_v40 }
 0x3bd   :  { %v502_v37 = vmul.f32 2.0, %v499_v35 }
 0x3be   :  { %v4105_v49 = vadd.f32 -1.0, %v501_v45 }
 0x3bf   :  { %v4106_v41 = vadd.f32 -1.0, %v502_v37 }
 0x3c0   :  { %v505_v50 = vsel %vm4900_vm3, %v4105_v49, %v484_v40 }
 0x3c1   :  { %v506_v47 = vsel %vm4915_vm6, %v4106_v41, %v499_v35  ;;  %v511_v4 = vmul.f32 %v509_v3, %v505_v50  ;;  %v5019_v35 = vsub.f32 1.0, %v71_v33 }
 0x3c2   :  { %530 = vrot.lane.b32.xlu1 %v506_v47, %s4540_s27  ;;  %v528_v61 = vmul.f32 %v506_v47, %v4987_v5 }
 0x3ca   :  { %513 = vrot.lane.b32.xlu1 %v505_v50, %s4540_s27 }
 0x434   :  { %v531_v53 = vpop.permute.xlu1 %530 }
 0x435   :  { %v533_v57 = vmul.f32 %v531_v53, %v506_v47 }
 0x437   :  { %535 = vrot.lane.b32.xlu2 %v533_v57, %s4541_s28 }
 0x43c   :  { %v514_v55 = vpop.permute.xlu1 %513 }
 0x43d   :  { %v516_v58 = vmul.f32 %v514_v55, %v505_v50 }
 0x43f   :  { %518 = vrot.lane.b32.xlu1 %v516_v58, %s4541_s28 }
 0x491   :  { %v536_v62 = vpop.permute.xlu2 %535 }
 0x492   :  { %v538_v0 = vadd.f32 %v536_v62, %v528_v61  ;;  %v66_v61 = vld [vmem:[%s6588_s3 + $0x8] sm:$0xff] }
 0x493   :  { %v5031_v62 = vsub.f32 1.0, %v66_v61 }
 0x494   :  { %4280 = vtanh.f32 %v538_v0 }
 0x49a   :  { %v4281_v1 = vpop.eup %4280 }
 0x49b   :  { %541 = vrot.lane.b32.xlu2 %v4281_v1, %s4540_s27  ;;  %v551_v1 = vmul.f32 %v5031_v62, %v4963_v63 }
 0x4a3   :  { %559 = vrot.lane.b32.xlu2 %v4963_v63, %s4542_s1 }
 0x4ab   :  { %577 = vrot.lane.b32.xlu2 %v538_v0, %s4542_s1 }
 0x4b1   :  { %v519_v6 = vpop.permute.xlu1 %518 }
 0x4b2   :  { %v521_v7 = vadd.f32 %v519_v6, %v511_v4 }
 0x4b4   :  { %4282 = vtanh.f32 %v521_v7  ;;  %570 = vrot.lane.b32.xlu2 %v521_v7, %s4542_s1  ;;  %v188_v7 = vpop.f32.mrf.mxu0 }
 0x4ba   :  { %v4283_v10 = vpop.eup %4282 }
 0x4bb   :  { %524 = vrot.lane.b32.xlu0 %v4283_v10, %s4540_s27  ;;  %v189_v10 = vadd.f32 %v188_v7, %v4892_v39 }
 0x4f5   :  { %v542_v13 = vpop.permute.xlu2 %541 }
 0x4f6   :  { %v544_v21 = vmul.f32 %v542_v13, %v506_v47 }
 0x4f8   :  { %554 = vrot.lane.b32.xlu1 %v544_v21, %s4541_s28 }
 0x4fd   :  { %v560_v37 = vpop.permute.xlu2 %559 }
 0x4fe   :  { %v562_v41 = vmul.f32 %v560_v37, %v5019_v35 }
 0x52d   :  { %v525_v28 = vpop.permute.xlu0 %524 }
 0x52e   :  { %v527_v31 = vmul.f32 %v525_v28, %v505_v50  ;;  %v578_v50 = vpop.permute.xlu2 %577 }
 0x52f   :  { %v580_v57 = vmul.f32 %v578_v50, %v71_v33 }
 0x530   :  { %546 = vrot.lane.b32.xlu0 %v527_v31, %s4541_s28 }
 0x538   :  { %581 = vrot.lane.b32.xlu0 %v4987_v5, %s4542_s1 }
 0x56a   :  { %v555_v40 = vpop.permute.xlu1 %554 }
 0x56b   :  { %v5022_v45 = vmul.f32 %v555_v40, %v71_v33 }
 0x56d   :  { %v563_v47 = vadd.f32 %v562_v41, %v5022_v45 }
 0x56f   :  { %565 = vrot.lane.b32.xlu1 %v563_v47, %s4541_s28 }
 0x5a2   :  { %v547_v49 = vpop.permute.xlu0 %546 }
 0x5a3   :  { %v5033_v0 = vmul.f32 %v547_v49, %v66_v61 }
 0x5a5   :  { %v552_v3 = vadd.f32 %v551_v1, %v5033_v0 }
 0x5aa   :  { %v582_v53 = vpop.permute.xlu0 %581 }
 0x5ab   :  { %v584_v55 = vmul.f32 %v582_v53, %v5019_v35 }
 0x5ad   :  { %v585_v58 = vadd.f32 %v584_v55, %v580_v57 }
 0x5af   :  { %587 = vrot.lane.b32.xlu0 %v585_v58, %s4541_s28 }
 0x5e1   :  { %v566_v4 = vpop.permute.xlu1 %565 }
 0x5e2   :  { %v5039_v6 = vsel %vm395_vm15, %v552_v3, %v566_v4 }
 0x5e3   :  { %4107 = vmatmul.msk.f32.vlgmr.msra.gmra.mxu2 %vm247_vm1, %v5039_v6  ;;  %4108 = vmatmul.msk.f32.vlgmr.msrb.gmra.mxu3 %vm247_vm1, %v5039_v6 }
 0x5e4   :  { %1131 = vmatpush.msra.mxu2 %v4720_v14  ;;  %1151 = vmatpush.msrb.mxu3 %v4683_v8  ;;  %v571_v8 = vpop.permute.xlu2 %570 }
 0x5e6   :  { %1132 = vmatpush.msra.mxu2 %v4734_v16  ;;  %1152 = vmatpush.msrb.mxu3 %v4690_v9  ;;  %v573_v9 = vmul.f32 %v571_v8, %v66_v61 }
 0x5e8   :  { %1133 = vmatpush.msra.mxu2 %v4759_v19  ;;  %1153 = vmatpush.msrb.mxu3 %v4704_v11  ;;  %v574_v11 = vmul.f32 %v5031_v62, %v4987_v5 }
 0x5ea   :  { %1134 = vmatpush.msra.mxu2 %v4774_v22  ;;  %1154 = vmatpush.msrb.mxu3 %v4709_v12  ;;  %v575_v12 = vadd.f32 %v574_v11, %v573_v9 }
 0x5ec   :  { %1135 = vmatpush.msra.mxu2 %v4779_v23  ;;  %1155 = vmatpush.msrb.mxu3 %v4728_v15 }
 0x5ee   :  { %1136 = vmatpush.msra.mxu2 %v4789_v25  ;;  %1156 = vmatpush.msrb.mxu3 %v4741_v17 }
 0x5f0   :  { %1137 = vmatpush.msra.mxu2 %v4802_v26  ;;  %1157 = vmatpush.msrb.mxu3 %v4754_v18 }
 0x5f2   :  { %1138 = vmatpush.msra.mxu2 %v4807_v27  ;;  %1158 = vmatpush.msrb.mxu3 %v4764_v20 }
 0x621   :  { %v588_v63 = vpop.permute.xlu0 %587 }
 0x622   :  { %v5064_v15 = vsel %vm395_vm15, %v575_v12, %v588_v63 }
 0x623   :  { %685 = vrot.lane.b32.xlu0 %v5064_v15, %s4541_s28 }
 0x666   :  { %v611_v13 = vpop.f32.mrf.mxu2  ;;  %v631_v21 = vpop.f32.mrf.mxu3 }
 0x667   :  { %v634_v28 = vadd.f32 %v611_v13, %v189_v10  ;;  %v635_v31 = vadd.f32 %v631_v21, %v4905_v52 }
 0x669   :  { %v636_v33 = vmul.f32 2.0, %v634_v28  ;;  %v637_v37 = vmul.f32 2.0, %v635_v31 }
 0x66b   :  { %v638_v5 = vsel %vm4900_vm3, %v636_v33, %v634_v28  ;;  %v639_v40 = vsel %vm4915_vm6, %v637_v37, %v635_v31 }
 0x66c   :  { %v4109_v41 = vmul.f32 -1.442695, %v638_v5  ;;  %v4110_v47 = vmul.f32 -1.442695, %v639_v40 }
 0x66e   :  { %4284 = vpow2.f32 %v4109_v41 }
 0x66f   :  { %4286 = vpow2.f32 %v4110_v47 }
 0x674   :  { %v4285_v49 = vpop.eup %4284 }
 0x675   :  { %v4287_v50 = vpop.eup %4286  ;;  %v646_v53 = vadd.f32 1.0, %v4285_v49 }
 0x676   :  { %v647_v57 = vadd.f32 1.0, %v4287_v50 }
 0x677   :  { %4288 = vrcp.f32 %v646_v53  ;;  %vm653_vm14 = vweird.f32 %v646_v53  ;;  %v659_v63 = vand.u32 2147483648, %v646_v53  ;;  %v657_v10 = vand.u32 2147483647, %v646_v53 }
 0x678   :  { %4290 = vrcp.f32 %v647_v57  ;;  %v674_v4 = vand.u32 2147483648, %v647_v57  ;;  %v672_v11 = vand.u32 2147483647, %v647_v57  ;;  %vm668_vm2 = vweird.f32 %v647_v57 }
 0x679   :  { %v660_v33 = vor.u32 1.1754944e-38, %v659_v63  ;;  %vm658_vm8 = vcmp.eq.f32.partialorder %v657_v10, 8.507059e+37 }
 0x67a   :  { %v675_v13 = vor.u32 1.1754944e-38, %v674_v4  ;;  %vm673_vm7 = vcmp.eq.f32.partialorder %v672_v11, 8.507059e+37 }
 0x67d   :  { %v4289_v55 = vpop.eup %4288 }
 0x67e   :  { %v4291_v52 = vpop.eup %4290  ;;  %v649_v58 = vmul.f32 %v4289_v55, %v646_v53  ;;  %vm654_vm12 = vweird.f32 %v4289_v55 }
 0x67f   :  { %v664_v61 = vmul.f32 %v4291_v52, %v647_v57  ;;  %vm669_vm13 = vweird.f32 %v4291_v52  ;;  %vm655_vm4 = vmor %vm653_vm14, %vm654_vm12 }
 0x680   :  { %v650_v1 = vsub.f32 1.0, %v649_v58  ;;  %vm670_vm5 = vmor %vm668_vm2, %vm669_vm13 }
 0x681   :  { %v665_v3 = vsub.f32 1.0, %v664_v61 }
 0x682   :  { %v651_v8 = vmul.f32 %v4289_v55, %v650_v1 }
 0x683   :  { %v666_v9 = vmul.f32 %v4291_v52, %v665_v3 }
 0x684   :  { %v652_v12 = vadd.f32 %v4289_v55, %v651_v8 }
 0x685   :  { %v667_v7 = vadd.f32 %v4291_v52, %v666_v9 }
 0x686   :  { %v656_v28 = vsel %vm655_vm4, %v4289_v55, %v652_v12 }
 0x687   :  { %v671_v21 = vsel %vm670_vm5, %v4291_v52, %v667_v7  ;;  %v661_v5 = vsel %vm658_vm8, %v660_v33, %v656_v28 }
 0x688   :  { %v676_v31 = vsel %vm673_vm7, %v675_v13, %v671_v21  ;;  %v678_v47 = vmul.f32 2.0, %v661_v5  ;;  %v5096_v21 = vld [vmem:[%s6588_s3 + $0x28] sm:$0xff] }
 0x689   :  { %v679_v37 = vmul.f32 2.0, %v676_v31  ;;  %v5099_v28 = vsub.f32 1.0, %v5096_v21 }
 0x68a   :  { %v4111_v49 = vadd.f32 -1.0, %v678_v47 }
 0x68b   :  { %v4112_v40 = vadd.f32 -1.0, %v679_v37 }
 0x68c   :  { %v682_v50 = vsel %vm4900_vm3, %v4111_v49, %v661_v5 }
 0x68d   :  { %v683_v41 = vsel %vm4915_vm6, %v4112_v40, %v676_v31 }
 0x68e   :  { %707 = vrot.lane.b32.xlu1 %v683_v41, %s4540_s27  ;;  %v705_v58 = vmul.f32 %v683_v41, %v5064_v15 }
 0x695   :  { %v686_v4 = vpop.permute.xlu0 %685 }
 0x696   :  { %690 = vrot.lane.b32.xlu1 %v682_v50, %s4540_s27  ;;  %v688_v8 = vmul.f32 %v686_v4, %v682_v50 }
 0x700   :  { %v708_v53 = vpop.permute.xlu1 %707 }
 0x701   :  { %v710_v57 = vmul.f32 %v708_v53, %v683_v41 }
 0x703   :  { %712 = vrot.lane.b32.xlu2 %v710_v57, %s4541_s28 }
 0x708   :  { %v691_v55 = vpop.permute.xlu1 %690 }
 0x709   :  { %v693_v52 = vmul.f32 %v691_v55, %v682_v50  ;;  %v5113_v55 = vld [vmem:[%s6588_s3 + $0x10] sm:$0xff] }
 0x70b   :  { %695 = vrot.lane.b32.xlu1 %v693_v52, %s4541_s28  ;;  %v5116_v52 = vsub.f32 1.0, %v5113_v55 }
 0x75d   :  { %v713_v61 = vpop.permute.xlu2 %712 }
 0x75e   :  { %v715_v1 = vadd.f32 %v713_v61, %v705_v58  ;;  %v728_v61 = vmul.f32 %v5116_v52, %v5039_v6 }
 0x760   :  { %4292 = vtanh.f32 %v715_v1 }
 0x766   :  { %v4293_v3 = vpop.eup %4292 }
 0x767   :  { %718 = vrot.lane.b32.xlu2 %v4293_v3, %s4540_s27 }
 0x76f   :  { %736 = vrot.lane.b32.xlu2 %v5039_v6, %s4542_s1  ;;  %v4513_v6 = vld [vmem:[%s6582_s25 + $0x68] sm:$0xff] }
 0x777   :  { %754 = vrot.lane.b32.xlu2 %v715_v1, %s4542_s1 }
 0x77d   :  { %v696_v9 = vpop.permute.xlu1 %695 }
 0x77e   :  { %v698_v11 = vadd.f32 %v696_v9, %v688_v8  ;;  %v4512_v8 = vld [vmem:[%s6582_s25 + $0x78] sm:$0xff] }
 0x77f   :  { %v4514_v9 = vld [vmem:[%s6582_s25 + $0x58] sm:$0xff] }
 0x780   :  { %4294 = vtanh.f32 %v698_v11  ;;  %747 = vrot.lane.b32.xlu2 %v698_v11, %s4542_s1 }
 0x786   :  { %v4295_v12 = vpop.eup %4294 }
 0x787   :  { %701 = vrot.lane.b32.xlu0 %v4295_v12, %s4540_s27 }
 0x7c1   :  { %v719_v63 = vpop.permute.xlu2 %718 }
 0x7c2   :  { %v721_v7 = vmul.f32 %v719_v63, %v683_v41 }
 0x7c4   :  { %731 = vrot.lane.b32.xlu1 %v721_v7, %s4541_s28 }
 0x7c9   :  { %v737_v31 = vpop.permute.xlu2 %736 }
 0x7ca   :  { %v739_v37 = vmul.f32 %v737_v31, %v5099_v28 }
 0x7d1   :  { %v755_v47 = vpop.permute.xlu2 %754 }
 0x7f9   :  { %v702_v10 = vpop.permute.xlu0 %701 }
 0x7fa   :  { %v704_v13 = vmul.f32 %v702_v10, %v682_v50  ;;  %v757_v50 = vmul.f32 %v755_v47, %v5096_v21 }
 0x7fc   :  { %723 = vrot.lane.b32.xlu0 %v704_v13, %s4541_s28 }
 0x804   :  { %758 = vrot.lane.b32.xlu0 %v5064_v15, %s4542_s1 }
 0x836   :  { %v732_v33 = vpop.permute.xlu1 %731 }
 0x837   :  { %v5103_v5 = vmul.f32 %v732_v33, %v5096_v21 }
 0x839   :  { %v740_v40 = vadd.f32 %v739_v37, %v5103_v5 }
 0x83b   :  { %742 = vrot.lane.b32.xlu1 %v740_v40, %s4541_s28 }
 0x86e   :  { %v724_v41 = vpop.permute.xlu0 %723 }
 0x86f   :  { %v5119_v58 = vmul.f32 %v724_v41, %v5113_v55 }
 0x871   :  { %v729_v1 = vadd.f32 %v728_v61, %v5119_v58 }
 0x876   :  { %v759_v49 = vpop.permute.xlu0 %758 }
 0x877   :  { %v761_v53 = vmul.f32 %v759_v49, %v5099_v28 }
 0x879   :  { %v762_v57 = vadd.f32 %v761_v53, %v757_v50 }
 0x87b   :  { %764 = vrot.lane.b32.xlu0 %v762_v57, %s4541_s28 }
 0x8ad   :  { %v743_v3 = vpop.permute.xlu1 %742 }
 0x8ae   :  { %v5125_v4 = vsel %vm395_vm15, %v729_v1, %v743_v3 }
 0x8af   :  { %4113 = vmatmul.msk.f32.vlgmr.msrb.gmra.mxu2 %vm247_vm1, %v5125_v4  ;;  %4114 = vmatmul.msk.f32.vlgmr.msra.gmra.mxu3 %vm247_vm1, %v5125_v4 }
 0x8b0   :  { %1481 = vmatpush.msrb.mxu2 %v4720_v14  ;;  %1501 = vmatpush.msra.mxu3 %v4512_v8  ;;  %v4515_v14 = vld [vmem:[%s6582_s25 + $0x48] sm:$0xff] }
 0x8b2   :  { %1482 = vmatpush.msrb.mxu2 %v4734_v16  ;;  %1502 = vmatpush.msra.mxu3 %v4513_v6  ;;  %v4516_v16 = vld [vmem:[%s6582_s25 + $0x38] sm:$0xff] }
 0x8b4   :  { %1483 = vmatpush.msrb.mxu2 %v4759_v19  ;;  %1503 = vmatpush.msra.mxu3 %v4514_v9  ;;  %v748_v19 = vpop.permute.xlu2 %747 }
 0x8b6   :  { %1484 = vmatpush.msrb.mxu2 %v4774_v22  ;;  %1504 = vmatpush.msra.mxu3 %v4515_v14  ;;  %v750_v22 = vmul.f32 %v748_v19, %v5113_v55 }
 0x8b8   :  { %1485 = vmatpush.msrb.mxu2 %v4779_v23  ;;  %1505 = vmatpush.msra.mxu3 %v4516_v16  ;;  %v751_v23 = vmul.f32 %v5116_v52, %v5064_v15 }
 0x8ba   :  { %1486 = vmatpush.msrb.mxu2 %v4789_v25  ;;  %1506 = vmatpush.msra.mxu3 %v4741_v17  ;;  %v752_v11 = vadd.f32 %v751_v23, %v750_v22  ;;  %v191_v17 = vpop.f32.mrf.mxu0 }
 0x8bc   :  { %1487 = vmatpush.msrb.mxu2 %v4802_v26  ;;  %1507 = vmatpush.msra.mxu3 %v4754_v18  ;;  %v192_v18 = vadd.f32 %v191_v17, %v4892_v39 }
 0x8be   :  { %1488 = vmatpush.msrb.mxu2 %v4807_v27  ;;  %1508 = vmatpush.msra.mxu3 %v4764_v20 }
 0x8ed   :  { %v765_v12 = vpop.permute.xlu0 %764 }
 0x8ee   :  { %v5161_v25 = vsel %vm395_vm15, %v752_v11, %v765_v12 }
 0x8ef   :  { %862 = vrot.lane.b32.xlu0 %v5161_v25, %s4541_s28 }
 0x932   :  { %v788_v26 = vpop.f32.mrf.mxu2  ;;  %v808_v27 = vpop.f32.mrf.mxu3 }
 0x933   :  { %v811_v20 = vadd.f32 %v788_v26, %v192_v18  ;;  %v812_v63 = vadd.f32 %v808_v27, %v4895_v43 }
 0x935   :  { %v813_v7 = vmul.f32 2.0, %v811_v20  ;;  %v814_v10 = vmul.f32 2.0, %v812_v63 }
 0x937   :  { %v815_v15 = vsel %vm4900_vm3, %v813_v7, %v811_v20  ;;  %v816_v13 = vsel %vm4915_vm6, %v814_v10, %v812_v63 }
 0x938   :  { %v4115_v31 = vmul.f32 -1.442695, %v815_v15  ;;  %v4116_v33 = vmul.f32 -1.442695, %v816_v13 }
 0x93a   :  { %4296 = vpow2.f32 %v4115_v31 }
 0x93b   :  { %4298 = vpow2.f32 %v4116_v33 }
 0x940   :  { %v4297_v37 = vpop.eup %4296 }
 0x941   :  { %v4299_v40 = vpop.eup %4298  ;;  %v823_v41 = vadd.f32 1.0, %v4297_v37 }
 0x942   :  { %v824_v47 = vadd.f32 1.0, %v4299_v40 }
 0x943   :  { %4300 = vrcp.f32 %v823_v41  ;;  %vm830_vm11 = vweird.f32 %v823_v41  ;;  %v836_v14 = vand.u32 2147483648, %v823_v41  ;;  %v834_v19 = vand.u32 2147483647, %v823_v41 }
 0x944   :  { %4302 = vrcp.f32 %v824_v47  ;;  %v851_v1 = vand.u32 2147483648, %v824_v47  ;;  %v849_v6 = vand.u32 2147483647, %v824_v47  ;;  %vm845_vm12 = vweird.f32 %v824_v47 }
 0x945   :  { %v837_v17 = vor.u32 1.1754944e-38, %v836_v14  ;;  %vm835_vm4 = vcmp.eq.f32.partialorder %v834_v19, 8.507059e+37 }
 0x946   :  { %v852_v22 = vor.u32 1.1754944e-38, %v851_v1  ;;  %vm850_vm2 = vcmp.eq.f32.partialorder %v849_v6, 8.507059e+37  ;;  %v5193_v6 = vld [vmem:[%s6588_s3 + $0x20] sm:$0xff] }
 0x949   :  { %v4301_v49 = vpop.eup %4300 }
 0x94a   :  { %v4303_v43 = vpop.eup %4302  ;;  %v826_v50 = vmul.f32 %v4301_v49, %v823_v41  ;;  %vm831_vm9 = vweird.f32 %v4301_v49 }
 0x94b   :  { %v841_v53 = vmul.f32 %v4303_v43, %v824_v47  ;;  %vm846_vm10 = vweird.f32 %v4303_v43  ;;  %vm832_vm13 = vmor %vm830_vm11, %vm831_vm9 }
 0x94c   :  { %v827_v57 = vsub.f32 1.0, %v826_v50  ;;  %vm847_vm14 = vmor %vm845_vm12, %vm846_vm10 }
 0x94d   :  { %v842_v61 = vsub.f32 1.0, %v841_v53 }
 0x94e   :  { %v828_v3 = vmul.f32 %v4301_v49, %v827_v57 }
 0x94f   :  { %v843_v8 = vmul.f32 %v4303_v43, %v842_v61 }
 0x950   :  { %v829_v9 = vadd.f32 %v4301_v49, %v828_v3 }
 0x951   :  { %v844_v16 = vadd.f32 %v4303_v43, %v843_v8 }
 0x952   :  { %v833_v11 = vsel %vm832_vm13, %v4301_v49, %v829_v9  ;;  %v5196_v9 = vsub.f32 1.0, %v5193_v6 }
 0x953   :  { %v848_v23 = vsel %vm847_vm14, %v4303_v43, %v844_v16  ;;  %v838_v26 = vsel %vm835_vm4, %v837_v17, %v833_v11 }
 0x954   :  { %v853_v12 = vsel %vm850_vm2, %v852_v22, %v848_v23  ;;  %v855_v63 = vmul.f32 2.0, %v838_v26 }
 0x955   :  { %v856_v18 = vmul.f32 2.0, %v853_v12 }
 0x956   :  { %v4117_v7 = vadd.f32 -1.0, %v855_v63 }
 0x957   :  { %v4118_v27 = vadd.f32 -1.0, %v856_v18 }
 0x958   :  { %v859_v10 = vsel %vm4900_vm3, %v4117_v7, %v838_v26 }
 0x959   :  { %v860_v20 = vsel %vm4915_vm6, %v4118_v27, %v853_v12 }
 0x95a   :  { %884 = vrot.lane.b32.xlu1 %v860_v20, %s4540_s27  ;;  %v882_v37 = vmul.f32 %v860_v20, %v5161_v25 }
 0x961   :  { %v863_v49 = vpop.permute.xlu0 %862 }
 0x962   :  { %867 = vrot.lane.b32.xlu1 %v859_v10, %s4540_s27  ;;  %v865_v43 = vmul.f32 %v863_v49, %v859_v10  ;;  %v194_v49 = vpop.f32.mrf.mxu0 }
 0x9cc   :  { %v885_v15 = vpop.permute.xlu1 %884 }
 0x9cd   :  { %v887_v13 = vmul.f32 %v885_v15, %v860_v20 }
 0x9cf   :  { %889 = vrot.lane.b32.xlu2 %v887_v13, %s4541_s28 }
 0x9d4   :  { %v868_v31 = vpop.permute.xlu1 %867 }
 0x9d5   :  { %v870_v33 = vmul.f32 %v868_v31, %v859_v10 }
 0x9d7   :  { %872 = vrot.lane.b32.xlu1 %v870_v33, %s4541_s28 }
 0xa29   :  { %v890_v40 = vpop.permute.xlu2 %889 }
 0xa2a   :  { %v892_v41 = vadd.f32 %v890_v40, %v882_v37 }
 0xa2c   :  { %4304 = vtanh.f32 %v892_v41 }
 0xa32   :  { %v4305_v47 = vpop.eup %4304 }
 0xa33   :  { %895 = vrot.lane.b32.xlu2 %v4305_v47, %s4540_s27 }
 0xa3b   :  { %913 = vrot.lane.b32.xlu2 %v5125_v4, %s4542_s1 }
 0xa43   :  { %931 = vrot.lane.b32.xlu2 %v892_v41, %s4542_s1 }
 0xa49   :  { %v873_v50 = vpop.permute.xlu1 %872 }
 0xa4a   :  { %v875_v53 = vadd.f32 %v873_v50, %v865_v43  ;;  %v195_v43 = vadd.f32 %v194_v49, %v4892_v39 }
 0xa4c   :  { %4306 = vtanh.f32 %v875_v53  ;;  %924 = vrot.lane.b32.xlu2 %v875_v53, %s4542_s1 }
 0xa52   :  { %v4307_v57 = vpop.eup %4306 }
 0xa53   :  { %878 = vrot.lane.b32.xlu0 %v4307_v57, %s4540_s27 }
 0xa8d   :  { %v896_v61 = vpop.permute.xlu2 %895 }
 0xa8e   :  { %v898_v1 = vmul.f32 %v896_v61, %v860_v20  ;;  %v5210_v20 = vld [vmem:[%s6588_s3 + $0x18] sm:$0xff] }
 0xa8f   :  { %v5213_v63 = vsub.f32 1.0, %v5210_v20 }
 0xa90   :  { %908 = vrot.lane.b32.xlu1 %v898_v1, %s4541_s28 }
 0xa91   :  { %v928_v40 = vmul.f32 %v5213_v63, %v5161_v25 }
 0xa95   :  { %v914_v14 = vpop.permute.xlu2 %913 }
 0xa96   :  { %v916_v19 = vmul.f32 %v914_v14, %v5196_v9 }
 0xa9d   :  { %v932_v12 = vpop.permute.xlu2 %931 }
 0xa9e   :  { %v934_v18 = vmul.f32 %v932_v12, %v5193_v6 }
 0xaa6   :  { %v925_v33 = vpop.permute.xlu2 %924 }
 0xaa7   :  { %v927_v37 = vmul.f32 %v925_v33, %v5210_v20 }
 0xaa9   :  { %v929_v41 = vadd.f32 %v928_v40, %v927_v37 }
 0xac5   :  { %v879_v3 = vpop.permute.xlu0 %878 }
 0xac6   :  { %v881_v8 = vmul.f32 %v879_v3, %v859_v10  ;;  %v905_v10 = vmul.f32 %v5213_v63, %v5125_v4 }
 0xac8   :  { %900 = vrot.lane.b32.xlu0 %v881_v8, %s4541_s28 }
 0xad0   :  { %935 = vrot.lane.b32.xlu0 %v5161_v25, %s4542_s1 }
 0xb02   :  { %v909_v16 = vpop.permute.xlu1 %908 }
 0xb03   :  { %v5200_v22 = vmul.f32 %v909_v16, %v5193_v6 }
 0xb05   :  { %v917_v23 = vadd.f32 %v916_v19, %v5200_v22 }
 0xb07   :  { %919 = vrot.lane.b32.xlu1 %v917_v23, %s4541_s28 }
 0xb3a   :  { %v901_v11 = vpop.permute.xlu0 %900 }
 0xb3b   :  { %v5216_v7 = vmul.f32 %v901_v11, %v5210_v20 }
 0xb3d   :  { %v906_v15 = vadd.f32 %v905_v10, %v5216_v7 }
 0xb42   :  { %v936_v17 = vpop.permute.xlu0 %935 }
 0xb43   :  { %v938_v26 = vmul.f32 %v936_v17, %v5196_v9 }
 0xb45   :  { %v939_v27 = vadd.f32 %v938_v26, %v934_v18 }
 0xb47   :  { %941 = vrot.lane.b32.xlu0 %v939_v27, %s4541_s28 }
 0xb79   :  { %v920_v13 = vpop.permute.xlu1 %919 }
 0xb7a   :  { %v5222_v31 = vsel %vm395_vm15, %v906_v15, %v920_v13 }
 0xb7b   :  { %4119 = vmatmul.msk.f32.vlgmr.msrb.gmra.mxu0 %vm247_vm1, %v5222_v31  ;;  %4120 = vmatmul.msk.f32.vlgmr.msra.gmra.mxu1 %vm247_vm1, %v5222_v31 }
 0xbb9   :  { %v942_v4 = vpop.permute.xlu0 %941 }
 0xbba   :  { %v5232_v47 = vsel %vm395_vm15, %v929_v41, %v942_v4 }
 0xbbb   :  { %1039 = vrot.lane.b32.xlu0 %v5232_v47, %s4541_s28 }
 0xbf8   :  { %v965_v50 = vpop.f32.mrf.mxu0  ;;  %v985_v53 = vpop.f32.mrf.mxu1 }
 0xbf9   :  { %v988_v57 = vadd.f32 %v965_v50, %v195_v43  ;;  %v989_v61 = vadd.f32 %v985_v53, %v4890_v38 }
 0xbfb   :  { %v990_v1 = vmul.f32 2.0, %v988_v57  ;;  %v991_v3 = vmul.f32 2.0, %v989_v61 }
 0xbfd   :  { %v992_v25 = vsel %vm4900_vm3, %v990_v1, %v988_v57  ;;  %v993_v8 = vsel %vm4915_vm6, %v991_v3, %v989_v61 }
 0xbfe   :  { %v4121_v14 = vmul.f32 -1.442695, %v992_v25  ;;  %v4122_v16 = vmul.f32 -1.442695, %v993_v8 }
 0xc00   :  { %4308 = vpow2.f32 %v4121_v14 }
 0xc01   :  { %4310 = vpow2.f32 %v4122_v16 }
 0xc06   :  { %v4309_v19 = vpop.eup %4308 }
 0xc07   :  { %v4311_v23 = vpop.eup %4310  ;;  %v1000_v11 = vadd.f32 1.0, %v4309_v19 }
 0xc08   :  { %v1001_v12 = vadd.f32 1.0, %v4311_v23 }
 0xc09   :  { %4312 = vrcp.f32 %v1000_v11  ;;  %vm1007_vm8 = vweird.f32 %v1000_v11  ;;  %v1013_v41 = vand.u32 2147483648, %v1000_v11  ;;  %v1011_v49 = vand.u32 2147483647, %v1000_v11 }
 0xc0a   :  { %4314 = vrcp.f32 %v1001_v12  ;;  %v1028_v15 = vand.u32 2147483648, %v1001_v12  ;;  %v1026_v37 = vand.u32 2147483647, %v1001_v12  ;;  %vm1022_vm9 = vweird.f32 %v1001_v12 }
 0xc0b   :  { %v1014_v61 = vor.u32 1.1754944e-38, %v1013_v41  ;;  %vm1012_vm13 = vcmp.eq.f32.partialorder %v1011_v49, 8.507059e+37 }
 0xc0c   :  { %v1029_v43 = vor.u32 1.1754944e-38, %v1028_v15  ;;  %vm1027_vm12 = vcmp.eq.f32.partialorder %v1026_v37, 8.507059e+37 }
 0xc0f   :  { %v4313_v17 = vpop.eup %4312 }
 0xc10   :  { %v4315_v38 = vpop.eup %4314  ;;  %v1003_v18 = vmul.f32 %v4313_v17, %v1000_v11  ;;  %vm1008_vm5 = vweird.f32 %v4313_v17 }
 0xc11   :  { %v1018_v26 = vmul.f32 %v4315_v38, %v1001_v12  ;;  %vm1023_vm7 = vweird.f32 %v4315_v38  ;;  %vm1009_vm10 = vmor %vm1007_vm8, %vm1008_vm5 }
 0xc12   :  { %v1004_v27 = vsub.f32 1.0, %v1003_v18  ;;  %vm1024_vm11 = vmor %vm1022_vm9, %vm1023_vm7 }
 0xc13   :  { %v1019_v10 = vsub.f32 1.0, %v1018_v26 }
 0xc14   :  { %v1005_v13 = vmul.f32 %v4313_v17, %v1004_v27 }
 0xc15   :  { %v1020_v33 = vmul.f32 %v4315_v38, %v1019_v10 }
 0xc16   :  { %v1006_v40 = vadd.f32 %v4313_v17, %v1005_v13 }
 0xc17   :  { %v1021_v4 = vadd.f32 %v4315_v38, %v1020_v33 }
 0xc18   :  { %v1010_v53 = vsel %vm1009_vm10, %v4313_v17, %v1006_v40 }
 0xc19   :  { %v1025_v50 = vsel %vm1024_vm11, %v4315_v38, %v1021_v4  ;;  %v1015_v3 = vsel %vm1012_vm13, %v1014_v61, %v1010_v53 }
 0xc1a   :  { %v1030_v57 = vsel %vm1027_vm12, %v1029_v43, %v1025_v50  ;;  %v1032_v14 = vmul.f32 2.0, %v1015_v3 }
 0xc1b   :  { %v1033_v1 = vmul.f32 2.0, %v1030_v57 }
 0xc1c   :  { %v4123_v16 = vadd.f32 -1.0, %v1032_v14 }
 0xc1d   :  { %v4124_v25 = vadd.f32 -1.0, %v1033_v1 }
 0xc1e   :  { %v1036_v19 = vsel %vm4900_vm3, %v4123_v16, %v1015_v3 }
 0xc1f   :  { %v1037_v8 = vsel %vm4915_vm6, %v4124_v25, %v1030_v57 }
 0xc20   :  { %1061 = vrot.lane.b32.xlu1 %v1037_v8, %s4540_s27  ;;  %v1059_v38 = vmul.f32 %v1037_v8, %v5232_v47 }
 0xc28   :  { %1044 = vrot.lane.b32.xlu1 %v1036_v19, %s4540_s27 }
 0xc2d   :  { %v1040_v10 = vpop.permute.xlu0 %1039 }
 0xc2e   :  { %v1042_v15 = vmul.f32 %v1040_v10, %v1036_v19  ;;  %v198_v10 = vadd.f32 %v4874_v29, %v4892_v39 }
 0xc92   :  { %v1062_v23 = vpop.permute.xlu1 %1061 }
 0xc93   :  { %v1064_v11 = vmul.f32 %v1062_v23, %v1037_v8  ;;  %v1081_v23 = vmul.f32 %v5222_v31, %v5196_v9 }
 0xc95   :  { %1066 = vrot.lane.b32.xlu2 %v1064_v11, %s4541_s28 }
 0xc9a   :  { %v1045_v12 = vpop.permute.xlu1 %1044 }
 0xc9b   :  { %v1047_v17 = vmul.f32 %v1045_v12, %v1036_v19 }
 0xc9d   :  { %1049 = vrot.lane.b32.xlu1 %v1047_v17, %s4541_s28 }
 0xcef   :  { %v1067_v18 = vpop.permute.xlu2 %1066 }
 0xcf0   :  { %v1069_v26 = vadd.f32 %v1067_v18, %v1059_v38  ;;  %v1103_v18 = vmul.f32 %v5232_v47, %v5196_v9 }
 0xcf2   :  { %4316 = vtanh.f32 %v1069_v26 }
 0xcf8   :  { %v4317_v27 = vpop.eup %4316 }
 0xcf9   :  { %1072 = vrot.lane.b32.xlu2 %v4317_v27, %s4540_s27 }
 0xd01   :  { %1088 = vrot.lane.b32.xlu2 %v5222_v31, %s4542_s1 }
 0xd09   :  { %1106 = vrot.lane.b32.xlu2 %v1069_v26, %s4542_s1 }
 0xd0f   :  { %v1050_v13 = vpop.permute.xlu1 %1049 }
 0xd10   :  { %v1052_v33 = vadd.f32 %v1050_v13, %v1042_v15 }
 0xd12   :  { %4318 = vtanh.f32 %v1052_v33  ;;  %1099 = vrot.lane.b32.xlu2 %v1052_v33, %s4542_s1 }
 0xd18   :  { %v4319_v37 = vpop.eup %4318 }
 0xd19   :  { %1055 = vrot.lane.b32.xlu0 %v4319_v37, %s4540_s27 }
 0xd53   :  { %v1073_v40 = vpop.permute.xlu2 %1072 }
 0xd54   :  { %v1075_v41 = vmul.f32 %v1073_v40, %v1037_v8 }
 0xd56   :  { %1084 = vrot.lane.b32.xlu1 %v1075_v41, %s4541_s28 }
 0xd5b   :  { %v1089_v43 = vpop.permute.xlu2 %1088 }
 0xd5c   :  { %v1091_v53 = vmul.f32 %v1089_v43, %v5213_v63 }
 0xd63   :  { %v1107_v3 = vpop.permute.xlu2 %1106 }
 0xd64   :  { %v1109_v8 = vmul.f32 %v1107_v3, %v5210_v20 }
 0xd8b   :  { %v1056_v4 = vpop.permute.xlu0 %1055 }
 0xd8c   :  { %v1058_v49 = vmul.f32 %v1056_v4, %v1036_v19 }
 0xd8e   :  { %1077 = vrot.lane.b32.xlu0 %v1058_v49, %s4541_s28 }
 0xd96   :  { %1110 = vrot.lane.b32.xlu0 %v5232_v47, %s4542_s1 }
 0xdc8   :  { %v1085_v50 = vpop.permute.xlu1 %1084 }
 0xdc9   :  { %v5263_v57 = vmul.f32 %v1085_v50, %v5210_v20  ;;  %v1100_v20 = vpop.permute.xlu2 %1099 }
 0xdca   :  { %v1102_v38 = vmul.f32 %v1100_v20, %v5193_v6 }
 0xdcb   :  { %v1092_v61 = vadd.f32 %v1091_v53, %v5263_v57 }
 0xdcc   :  { %v1104_v26 = vadd.f32 %v1103_v18, %v1102_v38 }
 0xdcd   :  { %1094 = vrot.lane.b32.xlu1 %v1092_v61, %s4541_s28 }
 0xe00   :  { %v1078_v1 = vpop.permute.xlu0 %1077 }
 0xe01   :  { %v5271_v19 = vmul.f32 %v1078_v1, %v5193_v6 }
 0xe03   :  { %v1082_v11 = vadd.f32 %v1081_v23, %v5271_v19 }
 0xe08   :  { %v1111_v25 = vpop.permute.xlu0 %1110 }
 0xe09   :  { %v1113_v14 = vmul.f32 %v1111_v25, %v5213_v63 }
 0xe0b   :  { %v1114_v16 = vadd.f32 %v1113_v14, %v1109_v8 }
 0xe0d   :  { %1116 = vrot.lane.b32.xlu0 %v1114_v16, %s4541_s28 }
 0xe3f   :  { %v1095_v12 = vpop.permute.xlu1 %1094 }
 0xe40   :  { %v5277_v17 = vsel %vm395_vm15, %v1082_v11, %v1095_v12 }
 0xe41   :  { %4125 = vmatmul.msk.f32.vlgmr.msra.gmra.mxu2 %vm247_vm1, %v5277_v17  ;;  %4126 = vmatmul.msk.f32.vlgmr.msrb.gmra.mxu3 %vm247_vm1, %v5277_v17 }
 0xe7f   :  { %v1117_v31 = vpop.permute.xlu0 %1116 }
 0xe80   :  { %v5287_v27 = vsel %vm395_vm15, %v1104_v26, %v1117_v31 }
 0xe81   :  { %1214 = vrot.lane.b32.xlu0 %v5287_v27, %s4541_s28 }
 0xec4   :  { %v1140_v15 = vpop.f32.mrf.mxu2  ;;  %v1160_v13 = vpop.f32.mrf.mxu3 }
 0xec5   :  { %v1163_v33 = vadd.f32 %v1140_v15, %v198_v10  ;;  %v1164_v37 = vadd.f32 %v1160_v13, %v4887_v36 }
 0xec7   :  { %v1165_v6 = vmul.f32 2.0, %v1163_v33  ;;  %v1166_v40 = vmul.f32 2.0, %v1164_v37 }
 0xec9   :  { %v1167_v47 = vsel %vm4900_vm3, %v1165_v6, %v1163_v33  ;;  %v1168_v41 = vsel %vm4915_vm6, %v1166_v40, %v1164_v37 }
 0xeca   :  { %v4127_v4 = vmul.f32 -1.442695, %v1167_v47  ;;  %v4128_v49 = vmul.f32 -1.442695, %v1168_v41 }
 0xecc   :  { %4320 = vpow2.f32 %v4127_v4 }
 0xecd   :  { %4322 = vpow2.f32 %v4128_v49 }
 0xed2   :  { %v4321_v43 = vpop.eup %4320 }
 0xed3   :  { %v4323_v50 = vpop.eup %4322  ;;  %v1175_v29 = vadd.f32 1.0, %v4321_v43 }
 0xed4   :  { %v1176_v53 = vadd.f32 1.0, %v4323_v50 }
 0xed5   :  { %4324 = vrcp.f32 %v1175_v29  ;;  %vm1182_vm4 = vweird.f32 %v1175_v29  ;;  %v1188_v20 = vand.u32 2147483648, %v1175_v29  ;;  %v1186_v18 = vand.u32 2147483647, %v1175_v29 }
 0xed6   :  { %4326 = vrcp.f32 %v1176_v53  ;;  %v1203_v14 = vand.u32 2147483648, %v1176_v53  ;;  %v1201_v11 = vand.u32 2147483647, %v1176_v53  ;;  %vm1197_vm5 = vweird.f32 %v1176_v53 }
 0xed7   :  { %v1189_v13 = vor.u32 1.1754944e-38, %v1188_v20  ;;  %vm1187_vm10 = vcmp.eq.f32.partialorder %v1186_v18, 8.507059e+37 }
 0xed8   :  { %v1204_v26 = vor.u32 1.1754944e-38, %v1203_v14  ;;  %vm1202_vm9 = vcmp.eq.f32.partialorder %v1201_v11, 8.507059e+37 }
 0xedb   :  { %v4325_v61 = vpop.eup %4324 }
 0xedc   :  { %v4327_v36 = vpop.eup %4326  ;;  %v1178_v1 = vmul.f32 %v4325_v61, %v1175_v29  ;;  %vm1183_vm14 = vweird.f32 %v4325_v61 }
 0xedd   :  { %v1193_v3 = vmul.f32 %v4327_v36, %v1176_v53  ;;  %vm1198_vm2 = vweird.f32 %v4327_v36  ;;  %vm1184_vm7 = vmor %vm1182_vm4, %vm1183_vm14 }
 0xede   :  { %v1179_v25 = vsub.f32 1.0, %v1178_v1  ;;  %vm1199_vm8 = vmor %vm1197_vm5, %vm1198_vm2 }
 0xedf   :  { %v1194_v8 = vsub.f32 1.0, %v1193_v3 }
 0xee0   :  { %v1180_v16 = vmul.f32 %v4325_v61, %v1179_v25 }
 0xee1   :  { %v1195_v23 = vmul.f32 %v4327_v36, %v1194_v8 }
 0xee2   :  { %v1181_v12 = vadd.f32 %v4325_v61, %v1180_v16 }
 0xee3   :  { %v1196_v38 = vadd.f32 %v4327_v36, %v1195_v23 }
 0xee4   :  { %v1185_v10 = vsel %vm1184_vm7, %v4325_v61, %v1181_v12 }
 0xee5   :  { %v1200_v31 = vsel %vm1199_vm8, %v4327_v36, %v1196_v38  ;;  %v1190_v37 = vsel %vm1187_vm10, %v1189_v13, %v1185_v10 }
 0xee6   :  { %v1205_v15 = vsel %vm1202_vm9, %v1204_v26, %v1200_v31  ;;  %v1207_v47 = vmul.f32 2.0, %v1190_v37 }
 0xee7   :  { %v1208_v33 = vmul.f32 2.0, %v1205_v15 }
 0xee8   :  { %v4129_v41 = vadd.f32 -1.0, %v1207_v47 }
 0xee9   :  { %v4130_v6 = vadd.f32 -1.0, %v1208_v33 }
 0xeea   :  { %v1211_v4 = vsel %vm4900_vm3, %v4129_v41, %v1190_v37  ;;  %v1256_v41 = vmul.f32 %v5277_v17, %v5099_v28 }
 0xeeb   :  { %v1212_v40 = vsel %vm4915_vm6, %v4130_v6, %v1205_v15 }
 0xeec   :  { %1236 = vrot.lane.b32.xlu1 %v1212_v40, %s4540_s27  ;;  %v1234_v53 = vmul.f32 %v1212_v40, %v5287_v27 }
 0xef3   :  { %v1215_v3 = vpop.permute.xlu0 %1214 }
 0xef4   :  { %1219 = vrot.lane.b32.xlu1 %v1211_v4, %s4540_s27  ;;  %v1217_v25 = vmul.f32 %v1215_v3, %v1211_v4 }
 0xf5e   :  { %v1237_v49 = vpop.permute.xlu1 %1236 }
 0xf5f   :  { %v1239_v43 = vmul.f32 %v1237_v49, %v1212_v40 }
 0xf61   :  { %1241 = vrot.lane.b32.xlu2 %v1239_v43, %s4541_s28 }
 0xf66   :  { %v1220_v50 = vpop.permute.xlu1 %1219 }
 0xf67   :  { %v1222_v29 = vmul.f32 %v1220_v50, %v1211_v4 }
 0xf69   :  { %1224 = vrot.lane.b32.xlu1 %v1222_v29, %s4541_s28  ;;  %v1278_v29 = vmul.f32 %v5287_v27, %v5099_v28 }
 0xfbb   :  { %v1242_v61 = vpop.permute.xlu2 %1241 }
 0xfbc   :  { %v1244_v36 = vadd.f32 %v1242_v61, %v1234_v53 }
 0xfbe   :  { %4328 = vtanh.f32 %v1244_v36 }
 0xfc4   :  { %v4329_v1 = vpop.eup %4328 }
 0xfc5   :  { %1247 = vrot.lane.b32.xlu2 %v4329_v1, %s4540_s27 }
 0xfcd   :  { %1263 = vrot.lane.b32.xlu2 %v5277_v17, %s4542_s1 }
 0xfd5   :  { %1281 = vrot.lane.b32.xlu2 %v1244_v36, %s4542_s1  ;;  %v201_v36 = vadd.f32 %v4898_v48, %v4892_v39 }
 0xfdb   :  { %v1225_v8 = vpop.permute.xlu1 %1224 }
 0xfdc   :  { %v1227_v14 = vadd.f32 %v1225_v8, %v1217_v25 }
 0xfde   :  { %4330 = vtanh.f32 %v1227_v14  ;;  %1274 = vrot.lane.b32.xlu2 %v1227_v14, %s4542_s1 }
 0xfe4   :  { %v4331_v16 = vpop.eup %4330 }
 0xfe5   :  { %1230 = vrot.lane.b32.xlu0 %v4331_v16, %s4540_s27 }
0x101f   :  { %v1248_v23 = vpop.permute.xlu2 %1247 }
0x1020   :  { %v1250_v11 = vmul.f32 %v1248_v23, %v1212_v40 }
0x1022   :  { %1259 = vrot.lane.b32.xlu1 %v1250_v11, %s4541_s28 }
0x1027   :  { %v1264_v38 = vpop.permute.xlu2 %1263 }
0x1028   :  { %v1266_v26 = vmul.f32 %v1264_v38, %v5116_v52 }
0x102f   :  { %v1282_v13 = vpop.permute.xlu2 %1281 }
0x1030   :  { %v1284_v37 = vmul.f32 %v1282_v13, %v5113_v55 }
0x1057   :  { %v1231_v12 = vpop.permute.xlu0 %1230 }
0x1058   :  { %v1233_v20 = vmul.f32 %v1231_v12, %v1211_v4 }
0x105a   :  { %1252 = vrot.lane.b32.xlu0 %v1233_v20, %s4541_s28 }
0x1062   :  { %1285 = vrot.lane.b32.xlu0 %v5287_v27, %s4542_s1 }
0x1094   :  { %v1260_v18 = vpop.permute.xlu1 %1259 }
0x1095   :  { %v5319_v31 = vmul.f32 %v1260_v18, %v5113_v55  ;;  %v1275_v55 = vpop.permute.xlu2 %1274 }
0x1096   :  { %v1277_v50 = vmul.f32 %v1275_v55, %v5096_v21 }
0x1097   :  { %v1267_v10 = vadd.f32 %v1266_v26, %v5319_v31 }
0x1098   :  { %v1279_v53 = vadd.f32 %v1278_v29, %v1277_v50 }
0x1099   :  { %1269 = vrot.lane.b32.xlu1 %v1267_v10, %s4541_s28 }
0x10cc   :  { %v1253_v15 = vpop.permute.xlu0 %1252 }
0x10cd   :  { %v5327_v47 = vmul.f32 %v1253_v15, %v5096_v21 }
0x10cf   :  { %v1257_v4 = vadd.f32 %v1256_v41, %v5327_v47 }
0x10d4   :  { %v1286_v33 = vpop.permute.xlu0 %1285 }
0x10d5   :  { %v1288_v6 = vmul.f32 %v1286_v33, %v5116_v52 }
0x10d7   :  { %v1289_v40 = vadd.f32 %v1288_v6, %v1284_v37 }
0x10d9   :  { %1291 = vrot.lane.b32.xlu0 %v1289_v40, %s4541_s28 }
0x110b   :  { %v1270_v49 = vpop.permute.xlu1 %1269 }
0x110c   :  { %v5333_v43 = vsel %vm395_vm15, %v1257_v4, %v1270_v49 }
0x110d   :  { %4131 = vmatmul.msk.f32.vlgmr.msra.gmra.mxu0 %vm247_vm1, %v5333_v43  ;;  %4132 = vmatmul.msk.f32.vlgmr.msrb.gmra.mxu1 %vm247_vm1, %v5333_v43 }
0x114b   :  { %v1292_v17 = vpop.permute.xlu0 %1291 }
0x114c   :  { %v5343_v61 = vsel %vm395_vm15, %v1279_v53, %v1292_v17 }
0x114d   :  { %1389 = vrot.lane.b32.xlu0 %v5343_v61, %s4541_s28 }
0x118a   :  { %v1315_v1 = vpop.f32.mrf.mxu0  ;;  %v1335_v3 = vpop.f32.mrf.mxu1 }
0x118b   :  { %v1338_v25 = vadd.f32 %v1315_v1, %v201_v36  ;;  %v1339_v8 = vadd.f32 %v1335_v3, %v4884_v34 }
0x118d   :  { %v1340_v21 = vmul.f32 2.0, %v1338_v25  ;;  %v1341_v14 = vmul.f32 2.0, %v1339_v8 }
0x118f   :  { %v1342_v27 = vsel %vm4900_vm3, %v1340_v21, %v1338_v25  ;;  %v1343_v16 = vsel %vm4915_vm6, %v1341_v14, %v1339_v8 }
0x1190   :  { %v4133_v23 = vmul.f32 -1.442695, %v1342_v27  ;;  %v4134_v11 = vmul.f32 -1.442695, %v1343_v16 }
0x1192   :  { %4332 = vpow2.f32 %v4133_v23 }
0x1193   :  { %4334 = vpow2.f32 %v4134_v11 }
0x1198   :  { %v4333_v12 = vpop.eup %4332 }
0x1199   :  { %v4335_v20 = vpop.eup %4334  ;;  %v1350_v48 = vadd.f32 1.0, %v4333_v12 }
0x119a   :  { %v1351_v38 = vadd.f32 1.0, %v4335_v20 }
0x119b   :  { %4336 = vrcp.f32 %v1350_v48  ;;  %vm1357_vm13 = vweird.f32 %v1350_v48  ;;  %v1363_v4 = vand.u32 2147483648, %v1350_v48  ;;  %v1361_v55 = vand.u32 2147483647, %v1350_v48 }
0x119c   :  { %4338 = vrcp.f32 %v1351_v38  ;;  %v1378_v33 = vand.u32 2147483648, %v1351_v38  ;;  %v1376_v40 = vand.u32 2147483647, %v1351_v38  ;;  %vm1372_vm14 = vweird.f32 %v1351_v38 }
0x119d   :  { %v1364_v36 = vor.u32 1.1754944e-38, %v1363_v4  ;;  %vm1362_vm7 = vcmp.eq.f32.partialorder %v1361_v55, 8.507059e+37  ;;  %v4517_v55 = vld [vmem:[%s6588_s3 + $0x8] sm:$0xff] }
0x119e   :  { %v1379_v50 = vor.u32 1.1754944e-38, %v1378_v33  ;;  %vm1377_vm5 = vcmp.eq.f32.partialorder %v1376_v40, 8.507059e+37 }
0x11a1   :  { %v4337_v18 = vpop.eup %4336 }
0x11a2   :  { %v4339_v34 = vpop.eup %4338  ;;  %v1353_v26 = vmul.f32 %v4337_v18, %v1350_v48  ;;  %vm1358_vm11 = vweird.f32 %v4337_v18 }
0x11a3   :  { %v1368_v10 = vmul.f32 %v4339_v34, %v1351_v38  ;;  %vm1373_vm12 = vweird.f32 %v4339_v34  ;;  %vm1359_vm2 = vmor %vm1357_vm13, %vm1358_vm11 }
0x11a4   :  { %v1354_v15 = vsub.f32 1.0, %v1353_v26  ;;  %vm1374_vm4 = vmor %vm1372_vm14, %vm1373_vm12 }
0x11a5   :  { %v1369_v13 = vsub.f32 1.0, %v1368_v10 }
0x11a6   :  { %v1355_v37 = vmul.f32 %v4337_v18, %v1354_v15 }
0x11a7   :  { %v1370_v6 = vmul.f32 %v4339_v34, %v1369_v13 }
0x11a8   :  { %v1356_v41 = vadd.f32 %v4337_v18, %v1355_v37 }
0x11a9   :  { %v1371_v49 = vadd.f32 %v4339_v34, %v1370_v6 }
0x11aa   :  { %v1360_v53 = vsel %vm1359_vm2, %v4337_v18, %v1356_v41 }
0x11ab   :  { %v1375_v29 = vsel %vm1374_vm4, %v4339_v34, %v1371_v49  ;;  %v1365_v3 = vsel %vm1362_vm7, %v1364_v36, %v1360_v53 }
0x11ac   :  { %v1380_v17 = vsel %vm1377_vm5, %v1379_v50, %v1375_v29  ;;  %v1382_v21 = vmul.f32 2.0, %v1365_v3 }
0x11ad   :  { %v1383_v1 = vmul.f32 2.0, %v1380_v17 }
0x11ae   :  { %v4135_v14 = vadd.f32 -1.0, %v1382_v21 }
0x11af   :  { %v4136_v25 = vadd.f32 -1.0, %v1383_v1 }
0x11b0   :  { %v1386_v27 = vsel %vm4900_vm3, %v4135_v14, %v1365_v3  ;;  %v1431_v14 = vmul.f32 %v5333_v43, %v5019_v35 }
0x11b1   :  { %v1387_v8 = vsel %vm4915_vm6, %v4136_v25, %v1380_v17 }
0x11b2   :  { %1411 = vrot.lane.b32.xlu1 %v1387_v8, %s4540_s27  ;;  %v1409_v20 = vmul.f32 %v1387_v8, %v5343_v61 }
0x11ba   :  { %1394 = vrot.lane.b32.xlu1 %v1386_v27, %s4540_s27 }
0x11bf   :  { %v1390_v34 = vpop.permute.xlu0 %1389 }
0x11c0   :  { %v1392_v26 = vmul.f32 %v1390_v34, %v1386_v27 }
0x1224   :  { %v1412_v16 = vpop.permute.xlu1 %1411 }
0x1225   :  { %v1414_v23 = vmul.f32 %v1412_v16, %v1387_v8 }
0x1227   :  { %1416 = vrot.lane.b32.xlu2 %v1414_v23, %s4541_s28 }
0x122c   :  { %v1395_v11 = vpop.permute.xlu1 %1394 }
0x122d   :  { %v1397_v12 = vmul.f32 %v1395_v11, %v1386_v27  ;;  %v224_v11 = vadd.f32 %v4876_v30, %v4881_v32 }
0x122f   :  { %1399 = vrot.lane.b32.xlu1 %v1397_v12, %s4541_s28  ;;  %v204_v12 = vadd.f32 %v4909_v54, %v4892_v39 }
0x1281   :  { %v1417_v48 = vpop.permute.xlu2 %1416 }
0x1282   :  { %v1419_v38 = vadd.f32 %v1417_v48, %v1409_v20 }
0x1284   :  { %4340 = vtanh.f32 %v1419_v38 }
0x128a   :  { %v4341_v18 = vpop.eup %4340 }
0x128b   :  { %1422 = vrot.lane.b32.xlu2 %v4341_v18, %s4540_s27 }
0x1293   :  { %1438 = vrot.lane.b32.xlu2 %v5333_v43, %s4542_s1 }
0x129b   :  { %1456 = vrot.lane.b32.xlu2 %v1419_v38, %s4542_s1 }
0x12a1   :  { %v1400_v10 = vpop.permute.xlu1 %1399 }
0x12a2   :  { %v1402_v15 = vadd.f32 %v1400_v10, %v1392_v26 }
0x12a4   :  { %4342 = vtanh.f32 %v1402_v15  ;;  %1449 = vrot.lane.b32.xlu2 %v1402_v15, %s4542_s1 }
0x12aa   :  { %v4343_v13 = vpop.eup %4342 }
0x12ab   :  { %1405 = vrot.lane.b32.xlu0 %v4343_v13, %s4540_s27 }
0x12e5   :  { %v1423_v33 = vpop.permute.xlu2 %1422 }
0x12e6   :  { %v1425_v37 = vmul.f32 %v1423_v33, %v1387_v8  ;;  %v5386_v8 = vld [vmem:[%s6588_s3 + $0x30] sm:$0xff] }
0x12e8   :  { %1434 = vrot.lane.b32.xlu1 %v1425_v37, %s4541_s28 }
0x12ed   :  { %v1439_v41 = vpop.permute.xlu2 %1438 }
0x12ee   :  { %v1441_v49 = vmul.f32 %v1439_v41, %v5031_v62 }
0x12f5   :  { %v1457_v17 = vpop.permute.xlu2 %1456 }
0x12f6   :  { %v1459_v1 = vmul.f32 %v4517_v55, %v1457_v17 }
0x131d   :  { %v1406_v6 = vpop.permute.xlu0 %1405 }
0x131e   :  { %v1408_v40 = vmul.f32 %v1406_v6, %v1386_v27 }
0x1320   :  { %1427 = vrot.lane.b32.xlu0 %v1408_v40, %s4541_s28 }
0x1328   :  { %1460 = vrot.lane.b32.xlu0 %v5343_v61, %s4542_s1 }
0x135a   :  { %v1435_v4 = vpop.permute.xlu1 %1434 }
0x135b   :  { %v5377_v50 = vmul.f32 %v4517_v55, %v1435_v4 }
0x135d   :  { %v1442_v29 = vadd.f32 %v1441_v49, %v5377_v50 }
0x135f   :  { %1444 = vrot.lane.b32.xlu1 %v1442_v29, %s4541_s28 }
0x1392   :  { %v1428_v53 = vpop.permute.xlu0 %1427 }
0x1393   :  { %v5389_v21 = vmul.f32 %v5386_v8, %v1428_v53 }
0x1395   :  { %v1432_v27 = vadd.f32 %v1431_v14, %v5389_v21 }
0x139a   :  { %v1461_v36 = vpop.permute.xlu0 %1460 }
0x139b   :  { %v1463_v3 = vmul.f32 %v1461_v36, %v5031_v62 }
0x139d   :  { %v1464_v25 = vadd.f32 %v1463_v3, %v1459_v1 }
0x139f   :  { %1466 = vrot.lane.b32.xlu0 %v1464_v25, %s4541_s28 }
0x13d1   :  { %v1445_v16 = vpop.permute.xlu1 %1444 }
0x13d2   :  { %v1447_v23 = vsel %vm395_vm15, %v1432_v27, %v1445_v16 }
0x13d3   :  { %4137 = vmatmul.msk.f32.vlgmr.msrb.gmra.mxu2 %vm247_vm1, %v1447_v23  ;;  %4138 = vmatmul.msk.f32.vlgmr.msra.gmra.mxu3 %vm247_vm1, %v1447_v23 }
0x1456   :  { %v1490_v20 = vpop.f32.mrf.mxu2  ;;  %v1510_v48 = vpop.f32.mrf.mxu3 }
0x1457   :  { %v1513_v38 = vadd.f32 %v1490_v20, %v204_v12  ;;  %v1514_v18 = vadd.f32 %v1510_v48, %v224_v11 }
0x1459   :  { %v1515_v43 = vmul.f32 2.0, %v1513_v38  ;;  %v1516_v34 = vmul.f32 2.0, %v1514_v18 }
0x145b   :  { %v1517_v26 = vsel %vm4900_vm3, %v1515_v43, %v1513_v38  ;;  %v1518_v10 = vsel %vm4915_vm6, %v1516_v34, %v1514_v18  ;;  %v1467_v34 = vpop.permute.xlu0 %1466 }
0x145c   :  { %v4139_v15 = vmul.f32 -1.442695, %v1517_v26  ;;  %v4140_v13 = vmul.f32 -1.442695, %v1518_v10 }
0x145e   :  { %4344 = vpow2.f32 %v4139_v15 }
0x145f   :  { %4346 = vpow2.f32 %v4140_v13 }
0x1464   :  { %v4345_v30 = vpop.eup %4344 }
0x1465   :  { %v4347_v32 = vpop.eup %4346  ;;  %v1525_v33 = vadd.f32 1.0, %v4345_v30  ;;  %v1450_v30 = vpop.permute.xlu2 %1449 }
0x1466   :  { %v1526_v39 = vadd.f32 1.0, %v4347_v32  ;;  %v1452_v32 = vmul.f32 %v5386_v8, %v1450_v30  ;;  %v1654_v30 = vld [vmem:[%s6556_s6 + $0x18] sm:$0xff] }
0x1467   :  { %4348 = vrcp.f32 %v1525_v33  ;;  %v1538_v49 = vand.u32 2147483648, %v1525_v33  ;;  %v1536_v53 = vand.u32 2147483647, %v1525_v33  ;;  %vm1532_vm10 = vweird.f32 %v1525_v33 }
0x1468   :  { %4350 = vrcp.f32 %v1526_v39  ;;  %v1553_v55 = vand.u32 2147483648, %v1526_v39  ;;  %v1551_v36 = vand.u32 2147483647, %v1526_v39  ;;  %vm1547_vm11 = vweird.f32 %v1526_v39 }
0x1469   :  { %v1539_v25 = vor.u32 1.1754944e-38, %v1538_v49  ;;  %vm1537_vm14 = vcmp.eq.f32.partialorder %v1536_v53, 8.507059e+37 }
0x146a   :  { %v1554_v14 = vor.u32 1.1754944e-38, %v1553_v55  ;;  %vm1552_vm2 = vcmp.eq.f32.partialorder %v1551_v36, 8.507059e+37  ;;  %v1663_v36 = vld [vmem:[%s6556_s6 + $0x60] sm:$0xff] }
0x146d   :  { %v4349_v54 = vpop.eup %4348 }
0x146e   :  { %v4351_v37 = vpop.eup %4350  ;;  %v1528_v6 = vmul.f32 %v4349_v54, %v1525_v33  ;;  %vm1533_vm8 = vweird.f32 %v4349_v54  ;;  %v1453_v33 = vmul.f32 %v5343_v61, %v5019_v35 }
0x146f   :  { %v1543_v40 = vmul.f32 %v4351_v37, %v1526_v39  ;;  %vm1548_vm9 = vweird.f32 %v4351_v37  ;;  %vm1534_vm12 = vmor %vm1532_vm10, %vm1533_vm8 }
0x1470   :  { %v1529_v41 = vsub.f32 1.0, %v1528_v6  ;;  %vm1549_vm13 = vmor %vm1547_vm11, %vm1548_vm9  ;;  %v1454_v39 = vadd.f32 %v1453_v33, %v1452_v32  ;;  %v5527_v32 = vld [vmem:[%s6555_s7] sm:$0xff] }
0x1471   :  { %v1544_v4 = vsub.f32 1.0, %v1543_v40 }
0x1472   :  { %v1530_v29 = vmul.f32 %v4349_v54, %v1529_v41 }
0x1473   :  { %v1545_v17 = vmul.f32 %v4351_v37, %v1544_v4 }
0x1474   :  { %v1531_v1 = vadd.f32 %v4349_v54, %v1530_v29 }
0x1475   :  { %v1546_v3 = vadd.f32 %v4351_v37, %v1545_v17 }
0x1476   :  { %v1535_v27 = vsel %vm1534_vm12, %v4349_v54, %v1531_v1  ;;  %v1469_v54 = vsel %vm395_vm15, %v1454_v39, %v1467_v34  ;;  %v5457_v1 = vld [vmem:[%s6555_s7 + $0x50] sm:$0xff]  ;;  %v5503_v34 = vld [vmem:[%s6555_s7 + $0x20] sm:$0xff] }
0x1477   :  { %v1550_v16 = vsel %vm1549_vm13, %v4351_v37, %v1546_v3  ;;  %v1540_v23 = vsel %vm1537_vm14, %v1539_v25, %v1535_v27  ;;  %v1664_v3 = vld [vmem:[%s6556_s6 + $0x68] sm:$0xff]  ;;  %v1661_v25 = vld [vmem:[%s6556_s6 + $0x50] sm:$0xff]  ;;  %v5472_v27 = vld [vmem:[%s6555_s7 + $0x40] sm:$0xff] }
0x1478   :  { %v1555_v11 = vsel %vm1552_vm2, %v1554_v14, %v1550_v16  ;;  %v1557_v12 = vmul.f32 2.0, %v1540_v23  ;;  %v1662_v14 = vld [vmem:[%s6556_s6 + $0x58] sm:$0xff]  ;;  %v1659_v16 = vld [vmem:[%s6556_s6 + $0x40] sm:$0xff] }
0x1479   :  { %v1558_v20 = vmul.f32 2.0, %v1555_v11 }
0x147a   :  { %v4141_v48 = vadd.f32 -1.0, %v1557_v12  ;;  %v5484_v12 = vld [vmem:[%s6588_s3] sm:$0xff] }
0x147b   :  { %v4142_v38 = vadd.f32 -1.0, %v1558_v20 }
0x147c   :  { %v5407_v18 = vsel %vm4900_vm3, %v4141_v48, %v1540_v23  ;;  %v5490_v48 = vld [vmem:[%s6555_s7 + $0x30] sm:$0xff] }
0x147d   :  { %v1562_v43 = vsel %vm4915_vm6, %v4142_v38, %v1555_v11  ;;  %1569 = vrot.lane.b32.xlu0 %v5407_v18, %s4540_s27  ;;  %v1660_v11 = vld [vmem:[%s6556_s6 + $0x48] sm:$0xff]  ;;  %v1657_v38 = vld [vmem:[%s6556_s6 + $0x30] sm:$0xff] }
0x147e   :  { %1586 = vrot.lane.b32.xlu1 %v1562_v43, %s4540_s27  ;;  %v1584_v37 = vmul.f32 %v1562_v43, %v1469_v54 }
0x14ef   :  { %v1570_v26 = vpop.permute.xlu0 %1569 }
0x14f0   :  { %v1587_v10 = vpop.permute.xlu1 %1586  ;;  %v1572_v15 = vmul.f32 %v1570_v26, %v5407_v18  ;;  %v1655_v26 = vld [vmem:[%s6556_s6 + $0x20] sm:$0xff] }
0x14f1   :  { %v1589_v13 = vmul.f32 %v1587_v10, %v1562_v43  ;;  %v1656_v10 = vld [vmem:[%s6556_s6 + $0x28] sm:$0xff] }
0x14f2   :  { %1574 = vrot.lane.b32.xlu0 %v1572_v15, %s4541_s28  ;;  %v5515_v15 = vld [vmem:[%s6555_s7 + $0x10] sm:$0xff] }
0x14f3   :  { %1591 = vrot.lane.b32.xlu1 %v1589_v13, %s4541_s28  ;;  %v1653_v13 = vld [vmem:[%s6556_s6 + $0x10] sm:$0xff] }
0x1564   :  { %v1575_v29 = vpop.permute.xlu0 %1574 }
0x1565   :  { %v1592_v6 = vpop.permute.xlu1 %1591 }
0x1566   :  { %v1594_v40 = vadd.f32 %v1592_v6, %v1584_v37  ;;  %v5582_v37 = vld [vmem:[%s6555_s7 + $0x68] sm:$0xff] }
0x1568   :  { %4352 = vtanh.f32 %v1594_v40  ;;  %v5598_v40 = vld [vmem:[%s6555_s7 + $0x58] sm:$0xff] }
0x156e   :  { %v4353_v41 = vpop.eup %4352 }
0x156f   :  { %1597 = vrot.lane.b32.xlu2 %v4353_v41, %s4540_s27  ;;  %v5603_v41 = vld [vmem:[%s6555_s7 + $0x48] sm:$0xff] }
0x1577   :  { %1564 = vrot.lane.b32.xlu2 %v1469_v54, %s4541_s28  ;;  %v5577_v54 = vld [vmem:[%s6555_s7 + $0x78] sm:$0xff] }
0x1578   :  { %1823 = vmatpush.msrb.mxu3 %v5577_v54 }
0x157a   :  { %1824 = vmatpush.msrb.mxu3 %v5582_v37 }
0x157c   :  { %1825 = vmatpush.msrb.mxu3 %v5598_v40 }
0x157e   :  { %1826 = vmatpush.msrb.mxu3 %v5603_v41 }
0x157f   :  { %1617 = vrot.lane.b32.xlu2 %v5377_v50, %s4541_s28  ;;  %v1665_v50 = vld [vmem:[%s6556_s6 + $0x70] sm:$0xff] }
0x1580   :  { %1721 = vmatpush.msrb.mxu0 %v1665_v50 }
0x1582   :  { %1722 = vmatpush.msrb.mxu0 %v1663_v36 }
0x1584   :  { %1723 = vmatpush.msrb.mxu0 %v1661_v25 }
0x1586   :  { %1724 = vmatpush.msrb.mxu0 %v1659_v16 }
0x1587   :  { %1627 = vrot.lane.b32.xlu2 %v5263_v57, %s4541_s28  ;;  %v5442_v57 = vld [vmem:[%s6555_s7 + $0x60] sm:$0xff] }
0x1588   :  { %1725 = vmatpush.msrb.mxu0 %v1657_v38 }
0x158a   :  { %1726 = vmatpush.msrb.mxu0 %v1655_v26 }
0x158c   :  { %1727 = vmatpush.msrb.mxu0 %v1653_v13 }
0x158f   :  { %1642 = vrot.lane.b32.xlu2 %v5022_v45, %s4541_s28  ;;  %v5437_v45 = vld [vmem:[%s6555_s7 + $0x70] sm:$0xff] }
0x1590   :  { %1803 = vmatpush.msra.mxu2 %v5437_v45 }
0x1592   :  { %1804 = vmatpush.msra.mxu2 %v5442_v57 }
0x1594   :  { %1805 = vmatpush.msra.mxu2 %v5457_v1 }
0x1596   :  { %1806 = vmatpush.msra.mxu2 %v5472_v27 }
0x1598   :  { %1807 = vmatpush.msra.mxu2 %v5490_v48 }
0x159a   :  { %1808 = vmatpush.msra.mxu2 %v5503_v34 }
0x159c   :  { %1809 = vmatpush.msra.mxu2 %v5515_v15 }
0x159e   :  { %1810 = vmatpush.msra.mxu2 %v5527_v32 }
0x159f   :  { %1811 = vmatmul.f32.vlgmr.msra.gmra.mxu2 %v4539_v24 }
0x15a0   :  { %1964 = vmatpush.msrb.mxu2 %v5437_v45 }
0x15a2   :  { %1965 = vmatpush.msrb.mxu2 %v5442_v57 }
0x15a4   :  { %1966 = vmatpush.msrb.mxu2 %v5457_v1 }
0x15a6   :  { %1967 = vmatpush.msrb.mxu2 %v5472_v27 }
0x15a8   :  { %1968 = vmatpush.msrb.mxu2 %v5490_v48 }
0x15aa   :  { %1969 = vmatpush.msrb.mxu2 %v5503_v34 }
0x15ac   :  { %1970 = vmatpush.msrb.mxu2 %v5515_v15 }
0x15ae   :  { %1971 = vmatpush.msrb.mxu2 %v5527_v32 }
0x15b0   :  { %2139 = vmatpush.msra.mxu2 %v5437_v45 }
0x15b2   :  { %2140 = vmatpush.msra.mxu2 %v5442_v57 }
0x15b4   :  { %2141 = vmatpush.msra.mxu2 %v5457_v1 }
0x15b6   :  { %2142 = vmatpush.msra.mxu2 %v5472_v27 }
0x15b8   :  { %2143 = vmatpush.msra.mxu2 %v5490_v48 }
0x15ba   :  { %2144 = vmatpush.msra.mxu2 %v5503_v34 }
0x15bc   :  { %2145 = vmatpush.msra.mxu2 %v5515_v15 }
0x15be   :  { %2146 = vmatpush.msra.mxu2 %v5527_v32 }
0x15c9   :  { %v1598_v61 = vpop.permute.xlu2 %1597 }
0x15ca   :  { %v1600_v4 = vmul.f32 %v1598_v61, %v1562_v43  ;;  %v1658_v43 = vld [vmem:[%s6556_s6 + $0x38] sm:$0xff] }
0x15cc   :  { %1607 = vrot.lane.b32.xlu1 %v1600_v4, %s4541_s28  ;;  %v5618_v4 = vld [vmem:[%s6555_s7 + $0x28] sm:$0xff] }
0x15d1   :  { %v1565_v49 = vpop.permute.xlu2 %1564 }
0x15d2   :  { %v1567_v55 = vmul.f32 %v1565_v49, %v5407_v18 }
0x15d4   :  { %v1577_v53 = vadd.f32 %v1575_v29, %v1567_v55  ;;  %v5633_v55 = vld [vmem:[%s6555_s7 + $0x18] sm:$0xff]  ;;  %v5638_v29 = vld [vmem:[%s6555_s7 + $0x8] sm:$0xff] }
0x15d6   :  { %4354 = vtanh.f32 %v1577_v53 }
0x15dc   :  { %v4355_v17 = vpop.eup %4354 }
0x15dd   :  { %1580 = vrot.lane.b32.xlu0 %v4355_v17, %s4540_s27 }
0x15e5   :  { %1632 = vrot.lane.b32.xlu0 %v5200_v22, %s4541_s28  ;;  %v1666_v22 = vld [vmem:[%s6556_s6 + $0x78] sm:$0xff] }
0x15e6   :  { %1762 = vmatpush.msra.mxu1 %v1666_v22 }
0x15e8   :  { %1763 = vmatpush.msra.mxu1 %v1664_v3  ;;  %v5690_v3 = vld [vmem:[%s6588_s3 + $0x38] sm:$0xff] }
0x15ea   :  { %1764 = vmatpush.msra.mxu1 %v1662_v14  ;;  %v1683_v14 = vld [vmem:[%s6557_s8] sm:$0x3] }
0x15eb   :  { %v5699_v16 = vperm.slane %v1683_v14, 0 }
0x15ec   :  { %1765 = vmatpush.msra.mxu1 %v1660_v11 }
0x15ee   :  { %1766 = vmatpush.msra.mxu1 %v1658_v43 }
0x15f0   :  { %1767 = vmatpush.msra.mxu1 %v1656_v10 }
0x15f2   :  { %1768 = vmatpush.msra.mxu1 %v1654_v30 }
0x1622   :  { %v1812_v11 = vpop.f32.mrf.mxu2 }
0x163e   :  { %v1608_v23 = vpop.permute.xlu1 %1607 }
0x163f   :  { %v1610_v20 = vmul.f32 %v5484_v12, %v1608_v23  ;;  %v1686_v23 = vperm.slane %v1683_v14, 1 }
0x1641   :  { %1612 = vrot.lane.b32.xlu1 %v1610_v20, %s4541_s28 }
0x1649   :  { %1622 = vrot.lane.b32.xlu1 %v5319_v31, %s4541_s28 }
0x164f   :  { %v1581_v33 = vpop.permute.xlu0 %1580 }
0x1650   :  { %v1583_v39 = vmul.f32 %v1581_v33, %v5407_v18 }
0x1651   :  { %1637 = vrot.lane.b32.xlu1 %v5103_v5, %s4541_s28  ;;  %v1652_v5 = vld [vmem:[%s6556_s6 + $0x8] sm:$0xff] }
0x1652   :  { %1602 = vrot.lane.b32.xlu0 %v1583_v39, %s4541_s28  ;;  %1769 = vmatpush.msra.mxu1 %v1652_v5 }
0x1654   :  { %2509 = vmatpush.msrb.mxu1 %v5577_v54 }
0x1656   :  { %2510 = vmatpush.msrb.mxu1 %v5582_v37 }
0x1658   :  { %2511 = vmatpush.msrb.mxu1 %v5598_v40 }
0x1659   :  { %1647 = vrot.lane.b32.xlu1 %v4942_v46, %s4541_s28  ;;  %v1651_v46 = vld [vmem:[%s6556_s6] sm:$0xff] }
0x165a   :  { %1728 = vmatpush.msrb.mxu0 %v1651_v46  ;;  %2512 = vmatpush.msrb.mxu1 %v5603_v41 }
0x165c   :  { %2489 = vmatpush.msra.mxu0 %v5437_v45 }
0x165e   :  { %2490 = vmatpush.msra.mxu0 %v5442_v57 }
0x1660   :  { %2491 = vmatpush.msra.mxu0 %v5457_v1 }
0x1662   :  { %2492 = vmatpush.msra.mxu0 %v5472_v27 }
0x1664   :  { %2493 = vmatpush.msra.mxu0 %v5490_v48 }
0x1666   :  { %2494 = vmatpush.msra.mxu0 %v5503_v34 }
0x1668   :  { %2495 = vmatpush.msra.mxu0 %v5515_v15 }
0x166a   :  { %2496 = vmatpush.msra.mxu0 %v5527_v32 }
0x16b3   :  { %v1613_v31 = vpop.permute.xlu1 %1612 }
0x16b4   :  { %v1615_v18 = vsel %vm395_vm15, %v4958_v60, %v1613_v31  ;;  %v1618_v60 = vpop.permute.xlu2 %1617 }
0x16b5   :  { %4143 = vmatmul.msk.f32.vlgmr.msrb.gmra.mxu0 %vm247_vm1, %v1615_v18  ;;  %4151 = vmatmul.msk.f32.vlgmr.msra.gmra.mxu1 %vm247_vm1, %v1615_v18  ;;  %v1620_v6 = vsel %vm395_vm15, %v5033_v0, %v1618_v60  ;;  %v5610_v0 = vld [vmem:[%s6555_s7 + $0x38] sm:$0xff] }
0x16b6   :  { %2839 = vmatpush.msrb.mxu0 %v5437_v45  ;;  %1827 = vmatpush.msrb.mxu3 %v5610_v0 }
0x16b7   :  { %2513 = vmatpush.msrb.mxu1 %v5610_v0 }
0x16b8   :  { %2840 = vmatpush.msrb.mxu0 %v5442_v57  ;;  %1828 = vmatpush.msrb.mxu3 %v5618_v4 }
0x16b9   :  { %2514 = vmatpush.msrb.mxu1 %v5618_v4 }
0x16ba   :  { %2841 = vmatpush.msrb.mxu0 %v5457_v1  ;;  %1829 = vmatpush.msrb.mxu3 %v5633_v55 }
0x16bb   :  { %v1623_v61 = vpop.permute.xlu1 %1622  ;;  %2515 = vmatpush.msrb.mxu1 %v5633_v55 }
0x16bc   :  { %2842 = vmatpush.msrb.mxu0 %v5472_v27  ;;  %v1625_v49 = vsel %vm395_vm15, %v5119_v58, %v1623_v61  ;;  %1830 = vmatpush.msrb.mxu3 %v5638_v29  ;;  %v1628_v58 = vpop.permute.xlu2 %1627 }
0x16bd   :  { %4144 = vmatmul.msk.f32.gmra.mxu0 %vm247_vm1, %v1620_v6  ;;  %4152 = vmatmul.msk.f32.gmra.mxu1 %vm247_vm1, %v1620_v6  ;;  %v1630_v53 = vsel %vm395_vm15, %v5216_v7, %v1628_v58 }
0x16be   :  { %2843 = vmatpush.msrb.mxu0 %v5490_v48  ;;  %2516 = vmatpush.msrb.mxu1 %v5638_v29 }
0x16bf   :  { %1831 = vmatmul.f32.vlgmr.msrb.gmra.mxu3 %v4539_v24  ;;  %v1633_v24 = vpop.permute.xlu0 %1632 }
0x16c0   :  { %2844 = vmatpush.msrb.mxu0 %v5503_v34  ;;  %2859 = vmatpush.msra.mxu1 %v5577_v54  ;;  %v1635_v7 = vsel %vm395_vm15, %v5271_v19, %v1633_v24 }
0x16c1   :  { %1984 = vmatpush.msra.mxu3 %v5577_v54 }
0x16c2   :  { %2845 = vmatpush.msrb.mxu0 %v5515_v15  ;;  %2860 = vmatpush.msra.mxu1 %v5582_v37 }
0x16c3   :  { %1985 = vmatpush.msra.mxu3 %v5582_v37  ;;  %v1638_v17 = vpop.permute.xlu1 %1637 }
0x16c4   :  { %2846 = vmatpush.msrb.mxu0 %v5527_v32  ;;  %2861 = vmatpush.msra.mxu1 %v5598_v40  ;;  %v1640_v19 = vsel %vm395_vm15, %v5327_v47, %v1638_v17  ;;  %v1643_v50 = vpop.permute.xlu2 %1642 }
0x16c5   :  { %4145 = vmatmul.msk.f32.gmra.mxu0 %vm247_vm1, %v1625_v49  ;;  %4153 = vmatmul.msk.f32.gmra.mxu1 %vm247_vm1, %v1625_v49  ;;  %v1645_v22 = vsel %vm395_vm15, %v5389_v21, %v1643_v50 }
0x16c6   :  { %1986 = vmatpush.msra.mxu3 %v5598_v40  ;;  %2862 = vmatpush.msra.mxu1 %v5603_v41 }
0x16c7   :  { %v1603_v47 = vpop.permute.xlu0 %1602 }
0x16c8   :  { %1987 = vmatpush.msra.mxu3 %v5603_v41  ;;  %2863 = vmatpush.msra.mxu1 %v5610_v0  ;;  %v1605_v25 = vmul.f32 %v5690_v3, %v1603_v47 }
0x16ca   :  { %1988 = vmatpush.msra.mxu3 %v5610_v0  ;;  %2864 = vmatpush.msra.mxu1 %v5618_v4 }
0x16cb   :  { %v1648_v36 = vpop.permute.xlu1 %1647 }
0x16cc   :  { %1989 = vmatpush.msra.mxu3 %v5618_v4  ;;  %2865 = vmatpush.msra.mxu1 %v5633_v55  ;;  %v1650_v21 = vsel %vm395_vm15, %v1605_v25, %v1648_v36 }
0x16cd   :  { %4146 = vmatmul.msk.f32.gmra.mxu0 %vm247_vm1, %v1630_v53  ;;  %4154 = vmatmul.msk.f32.gmra.mxu1 %vm247_vm1, %v1630_v53 }
0x16ce   :  { %1990 = vmatpush.msra.mxu3 %v5633_v55  ;;  %2866 = vmatpush.msra.mxu1 %v5638_v29 }
0x16d0   :  { %1991 = vmatpush.msra.mxu3 %v5638_v29 }
0x16d2   :  { %2159 = vmatpush.msrb.mxu3 %v5577_v54 }
0x16d4   :  { %2160 = vmatpush.msrb.mxu3 %v5582_v37 }
0x16d5   :  { %4147 = vmatmul.msk.f32.gmra.mxu0 %vm247_vm1, %v1635_v7  ;;  %4155 = vmatmul.msk.f32.gmra.mxu1 %vm247_vm1, %v1635_v7 }
0x16d6   :  { %2161 = vmatpush.msrb.mxu3 %v5598_v40 }
0x16d8   :  { %2162 = vmatpush.msrb.mxu3 %v5603_v41 }
0x16da   :  { %2163 = vmatpush.msrb.mxu3 %v5610_v0 }
0x16dc   :  { %2164 = vmatpush.msrb.mxu3 %v5618_v4 }
0x16dd   :  { %4148 = vmatmul.msk.f32.gmra.mxu0 %vm247_vm1, %v1640_v19  ;;  %4156 = vmatmul.msk.f32.gmra.mxu1 %vm247_vm1, %v1640_v19 }
0x16de   :  { %2165 = vmatpush.msrb.mxu3 %v5633_v55 }
0x16e0   :  { %2166 = vmatpush.msrb.mxu3 %v5638_v29 }
0x16e5   :  { %4149 = vmatmul.msk.f32.gmra.mxu0 %vm247_vm1, %v1645_v22  ;;  %4157 = vmatmul.msk.f32.gmra.mxu1 %vm247_vm1, %v1645_v22 }
0x16ed   :  { %4150 = vmatmul.msk.f32.gmra.mxu0 %vm247_vm1, %v1650_v21  ;;  %4158 = vmatmul.msk.f32.gmra.mxu1 %vm247_vm1, %v1650_v21 }
0x1732   :  { %v1730_v20 = vpop.f32.mrf.mxu0  ;;  %v1771_v38 = vpop.f32.mrf.mxu1 }
0x1733   :  { %v1731_v43 = vadd.f32 %v1730_v20, %v5699_v16  ;;  %v5702_v26 = vadd.f32 %v1771_v38, %v1686_v23 }
0x1735   :  { %v1835_v10 = vadd.f32 %v1812_v11, %v1731_v43 }
0x1737   :  { %v1837_v13 = vmul.f32 2.0, %v1835_v10 }
0x1739   :  { %v1839_v30 = vsel %vm4900_vm3, %v1837_v13, %v1835_v10 }
0x173a   :  { %v4159_v33 = vmul.f32 -1.442695, %v1839_v30  ;;  %v5706_v39 = vpop.f32.mrf.mxu0  ;;  %v1774_v46 = vpop.f32.mrf.mxu1 }
0x173b   :  { %v5708_v5 = vadd.f32 %v1774_v46, %v1686_v23 }
0x173c   :  { %4356 = vpow2.f32 %v4159_v33 }
0x1742   :  { %v4357_v31 = vpop.eup %4356  ;;  %v5710_v18 = vpop.f32.mrf.mxu0 }
0x1743   :  { %v1777_v60 = vpop.f32.mrf.mxu1  ;;  %v1847_v6 = vadd.f32 1.0, %v4357_v31 }
0x1744   :  { %v5712_v61 = vadd.f32 %v1777_v60, %v1686_v23 }
0x1745   :  { %4358 = vrcp.f32 %v1847_v6  ;;  %v1860_v19 = vand.u32 2147483648, %v1847_v6  ;;  %v1858_v22 = vand.u32 2147483647, %v1847_v6  ;;  %vm1854_vm5 = vweird.f32 %v1847_v6 }
0x1747   :  { %v1861_v14 = vor.u32 1.1754944e-38, %v1860_v19  ;;  %vm1859_vm8 = vcmp.eq.f32.partialorder %v1858_v22, 8.507059e+37 }
0x174a   :  { %v5714_v49 = vpop.f32.mrf.mxu0 }
0x174b   :  { %v1780_v58 = vpop.f32.mrf.mxu1  ;;  %v4359_v53 = vpop.eup %4358 }
0x174c   :  { %v5716_v24 = vadd.f32 %v1780_v58, %v1686_v23  ;;  %v1850_v7 = vmul.f32 %v4359_v53, %v1847_v6  ;;  %vm1855_vm4 = vweird.f32 %v4359_v53 }
0x174d   :  { %vm1856_vm7 = vmor %vm1854_vm5, %vm1855_vm4 }
0x174e   :  { %v1851_v17 = vsub.f32 1.0, %v1850_v7  ;;  %v1832_v7 = vpop.f32.mrf.mxu3 }
0x1750   :  { %v1852_v50 = vmul.f32 %v4359_v53, %v1851_v17 }
0x1752   :  { %v5718_v47 = vpop.f32.mrf.mxu0  ;;  %v1853_v25 = vadd.f32 %v4359_v53, %v1852_v50 }
0x1753   :  { %v1783_v36 = vpop.f32.mrf.mxu1 }
0x1754   :  { %v5720_v21 = vadd.f32 %v1783_v36, %v1686_v23  ;;  %v1857_v11 = vsel %vm1856_vm7, %v4359_v53, %v1853_v25 }
0x1755   :  { %v1862_v20 = vsel %vm1859_vm8, %v1861_v14, %v1857_v11 }
0x1756   :  { %v1879_v38 = vmul.f32 2.0, %v1862_v20 }
0x1758   :  { %v4161_v43 = vadd.f32 -1.0, %v1879_v38 }
0x175a   :  { %v1745_v10 = vpop.f32.mrf.mxu0  ;;  %v1883_v30 = vsel %vm4900_vm3, %v4161_v43, %v1862_v20 }
0x175b   :  { %v1786_v13 = vpop.f32.mrf.mxu1  ;;  %v5725_v33 = vadd.f32 %v1745_v10, %v5699_v16  ;;  %1887 = vrot.lane.b32.xlu0 %v1883_v30, %s4540_s27 }
0x175c   :  { %v5727_v46 = vadd.f32 %v1786_v13, %v1686_v23 }
0x1762   :  { %v1748_v31 = vpop.f32.mrf.mxu0 }
0x1763   :  { %v1789_v60 = vpop.f32.mrf.mxu1  ;;  %v5731_v6 = vadd.f32 %v1748_v31, %v5699_v16 }
0x1764   :  { %v5733_v58 = vadd.f32 %v1789_v60, %v1686_v23 }
0x176b   :  { %v1792_v53 = vpop.f32.mrf.mxu1 }
0x176c   :  { %v1793_v17 = vadd.f32 %v1792_v53, %v1686_v23 }
0x176e   :  { %v1836_v19 = vadd.f32 %v1832_v7, %v1793_v17 }
0x1770   :  { %v1838_v50 = vmul.f32 2.0, %v1836_v19 }
0x1772   :  { %v1840_v22 = vsel %vm4915_vm6, %v1838_v50, %v1836_v19 }
0x1773   :  { %v4160_v36 = vmul.f32 -1.442695, %v1840_v22 }
0x1775   :  { %4360 = vpow2.f32 %v4160_v36 }
0x177b   :  { %v4361_v25 = vpop.eup %4360 }
0x177c   :  { %v1848_v14 = vadd.f32 1.0, %v4361_v25 }
0x177e   :  { %4362 = vrcp.f32 %v1848_v14  ;;  %v1875_v43 = vand.u32 2147483648, %v1848_v14  ;;  %v1873_v13 = vand.u32 2147483647, %v1848_v14  ;;  %vm1869_vm10 = vweird.f32 %v1848_v14 }
0x1780   :  { %v1876_v23 = vor.u32 1.1754944e-38, %v1875_v43  ;;  %vm1874_vm12 = vcmp.eq.f32.partialorder %v1873_v13, 8.507059e+37 }
0x1784   :  { %v4363_v11 = vpop.eup %4362 }
0x1785   :  { %v1865_v20 = vmul.f32 %v4363_v11, %v1848_v14  ;;  %vm1870_vm9 = vweird.f32 %v4363_v11  ;;  %v1885_v14 = vmul.f32 0.0, %v1883_v30 }
0x1786   :  { %vm1871_vm11 = vmor %vm1869_vm10, %vm1870_vm9 }
0x1787   :  { %v1866_v38 = vsub.f32 1.0, %v1865_v20 }
0x1789   :  { %v1867_v10 = vmul.f32 %v4363_v11, %v1866_v38 }
0x178b   :  { %v1868_v31 = vadd.f32 %v4363_v11, %v1867_v10 }
0x178d   :  { %v1872_v60 = vsel %vm1871_vm11, %v4363_v11, %v1868_v31 }
0x178e   :  { %v1877_v53 = vsel %vm1874_vm12, %v1876_v23, %v1872_v60 }
0x178f   :  { %v1880_v7 = vmul.f32 2.0, %v1877_v53 }
0x1791   :  { %v4162_v17 = vadd.f32 -1.0, %v1880_v7 }
0x1793   :  { %v1884_v19 = vsel %vm4915_vm6, %v4162_v17, %v1877_v53 }
0x1794   :  { %1904 = vrot.lane.b32.xlu2 %v1884_v19, %s4540_s27  ;;  %v1902_v43 = vmul.f32 0.0, %v1884_v19 }
0x17cd   :  { %v1888_v50 = vpop.permute.xlu0 %1887 }
0x17ce   :  { %v1890_v22 = vmul.f32 %v1888_v50, %v1883_v30 }
0x17d0   :  { %1892 = vrot.lane.b32.xlu2 %v1890_v22, %s4541_s28 }
0x17ee   :  { %v1905_v36 = vpop.permute.xlu2 %1904 }
0x17ef   :  { %v1907_v25 = vmul.f32 %v1905_v36, %v1884_v19 }
0x17f1   :  { %1909 = vrot.lane.b32.xlu1 %v1907_v25, %s4541_s28 }
0x182a   :  { %v1893_v20 = vpop.permute.xlu2 %1892 }
0x182b   :  { %v1895_v11 = vadd.f32 %v1893_v20, %v1885_v14 }
0x182d   :  { %4364 = vtanh.f32 %v1895_v11 }
0x1833   :  { %v4365_v38 = vpop.eup %4364 }
0x1834   :  { %1898 = vrot.lane.b32.xlu1 %v4365_v38, %s4540_s27 }
0x1863   :  { %v1910_v10 = vpop.permute.xlu1 %1909 }
0x1864   :  { %v1912_v13 = vadd.f32 %v1910_v10, %v1902_v43 }
0x1866   :  { %4366 = vtanh.f32 %v1912_v13 }
0x186c   :  { %v4367_v31 = vpop.eup %4366 }
0x186d   :  { %1915 = vrot.lane.b32.xlu0 %v4367_v31, %s4540_s27 }
0x18a6   :  { %v1899_v23 = vpop.permute.xlu1 %1898 }
0x18a7   :  { %v1901_v60 = vmul.f32 %v1899_v23, %v1883_v30 }
0x18a9   :  { %1920 = vrot.lane.b32.xlu0 %v1901_v60, %s4541_s28 }
0x18df   :  { %v1916_v53 = vpop.permute.xlu0 %1915 }
0x18e0   :  { %v1918_v7 = vmul.f32 %v1916_v53, %v1884_v19 }
0x18e2   :  { %1926 = vrot.lane.b32.xlu2 %v1918_v7, %s4541_s28 }
0x18ea   :  { %1943 = vrot.lane.b32.xlu2 %v1912_v13, %s4542_s1 }
0x191b   :  { %v1921_v19 = vpop.permute.xlu0 %1920 }
0x191c   :  { %v1923_v14 = vmul.f32 %v5484_v12, %v1921_v19 }
0x191e   :  { %v1924_v20 = vadd.f32 %v1923_v14, %v4956_v59 }
0x193c   :  { %v1927_v17 = vpop.permute.xlu2 %1926 }
0x193d   :  { %v1929_v50 = vmul.f32 %v5690_v3, %v1927_v17 }
0x193f   :  { %v1930_v22 = vadd.f32 %v1929_v50, %v4940_v44 }
0x1941   :  { %1932 = vrot.lane.b32.xlu1 %v1930_v22, %s4541_s28 }
0x1944   :  { %v1944_v36 = vpop.permute.xlu2 %1943 }
0x1945   :  { %v1946_v25 = vmul.f32 %v5690_v3, %v1944_v36 }
0x1947   :  { %v1947_v30 = vadd.f32 %v1946_v25, %v4940_v44 }
0x1949   :  { %1937 = vrot.lane.b32.xlu1 %v1895_v11, %s4542_s1  ;;  %1949 = vrot.lane.b32.xlu2 %v1947_v30, %s4541_s28 }
0x19a3   :  { %v1950_v10 = vpop.permute.xlu2 %1949 }
0x19b3   :  { %v1933_v38 = vpop.permute.xlu1 %1932 }
0x19b4   :  { %v5757_v43 = vsel %vm395_vm15, %v1924_v20, %v1933_v38 }
0x19b5   :  { %4163 = vmatmul.msk.f32.vlgmr.msrb.gmra.mxu2 %vm247_vm1, %v5757_v43  ;;  %4164 = vmatmul.msk.f32.vlgmr.msra.gmra.mxu3 %vm247_vm1, %v5757_v43 }
0x19b6   :  { %2314 = vmatpush.msrb.mxu2 %v5437_v45  ;;  %2334 = vmatpush.msra.mxu3 %v5577_v54 }
0x19b8   :  { %2315 = vmatpush.msrb.mxu2 %v5442_v57  ;;  %2335 = vmatpush.msra.mxu3 %v5582_v37 }
0x19ba   :  { %2316 = vmatpush.msrb.mxu2 %v5457_v1  ;;  %2336 = vmatpush.msra.mxu3 %v5598_v40 }
0x19bb   :  { %v1938_v44 = vpop.permute.xlu1 %1937 }
0x19bc   :  { %v1940_v3 = vmul.f32 %v5484_v12, %v1938_v44  ;;  %2317 = vmatpush.msrb.mxu2 %v5472_v27  ;;  %2337 = vmatpush.msra.mxu3 %v5603_v41 }
0x19be   :  { %v1941_v11 = vadd.f32 %v1940_v3, %v4956_v59  ;;  %2318 = vmatpush.msrb.mxu2 %v5490_v48  ;;  %2338 = vmatpush.msra.mxu3 %v5610_v0  ;;  %v1734_v59 = vadd.f32 %v5706_v39, %v5699_v16 }
0x19c0   :  { %v5776_v13 = vsel %vm395_vm15, %v1941_v11, %v1950_v10  ;;  %2319 = vmatpush.msrb.mxu2 %v5503_v34  ;;  %2339 = vmatpush.msra.mxu3 %v5618_v4 }
0x19c1   :  { %2047 = vrot.lane.b32.xlu2 %v5776_v13, %s4541_s28 }
0x19c2   :  { %2320 = vmatpush.msrb.mxu2 %v5515_v15  ;;  %2340 = vmatpush.msra.mxu3 %v5633_v55 }
0x19c4   :  { %2321 = vmatpush.msrb.mxu2 %v5527_v32  ;;  %2341 = vmatpush.msra.mxu3 %v5638_v29 }
0x1a38   :  { %v1973_v12 = vpop.f32.mrf.mxu2  ;;  %v1993_v31 = vpop.f32.mrf.mxu3 }
0x1a39   :  { %v1996_v23 = vadd.f32 %v1973_v12, %v1734_v59  ;;  %v1997_v60 = vadd.f32 %v1993_v31, %v5733_v58 }
0x1a3b   :  { %v1998_v53 = vmul.f32 2.0, %v1996_v23  ;;  %v1999_v7 = vmul.f32 2.0, %v1997_v60 }
0x1a3d   :  { %v2000_v17 = vsel %vm4900_vm3, %v1998_v53, %v1996_v23  ;;  %v2001_v50 = vsel %vm4915_vm6, %v1999_v7, %v1997_v60 }
0x1a3e   :  { %v4165_v22 = vmul.f32 -1.442695, %v2000_v17  ;;  %v4166_v36 = vmul.f32 -1.442695, %v2001_v50 }
0x1a40   :  { %4368 = vpow2.f32 %v4165_v22 }
0x1a41   :  { %4370 = vpow2.f32 %v4166_v36 }
0x1a46   :  { %v4369_v25 = vpop.eup %4368 }
0x1a47   :  { %v4371_v30 = vpop.eup %4370  ;;  %v2008_v39 = vadd.f32 1.0, %v4369_v25 }
0x1a48   :  { %v2009_v19 = vadd.f32 1.0, %v4371_v30 }
0x1a49   :  { %4372 = vrcp.f32 %v2008_v39  ;;  %vm2015_vm2 = vweird.f32 %v2008_v39  ;;  %v2021_v23 = vand.u32 2147483648, %v2008_v39  ;;  %v2019_v53 = vand.u32 2147483647, %v2008_v39 }
0x1a4a   :  { %4374 = vrcp.f32 %v2009_v19  ;;  %v2036_v11 = vand.u32 2147483648, %v2009_v19  ;;  %v2034_v12 = vand.u32 2147483647, %v2009_v19  ;;  %vm2030_vm4 = vweird.f32 %v2009_v19 }
0x1a4b   :  { %v2022_v36 = vor.u32 1.1754944e-38, %v2021_v23  ;;  %vm2020_vm9 = vcmp.eq.f32.partialorder %v2019_v53, 8.507059e+37 }
0x1a4c   :  { %v2037_v7 = vor.u32 1.1754944e-38, %v2036_v11  ;;  %vm2035_vm8 = vcmp.eq.f32.partialorder %v2034_v12, 8.507059e+37 }
0x1a4f   :  { %v4373_v14 = vpop.eup %4372 }
0x1a50   :  { %v4375_v58 = vpop.eup %4374  ;;  %v2011_v20 = vmul.f32 %v4373_v14, %v2008_v39  ;;  %vm2016_vm13 = vweird.f32 %v4373_v14 }
0x1a51   :  { %v2026_v38 = vmul.f32 %v4375_v58, %v2009_v19  ;;  %vm2031_vm14 = vweird.f32 %v4375_v58  ;;  %vm2017_vm5 = vmor %vm2015_vm2, %vm2016_vm13 }
0x1a52   :  { %v2012_v44 = vsub.f32 1.0, %v2011_v20  ;;  %vm2032_vm7 = vmor %vm2030_vm4, %vm2031_vm14 }
0x1a53   :  { %v2027_v3 = vsub.f32 1.0, %v2026_v38 }
0x1a54   :  { %v2013_v10 = vmul.f32 %v4373_v14, %v2012_v44 }
0x1a55   :  { %v2028_v59 = vmul.f32 %v4375_v58, %v2027_v3 }
0x1a56   :  { %v2014_v31 = vadd.f32 %v4373_v14, %v2013_v10 }
0x1a57   :  { %v2029_v60 = vadd.f32 %v4375_v58, %v2028_v59 }
0x1a58   :  { %v2018_v50 = vsel %vm2017_vm5, %v4373_v14, %v2014_v31  ;;  %v2048_v31 = vpop.permute.xlu2 %2047 }
0x1a59   :  { %v2033_v17 = vsel %vm2032_vm7, %v4375_v58, %v2029_v60  ;;  %v2023_v30 = vsel %vm2020_vm9, %v2022_v36, %v2018_v50 }
0x1a5a   :  { %v2038_v22 = vsel %vm2035_vm8, %v2037_v7, %v2033_v17  ;;  %v2040_v44 = vmul.f32 2.0, %v2023_v30 }
0x1a5b   :  { %v2041_v25 = vmul.f32 2.0, %v2038_v22 }
0x1a5c   :  { %v4167_v19 = vadd.f32 -1.0, %v2040_v44 }
0x1a5d   :  { %v4168_v20 = vadd.f32 -1.0, %v2041_v25 }
0x1a5e   :  { %v2044_v39 = vsel %vm4900_vm3, %v4167_v19, %v2023_v30 }
0x1a5f   :  { %v2045_v38 = vsel %vm4915_vm6, %v4168_v20, %v2038_v22  ;;  %v2050_v23 = vmul.f32 %v2048_v31, %v2044_v39 }
0x1a60   :  { %2069 = vrot.lane.b32.xlu0 %v2045_v38, %s4540_s27  ;;  %v2067_v10 = vmul.f32 %v2045_v38, %v5776_v13 }
0x1a68   :  { %2052 = vrot.lane.b32.xlu0 %v2044_v39, %s4540_s27 }
0x1ad2   :  { %v2070_v58 = vpop.permute.xlu0 %2069 }
0x1ad3   :  { %v2072_v14 = vmul.f32 %v2070_v58, %v2045_v38 }
0x1ad5   :  { %2074 = vrot.lane.b32.xlu1 %v2072_v14, %s4541_s28 }
0x1ada   :  { %v2053_v3 = vpop.permute.xlu0 %2052 }
0x1adb   :  { %v2055_v11 = vmul.f32 %v2053_v3, %v2044_v39 }
0x1add   :  { %2057 = vrot.lane.b32.xlu0 %v2055_v11, %s4541_s28 }
0x1b47   :  { %v2075_v59 = vpop.permute.xlu1 %2074 }
0x1b48   :  { %v2077_v12 = vadd.f32 %v2075_v59, %v2067_v10 }
0x1b4a   :  { %4376 = vtanh.f32 %v2077_v12 }
0x1b4f   :  { %v2058_v60 = vpop.permute.xlu0 %2057 }
0x1b50   :  { %v4377_v53 = vpop.eup %4376  ;;  %v2060_v7 = vadd.f32 %v2058_v60, %v2050_v23  ;;  %v2111_v23 = vmul.f32 %v5776_v13, %v5031_v62 }
0x1b51   :  { %2080 = vrot.lane.b32.xlu1 %v4377_v53, %s4540_s27 }
0x1b52   :  { %4378 = vtanh.f32 %v2060_v7 }
0x1b58   :  { %v4379_v17 = vpop.eup %4378 }
0x1b59   :  { %2063 = vrot.lane.b32.xlu2 %v4379_v17, %s4540_s27  ;;  %2096 = vrot.lane.b32.xlu1 %v5757_v43, %s4542_s1 }
0x1b61   :  { %2114 = vrot.lane.b32.xlu1 %v2077_v12, %s4542_s1 }
0x1b69   :  { %2107 = vrot.lane.b32.xlu1 %v2060_v7, %s4542_s1 }
0x1bb3   :  { %v2064_v50 = vpop.permute.xlu2 %2063 }
0x1bb4   :  { %v2066_v22 = vmul.f32 %v2064_v50, %v2044_v39  ;;  %v2089_v50 = vmul.f32 %v5757_v43, %v5031_v62 }
0x1bb6   :  { %2085 = vrot.lane.b32.xlu2 %v2066_v22, %s4541_s28 }
0x1bbe   :  { %2118 = vrot.lane.b32.xlu2 %v5776_v13, %s4542_s1 }
0x1bc3   :  { %v2081_v36 = vpop.permute.xlu1 %2080 }
0x1bc4   :  { %v2083_v25 = vmul.f32 %v2081_v36, %v2045_v38  ;;  %v4521_v38 = vld [vmem:[%s6588_s3 + $0x30] sm:$0xff] }
0x1bc6   :  { %2092 = vrot.lane.b32.xlu0 %v2083_v25, %s4541_s28 }
0x1bcb   :  { %v2097_v30 = vpop.permute.xlu1 %2096 }
0x1bcc   :  { %v2099_v11 = vmul.f32 %v2097_v30, %v5019_v35 }
0x1bd3   :  { %v2115_v44 = vpop.permute.xlu1 %2114 }
0x1bd4   :  { %v2117_v58 = vmul.f32 %v5386_v8, %v2115_v44  ;;  %v4522_v8 = vld [vmem:[%s6588_s3 + $0x8] sm:$0xff] }
0x1bdb   :  { %v2108_v12 = vpop.permute.xlu1 %2107 }
0x1bdc   :  { %v2110_v31 = vmul.f32 %v4522_v8, %v2108_v12 }
0x1bde   :  { %v2112_v60 = vadd.f32 %v2111_v23, %v2110_v31 }
0x1c10   :  { %v2086_v20 = vpop.permute.xlu2 %2085 }
0x1c11   :  { %v2088_v17 = vmul.f32 %v4522_v8, %v2086_v20 }
0x1c13   :  { %v2090_v22 = vadd.f32 %v2089_v50, %v2088_v17 }
0x1c18   :  { %v2119_v19 = vpop.permute.xlu2 %2118 }
0x1c19   :  { %v2121_v14 = vmul.f32 %v2119_v19, %v5019_v35 }
0x1c1b   :  { %v2122_v3 = vadd.f32 %v2121_v14, %v2117_v58 }
0x1c1d   :  { %2124 = vrot.lane.b32.xlu2 %v2122_v3, %s4541_s28 }
0x1c38   :  { %v2093_v39 = vpop.permute.xlu0 %2092 }
0x1c39   :  { %v2095_v10 = vmul.f32 %v4521_v38, %v2093_v39 }
0x1c3b   :  { %v2100_v59 = vadd.f32 %v2099_v11, %v2095_v10 }
0x1c3d   :  { %2102 = vrot.lane.b32.xlu0 %v2100_v59, %s4541_s28 }
0x1c77   :  { %v2125_v53 = vpop.permute.xlu2 %2124 }
0x1c78   :  { %v5826_v7 = vsel %vm395_vm15, %v2112_v60, %v2125_v53 }
0x1c79   :  { %2222 = vrot.lane.b32.xlu2 %v5826_v7, %s4541_s28 }
0x1caf   :  { %v2103_v36 = vpop.permute.xlu0 %2102 }
0x1cb0   :  { %v5833_v25 = vsel %vm395_vm15, %v2090_v22, %v2103_v36 }
0x1cb1   :  { %4169 = vmatmul.msk.f32.vlgmr.msra.gmra.mxu2 %vm247_vm1, %v5833_v25  ;;  %4170 = vmatmul.msk.f32.vlgmr.msrb.gmra.mxu3 %vm247_vm1, %v5833_v25 }
0x1cb2   :  { %2664 = vmatpush.msra.mxu2 %v5437_v45  ;;  %2684 = vmatpush.msrb.mxu3 %v5577_v54  ;;  %v1737_v45 = vadd.f32 %v5710_v18, %v5699_v16 }
0x1cb4   :  { %2665 = vmatpush.msra.mxu2 %v5442_v57  ;;  %2685 = vmatpush.msrb.mxu3 %v5582_v37 }
0x1cb6   :  { %2666 = vmatpush.msra.mxu2 %v5457_v1  ;;  %2686 = vmatpush.msrb.mxu3 %v5598_v40 }
0x1cb8   :  { %2667 = vmatpush.msra.mxu2 %v5472_v27  ;;  %2687 = vmatpush.msrb.mxu3 %v5603_v41 }
0x1cba   :  { %2668 = vmatpush.msra.mxu2 %v5490_v48  ;;  %2688 = vmatpush.msrb.mxu3 %v5610_v0 }
0x1cbc   :  { %2669 = vmatpush.msra.mxu2 %v5503_v34  ;;  %2689 = vmatpush.msrb.mxu3 %v5618_v4 }
0x1cbe   :  { %2670 = vmatpush.msra.mxu2 %v5515_v15  ;;  %2690 = vmatpush.msrb.mxu3 %v5633_v55 }
0x1cc0   :  { %2671 = vmatpush.msra.mxu2 %v5527_v32  ;;  %2691 = vmatpush.msrb.mxu3 %v5638_v29 }
0x1d34   :  { %v2148_v57 = vpop.f32.mrf.mxu2  ;;  %v2168_v1 = vpop.f32.mrf.mxu3 }
0x1d35   :  { %v2171_v27 = vadd.f32 %v2148_v57, %v1737_v45  ;;  %v2172_v48 = vadd.f32 %v2168_v1, %v5727_v46 }
0x1d37   :  { %v2173_v43 = vmul.f32 2.0, %v2171_v27  ;;  %v2174_v34 = vmul.f32 2.0, %v2172_v48 }
0x1d39   :  { %v2175_v13 = vsel %vm4900_vm3, %v2173_v43, %v2171_v27  ;;  %v2176_v15 = vsel %vm4915_vm6, %v2174_v34, %v2172_v48 }
0x1d3a   :  { %v4171_v30 = vmul.f32 -1.442695, %v2175_v13  ;;  %v4172_v32 = vmul.f32 -1.442695, %v2176_v15 }
0x1d3c   :  { %4380 = vpow2.f32 %v4171_v30 }
0x1d3d   :  { %4382 = vpow2.f32 %v4172_v32 }
0x1d42   :  { %v4381_v20 = vpop.eup %4380 }
0x1d43   :  { %v4383_v44 = vpop.eup %4382  ;;  %v2183_v18 = vadd.f32 1.0, %v4381_v20 }
0x1d44   :  { %v2184_v19 = vadd.f32 1.0, %v4383_v44 }
0x1d45   :  { %4384 = vrcp.f32 %v2183_v18  ;;  %vm2190_vm12 = vweird.f32 %v2183_v18  ;;  %v2196_v31 = vand.u32 2147483648, %v2183_v18  ;;  %v2194_v60 = vand.u32 2147483647, %v2183_v18 }
0x1d46   :  { %4386 = vrcp.f32 %v2184_v19  ;;  %v2211_v38 = vand.u32 2147483648, %v2184_v19  ;;  %v2209_v12 = vand.u32 2147483647, %v2184_v19  ;;  %vm2205_vm13 = vweird.f32 %v2184_v19 }
0x1d47   :  { %v2197_v36 = vor.u32 1.1754944e-38, %v2196_v31  ;;  %vm2195_vm5 = vcmp.eq.f32.partialorder %v2194_v60, 8.507059e+37  ;;  %v5884_v60 = vld [vmem:[%s6588_s3 + $0x28] sm:$0xff] }
0x1d48   :  { %v2212_v53 = vor.u32 1.1754944e-38, %v2211_v38  ;;  %vm2210_vm4 = vcmp.eq.f32.partialorder %v2209_v12, 8.507059e+37 }
0x1d4b   :  { %v4385_v58 = vpop.eup %4384 }
0x1d4c   :  { %v4387_v46 = vpop.eup %4386  ;;  %v2186_v14 = vmul.f32 %v4385_v58, %v2183_v18  ;;  %vm2191_vm10 = vweird.f32 %v4385_v58 }
0x1d4d   :  { %v2201_v3 = vmul.f32 %v4387_v46, %v2184_v19  ;;  %vm2206_vm11 = vweird.f32 %v4387_v46  ;;  %vm2192_vm14 = vmor %vm2190_vm12, %vm2191_vm10  ;;  %v2223_v19 = vpop.permute.xlu2 %2222 }
0x1d4e   :  { %v2187_v39 = vsub.f32 1.0, %v2186_v14  ;;  %vm2207_vm2 = vmor %vm2205_vm13, %vm2206_vm11 }
0x1d4f   :  { %v2202_v11 = vsub.f32 1.0, %v2201_v3 }
0x1d50   :  { %v2188_v10 = vmul.f32 %v4385_v58, %v2187_v39 }
0x1d51   :  { %v2203_v59 = vmul.f32 %v4387_v46, %v2202_v11 }
0x1d52   :  { %v2189_v8 = vadd.f32 %v4385_v58, %v2188_v10 }
0x1d53   :  { %v2204_v23 = vadd.f32 %v4387_v46, %v2203_v59 }
0x1d54   :  { %v2193_v50 = vsel %vm2192_vm14, %v4385_v58, %v2189_v8 }
0x1d55   :  { %v2208_v17 = vsel %vm2207_vm2, %v4387_v46, %v2204_v23  ;;  %v2198_v57 = vsel %vm2195_vm5, %v2197_v36, %v2193_v50 }
0x1d56   :  { %v2213_v22 = vsel %vm2210_vm4, %v2212_v53, %v2208_v17  ;;  %v2215_v48 = vmul.f32 2.0, %v2198_v57 }
0x1d57   :  { %v2216_v45 = vmul.f32 2.0, %v2213_v22 }
0x1d58   :  { %v4173_v43 = vadd.f32 -1.0, %v2215_v48 }
0x1d59   :  { %v4174_v1 = vadd.f32 -1.0, %v2216_v45 }
0x1d5a   :  { %v2219_v34 = vsel %vm4900_vm3, %v4173_v43, %v2198_v57  ;;  %v2286_v43 = vmul.f32 %v5826_v7, %v5116_v52 }
0x1d5b   :  { %v2220_v27 = vsel %vm4915_vm6, %v4174_v1, %v2213_v22  ;;  %v2225_v58 = vmul.f32 %v2223_v19, %v2219_v34  ;;  %v4527_v19 = vld [vmem:[%s6555_s7 + $0x50] sm:$0xff] }
0x1d5c   :  { %2244 = vrot.lane.b32.xlu0 %v2220_v27, %s4540_s27  ;;  %v2242_v20 = vmul.f32 %v2220_v27, %v5826_v7 }
0x1d64   :  { %2227 = vrot.lane.b32.xlu0 %v2219_v34, %s4540_s27 }
0x1dce   :  { %v2245_v13 = vpop.permute.xlu0 %2244 }
0x1dcf   :  { %v2247_v15 = vmul.f32 %v2245_v13, %v2220_v27 }
0x1dd1   :  { %2249 = vrot.lane.b32.xlu1 %v2247_v15, %s4541_s28 }
0x1dd6   :  { %v2228_v30 = vpop.permute.xlu0 %2227 }
0x1dd7   :  { %v2230_v32 = vmul.f32 %v2228_v30, %v2219_v34 }
0x1dd9   :  { %2232 = vrot.lane.b32.xlu0 %v2230_v32, %s4541_s28  ;;  %v2264_v32 = vmul.f32 %v5833_v25, %v5116_v52 }
0x1e43   :  { %v2250_v44 = vpop.permute.xlu1 %2249 }
0x1e44   :  { %v2252_v18 = vadd.f32 %v2250_v44, %v2242_v20 }
0x1e46   :  { %4388 = vtanh.f32 %v2252_v18 }
0x1e4b   :  { %v2233_v46 = vpop.permute.xlu0 %2232 }
0x1e4c   :  { %v4389_v14 = vpop.eup %4388  ;;  %v2235_v3 = vadd.f32 %v2233_v46, %v2225_v58  ;;  %v4528_v58 = vld [vmem:[%s6555_s7 + $0x40] sm:$0xff] }
0x1e4d   :  { %2255 = vrot.lane.b32.xlu1 %v4389_v14, %s4540_s27 }
0x1e4e   :  { %4390 = vtanh.f32 %v2235_v3 }
0x1e54   :  { %v4391_v39 = vpop.eup %4390 }
0x1e55   :  { %2238 = vrot.lane.b32.xlu2 %v4391_v39, %s4540_s27  ;;  %2271 = vrot.lane.b32.xlu1 %v5833_v25, %s4542_s1  ;;  %v4526_v25 = vld [vmem:[%s6555_s7 + $0x60] sm:$0xff] }
0x1e5d   :  { %2289 = vrot.lane.b32.xlu1 %v2252_v18, %s4542_s1 }
0x1e65   :  { %2282 = vrot.lane.b32.xlu1 %v2235_v3, %s4542_s1 }
0x1eaf   :  { %v2239_v11 = vpop.permute.xlu2 %2238 }
0x1eb0   :  { %v2241_v38 = vmul.f32 %v2239_v11, %v2219_v34 }
0x1eb2   :  { %2260 = vrot.lane.b32.xlu2 %v2241_v38, %s4541_s28 }
0x1eba   :  { %2293 = vrot.lane.b32.xlu2 %v5826_v7, %s4542_s1  ;;  %v4525_v7 = vld [vmem:[%s6555_s7 + $0x70] sm:$0xff] }
0x1ebf   :  { %v2256_v10 = vpop.permute.xlu1 %2255 }
0x1ec0   :  { %v2258_v59 = vmul.f32 %v2256_v10, %v2220_v27  ;;  %v5895_v27 = vld [vmem:[%s6588_s3 + $0x10] sm:$0xff] }
0x1ec2   :  { %2267 = vrot.lane.b32.xlu0 %v2258_v59, %s4541_s28 }
0x1ec7   :  { %v2272_v12 = vpop.permute.xlu1 %2271 }
0x1ec8   :  { %v2274_v36 = vmul.f32 %v2272_v12, %v5099_v28 }
0x1ecf   :  { %v2290_v31 = vpop.permute.xlu1 %2289 }
0x1ed0   :  { %v2292_v53 = vmul.f32 %v5884_v60, %v2290_v31 }
0x1ed7   :  { %v2283_v1 = vpop.permute.xlu1 %2282 }
0x1ed8   :  { %v2285_v48 = vmul.f32 %v5895_v27, %v2283_v1 }
0x1eda   :  { %v2287_v34 = vadd.f32 %v2286_v43, %v2285_v48 }
0x1f0c   :  { %v2261_v8 = vpop.permute.xlu2 %2260 }
0x1f0d   :  { %v2263_v30 = vmul.f32 %v5895_v27, %v2261_v8 }
0x1f0f   :  { %v2265_v20 = vadd.f32 %v2264_v32, %v2263_v30 }
0x1f14   :  { %v2294_v23 = vpop.permute.xlu2 %2293 }
0x1f15   :  { %v2296_v17 = vmul.f32 %v2294_v23, %v5099_v28 }
0x1f17   :  { %v2297_v50 = vadd.f32 %v2296_v17, %v2292_v53 }
0x1f19   :  { %2299 = vrot.lane.b32.xlu2 %v2297_v50, %s4541_s28 }
0x1f34   :  { %v2268_v22 = vpop.permute.xlu0 %2267 }
0x1f35   :  { %v2270_v45 = vmul.f32 %v5884_v60, %v2268_v22 }
0x1f37   :  { %v2275_v57 = vadd.f32 %v2274_v36, %v2270_v45 }
0x1f39   :  { %2277 = vrot.lane.b32.xlu0 %v2275_v57, %s4541_s28 }
0x1f73   :  { %v2300_v13 = vpop.permute.xlu2 %2299 }
0x1f74   :  { %v5901_v15 = vsel %vm395_vm15, %v2287_v34, %v2300_v13 }
0x1f75   :  { %2397 = vrot.lane.b32.xlu2 %v5901_v15, %s4541_s28 }
0x1fab   :  { %v2278_v44 = vpop.permute.xlu0 %2277 }
0x1fac   :  { %v5909_v18 = vsel %vm395_vm15, %v2265_v20, %v2278_v44 }
0x1fad   :  { %4175 = vmatmul.msk.f32.vlgmr.msrb.gmra.mxu2 %vm247_vm1, %v5909_v18  ;;  %4176 = vmatmul.msk.f32.vlgmr.msra.gmra.mxu3 %vm247_vm1, %v5909_v18 }
0x1fae   :  { %3014 = vmatpush.msrb.mxu2 %v4525_v7  ;;  %3034 = vmatpush.msra.mxu3 %v5577_v54  ;;  %v4529_v54 = vld [vmem:[%s6555_s7 + $0x30] sm:$0xff] }
0x1fb0   :  { %3015 = vmatpush.msrb.mxu2 %v4526_v25  ;;  %3035 = vmatpush.msra.mxu3 %v5582_v37  ;;  %v4530_v37 = vld [vmem:[%s6555_s7 + $0x20] sm:$0xff] }
0x1fb2   :  { %3016 = vmatpush.msrb.mxu2 %v4527_v19  ;;  %3036 = vmatpush.msra.mxu3 %v5598_v40  ;;  %v4531_v40 = vld [vmem:[%s6555_s7 + $0x10] sm:$0xff] }
0x1fb4   :  { %3017 = vmatpush.msrb.mxu2 %v4528_v58  ;;  %3037 = vmatpush.msra.mxu3 %v5603_v41  ;;  %v4532_v41 = vld [vmem:[%s6555_s7] sm:$0xff] }
0x1fb6   :  { %3018 = vmatpush.msrb.mxu2 %v4529_v54  ;;  %3038 = vmatpush.msra.mxu3 %v5610_v0  ;;  %v1740_v0 = vadd.f32 %v5714_v49, %v5699_v16 }
0x1fb8   :  { %3019 = vmatpush.msrb.mxu2 %v4530_v37  ;;  %3039 = vmatpush.msra.mxu3 %v5618_v4 }
0x1fba   :  { %3020 = vmatpush.msrb.mxu2 %v4531_v40  ;;  %3040 = vmatpush.msra.mxu3 %v5633_v55 }
0x1fbc   :  { %3021 = vmatpush.msrb.mxu2 %v4532_v41  ;;  %3041 = vmatpush.msra.mxu3 %v5638_v29 }
0x2030   :  { %v2323_v46 = vpop.f32.mrf.mxu2  ;;  %v2343_v14 = vpop.f32.mrf.mxu3 }
0x2031   :  { %v2346_v4 = vadd.f32 %v2323_v46, %v1740_v0  ;;  %v2347_v3 = vadd.f32 %v2343_v14, %v5720_v21 }
0x2033   :  { %v2348_v39 = vmul.f32 2.0, %v2346_v4  ;;  %v2349_v11 = vmul.f32 2.0, %v2347_v3 }
0x2035   :  { %v2350_v55 = vsel %vm4900_vm3, %v2348_v39, %v2346_v4  ;;  %v2351_v38 = vsel %vm4915_vm6, %v2349_v11, %v2347_v3  ;;  %v2398_v11 = vpop.permute.xlu2 %2397 }
0x2036   :  { %v4177_v10 = vmul.f32 -1.442695, %v2350_v55  ;;  %v4178_v59 = vmul.f32 -1.442695, %v2351_v38 }
0x2038   :  { %4392 = vpow2.f32 %v4177_v10 }
0x2039   :  { %4394 = vpow2.f32 %v4178_v59 }
0x203e   :  { %v4393_v29 = vpop.eup %4392 }
0x203f   :  { %v4395_v12 = vpop.eup %4394  ;;  %v2358_v49 = vadd.f32 1.0, %v4393_v29 }
0x2040   :  { %v2359_v8 = vadd.f32 1.0, %v4395_v12 }
0x2041   :  { %4396 = vrcp.f32 %v2358_v49  ;;  %vm2365_vm9 = vweird.f32 %v2358_v49  ;;  %v2371_v48 = vand.u32 2147483648, %v2358_v49  ;;  %v2369_v34 = vand.u32 2147483647, %v2358_v49 }
0x2042   :  { %4398 = vrcp.f32 %v2359_v8  ;;  %v2386_v22 = vand.u32 2147483648, %v2359_v8  ;;  %v2384_v57 = vand.u32 2147483647, %v2359_v8  ;;  %vm2380_vm10 = vweird.f32 %v2359_v8 }
0x2043   :  { %v2372_v44 = vor.u32 1.1754944e-38, %v2371_v48  ;;  %vm2370_vm14 = vcmp.eq.f32.partialorder %v2369_v34, 8.507059e+37 }
0x2044   :  { %v2387_v13 = vor.u32 1.1754944e-38, %v2386_v22  ;;  %vm2385_vm13 = vcmp.eq.f32.partialorder %v2384_v57, 8.507059e+37 }
0x2047   :  { %v4397_v31 = vpop.eup %4396 }
0x2048   :  { %v4399_v21 = vpop.eup %4398  ;;  %v2361_v23 = vmul.f32 %v4397_v31, %v2358_v49  ;;  %vm2366_vm7 = vweird.f32 %v4397_v31 }
0x2049   :  { %v2376_v53 = vmul.f32 %v4399_v21, %v2359_v8  ;;  %vm2381_vm8 = vweird.f32 %v4399_v21  ;;  %vm2367_vm11 = vmor %vm2365_vm9, %vm2366_vm7 }
0x204a   :  { %v2362_v17 = vsub.f32 1.0, %v2361_v23  ;;  %vm2382_vm12 = vmor %vm2380_vm10, %vm2381_vm8 }
0x204b   :  { %v2377_v50 = vsub.f32 1.0, %v2376_v53 }
0x204c   :  { %v2363_v36 = vmul.f32 %v4397_v31, %v2362_v17 }
0x204d   :  { %v2378_v45 = vmul.f32 %v4399_v21, %v2377_v50  ;;  %v5976_v50 = vld [vmem:[%s6588_s3 + $0x20] sm:$0xff] }
0x204e   :  { %v2364_v1 = vadd.f32 %v4397_v31, %v2363_v36 }
0x204f   :  { %v2379_v43 = vadd.f32 %v4399_v21, %v2378_v45 }
0x2050   :  { %v2368_v32 = vsel %vm2367_vm11, %v4397_v31, %v2364_v1 }
0x2051   :  { %v2383_v30 = vsel %vm2382_vm12, %v4399_v21, %v2379_v43  ;;  %v2373_v25 = vsel %vm2370_vm14, %v2372_v44, %v2368_v32  ;;  %v2461_v32 = vmul.f32 %v5901_v15, %v5213_v63 }
0x2052   :  { %v2388_v20 = vsel %vm2385_vm13, %v2387_v13, %v2383_v30  ;;  %v2390_v54 = vmul.f32 2.0, %v2373_v25  ;;  %v5987_v13 = vld [vmem:[%s6588_s3 + $0x18] sm:$0xff] }
0x2053   :  { %v2391_v7 = vmul.f32 2.0, %v2388_v20 }
0x2054   :  { %v4179_v37 = vadd.f32 -1.0, %v2390_v54 }
0x2055   :  { %v4180_v19 = vadd.f32 -1.0, %v2391_v7 }
0x2056   :  { %v2394_v40 = vsel %vm4900_vm3, %v4179_v37, %v2373_v25 }
0x2057   :  { %v2395_v58 = vsel %vm4915_vm6, %v4180_v19, %v2388_v20  ;;  %v2400_v55 = vmul.f32 %v2398_v11, %v2394_v40  ;;  %v2439_v19 = vmul.f32 %v5909_v18, %v5213_v63 }
0x2058   :  { %2419 = vrot.lane.b32.xlu0 %v2395_v58, %s4540_s27  ;;  %v2417_v4 = vmul.f32 %v2395_v58, %v5901_v15 }
0x2060   :  { %2402 = vrot.lane.b32.xlu0 %v2394_v40, %s4540_s27 }
0x20ca   :  { %v2420_v41 = vpop.permute.xlu0 %2419 }
0x20cb   :  { %v2422_v0 = vmul.f32 %v2420_v41, %v2395_v58 }
0x20cd   :  { %2424 = vrot.lane.b32.xlu1 %v2422_v0, %s4541_s28 }
0x20d2   :  { %v2403_v46 = vpop.permute.xlu0 %2402 }
0x20d3   :  { %v2405_v14 = vmul.f32 %v2403_v46, %v2394_v40 }
0x20d5   :  { %2407 = vrot.lane.b32.xlu0 %v2405_v14, %s4541_s28 }
0x213f   :  { %v2425_v3 = vpop.permute.xlu1 %2424 }
0x2140   :  { %v2427_v39 = vadd.f32 %v2425_v3, %v2417_v4 }
0x2142   :  { %4400 = vtanh.f32 %v2427_v39 }
0x2147   :  { %v2408_v38 = vpop.permute.xlu0 %2407 }
0x2148   :  { %v4401_v10 = vpop.eup %4400  ;;  %v2410_v59 = vadd.f32 %v2408_v38, %v2400_v55 }
0x2149   :  { %2430 = vrot.lane.b32.xlu1 %v4401_v10, %s4540_s27 }
0x214a   :  { %4402 = vtanh.f32 %v2410_v59 }
0x2150   :  { %v4403_v29 = vpop.eup %4402 }
0x2151   :  { %2413 = vrot.lane.b32.xlu2 %v4403_v29, %s4540_s27  ;;  %2446 = vrot.lane.b32.xlu1 %v5909_v18, %s4542_s1 }
0x2159   :  { %2464 = vrot.lane.b32.xlu1 %v2427_v39, %s4542_s1 }
0x2161   :  { %2457 = vrot.lane.b32.xlu1 %v2410_v59, %s4542_s1 }
0x21ab   :  { %v2414_v12 = vpop.permute.xlu2 %2413 }
0x21ac   :  { %v2416_v49 = vmul.f32 %v2414_v12, %v2394_v40  ;;  %v1743_v40 = vadd.f32 %v5718_v47, %v5699_v16 }
0x21ae   :  { %2435 = vrot.lane.b32.xlu2 %v2416_v49, %s4541_s28 }
0x21b6   :  { %2468 = vrot.lane.b32.xlu2 %v5901_v15, %s4542_s1  ;;  %v6007_v15 = vpop.f32.mrf.mxu0 }
0x21bb   :  { %v2431_v8 = vpop.permute.xlu1 %2430 }
0x21bc   :  { %v2433_v31 = vmul.f32 %v2431_v8, %v2395_v58 }
0x21be   :  { %2442 = vrot.lane.b32.xlu0 %v2433_v31, %s4541_s28 }
0x21c3   :  { %v2447_v21 = vpop.permute.xlu1 %2446 }
0x21c4   :  { %v2449_v1 = vmul.f32 %v2447_v21, %v5196_v9 }
0x21cb   :  { %v2465_v53 = vpop.permute.xlu1 %2464 }
0x21cc   :  { %v2467_v22 = vmul.f32 %v5976_v50, %v2465_v53 }
0x21d3   :  { %v2458_v34 = vpop.permute.xlu1 %2457 }
0x21d4   :  { %v2460_v30 = vmul.f32 %v5987_v13, %v2458_v34 }
0x21d6   :  { %v2462_v20 = vadd.f32 %v2461_v32, %v2460_v30 }
0x2208   :  { %v2436_v23 = vpop.permute.xlu2 %2435 }
0x2209   :  { %v2438_v25 = vmul.f32 %v5987_v13, %v2436_v23 }
0x220b   :  { %v2440_v58 = vadd.f32 %v2439_v19, %v2438_v25 }
0x2210   :  { %v2469_v17 = vpop.permute.xlu2 %2468 }
0x2211   :  { %v2471_v36 = vmul.f32 %v2469_v17, %v5196_v9 }
0x2213   :  { %v2472_v45 = vadd.f32 %v2471_v36, %v2467_v22 }
0x2215   :  { %2474 = vrot.lane.b32.xlu2 %v2472_v45, %s4541_s28 }
0x2230   :  { %v2443_v57 = vpop.permute.xlu0 %2442 }
0x2231   :  { %v2445_v48 = vmul.f32 %v5976_v50, %v2443_v57 }
0x2233   :  { %v2450_v43 = vadd.f32 %v2449_v1, %v2445_v48 }
0x2235   :  { %2452 = vrot.lane.b32.xlu0 %v2450_v43, %s4541_s28 }
0x226f   :  { %v2475_v44 = vpop.permute.xlu2 %2474 }
0x2270   :  { %v5993_v7 = vsel %vm395_vm15, %v2462_v20, %v2475_v44 }
0x2271   :  { %2572 = vrot.lane.b32.xlu2 %v5993_v7, %s4541_s28 }
0x22a7   :  { %v2453_v54 = vpop.permute.xlu0 %2452 }
0x22a8   :  { %v6001_v37 = vsel %vm395_vm15, %v2440_v58, %v2453_v54 }
0x22a9   :  { %4181 = vmatmul.msk.f32.vlgmr.msra.gmra.mxu0 %vm247_vm1, %v6001_v37  ;;  %4182 = vmatmul.msk.f32.vlgmr.msrb.gmra.mxu1 %vm247_vm1, %v6001_v37 }
0x2326   :  { %v2498_v41 = vpop.f32.mrf.mxu0  ;;  %v2518_v0 = vpop.f32.mrf.mxu1 }
0x2327   :  { %v2521_v46 = vadd.f32 %v2498_v41, %v1743_v40  ;;  %v2522_v18 = vadd.f32 %v2518_v0, %v5716_v24 }
0x2329   :  { %v2523_v14 = vmul.f32 2.0, %v2521_v46  ;;  %v2524_v4 = vmul.f32 2.0, %v2522_v18 }
0x232b   :  { %v2525_v3 = vsel %vm4900_vm3, %v2523_v14, %v2521_v46  ;;  %v2526_v39 = vsel %vm4915_vm6, %v2524_v4, %v2522_v18 }
0x232c   :  { %v4183_v11 = vmul.f32 -1.442695, %v2525_v3  ;;  %v4184_v55 = vmul.f32 -1.442695, %v2526_v39  ;;  %v2573_v3 = vpop.permute.xlu2 %2572 }
0x232e   :  { %4404 = vpow2.f32 %v4183_v11 }
0x232f   :  { %4406 = vpow2.f32 %v4184_v55 }
0x2334   :  { %v4405_v38 = vpop.eup %4404 }
0x2335   :  { %v4407_v10 = vpop.eup %4406  ;;  %v2533_v47 = vadd.f32 1.0, %v4405_v38 }
0x2336   :  { %v2534_v59 = vadd.f32 1.0, %v4407_v10 }
0x2337   :  { %4408 = vrcp.f32 %v2533_v47  ;;  %vm2540_vm5 = vweird.f32 %v2533_v47  ;;  %v2546_v36 = vand.u32 2147483648, %v2533_v47  ;;  %v2544_v57 = vand.u32 2147483647, %v2533_v47 }
0x2338   :  { %4410 = vrcp.f32 %v2534_v59  ;;  %v2561_v21 = vand.u32 2147483648, %v2534_v59  ;;  %v2559_v17 = vand.u32 2147483647, %v2534_v59  ;;  %vm2555_vm7 = vweird.f32 %v2534_v59 }
0x2339   :  { %v2547_v30 = vor.u32 1.1754944e-38, %v2546_v36  ;;  %vm2545_vm11 = vcmp.eq.f32.partialorder %v2544_v57, 8.507059e+37 }
0x233a   :  { %v2562_v1 = vor.u32 1.1754944e-38, %v2561_v21  ;;  %vm2560_vm10 = vcmp.eq.f32.partialorder %v2559_v17, 8.507059e+37 }
0x233d   :  { %v4409_v29 = vpop.eup %4408 }
0x233e   :  { %v4411_v24 = vpop.eup %4410  ;;  %v2536_v12 = vmul.f32 %v4409_v29, %v2533_v47  ;;  %vm2541_vm2 = vweird.f32 %v4409_v29 }
0x233f   :  { %v2551_v49 = vmul.f32 %v4411_v24, %v2534_v59  ;;  %vm2556_vm4 = vweird.f32 %v4411_v24  ;;  %vm2542_vm8 = vmor %vm2540_vm5, %vm2541_vm2 }
0x2340   :  { %v2537_v8 = vsub.f32 1.0, %v2536_v12  ;;  %vm2557_vm9 = vmor %vm2555_vm7, %vm2556_vm4 }
0x2341   :  { %v2552_v31 = vsub.f32 1.0, %v2551_v49 }
0x2342   :  { %v2538_v23 = vmul.f32 %v4409_v29, %v2537_v8 }
0x2343   :  { %v2553_v53 = vmul.f32 %v4411_v24, %v2552_v31 }
0x2344   :  { %v2539_v22 = vadd.f32 %v4409_v29, %v2538_v23 }
0x2345   :  { %v2554_v45 = vadd.f32 %v4411_v24, %v2553_v53 }
0x2346   :  { %v2543_v43 = vsel %vm2542_vm8, %v4409_v29, %v2539_v22 }
0x2347   :  { %v2558_v48 = vsel %vm2557_vm9, %v4411_v24, %v2554_v45  ;;  %v2548_v20 = vsel %vm2545_vm11, %v2547_v30, %v2543_v43 }
0x2348   :  { %v2563_v34 = vsel %vm2560_vm10, %v2562_v1, %v2558_v48  ;;  %v2565_v19 = vmul.f32 2.0, %v2548_v20  ;;  %v2636_v48 = vmul.f32 %v5993_v7, %v5196_v9 }
0x2349   :  { %v2566_v32 = vmul.f32 2.0, %v2563_v34 }
0x234a   :  { %v4185_v58 = vadd.f32 -1.0, %v2565_v19 }
0x234b   :  { %v4186_v44 = vadd.f32 -1.0, %v2566_v32 }
0x234c   :  { %v2569_v54 = vsel %vm4900_vm3, %v4185_v58, %v2548_v20 }
0x234d   :  { %v2570_v25 = vsel %vm4915_vm6, %v4186_v44, %v2563_v34  ;;  %v2575_v39 = vmul.f32 %v2573_v3, %v2569_v54 }
0x234e   :  { %2594 = vrot.lane.b32.xlu0 %v2570_v25, %s4540_s27  ;;  %v2592_v18 = vmul.f32 %v2570_v25, %v5993_v7 }
0x2356   :  { %2577 = vrot.lane.b32.xlu0 %v2569_v54, %s4540_s27 }
0x23c0   :  { %v2595_v40 = vpop.permute.xlu0 %2594 }
0x23c1   :  { %v2597_v41 = vmul.f32 %v2595_v40, %v2570_v25 }
0x23c3   :  { %2599 = vrot.lane.b32.xlu1 %v2597_v41, %s4541_s28 }
0x23c8   :  { %v2578_v0 = vpop.permute.xlu0 %2577 }
0x23c9   :  { %v2580_v46 = vmul.f32 %v2578_v0, %v2569_v54 }
0x23cb   :  { %2582 = vrot.lane.b32.xlu0 %v2580_v46, %s4541_s28 }
0x2435   :  { %v2600_v14 = vpop.permute.xlu1 %2599 }
0x2436   :  { %v2602_v4 = vadd.f32 %v2600_v14, %v2592_v18 }
0x2438   :  { %4412 = vtanh.f32 %v2602_v4 }
0x243d   :  { %v2583_v11 = vpop.permute.xlu0 %2582 }
0x243e   :  { %v4413_v55 = vpop.eup %4412  ;;  %v2585_v38 = vadd.f32 %v2583_v11, %v2575_v39 }
0x243f   :  { %2605 = vrot.lane.b32.xlu1 %v4413_v55, %s4540_s27 }
0x2440   :  { %4414 = vtanh.f32 %v2585_v38 }
0x2446   :  { %v4415_v10 = vpop.eup %4414 }
0x2447   :  { %2621 = vrot.lane.b32.xlu1 %v6001_v37, %s4542_s1  ;;  %2588 = vrot.lane.b32.xlu2 %v4415_v10, %s4540_s27 }
0x244f   :  { %2639 = vrot.lane.b32.xlu1 %v2602_v4, %s4542_s1 }
0x2457   :  { %2632 = vrot.lane.b32.xlu1 %v2585_v38, %s4542_s1 }
0x24a1   :  { %v2589_v47 = vpop.permute.xlu2 %2588 }
0x24a2   :  { %v2591_v59 = vmul.f32 %v2589_v47, %v2569_v54 }
0x24a4   :  { %2610 = vrot.lane.b32.xlu2 %v2591_v59, %s4541_s28 }
0x24ac   :  { %2643 = vrot.lane.b32.xlu2 %v5993_v7, %s4542_s1 }
0x24b1   :  { %v2606_v29 = vpop.permute.xlu1 %2605 }
0x24b2   :  { %v2608_v24 = vmul.f32 %v2606_v29, %v2570_v25 }
0x24b4   :  { %2617 = vrot.lane.b32.xlu0 %v2608_v24, %s4541_s28 }
0x24b9   :  { %v2622_v12 = vpop.permute.xlu1 %2621 }
0x24ba   :  { %v2624_v22 = vmul.f32 %v2622_v12, %v5213_v63 }
0x24c1   :  { %v2640_v8 = vpop.permute.xlu1 %2639 }
0x24c2   :  { %v2642_v21 = vmul.f32 %v5987_v13, %v2640_v8 }
0x24c9   :  { %v2633_v57 = vpop.permute.xlu1 %2632 }
0x24ca   :  { %v2635_v1 = vmul.f32 %v5976_v50, %v2633_v57 }
0x24cc   :  { %v2637_v43 = vadd.f32 %v2636_v48, %v2635_v1 }
0x24fe   :  { %v2611_v49 = vpop.permute.xlu2 %2610 }
0x2506   :  { %v2644_v31 = vpop.permute.xlu2 %2643 }
0x2507   :  { %v2646_v23 = vmul.f32 %v2644_v31, %v5213_v63  ;;  %v2613_v63 = vmul.f32 %v5976_v50, %v2611_v49 }
0x2509   :  { %v2647_v53 = vadd.f32 %v2646_v23, %v2642_v21 }
0x250b   :  { %2649 = vrot.lane.b32.xlu2 %v2647_v53, %s4541_s28 }
0x2526   :  { %v2618_v17 = vpop.permute.xlu0 %2617 }
0x2527   :  { %v2620_v36 = vmul.f32 %v5987_v13, %v2618_v17  ;;  %v2614_v13 = vmul.f32 %v6001_v37, %v5196_v9 }
0x2529   :  { %v2625_v45 = vadd.f32 %v2624_v22, %v2620_v36  ;;  %v2615_v32 = vadd.f32 %v2614_v13, %v2613_v63 }
0x252b   :  { %2627 = vrot.lane.b32.xlu0 %v2625_v45, %s4541_s28 }
0x2565   :  { %v2650_v34 = vpop.permute.xlu2 %2649 }
0x2566   :  { %v6045_v30 = vsel %vm395_vm15, %v2637_v43, %v2650_v34 }
0x2567   :  { %2747 = vrot.lane.b32.xlu2 %v6045_v30, %s4541_s28 }
0x259d   :  { %v2628_v20 = vpop.permute.xlu0 %2627 }
0x259e   :  { %v6053_v44 = vsel %vm395_vm15, %v2615_v32, %v2628_v20 }
0x259f   :  { %4187 = vmatmul.msk.f32.vlgmr.msra.gmra.mxu2 %vm247_vm1, %v6053_v44  ;;  %4188 = vmatmul.msk.f32.vlgmr.msrb.gmra.mxu3 %vm247_vm1, %v6053_v44 }
0x2622   :  { %v2673_v7 = vpop.f32.mrf.mxu2  ;;  %v2693_v25 = vpop.f32.mrf.mxu3 }
0x2623   :  { %v2696_v19 = vadd.f32 %v2673_v7, %v5725_v33  ;;  %v2697_v50 = vadd.f32 %v2693_v25, %v5712_v61  ;;  %v2748_v7 = vpop.permute.xlu2 %2747 }
0x2625   :  { %v2698_v58 = vmul.f32 2.0, %v2696_v19  ;;  %v2699_v54 = vmul.f32 2.0, %v2697_v50 }
0x2627   :  { %v2700_v9 = vsel %vm4900_vm3, %v2698_v58, %v2696_v19  ;;  %v2701_v37 = vsel %vm4915_vm6, %v2699_v54, %v2697_v50 }
0x2628   :  { %v4189_v40 = vmul.f32 -1.442695, %v2700_v9  ;;  %v4190_v41 = vmul.f32 -1.442695, %v2701_v37 }
0x262a   :  { %4416 = vpow2.f32 %v4189_v40 }
0x262b   :  { %4418 = vpow2.f32 %v4190_v41 }
0x2630   :  { %v4417_v0 = vpop.eup %4416 }
0x2631   :  { %v4419_v46 = vpop.eup %4418  ;;  %v2708_v18 = vadd.f32 1.0, %v4417_v0 }
0x2632   :  { %v2709_v14 = vadd.f32 1.0, %v4419_v46 }
0x2633   :  { %4420 = vrcp.f32 %v2708_v18  ;;  %vm2715_vm14 = vweird.f32 %v2708_v18  ;;  %v2721_v29 = vand.u32 2147483648, %v2708_v18  ;;  %v2719_v12 = vand.u32 2147483647, %v2708_v18 }
0x2634   :  { %4422 = vrcp.f32 %v2709_v14  ;;  %v2736_v55 = vand.u32 2147483648, %v2709_v14  ;;  %v2734_v47 = vand.u32 2147483647, %v2709_v14  ;;  %vm2730_vm2 = vweird.f32 %v2709_v14 }
0x2635   :  { %v2722_v23 = vor.u32 1.1754944e-38, %v2721_v29  ;;  %vm2720_vm8 = vcmp.eq.f32.partialorder %v2719_v12, 8.507059e+37 }
0x2636   :  { %v2737_v49 = vor.u32 1.1754944e-38, %v2736_v55  ;;  %vm2735_vm7 = vcmp.eq.f32.partialorder %v2734_v47, 8.507059e+37  ;;  %v2811_v47 = vmul.f32 %v6045_v30, %v5099_v28 }
0x2639   :  { %v4421_v33 = vpop.eup %4420 }
0x263a   :  { %v4423_v61 = vpop.eup %4422  ;;  %v2711_v4 = vmul.f32 %v4421_v33, %v2708_v18  ;;  %vm2716_vm12 = vweird.f32 %v4421_v33 }
0x263b   :  { %v2726_v3 = vmul.f32 %v4423_v61, %v2709_v14  ;;  %vm2731_vm13 = vweird.f32 %v4423_v61  ;;  %vm2717_vm4 = vmor %vm2715_vm14, %vm2716_vm12 }
0x263c   :  { %v2712_v39 = vsub.f32 1.0, %v2711_v4  ;;  %vm2732_vm5 = vmor %vm2730_vm2, %vm2731_vm13 }
0x263d   :  { %v2727_v11 = vsub.f32 1.0, %v2726_v3 }
0x263e   :  { %v2713_v38 = vmul.f32 %v4421_v33, %v2712_v39 }
0x263f   :  { %v2728_v10 = vmul.f32 %v4423_v61, %v2727_v11 }
0x2640   :  { %v2714_v59 = vadd.f32 %v4421_v33, %v2713_v38 }
0x2641   :  { %v2729_v24 = vadd.f32 %v4423_v61, %v2728_v10 }
0x2642   :  { %v2718_v31 = vsel %vm2717_vm4, %v4421_v33, %v2714_v59 }
0x2643   :  { %v2733_v8 = vsel %vm2732_vm5, %v4423_v61, %v2729_v24  ;;  %v2723_v17 = vsel %vm2720_vm8, %v2722_v23, %v2718_v31 }
0x2644   :  { %v2738_v21 = vsel %vm2735_vm7, %v2737_v49, %v2733_v8  ;;  %v2740_v45 = vmul.f32 2.0, %v2723_v17 }
0x2645   :  { %v2741_v53 = vmul.f32 2.0, %v2738_v21 }
0x2646   :  { %v4191_v57 = vadd.f32 -1.0, %v2740_v45 }
0x2647   :  { %v4192_v22 = vadd.f32 -1.0, %v2741_v53 }
0x2648   :  { %v2744_v1 = vsel %vm4900_vm3, %v4191_v57, %v2723_v17 }
0x2649   :  { %v2745_v36 = vsel %vm4915_vm6, %v4192_v22, %v2738_v21  ;;  %v2750_v25 = vmul.f32 %v2748_v7, %v2744_v1 }
0x264a   :  { %2769 = vrot.lane.b32.xlu0 %v2745_v36, %s4540_s27  ;;  %v2767_v13 = vmul.f32 %v2745_v36, %v6045_v30 }
0x2652   :  { %2752 = vrot.lane.b32.xlu0 %v2744_v1, %s4540_s27 }
0x26bc   :  { %v2770_v48 = vpop.permute.xlu0 %2769 }
0x26bd   :  { %v2772_v43 = vmul.f32 %v2770_v48, %v2745_v36 }
0x26bf   :  { %2774 = vrot.lane.b32.xlu1 %v2772_v43, %s4541_s28 }
0x26c4   :  { %v2753_v34 = vpop.permute.xlu0 %2752 }
0x26c5   :  { %v2755_v63 = vmul.f32 %v2753_v34, %v2744_v1 }
0x26c7   :  { %2757 = vrot.lane.b32.xlu0 %v2755_v63, %s4541_s28 }
0x2731   :  { %v2775_v32 = vpop.permute.xlu1 %2774 }
0x2732   :  { %v2777_v20 = vadd.f32 %v2775_v32, %v2767_v13 }
0x2734   :  { %4424 = vtanh.f32 %v2777_v20 }
0x2739   :  { %v2758_v19 = vpop.permute.xlu0 %2757 }
0x273a   :  { %v4425_v50 = vpop.eup %4424  ;;  %v2760_v58 = vadd.f32 %v2758_v19, %v2750_v25 }
0x273b   :  { %2780 = vrot.lane.b32.xlu1 %v4425_v50, %s4540_s27 }
0x273c   :  { %4426 = vtanh.f32 %v2760_v58 }
0x2742   :  { %v4427_v54 = vpop.eup %4426 }
0x2743   :  { %2763 = vrot.lane.b32.xlu2 %v4427_v54, %s4540_s27  ;;  %2796 = vrot.lane.b32.xlu1 %v6053_v44, %s4542_s1 }
0x274b   :  { %2814 = vrot.lane.b32.xlu1 %v2777_v20, %s4542_s1 }
0x2753   :  { %2807 = vrot.lane.b32.xlu1 %v2760_v58, %s4542_s1 }
0x279d   :  { %v2764_v9 = vpop.permute.xlu2 %2763 }
0x279e   :  { %v2766_v37 = vmul.f32 %v2764_v9, %v2744_v1 }
0x27a0   :  { %2785 = vrot.lane.b32.xlu2 %v2766_v37, %s4541_s28 }
0x27a8   :  { %2818 = vrot.lane.b32.xlu2 %v6045_v30, %s4542_s1 }
0x27ad   :  { %v2781_v40 = vpop.permute.xlu1 %2780 }
0x27ae   :  { %v2783_v41 = vmul.f32 %v2781_v40, %v2745_v36 }
0x27b0   :  { %2792 = vrot.lane.b32.xlu0 %v2783_v41, %s4541_s28 }
0x27b5   :  { %v2797_v0 = vpop.permute.xlu1 %2796 }
0x27b6   :  { %v2799_v39 = vmul.f32 %v2797_v0, %v5116_v52 }
0x27bd   :  { %v2815_v18 = vpop.permute.xlu1 %2814 }
0x27be   :  { %v2817_v33 = vmul.f32 %v5895_v27, %v2815_v18 }
0x27c5   :  { %v2808_v38 = vpop.permute.xlu1 %2807 }
0x27c6   :  { %v2810_v10 = vmul.f32 %v5884_v60, %v2808_v38 }
0x27c8   :  { %v2812_v59 = vadd.f32 %v2811_v47, %v2810_v10 }
0x27fa   :  { %v2786_v46 = vpop.permute.xlu2 %2785 }
0x2802   :  { %v2819_v14 = vpop.permute.xlu2 %2818 }
0x2803   :  { %v2821_v61 = vmul.f32 %v2819_v14, %v5116_v52  ;;  %v2788_v52 = vmul.f32 %v5884_v60, %v2786_v46 }
0x2805   :  { %v2822_v4 = vadd.f32 %v2821_v61, %v2817_v33 }
0x2807   :  { %2824 = vrot.lane.b32.xlu2 %v2822_v4, %s4541_s28 }
0x2822   :  { %v2793_v3 = vpop.permute.xlu0 %2792 }
0x2823   :  { %v2795_v11 = vmul.f32 %v5895_v27, %v2793_v3  ;;  %v2789_v27 = vmul.f32 %v6053_v44, %v5099_v28 }
0x2825   :  { %v2800_v55 = vadd.f32 %v2799_v39, %v2795_v11  ;;  %v2790_v12 = vadd.f32 %v2789_v27, %v2788_v52 }
0x2827   :  { %2802 = vrot.lane.b32.xlu0 %v2800_v55, %s4541_s28 }
0x2861   :  { %v2825_v29 = vpop.permute.xlu2 %2824 }
0x2862   :  { %v6094_v24 = vsel %vm395_vm15, %v2812_v59, %v2825_v29 }
0x2863   :  { %2922 = vrot.lane.b32.xlu2 %v6094_v24, %s4541_s28 }
0x2899   :  { %v2803_v49 = vpop.permute.xlu0 %2802 }
0x289a   :  { %v6102_v8 = vsel %vm395_vm15, %v2790_v12, %v2803_v49 }
0x289b   :  { %4193 = vmatmul.msk.f32.vlgmr.msrb.gmra.mxu0 %vm247_vm1, %v6102_v8  ;;  %4194 = vmatmul.msk.f32.vlgmr.msra.gmra.mxu1 %vm247_vm1, %v6102_v8 }
0x28bd   :  { %v2923_v59 = vpop.permute.xlu2 %2922 }
0x2918   :  { %v2848_v30 = vpop.f32.mrf.mxu0  ;;  %v2868_v31 = vpop.f32.mrf.mxu1 }
0x2919   :  { %v2871_v21 = vadd.f32 %v2848_v30, %v5731_v6  ;;  %v2872_v60 = vadd.f32 %v2868_v31, %v5708_v5 }
0x291b   :  { %v2873_v23 = vmul.f32 2.0, %v2871_v21  ;;  %v2874_v53 = vmul.f32 2.0, %v2872_v60 }
0x291d   :  { %v2875_v28 = vsel %vm4900_vm3, %v2873_v23, %v2871_v21  ;;  %v2876_v44 = vsel %vm4915_vm6, %v2874_v53, %v2872_v60 }
0x291e   :  { %v4195_v17 = vmul.f32 -1.442695, %v2875_v28  ;;  %v4196_v22 = vmul.f32 -1.442695, %v2876_v44 }
0x2920   :  { %4428 = vpow2.f32 %v4195_v17  ;;  %v4535_v17 = vld [vmem:[%s6588_s3 + $0x8] sm:$0xff] }
0x2921   :  { %4430 = vpow2.f32 %v4196_v22 }
0x2926   :  { %v4429_v36 = vpop.eup %4428 }
0x2927   :  { %v4431_v45 = vpop.eup %4430  ;;  %v2883_v57 = vadd.f32 1.0, %v4429_v36 }
0x2928   :  { %v2884_v1 = vadd.f32 1.0, %v4431_v45 }
0x2929   :  { %4432 = vrcp.f32 %v2883_v57  ;;  %vm2890_vm11 = vweird.f32 %v2883_v57  ;;  %v2896_v19 = vand.u32 2147483648, %v2883_v57  ;;  %v2894_v58 = vand.u32 2147483647, %v2883_v57 }
0x292a   :  { %4434 = vrcp.f32 %v2884_v1  ;;  %v2911_v13 = vand.u32 2147483648, %v2884_v1  ;;  %v2909_v7 = vand.u32 2147483647, %v2884_v1  ;;  %vm2905_vm12 = vweird.f32 %v2884_v1 }
0x292b   :  { %v2897_v41 = vor.u32 1.1754944e-38, %v2896_v19  ;;  %vm2895_vm4 = vcmp.eq.f32.partialorder %v2894_v58, 8.507059e+37 }
0x292c   :  { %v2912_v54 = vor.u32 1.1754944e-38, %v2911_v13  ;;  %vm2910_vm2 = vcmp.eq.f32.partialorder %v2909_v7, 8.507059e+37  ;;  %v2964_v7 = vmul.f32 %v6102_v8, %v5019_v35 }
0x292f   :  { %v4433_v6 = vpop.eup %4432 }
0x2930   :  { %v4435_v5 = vpop.eup %4434  ;;  %v2886_v48 = vmul.f32 %v4433_v6, %v2883_v57  ;;  %vm2891_vm9 = vweird.f32 %v4433_v6 }
0x2931   :  { %v2901_v43 = vmul.f32 %v4435_v5, %v2884_v1  ;;  %vm2906_vm10 = vweird.f32 %v4435_v5  ;;  %vm2892_vm13 = vmor %vm2890_vm11, %vm2891_vm9 }
0x2932   :  { %v2887_v34 = vsub.f32 1.0, %v2886_v48  ;;  %vm2907_vm14 = vmor %vm2905_vm12, %vm2906_vm10 }
0x2933   :  { %v2902_v63 = vsub.f32 1.0, %v2901_v43  ;;  %v4536_v43 = vld [vmem:[%s6588_s3 + $0x30] sm:$0xff] }
0x2934   :  { %v2888_v32 = vmul.f32 %v4433_v6, %v2887_v34 }
0x2935   :  { %v2903_v20 = vmul.f32 %v4435_v5, %v2902_v63  ;;  %v2986_v63 = vmul.f32 %v6094_v24, %v5019_v35 }
0x2936   :  { %v2889_v25 = vadd.f32 %v4433_v6, %v2888_v32 }
0x2937   :  { %v2904_v50 = vadd.f32 %v4435_v5, %v2903_v20 }
0x2938   :  { %v2893_v37 = vsel %vm2892_vm13, %v4433_v6, %v2889_v25 }
0x2939   :  { %v2908_v9 = vsel %vm2907_vm14, %v4435_v5, %v2904_v50  ;;  %v2898_v46 = vsel %vm2895_vm4, %v2897_v41, %v2893_v37 }
0x293a   :  { %v2913_v40 = vsel %vm2910_vm2, %v2912_v54, %v2908_v9  ;;  %v2915_v33 = vmul.f32 2.0, %v2898_v46 }
0x293b   :  { %v2916_v0 = vmul.f32 2.0, %v2913_v40 }
0x293c   :  { %v4197_v61 = vadd.f32 -1.0, %v2915_v33 }
0x293d   :  { %v4198_v18 = vadd.f32 -1.0, %v2916_v0 }
0x293e   :  { %v2919_v4 = vsel %vm4900_vm3, %v4197_v61, %v2898_v46 }
0x293f   :  { %v2920_v14 = vsel %vm4915_vm6, %v4198_v18, %v2913_v40  ;;  %v2925_v29 = vmul.f32 %v2923_v59, %v2919_v4 }
0x2940   :  { %2944 = vrot.lane.b32.xlu0 %v2920_v14, %s4540_s27  ;;  %v2942_v38 = vmul.f32 %v2920_v14, %v6094_v24 }
0x2948   :  { %2927 = vrot.lane.b32.xlu0 %v2919_v4, %s4540_s27 }
0x29b2   :  { %v2945_v3 = vpop.permute.xlu0 %2944 }
0x29b3   :  { %v2947_v39 = vmul.f32 %v2945_v3, %v2920_v14 }
0x29b5   :  { %2949 = vrot.lane.b32.xlu1 %v2947_v39, %s4541_s28 }
0x29ba   :  { %v2928_v11 = vpop.permute.xlu0 %2927 }
0x29bb   :  { %v2930_v55 = vmul.f32 %v2928_v11, %v2919_v4 }
0x29bd   :  { %2932 = vrot.lane.b32.xlu0 %v2930_v55, %s4541_s28 }
0x2a27   :  { %v2950_v10 = vpop.permute.xlu1 %2949 }
0x2a28   :  { %v2952_v47 = vadd.f32 %v2950_v10, %v2942_v38 }
0x2a2a   :  { %4436 = vtanh.f32 %v2952_v47 }
0x2a2f   :  { %v2933_v52 = vpop.permute.xlu0 %2932 }
0x2a30   :  { %v4437_v27 = vpop.eup %4436  ;;  %v2935_v12 = vadd.f32 %v2933_v52, %v2925_v29 }
0x2a31   :  { %2955 = vrot.lane.b32.xlu1 %v4437_v27, %s4540_s27 }
0x2a32   :  { %4438 = vtanh.f32 %v2935_v12 }
0x2a38   :  { %v4439_v49 = vpop.eup %4438 }
0x2a39   :  { %2971 = vrot.lane.b32.xlu1 %v6102_v8, %s4542_s1  ;;  %2938 = vrot.lane.b32.xlu2 %v4439_v49, %s4540_s27 }
0x2a41   :  { %2989 = vrot.lane.b32.xlu1 %v2952_v47, %s4542_s1 }
0x2a49   :  { %2982 = vrot.lane.b32.xlu1 %v2935_v12, %s4542_s1 }
0x2a93   :  { %v2939_v30 = vpop.permute.xlu2 %2938 }
0x2a94   :  { %v2941_v31 = vmul.f32 %v2939_v30, %v2919_v4 }
0x2a96   :  { %2960 = vrot.lane.b32.xlu2 %v2941_v31, %s4541_s28 }
0x2a9e   :  { %2993 = vrot.lane.b32.xlu2 %v6094_v24, %s4542_s1  ;;  %v1752_v24 = vadd.f32 %v6007_v15, %v5699_v16 }
0x2aa3   :  { %v2956_v21 = vpop.permute.xlu1 %2955 }
0x2aa4   :  { %v2958_v60 = vmul.f32 %v2956_v21, %v2920_v14 }
0x2aa6   :  { %2967 = vrot.lane.b32.xlu0 %v2958_v60, %s4541_s28 }
0x2aab   :  { %v2972_v23 = vpop.permute.xlu1 %2971 }
0x2aac   :  { %v2974_v1 = vmul.f32 %v2972_v23, %v5031_v62 }
0x2ab3   :  { %v2990_v28 = vpop.permute.xlu1 %2989 }
0x2ab4   :  { %v2992_v22 = vmul.f32 %v4535_v17, %v2990_v28 }
0x2abb   :  { %v2983_v48 = vpop.permute.xlu1 %2982 }
0x2abc   :  { %v2985_v34 = vmul.f32 %v4536_v43, %v2983_v48 }
0x2abe   :  { %v2987_v13 = vadd.f32 %v2986_v63, %v2985_v34 }
0x2af0   :  { %v2961_v53 = vpop.permute.xlu2 %2960 }
0x2af8   :  { %v2994_v44 = vpop.permute.xlu2 %2993 }
0x2af9   :  { %v2996_v36 = vmul.f32 %v2994_v44, %v5031_v62  ;;  %v2963_v62 = vmul.f32 %v4536_v43, %v2961_v53 }
0x2afb   :  { %v2997_v45 = vadd.f32 %v2996_v36, %v2992_v22  ;;  %v2965_v25 = vadd.f32 %v2964_v7, %v2963_v62 }
0x2afd   :  { %2999 = vrot.lane.b32.xlu2 %v2997_v45, %s4541_s28 }
0x2b18   :  { %v2968_v57 = vpop.permute.xlu0 %2967 }
0x2b19   :  { %v2970_v6 = vmul.f32 %v4535_v17, %v2968_v57 }
0x2b1b   :  { %v2975_v5 = vadd.f32 %v2974_v1, %v2970_v6 }
0x2b1d   :  { %2977 = vrot.lane.b32.xlu0 %v2975_v5, %s4541_s28 }
0x2b57   :  { %v3000_v32 = vpop.permute.xlu2 %2999 }
0x2b58   :  { %v6146_v20 = vsel %vm395_vm15, %v2987_v13, %v3000_v32 }
0x2b59   :  { %3097 = vrot.lane.b32.xlu2 %v6146_v20, %s4541_s28 }
0x2b8f   :  { %v2978_v19 = vpop.permute.xlu0 %2977 }
0x2b90   :  { %v6153_v50 = vsel %vm395_vm15, %v2965_v25, %v2978_v19 }
0x2b91   :  { %4199 = vmatmul.msk.f32.vlgmr.msrb.gmra.mxu2 %vm247_vm1, %v6153_v50  ;;  %4200 = vmatmul.msk.f32.vlgmr.msra.gmra.mxu3 %vm247_vm1, %v6153_v50 }
0x2bb3   :  { %v3098_v5 = vpop.permute.xlu2 %3097 }
0x2c14   :  { %v3023_v58 = vpop.f32.mrf.mxu2  ;;  %v3043_v54 = vpop.f32.mrf.mxu3 }
0x2c15   :  { %v3046_v9 = vadd.f32 %v3023_v58, %v1752_v24  ;;  %v3047_v37 = vadd.f32 %v3043_v54, %v5702_v26 }
0x2c17   :  { %v3048_v35 = vmul.f32 2.0, %v3046_v9  ;;  %v3049_v8 = vmul.f32 2.0, %v3047_v37 }
0x2c19   :  { %v3050_v40 = vsel %vm4900_vm3, %v3048_v35, %v3046_v9  ;;  %v3051_v41 = vsel %vm4915_vm6, %v3049_v8, %v3047_v37  ;;  %v4537_v9 = vld [vmem:[%s6588_s3] sm:$0xff] }
0x2c1a   :  { %v4201_v0 = vmul.f32 -1.442695, %v3050_v40  ;;  %v4202_v46 = vmul.f32 -1.442695, %v3051_v41 }
0x2c1c   :  { %4440 = vpow2.f32 %v4201_v0 }
0x2c1d   :  { %4442 = vpow2.f32 %v4202_v46 }
0x2c22   :  { %v4441_v18 = vpop.eup %4440 }
0x2c23   :  { %v4443_v14 = vpop.eup %4442  ;;  %v3058_v16 = vadd.f32 1.0, %v4441_v18  ;;  %v3185_v18 = vld [vmem:[%s6559_s9 + $0x38] sm:$0xff] }
0x2c24   :  { %v3059_v15 = vadd.f32 1.0, %v4443_v14  ;;  %v3184_v14 = vld [vmem:[%s6559_s9 + $0x30] sm:$0xff]  ;;  %3201 = vmatpush.msra.mxu0 %v3185_v18 }
0x2c25   :  { %4444 = vrcp.f32 %v3058_v16  ;;  %vm3065_vm8 = vweird.f32 %v3058_v16  ;;  %v3071_v59 = vand.u32 2147483648, %v3058_v16  ;;  %v3069_v52 = vand.u32 2147483647, %v3058_v16 }
0x2c26   :  { %4446 = vrcp.f32 %v3059_v15  ;;  %v3086_v11 = vand.u32 2147483648, %v3059_v15  ;;  %v3084_v10 = vand.u32 2147483647, %v3059_v15  ;;  %vm3080_vm9 = vweird.f32 %v3059_v15  ;;  %3202 = vmatpush.msra.mxu0 %v3184_v14 }
0x2c27   :  { %v3072_v31 = vor.u32 1.1754944e-38, %v3071_v59  ;;  %vm3070_vm13 = vcmp.eq.f32.partialorder %v3069_v52, 8.507059e+37  ;;  %v3254_v59 = vld [vmem:[%s6561_s13 + $0x8] sm:$0xff]  ;;  %v3253_v52 = vld [vmem:[%s6561_s13] sm:$0xff] }
0x2c28   :  { %v3087_v27 = vor.u32 1.1754944e-38, %v3086_v11  ;;  %vm3085_vm12 = vcmp.eq.f32.partialorder %v3084_v10, 8.507059e+37  ;;  %v3217_v11 = vld [vmem:[%s6560_s11 + $0x20] sm:$0xff]  ;;  %v3214_v10 = vld [vmem:[%s6560_s11 + $0x8] sm:$0xff]  ;;  %3288 = vmatpush.msra.mxu2 %v3254_v59 }
0x2c2a   :  { %3289 = vmatpush.msra.mxu2 %v3253_v52 }
0x2c2b   :  { %v4445_v33 = vpop.eup %4444 }
0x2c2c   :  { %v4447_v26 = vpop.eup %4446  ;;  %v3061_v61 = vmul.f32 %v4445_v33, %v3058_v16  ;;  %vm3066_vm5 = vweird.f32 %v4445_v33  ;;  %v3183_v16 = vld [vmem:[%s6559_s9 + $0x28] sm:$0xff] }
0x2c2d   :  { %v3076_v4 = vmul.f32 %v4447_v26, %v3059_v15  ;;  %vm3081_vm7 = vweird.f32 %v4447_v26  ;;  %vm3067_vm10 = vmor %vm3065_vm8, %vm3066_vm5  ;;  %v3182_v15 = vld [vmem:[%s6559_s9 + $0x20] sm:$0xff]  ;;  %3203 = vmatpush.msra.mxu0 %v3183_v16 }
0x2c2e   :  { %v3062_v3 = vsub.f32 1.0, %v3061_v61  ;;  %vm3082_vm11 = vmor %vm3080_vm9, %vm3081_vm7  ;;  %v3179_v61 = vld [vmem:[%s6559_s9 + $0x8] sm:$0xff] }
0x2c2f   :  { %v3077_v39 = vsub.f32 1.0, %v3076_v4  ;;  %3204 = vmatpush.msra.mxu0 %v3182_v15  ;;  %v3178_v4 = vld [vmem:[%s6559_s9] sm:$0xff] }
0x2c30   :  { %v3063_v55 = vmul.f32 %v4445_v33, %v3062_v3  ;;  %v3219_v3 = vld [vmem:[%s6560_s11 + $0x30] sm:$0xff] }
0x2c31   :  { %v3078_v38 = vmul.f32 %v4447_v26, %v3077_v39  ;;  %v3218_v39 = vld [vmem:[%s6560_s11 + $0x28] sm:$0xff] }
0x2c32   :  { %v3064_v47 = vadd.f32 %v4445_v33, %v3063_v55  ;;  %v3216_v55 = vld [vmem:[%s6560_s11 + $0x18] sm:$0xff] }
0x2c33   :  { %v3079_v29 = vadd.f32 %v4447_v26, %v3078_v38  ;;  %v3215_v38 = vld [vmem:[%s6560_s11 + $0x10] sm:$0xff] }
0x2c34   :  { %v3068_v49 = vsel %vm3067_vm10, %v4445_v33, %v3064_v47  ;;  %v3181_v33 = vld [vmem:[%s6559_s9 + $0x18] sm:$0xff]  ;;  %v3213_v47 = vld [vmem:[%s6560_s11] sm:$0xff] }
0x2c35   :  { %v3083_v12 = vsel %vm3082_vm11, %v4447_v26, %v3079_v29  ;;  %v3073_v60 = vsel %vm3070_vm13, %v3072_v31, %v3068_v49  ;;  %v3180_v26 = vld [vmem:[%s6559_s9 + $0x10] sm:$0xff]  ;;  %3205 = vmatpush.msra.mxu0 %v3181_v33  ;;  %v6248_v29 = vld [vmem:[%s6562_s14 + $0x18] sm:$0xff]  ;;  %v3139_v31 = vmul.f32 %v6153_v50, %v4937_v42 }
0x2c36   :  { %v3088_v30 = vsel %vm3085_vm12, %v3087_v27, %v3083_v12  ;;  %v3090_v28 = vmul.f32 2.0, %v3073_v60  ;;  %3334 = vmatpush.msrb.mxu3 %v6248_v29  ;;  %v6257_v27 = vld [vmem:[%s6562_s14 + $0x10] sm:$0xff]  ;;  %v6262_v12 = vld [vmem:[%s6562_s14 + $0x8] sm:$0xff]  ;;  %v4538_v49 = vld [vmem:[%s6588_s3 + $0x38] sm:$0xff] }
0x2c37   :  { %v3091_v21 = vmul.f32 2.0, %v3088_v30  ;;  %3206 = vmatpush.msra.mxu0 %v3180_v26 }
0x2c38   :  { %v4203_v44 = vadd.f32 -1.0, %v3090_v28  ;;  %3335 = vmatpush.msrb.mxu3 %v6257_v27  ;;  %v3161_v28 = vmul.f32 %v6146_v20, %v4937_v42  ;;  %v4255_v42 = vld [vmem:[%s6558_s10] ss:$0 sm:$0xff] }
0x2c39   :  { %v4204_v23 = vadd.f32 -1.0, %v3091_v21  ;;  %3207 = vmatpush.msra.mxu0 %v3179_v61 }
0x2c3a   :  { %v3094_v17 = vsel %vm4900_vm3, %v4203_v44, %v3073_v60  ;;  %3336 = vmatpush.msrb.mxu3 %v6262_v12 }
0x2c3b   :  { %v3095_v53 = vsel %vm4915_vm6, %v4204_v23, %v3088_v30  ;;  %v3100_v48 = vmul.f32 %v3098_v5, %v3094_v17  ;;  %3208 = vmatpush.msra.mxu0 %v3178_v4  ;;  %v6307_v5 = vld [vmem:[%s6565_s15] ss:$0 sm:$0xff]  ;;  %v3317_v4 = vld [vmem:[%s6566_s16 + $0x38] sm:$0xff] }
0x2c3c   :  { %3119 = vrot.lane.b32.xlu0 %v3095_v53, %s4540_s27  ;;  %v3117_v2 = vmul.f32 %v3095_v53, %v6146_v20  ;;  %3958 = vmatpush.msrb.mxu2 %v3317_v4 }
0x2c3d   :  { %3410 = vmatpush.msrb.mxu0 %v3317_v4 }
0x2c44   :  { %3102 = vrot.lane.b32.xlu0 %v3094_v17, %s4540_s27 }
0x2cae   :  { %v3120_v22 = vpop.permute.xlu0 %3119 }
0x2caf   :  { %v3122_v36 = vmul.f32 %v3120_v22, %v3095_v53 }
0x2cb1   :  { %3124 = vrot.lane.b32.xlu1 %v3122_v36, %s4541_s28 }
0x2cb6   :  { %v3103_v45 = vpop.permute.xlu0 %3102 }
0x2cb7   :  { %v3105_v57 = vmul.f32 %v3103_v45, %v3094_v17  ;;  %v6288_v45 = vld [vmem:[%s6562_s14] sm:$0xff] }
0x2cb8   :  { %3337 = vmatpush.msrb.mxu3 %v6288_v45 }
0x2cb9   :  { %3107 = vrot.lane.b32.xlu0 %v3105_v57, %s4541_s28 }
0x2cba   :  { %3547 = vmatpush.msra.mxu3 %v3317_v4 }
0x2d23   :  { %v3125_v1 = vpop.permute.xlu1 %3124 }
0x2d24   :  { %v3127_v6 = vadd.f32 %v3125_v1, %v3117_v2  ;;  %v4256_v2 = vld [vmem:[%s6563_s12] ss:$0 sm:$0xff] }
0x2d26   :  { %4448 = vtanh.f32 %v3127_v6 }
0x2d2b   :  { %v3108_v43 = vpop.permute.xlu0 %3107 }
0x2d2c   :  { %v4449_v34 = vpop.eup %4448  ;;  %v3110_v63 = vadd.f32 %v3108_v43, %v3100_v48 }
0x2d2d   :  { %3130 = vrot.lane.b32.xlu1 %v4449_v34, %s4540_s27 }
0x2d2e   :  { %4450 = vtanh.f32 %v3110_v63 }
0x2d34   :  { %v4451_v13 = vpop.eup %4450 }
0x2d35   :  { %3113 = vrot.lane.b32.xlu2 %v4451_v13, %s4540_s27  ;;  %3146 = vrot.lane.b32.xlu1 %v6153_v50, %s4542_s1  ;;  %v3248_v50 = vld [vmem:[%s6564_s2] sm:$0xff] }
0x2d36   :  { %4207 = vmatmul.msk.f32.vlgmr.msra.gmra.mxu2 %vm140_vm0, %v3248_v50 }
0x2d3d   :  { %3164 = vrot.lane.b32.xlu1 %v3127_v6, %s4542_s1 }
0x2d8f   :  { %v3114_v32 = vpop.permute.xlu2 %3113 }
0x2d90   :  { %v3116_v62 = vmul.f32 %v3114_v32, %v3094_v17 }
0x2d92   :  { %3135 = vrot.lane.b32.xlu2 %v3116_v62, %s4541_s28 }
0x2d9a   :  { %3168 = vrot.lane.b32.xlu2 %v6146_v20, %s4542_s1 }
0x2d9f   :  { %v3131_v7 = vpop.permute.xlu1 %3130 }
0x2da0   :  { %v3133_v25 = vmul.f32 %v3131_v7, %v3095_v53 }
0x2da2   :  { %3142 = vrot.lane.b32.xlu0 %v3133_v25, %s4541_s28 }
0x2da7   :  { %v3147_v19 = vpop.permute.xlu1 %3146 }
0x2da8   :  { %v3149_v41 = vmul.f32 %v3147_v19, %v4953_v56 }
0x2daf   :  { %v3165_v58 = vpop.permute.xlu1 %3164 }
0x2db0   :  { %v3167_v37 = vmul.f32 %v4537_v9, %v3165_v58 }
0x2db9   :  { %v3291_v48 = vpop.f32.mrf.mxu2 }
0x2dba   :  { %v3292_v43 = vadd.f32 %v6307_v5, %v3291_v48 }
0x2dec   :  { %v6184_v24 = vpop.permute.xlu2 %3135 }
0x2ded   :  { %v3138_v30 = vmul.f32 %v4538_v49, %v6184_v24 }
0x2def   :  { %v3140_v21 = vadd.f32 %v3139_v31, %v3138_v30 }
0x2df4   :  { %v3169_v54 = vpop.permute.xlu2 %3168 }
0x2df5   :  { %v3171_v35 = vmul.f32 %v3169_v54, %v4953_v56  ;;  %v3220_v56 = vld [vmem:[%s6560_s11 + $0x38] sm:$0xff] }
0x2df6   :  { %3236 = vmatpush.msrb.mxu1 %v3220_v56 }
0x2df7   :  { %v3172_v8 = vadd.f32 %v3171_v35, %v3167_v37 }
0x2df8   :  { %3237 = vmatpush.msrb.mxu1 %v3219_v3  ;;  %v3316_v3 = vld [vmem:[%s6566_s16 + $0x30] sm:$0xff] }
0x2df9   :  { %3174 = vrot.lane.b32.xlu1 %v3172_v8, %s4541_s28  ;;  %3411 = vmatpush.msrb.mxu0 %v3316_v3 }
0x2dfa   :  { %3238 = vmatpush.msrb.mxu1 %v3218_v39  ;;  %v3249_v39 = vld [vmem:[%s6564_s2 + $0x8] sm:$0xff]  ;;  %3548 = vmatpush.msra.mxu3 %v3316_v3 }
0x2dfb   :  { %4208 = vmatmul.msk.f32.gmra.mxu2 %vm140_vm0, %v3249_v39 }
0x2dfc   :  { %3239 = vmatpush.msrb.mxu1 %v3217_v11  ;;  %v3315_v11 = vld [vmem:[%s6566_s16 + $0x28] sm:$0xff]  ;;  %3959 = vmatpush.msrb.mxu2 %v3316_v3 }
0x2dfd   :  { %3412 = vmatpush.msrb.mxu0 %v3315_v11  ;;  %3549 = vmatpush.msra.mxu3 %v3315_v11 }
0x2dfe   :  { %3240 = vmatpush.msrb.mxu1 %v3216_v55  ;;  %v3314_v55 = vld [vmem:[%s6566_s16 + $0x20] sm:$0xff]  ;;  %3960 = vmatpush.msrb.mxu2 %v3315_v11 }
0x2dff   :  { %3413 = vmatpush.msrb.mxu0 %v3314_v55  ;;  %3550 = vmatpush.msra.mxu3 %v3314_v55 }
0x2e00   :  { %3241 = vmatpush.msrb.mxu1 %v3215_v38  ;;  %v3313_v38 = vld [vmem:[%s6566_s16 + $0x18] sm:$0xff]  ;;  %3961 = vmatpush.msrb.mxu2 %v3314_v55 }
0x2e01   :  { %3414 = vmatpush.msrb.mxu0 %v3313_v38  ;;  %3551 = vmatpush.msra.mxu3 %v3313_v38 }
0x2e02   :  { %3242 = vmatpush.msrb.mxu1 %v3214_v10  ;;  %v3312_v10 = vld [vmem:[%s6566_s16 + $0x10] sm:$0xff]  ;;  %3962 = vmatpush.msrb.mxu2 %v3313_v38 }
0x2e03   :  { %3415 = vmatpush.msrb.mxu0 %v3312_v10  ;;  %3552 = vmatpush.msra.mxu3 %v3312_v10 }
0x2e04   :  { %3243 = vmatpush.msrb.mxu1 %v3213_v47  ;;  %v3311_v47 = vld [vmem:[%s6566_s16 + $0x8] sm:$0xff]  ;;  %3963 = vmatpush.msrb.mxu2 %v3312_v10 }
0x2e05   :  { %3416 = vmatpush.msrb.mxu0 %v3311_v47  ;;  %3553 = vmatpush.msra.mxu3 %v3311_v47 }
0x2e06   :  { %3477 = vmatpush.msra.mxu1 %v6248_v29  ;;  %3964 = vmatpush.msrb.mxu2 %v3311_v47 }
0x2e08   :  { %3478 = vmatpush.msra.mxu1 %v6257_v27 }
0x2e0a   :  { %3479 = vmatpush.msra.mxu1 %v6262_v12 }
0x2e0c   :  { %3480 = vmatpush.msra.mxu1 %v6288_v45 }
0x2e14   :  { %v3143_v40 = vpop.permute.xlu0 %3142 }
0x2e15   :  { %v3145_v0 = vmul.f32 %v4537_v9, %v3143_v40 }
0x2e17   :  { %v3150_v46 = vadd.f32 %v3149_v41, %v3145_v0 }
0x2e19   :  { %3152 = vrot.lane.b32.xlu0 %v3150_v46, %s4541_s28 }
0x2e21   :  { %3157 = vrot.lane.b32.xlu0 %v3110_v63, %s4542_s1 }
0x2e6b   :  { %v3175_v22 = vpop.permute.xlu1 %3174 }
0x2e8b   :  { %v3153_v60 = vpop.permute.xlu0 %3152 }
0x2e8c   :  { %v3155_v23 = vsel %vm395_vm15, %v3140_v21, %v3153_v60  ;;  %v3294_v60 = vpop.f32.mrf.mxu2 }
0x2e8d   :  { %4205 = vmatmul.msk.f32.vlgmr.msra.gmra.mxu0 %vm247_vm1, %v3155_v23  ;;  %v3295_v23 = vadd.f32 %v6307_v5, %v3294_v60 }
0x2e93   :  { %v3158_v53 = vpop.permute.xlu0 %3157 }
0x2e94   :  { %v3160_v44 = vmul.f32 %v4538_v49, %v3158_v53  ;;  %v3310_v49 = vld [vmem:[%s6566_s16] sm:$0xff] }
0x2e95   :  { %3417 = vmatpush.msrb.mxu0 %v3310_v49  ;;  %3554 = vmatpush.msra.mxu3 %v3310_v49  ;;  %v6364_v53 = vld [vmem:[%s6567_s17] ss:$0 sm:$0xff] }
0x2e96   :  { %v3162_v17 = vadd.f32 %v3161_v28, %v3160_v44  ;;  %3965 = vmatpush.msrb.mxu2 %v3310_v49 }
0x2e97   :  { %3684 = vmatpush.msra.mxu0 %v3317_v4 }
0x2e98   :  { %v3177_v36 = vsel %vm395_vm15, %v3162_v17, %v3175_v22 }
0x2e99   :  { %4206 = vmatmul.msk.f32.vlgmr.msrb.gmra.mxu1 %vm247_vm1, %v3177_v36  ;;  %3685 = vmatpush.msra.mxu0 %v3316_v3 }
0x2e9a   :  { %3614 = vmatpush.msrb.mxu1 %v6248_v29 }
0x2e9b   :  { %3686 = vmatpush.msra.mxu0 %v3315_v11 }
0x2e9c   :  { %3615 = vmatpush.msrb.mxu1 %v6257_v27 }
0x2e9d   :  { %3687 = vmatpush.msra.mxu0 %v3314_v55 }
0x2e9e   :  { %3616 = vmatpush.msrb.mxu1 %v6262_v12 }
0x2e9f   :  { %3688 = vmatpush.msra.mxu0 %v3313_v38 }
0x2ea0   :  { %3617 = vmatpush.msrb.mxu1 %v6288_v45 }
0x2ea1   :  { %3689 = vmatpush.msra.mxu0 %v3312_v10 }
0x2ea3   :  { %3690 = vmatpush.msra.mxu0 %v3311_v47 }
0x2ea5   :  { %3691 = vmatpush.msra.mxu0 %v3310_v49 }
0x2f0a   :  { %v3210_v20 = vpop.f32.mrf.mxu0 }
0x2f0b   :  { %v3211_v57 = vadd.f32 %v4255_v42, %v3210_v20 }
0x2f0d   :  { %4212 = vmatmul.msk.f32.vlgmr.msrb.gmra.mxu3 %vm395_vm15, %v3211_v57 }
0x2f0e   :  { %3821 = vmatpush.msrb.mxu3 %v3317_v4 }
0x2f10   :  { %3822 = vmatpush.msrb.mxu3 %v3316_v3 }
0x2f12   :  { %3823 = vmatpush.msrb.mxu3 %v3315_v11 }
0x2f14   :  { %3824 = vmatpush.msrb.mxu3 %v3314_v55 }
0x2f16   :  { %v3245_v1 = vpop.f32.mrf.mxu1  ;;  %3825 = vmatpush.msrb.mxu3 %v3313_v38 }
0x2f17   :  { %v3246_v6 = vadd.f32 %v4256_v2, %v3245_v1 }
0x2f18   :  { %3826 = vmatpush.msrb.mxu3 %v3312_v10 }
0x2f19   :  { %3368 = vrot.lane.b32.xlu0 %v3246_v6, %s4541_s28 }
0x2f1a   :  { %3827 = vmatpush.msrb.mxu3 %v3311_v47 }
0x2f1c   :  { %3828 = vmatpush.msrb.mxu3 %v3310_v49 }
0x2f8b   :  { %v6317_v56 = vpop.permute.xlu0 %3368 }
0x2f90   :  { %v3339_v34 = vpop.f32.mrf.mxu3 }
0x2f91   :  { %v3342_v63 = vadd.f32 %v3339_v34, %v3292_v43 }
0x2f93   :  { %v3343_v13 = vmul.f32 2.0, %v3342_v63 }
0x2f95   :  { %v3344_v32 = vsel %vm4900_vm3, %v3343_v13, %v3342_v63 }
0x2f96   :  { %v4213_v62 = vmul.f32 -1.442695, %v3344_v32 }
0x2f98   :  { %4452 = vpow2.f32 %v4213_v62 }
0x2f9e   :  { %v4453_v7 = vpop.eup %4452 }
0x2f9f   :  { %v3348_v25 = vadd.f32 1.0, %v4453_v7 }
0x2fa1   :  { %4454 = vrcp.f32 %v3348_v25  ;;  %v3360_v54 = vand.u32 2147483648, %v3348_v25  ;;  %v3358_v37 = vand.u32 2147483647, %v3348_v25  ;;  %vm3354_vm14 = vweird.f32 %v3348_v25 }
0x2fa3   :  { %v3361_v8 = vor.u32 1.1754944e-38, %v3360_v54  ;;  %vm3359_vm4 = vcmp.eq.f32.partialorder %v3358_v37, 8.507059e+37 }
0x2fa7   :  { %v4455_v19 = vpop.eup %4454 }
0x2fa8   :  { %v3350_v24 = vmul.f32 %v4455_v19, %v3348_v25  ;;  %vm3355_vm6 = vweird.f32 %v4455_v19 }
0x2fa9   :  { %vm3356_vm2 = vmor %vm3354_vm14, %vm3355_vm6 }
0x2faa   :  { %v3351_v58 = vsub.f32 1.0, %v3350_v24 }
0x2fac   :  { %v3352_v9 = vmul.f32 %v4455_v19, %v3351_v58 }
0x2fae   :  { %v3353_v35 = vadd.f32 %v4455_v19, %v3352_v9 }
0x2fb0   :  { %v3357_v40 = vsel %vm3356_vm2, %v4455_v19, %v3353_v35 }
0x2fb1   :  { %v3362_v41 = vsel %vm3359_vm4, %v3361_v8, %v3357_v40 }
0x2fb2   :  { %v3364_v0 = vmul.f32 2.0, %v3362_v41 }
0x2fb4   :  { %v4214_v46 = vadd.f32 -1.0, %v3364_v0 }
0x2fb6   :  { %v3366_v18 = vsel %vm4900_vm3, %v4214_v46, %v3362_v41 }
0x2fb7   :  { %3373 = vrot.lane.b32.xlu2 %v3366_v18, %s4540_s27  ;;  %v3371_v15 = vmul.f32 %v6317_v56, %v3366_v18 }
0x3011   :  { %v3374_v14 = vpop.permute.xlu2 %3373 }
0x3012   :  { %v3376_v16 = vmul.f32 %v3374_v14, %v3366_v18 }
0x3014   :  { %3378 = vrot.lane.b32.xlu1 %v3376_v16, %s4541_s28 }
0x301c   :  { %3392 = vrot.lane.b32.xlu1 %v3211_v57, %s4541_s28 }
0x3086   :  { %v3379_v33 = vpop.permute.xlu1 %3378 }
0x3087   :  { %v6320_v26 = vadd.f32 %v3379_v33, %v3371_v15 }
0x3089   :  { %4456 = vtanh.f32 %v6320_v26 }
0x308e   :  { %v3393_v30 = vpop.permute.xlu1 %3392 }
0x308f   :  { %v4457_v61 = vpop.eup %4456 }
0x3090   :  { %3384 = vrot.lane.b32.xlu2 %v4457_v61, %s4540_s27 }
0x30ea   :  { %v3385_v59 = vpop.permute.xlu2 %3384 }
0x30eb   :  { %v3387_v52 = vmul.f32 %v3385_v59, %v3366_v18 }
0x30ed   :  { %3389 = vrot.lane.b32.xlu0 %v3387_v52, %s4541_s28 }
0x315f   :  { %v3390_v31 = vpop.permute.xlu0 %3389 }
0x3160   :  { %v3395_v21 = vsel %vm395_vm15, %v3390_v31, %v3393_v30  ;;  %4218 = vmatmul.msk.f32.vlgmr.msra.gmra.mxu1 %vm395_vm15, %v3390_v31 }
0x3161   :  { %4215 = vmatmul.msk.f32.vlgmr.msrb.gmra.mxu0 %vm247_vm1, %v3395_v21  ;;  %3751 = vmatpush.msra.mxu1 %v6248_v29 }
0x3163   :  { %3752 = vmatpush.msra.mxu1 %v6257_v27 }
0x3165   :  { %3753 = vmatpush.msra.mxu1 %v6262_v12 }
0x3167   :  { %3754 = vmatpush.msra.mxu1 %v6288_v45 }
0x31dd   :  { %v3482_v28 = vpop.f32.mrf.mxu1 }
0x31de   :  { %v3485_v44 = vadd.f32 %v3482_v28, %v3295_v23  ;;  %v3419_v17 = vpop.f32.mrf.mxu0 }
0x31df   :  { %v3420_v22 = vadd.f32 %v6364_v53, %v3419_v17 }
0x31e0   :  { %v3486_v36 = vmul.f32 2.0, %v3485_v44 }
0x31e1   :  { %v3422_v50 = vmul.f32 2.0, %v3420_v22 }
0x31e2   :  { %v3487_v42 = vsel %vm4900_vm3, %v3486_v36, %v3485_v44 }
0x31e3   :  { %v4219_v20 = vmul.f32 -1.442695, %v3487_v42  ;;  %v3423_v57 = vsel %vm4900_vm3, %v3422_v50, %v3420_v22 }
0x31e4   :  { %v4216_v2 = vmul.f32 -1.442695, %v3423_v57 }
0x31e5   :  { %4458 = vpow2.f32 %v4219_v20 }
0x31e6   :  { %4460 = vpow2.f32 %v4216_v2 }
0x31eb   :  { %v4459_v1 = vpop.eup %4458 }
0x31ec   :  { %v4461_v6 = vpop.eup %4460  ;;  %v3491_v48 = vadd.f32 1.0, %v4459_v1 }
0x31ed   :  { %v3427_v43 = vadd.f32 1.0, %v4461_v6 }
0x31ee   :  { %4462 = vrcp.f32 %v3491_v48  ;;  %v3503_v7 = vand.u32 2147483648, %v3491_v48  ;;  %v3501_v24 = vand.u32 2147483647, %v3491_v48  ;;  %vm3497_vm8 = vweird.f32 %v3491_v48 }
0x31ef   :  { %4464 = vrcp.f32 %v3427_v43  ;;  %v3439_v58 = vand.u32 2147483648, %v3427_v43  ;;  %v3437_v9 = vand.u32 2147483647, %v3427_v43  ;;  %vm3433_vm10 = vweird.f32 %v3427_v43 }
0x31f0   :  { %v3504_v35 = vor.u32 1.1754944e-38, %v3503_v7  ;;  %vm3502_vm11 = vcmp.eq.f32.partialorder %v3501_v24, 8.507059e+37 }
0x31f1   :  { %v3440_v41 = vor.u32 1.1754944e-38, %v3439_v58  ;;  %vm3438_vm13 = vcmp.eq.f32.partialorder %v3437_v9, 8.507059e+37 }
0x31f4   :  { %v4463_v34 = vpop.eup %4462 }
0x31f5   :  { %v4465_v63 = vpop.eup %4464  ;;  %v3493_v13 = vmul.f32 %v4463_v34, %v3491_v48  ;;  %vm3498_vm5 = vweird.f32 %v4463_v34 }
0x31f6   :  { %v3429_v32 = vmul.f32 %v4465_v63, %v3427_v43  ;;  %vm3434_vm7 = vweird.f32 %v4465_v63  ;;  %vm3499_vm9 = vmor %vm3497_vm8, %vm3498_vm5 }
0x31f7   :  { %v3494_v62 = vsub.f32 1.0, %v3493_v13  ;;  %vm3435_vm12 = vmor %vm3433_vm10, %vm3434_vm7 }
0x31f8   :  { %v3430_v25 = vsub.f32 1.0, %v3429_v32 }
0x31f9   :  { %v3495_v19 = vmul.f32 %v4463_v34, %v3494_v62 }
0x31fa   :  { %v3431_v54 = vmul.f32 %v4465_v63, %v3430_v25 }
0x31fb   :  { %v3496_v37 = vadd.f32 %v4463_v34, %v3495_v19 }
0x31fc   :  { %v3432_v8 = vadd.f32 %v4465_v63, %v3431_v54 }
0x31fd   :  { %v3500_v40 = vsel %vm3499_vm9, %v4463_v34, %v3496_v37 }
0x31fe   :  { %v3505_v0 = vsel %vm3502_vm11, %v3504_v35, %v3500_v40  ;;  %v3436_v46 = vsel %vm3435_vm12, %v4465_v63, %v3432_v8 }
0x31ff   :  { %v3507_v18 = vmul.f32 2.0, %v3505_v0  ;;  %v3441_v14 = vsel %vm3438_vm13, %v3440_v41, %v3436_v46 }
0x3200   :  { %v3443_v16 = vmul.f32 2.0, %v3441_v14 }
0x3201   :  { %v4220_v15 = vadd.f32 -1.0, %v3507_v18 }
0x3202   :  { %v4217_v33 = vadd.f32 -1.0, %v3443_v16 }
0x3203   :  { %v3509_v61 = vsel %vm4900_vm3, %v4220_v15, %v3505_v0 }
0x3204   :  { %3512 = vrot.lane.b32.xlu0 %v3509_v61, %s4540_s27  ;;  %v3445_v4 = vsel %vm4900_vm3, %v4217_v33, %v3441_v14  ;;  %v3510_v38 = vmul.f32 %v3509_v61, %v6320_v26  ;;  %v3250_v26 = vld [vmem:[%s6564_s2 + $0x10] sm:$0xff] }
0x3205   :  { %3448 = vrot.lane.b32.xlu2 %v3445_v4, %s4540_s27  ;;  %v3446_v47 = vmul.f32 %v3445_v4, %v6317_v56  ;;  %4209 = vmatmul.msk.f32.gmra.mxu2 %vm140_vm0, %v3250_v26 }
0x325f   :  { %v3449_v3 = vpop.permute.xlu2 %3448 }
0x3260   :  { %v3451_v39 = vmul.f32 %v3449_v3, %v3445_v4 }
0x3262   :  { %3453 = vrot.lane.b32.xlu1 %v3451_v39, %s4541_s28 }
0x3276   :  { %v3513_v11 = vpop.permute.xlu0 %3512 }
0x3277   :  { %v3515_v55 = vmul.f32 %v3513_v11, %v3509_v61 }
0x3279   :  { %3517 = vrot.lane.b32.xlu2 %v3515_v55, %s4541_s28 }
0x3288   :  { %v3297_v22 = vpop.f32.mrf.mxu2 }
0x3289   :  { %v3298_v36 = vadd.f32 %v6307_v5, %v3297_v22 }
0x32d3   :  { %v3518_v10 = vpop.permute.xlu2 %3517 }
0x32d4   :  { %v6381_v59 = vadd.f32 %v3518_v10, %v3510_v38  ;;  %v3454_v52 = vpop.permute.xlu1 %3453 }
0x32d5   :  { %v6383_v49 = vadd.f32 %v3454_v52, %v3446_v47 }
0x32d6   :  { %4466 = vtanh.f32 %v6381_v59 }
0x32d7   :  { %4468 = vtanh.f32 %v6383_v49 }
0x32dc   :  { %v4467_v30 = vpop.eup %4466 }
0x32dd   :  { %v4469_v31 = vpop.eup %4468  ;;  %3523 = vrot.lane.b32.xlu1 %v4467_v30, %s4540_s27 }
0x32de   :  { %3459 = vrot.lane.b32.xlu0 %v4469_v31, %s4540_s27 }
0x334f   :  { %v3524_v56 = vpop.permute.xlu1 %3523 }
0x3350   :  { %v3526_v21 = vmul.f32 %v3524_v56, %v3509_v61  ;;  %v3460_v60 = vpop.permute.xlu0 %3459 }
0x3351   :  { %v6393_v23 = vmul.f32 %v3460_v60, %v3445_v4 }
0x3352   :  { %3528 = vrot.lane.b32.xlu2 %v3526_v21, %s4541_s28 }
0x3353   :  { %3532 = vrot.lane.b32.xlu0 %v6393_v23, %s4540_s27 }
0x33ac   :  { %v3529_v28 = vpop.permute.xlu2 %3528 }
0x33ad   :  { %4224 = vmatmul.msk.f32.vlgmr.msrb.gmra.mxu1 %vm395_vm15, %v3529_v28 }
0x33ae   :  { %3888 = vmatpush.msrb.mxu1 %v6248_v29 }
0x33b0   :  { %3889 = vmatpush.msrb.mxu1 %v6257_v27 }
0x33b2   :  { %3890 = vmatpush.msrb.mxu1 %v6262_v12 }
0x33b4   :  { %3891 = vmatpush.msrb.mxu1 %v6288_v45 }
0x33c5   :  { %v3533_v44 = vpop.permute.xlu0 %3532 }
0x33c6   :  { %v3535_v17 = vsel %vm395_vm15, %v3529_v28, %v3533_v44  ;;  %v3251_v28 = vld [vmem:[%s6564_s2 + $0x18] sm:$0xff] }
0x33c7   :  { %4221 = vmatmul.msk.f32.vlgmr.msra.gmra.mxu3 %vm247_vm1, %v3535_v17  ;;  %4210 = vmatmul.msk.f32.gmra.mxu2 %vm140_vm0, %v3251_v28 }
0x342a   :  { %v3619_v50 = vpop.f32.mrf.mxu1 }
0x342b   :  { %v3622_v42 = vadd.f32 %v3619_v50, %v3298_v36 }
0x342d   :  { %v3623_v20 = vmul.f32 2.0, %v3622_v42 }
0x342f   :  { %v3624_v29 = vsel %vm4900_vm3, %v3623_v20, %v3622_v42 }
0x3430   :  { %v4225_v57 = vmul.f32 -1.442695, %v3624_v29 }
0x3432   :  { %4470 = vpow2.f32 %v4225_v57 }
0x3438   :  { %v4471_v27 = vpop.eup %4470 }
0x3439   :  { %v3628_v12 = vadd.f32 1.0, %v4471_v27 }
0x343b   :  { %4472 = vrcp.f32 %v3628_v12  ;;  %v3640_v6 = vand.u32 2147483648, %v3628_v12  ;;  %v3638_v43 = vand.u32 2147483647, %v3628_v12  ;;  %vm3634_vm14 = vweird.f32 %v3628_v12 }
0x343d   :  { %v3641_v63 = vor.u32 1.1754944e-38, %v3640_v6  ;;  %vm3639_vm4 = vcmp.eq.f32.partialorder %v3638_v43, 8.507059e+37 }
0x3441   :  { %v4473_v45 = vpop.eup %4472 }
0x3442   :  { %v3630_v2 = vmul.f32 %v4473_v45, %v3628_v12  ;;  %vm3635_vm6 = vweird.f32 %v4473_v45 }
0x3443   :  { %vm3636_vm2 = vmor %vm3634_vm14, %vm3635_vm6 }
0x3444   :  { %v3631_v1 = vsub.f32 1.0, %v3630_v2 }
0x3446   :  { %v3632_v48 = vmul.f32 %v4473_v45, %v3631_v1 }
0x3448   :  { %v3633_v34 = vadd.f32 %v4473_v45, %v3632_v48 }
0x344a   :  { %v3556_v13 = vpop.f32.mrf.mxu3  ;;  %v3637_v32 = vsel %vm3636_vm2, %v4473_v45, %v3633_v34  ;;  %v3300_v50 = vpop.f32.mrf.mxu2 }
0x344b   :  { %v3557_v62 = vadd.f32 %v6364_v53, %v3556_v13  ;;  %v3642_v7 = vsel %vm3639_vm4, %v3641_v63, %v3637_v32  ;;  %v3301_v42 = vadd.f32 %v6307_v5, %v3300_v50 }
0x344c   :  { %v3644_v25 = vmul.f32 2.0, %v3642_v7 }
0x344d   :  { %v3559_v19 = vmul.f32 2.0, %v3557_v62 }
0x344e   :  { %v4226_v24 = vadd.f32 -1.0, %v3644_v25 }
0x344f   :  { %v3560_v58 = vsel %vm4900_vm3, %v3559_v19, %v3557_v62 }
0x3450   :  { %v4222_v54 = vmul.f32 -1.442695, %v3560_v58  ;;  %v3646_v9 = vsel %vm4900_vm3, %v4226_v24, %v3642_v7 }
0x3451   :  { %3649 = vrot.lane.b32.xlu2 %v3646_v9, %s4540_s27  ;;  %v3647_v10 = vmul.f32 %v3646_v9, %v6381_v59 }
0x3452   :  { %4474 = vpow2.f32 %v4222_v54 }
0x3458   :  { %v4475_v37 = vpop.eup %4474 }
0x3459   :  { %v3564_v35 = vadd.f32 1.0, %v4475_v37 }
0x345b   :  { %4476 = vrcp.f32 %v3564_v35  ;;  %v3576_v0 = vand.u32 2147483648, %v3564_v35  ;;  %v3574_v18 = vand.u32 2147483647, %v3564_v35  ;;  %vm3570_vm7 = vweird.f32 %v3564_v35 }
0x345d   :  { %v3577_v16 = vor.u32 1.1754944e-38, %v3576_v0  ;;  %vm3575_vm9 = vcmp.eq.f32.partialorder %v3574_v18, 8.507059e+37 }
0x3461   :  { %v4477_v8 = vpop.eup %4476 }
0x3462   :  { %v3566_v40 = vmul.f32 %v4477_v8, %v3564_v35  ;;  %vm3571_vm5 = vweird.f32 %v4477_v8 }
0x3463   :  { %vm3572_vm8 = vmor %vm3570_vm7, %vm3571_vm5 }
0x3464   :  { %v3567_v41 = vsub.f32 1.0, %v3566_v40 }
0x3466   :  { %v3568_v46 = vmul.f32 %v4477_v8, %v3567_v41 }
0x3468   :  { %v3569_v14 = vadd.f32 %v4477_v8, %v3568_v46 }
0x346a   :  { %v3573_v15 = vsel %vm3572_vm8, %v4477_v8, %v3569_v14 }
0x346b   :  { %v3578_v33 = vsel %vm3575_vm9, %v3577_v16, %v3573_v15 }
0x346c   :  { %v3580_v61 = vmul.f32 2.0, %v3578_v33 }
0x346e   :  { %v4223_v4 = vadd.f32 -1.0, %v3580_v61 }
0x3470   :  { %v3582_v3 = vsel %vm4900_vm3, %v4223_v4, %v3578_v33 }
0x3471   :  { %3585 = vrot.lane.b32.xlu1 %v3582_v3, %s4540_s27  ;;  %v3583_v31 = vmul.f32 %v3582_v3, %v6383_v49 }
0x34ab   :  { %v3650_v39 = vpop.permute.xlu2 %3649 }
0x34ac   :  { %v3652_v11 = vmul.f32 %v3650_v39, %v3646_v9 }
0x34ae   :  { %3654 = vrot.lane.b32.xlu1 %v3652_v11, %s4541_s28 }
0x34e3   :  { %v3586_v55 = vpop.permute.xlu1 %3585 }
0x34e4   :  { %v3588_v38 = vmul.f32 %v3586_v55, %v3582_v3 }
0x34e6   :  { %3590 = vrot.lane.b32.xlu0 %v3588_v38, %s4541_s28 }
0x3520   :  { %v3655_v47 = vpop.permute.xlu1 %3654 }
0x3521   :  { %v6420_v52 = vadd.f32 %v3655_v47, %v3647_v10 }
0x3523   :  { %4478 = vtanh.f32 %v6420_v52 }
0x3529   :  { %v4479_v30 = vpop.eup %4478 }
0x352a   :  { %3660 = vrot.lane.b32.xlu0 %v4479_v30, %s4540_s27 }
0x3558   :  { %v3591_v26 = vpop.permute.xlu0 %3590 }
0x3559   :  { %v6425_v56 = vadd.f32 %v3591_v26, %v3583_v31 }
0x355b   :  { %4480 = vtanh.f32 %v6425_v56 }
0x3561   :  { %v4481_v21 = vpop.eup %4480 }
0x3562   :  { %3596 = vrot.lane.b32.xlu2 %v4481_v21, %s4540_s27 }
0x359c   :  { %v3661_v60 = vpop.permute.xlu0 %3660 }
0x359d   :  { %v3663_v59 = vmul.f32 %v3661_v60, %v3646_v9 }
0x359f   :  { %3665 = vrot.lane.b32.xlu1 %v3663_v59, %s4541_s28 }
0x35bc   :  { %v3597_v44 = vpop.permute.xlu2 %3596 }
0x35bd   :  { %v6434_v49 = vmul.f32 %v3597_v44, %v3582_v3 }
0x35bf   :  { %3669 = vrot.lane.b32.xlu2 %v6434_v49, %s4540_s27 }
0x3611   :  { %v3666_v17 = vpop.permute.xlu1 %3665 }
0x3612   :  { %4230 = vmatmul.msk.f32.vlgmr.msra.gmra.mxu1 %vm395_vm15, %v3666_v17 }
0x3619   :  { %v3670_v22 = vpop.permute.xlu2 %3669 }
0x361a   :  { %v3672_v36 = vsel %vm395_vm15, %v3666_v17, %v3670_v22 }
0x361b   :  { %4227 = vmatmul.msk.f32.vlgmr.msra.gmra.mxu0 %vm247_vm1, %v3672_v36 }
0x368f   :  { %v3756_v20 = vpop.f32.mrf.mxu1 }
0x3690   :  { %v3759_v29 = vadd.f32 %v3756_v20, %v3301_v42 }
0x3692   :  { %v3760_v57 = vmul.f32 2.0, %v3759_v29 }
0x3694   :  { %v3761_v27 = vsel %vm4900_vm3, %v3760_v57, %v3759_v29 }
0x3695   :  { %v4231_v12 = vmul.f32 -1.442695, %v3761_v27 }
0x3697   :  { %4482 = vpow2.f32 %v4231_v12 }
0x3698   :  { %v3693_v45 = vpop.f32.mrf.mxu0 }
0x3699   :  { %v3694_v2 = vadd.f32 %v6364_v53, %v3693_v45 }
0x369b   :  { %v3696_v1 = vmul.f32 2.0, %v3694_v2 }
0x369d   :  { %v4483_v6 = vpop.eup %4482  ;;  %v3697_v48 = vsel %vm4900_vm3, %v3696_v1, %v3694_v2 }
0x369e   :  { %v3765_v43 = vadd.f32 1.0, %v4483_v6  ;;  %v4228_v34 = vmul.f32 -1.442695, %v3697_v48 }
0x36a0   :  { %4484 = vrcp.f32 %v3765_v43  ;;  %v3777_v25 = vand.u32 2147483648, %v3765_v43  ;;  %v3775_v24 = vand.u32 2147483647, %v3765_v43  ;;  %vm3771_vm11 = vweird.f32 %v3765_v43 }
0x36a1   :  { %4486 = vpow2.f32 %v4228_v34 }
0x36a2   :  { %v3778_v54 = vor.u32 1.1754944e-38, %v3777_v25  ;;  %vm3776_vm13 = vcmp.eq.f32.partialorder %v3775_v24, 8.507059e+37 }
0x36a6   :  { %v4485_v63 = vpop.eup %4484 }
0x36a7   :  { %v4487_v13 = vpop.eup %4486  ;;  %v3767_v32 = vmul.f32 %v4485_v63, %v3765_v43  ;;  %vm3772_vm10 = vweird.f32 %v4485_v63 }
0x36a8   :  { %v3701_v62 = vadd.f32 1.0, %v4487_v13  ;;  %vm3773_vm12 = vmor %vm3771_vm11, %vm3772_vm10 }
0x36a9   :  { %v3768_v7 = vsub.f32 1.0, %v3767_v32 }
0x36aa   :  { %4488 = vrcp.f32 %v3701_v62  ;;  %v3713_v46 = vand.u32 2147483648, %v3701_v62  ;;  %v3711_v16 = vand.u32 2147483647, %v3701_v62  ;;  %vm3707_vm14 = vweird.f32 %v3701_v62 }
0x36ab   :  { %v3769_v19 = vmul.f32 %v4485_v63, %v3768_v7 }
0x36ac   :  { %v3714_v33 = vor.u32 1.1754944e-38, %v3713_v46  ;;  %vm3712_vm4 = vcmp.eq.f32.partialorder %v3711_v16, 8.507059e+37 }
0x36ad   :  { %v3770_v58 = vadd.f32 %v4485_v63, %v3769_v19 }
0x36af   :  { %v3774_v9 = vsel %vm3773_vm12, %v4485_v63, %v3770_v58 }
0x36b0   :  { %v4489_v37 = vpop.eup %4488  ;;  %v3779_v35 = vsel %vm3776_vm13, %v3778_v54, %v3774_v9 }
0x36b1   :  { %v3781_v8 = vmul.f32 2.0, %v3779_v35  ;;  %v3703_v40 = vmul.f32 %v4489_v37, %v3701_v62  ;;  %vm3708_vm6 = vweird.f32 %v4489_v37 }
0x36b2   :  { %vm3709_vm2 = vmor %vm3707_vm14, %vm3708_vm6 }
0x36b3   :  { %v4232_v41 = vadd.f32 -1.0, %v3781_v8  ;;  %v3704_v0 = vsub.f32 1.0, %v3703_v40 }
0x36b5   :  { %v3783_v18 = vsel %vm4900_vm3, %v4232_v41, %v3779_v35  ;;  %v3705_v14 = vmul.f32 %v4489_v37, %v3704_v0 }
0x36b6   :  { %3786 = vrot.lane.b32.xlu1 %v3783_v18, %s4540_s27  ;;  %v3784_v60 = vmul.f32 %v3783_v18, %v6420_v52 }
0x36b7   :  { %v3706_v15 = vadd.f32 %v4489_v37, %v3705_v14 }
0x36b9   :  { %v3710_v61 = vsel %vm3709_vm2, %v4489_v37, %v3706_v15 }
0x36ba   :  { %v3715_v4 = vsel %vm3712_vm4, %v3714_v33, %v3710_v61 }
0x36bb   :  { %v3717_v3 = vmul.f32 2.0, %v3715_v4 }
0x36bd   :  { %v4229_v39 = vadd.f32 -1.0, %v3717_v3 }
0x36bf   :  { %v3719_v11 = vsel %vm4900_vm3, %v4229_v39, %v3715_v4 }
0x36c0   :  { %3722 = vrot.lane.b32.xlu0 %v3719_v11, %s4540_s27  ;;  %v3720_v30 = vmul.f32 %v3719_v11, %v6425_v56  ;;  %v3252_v56 = vld [vmem:[%s6564_s2 + $0x20] sm:$0xff] }
0x36c1   :  { %4211 = vmatmul.msk.f32.gmra.mxu2 %vm140_vm0, %v3252_v56 }
0x3728   :  { %v3787_v55 = vpop.permute.xlu1 %3786 }
0x3729   :  { %v3789_v38 = vmul.f32 %v3787_v55, %v3783_v18 }
0x372b   :  { %3791 = vrot.lane.b32.xlu0 %v3789_v38, %s4541_s28 }
0x3732   :  { %v3723_v10 = vpop.permute.xlu0 %3722 }
0x3733   :  { %v3725_v47 = vmul.f32 %v3723_v10, %v3719_v11 }
0x3735   :  { %3727 = vrot.lane.b32.xlu2 %v3725_v47, %s4541_s28 }
0x3744   :  { %v3303_v29 = vpop.f32.mrf.mxu2 }
0x3745   :  { %v3304_v57 = vadd.f32 %v6307_v5, %v3303_v29 }
0x378f   :  { %v3728_v31 = vpop.permute.xlu2 %3727 }
0x3790   :  { %v6456_v26 = vadd.f32 %v3728_v31, %v3720_v30 }
0x3792   :  { %4490 = vtanh.f32 %v6456_v26 }
0x3798   :  { %v4491_v21 = vpop.eup %4490 }
0x3799   :  { %3733 = vrot.lane.b32.xlu1 %v4491_v21, %s4540_s27 }
0x379d   :  { %v3792_v59 = vpop.permute.xlu0 %3791 }
0x379e   :  { %v6461_v28 = vadd.f32 %v3792_v59, %v3784_v60 }
0x37a0   :  { %4492 = vtanh.f32 %v6461_v28 }
0x37a6   :  { %v4493_v44 = vpop.eup %4492 }
0x37a7   :  { %3797 = vrot.lane.b32.xlu2 %v4493_v44, %s4540_s27 }
0x3801   :  { %v3798_v17 = vpop.permute.xlu2 %3797 }
0x3802   :  { %v3800_v22 = vmul.f32 %v3798_v17, %v3783_v18 }
0x3804   :  { %3802 = vrot.lane.b32.xlu0 %v3800_v22, %s4541_s28 }
0x380b   :  { %v3734_v36 = vpop.permute.xlu1 %3733 }
0x380c   :  { %v6470_v52 = vmul.f32 %v3734_v36, %v3719_v11 }
0x380e   :  { %3806 = vrot.lane.b32.xlu1 %v6470_v52, %s4540_s27 }
0x3876   :  { %v3803_v50 = vpop.permute.xlu0 %3802 }
0x3877   :  { %4236 = vmatmul.msk.f32.vlgmr.msrb.gmra.mxu1 %vm395_vm15, %v3803_v50 }
0x3880   :  { %v3807_v42 = vpop.permute.xlu1 %3806 }
0x3881   :  { %v3809_v20 = vsel %vm395_vm15, %v3803_v50, %v3807_v42 }
0x3882   :  { %4233 = vmatmul.msk.f32.vlgmr.msrb.gmra.mxu3 %vm247_vm1, %v3809_v20 }
0x38f4   :  { %v3893_v27 = vpop.f32.mrf.mxu1 }
0x38f5   :  { %v3896_v12 = vadd.f32 %v3893_v27, %v3304_v57 }
0x38f7   :  { %v3897_v45 = vmul.f32 2.0, %v3896_v12 }
0x38f9   :  { %v3898_v2 = vsel %vm4900_vm3, %v3897_v45, %v3896_v12 }
0x38fa   :  { %v4237_v1 = vmul.f32 -1.442695, %v3898_v2 }
0x38fc   :  { %4494 = vpow2.f32 %v4237_v1 }
0x3902   :  { %v4495_v6 = vpop.eup %4494 }
0x3903   :  { %v3902_v48 = vadd.f32 1.0, %v4495_v6 }
0x3905   :  { %4496 = vrcp.f32 %v3902_v48  ;;  %v3830_v43 = vpop.f32.mrf.mxu3  ;;  %v3914_v25 = vand.u32 2147483648, %v3902_v48  ;;  %v3912_v24 = vand.u32 2147483647, %v3902_v48  ;;  %vm3908_vm5 = vweird.f32 %v3902_v48 }
0x3906   :  { %v3831_v34 = vadd.f32 %v6364_v53, %v3830_v43 }
0x3907   :  { %v3915_v9 = vor.u32 1.1754944e-38, %v3914_v25  ;;  %vm3913_vm8 = vcmp.eq.f32.partialorder %v3912_v24, 8.507059e+37 }
0x3908   :  { %v3833_v63 = vmul.f32 2.0, %v3831_v34 }
0x390a   :  { %v3834_v13 = vsel %vm4900_vm3, %v3833_v63, %v3831_v34 }
0x390b   :  { %v4497_v32 = vpop.eup %4496  ;;  %v4234_v5 = vmul.f32 -1.442695, %v3834_v13 }
0x390c   :  { %v3904_v62 = vmul.f32 %v4497_v32, %v3902_v48  ;;  %vm3909_vm0 = vweird.f32 %v4497_v32 }
0x390d   :  { %4498 = vpow2.f32 %v4234_v5  ;;  %vm3910_vm7 = vmor %vm3908_vm5, %vm3909_vm0 }
0x390e   :  { %v3905_v7 = vsub.f32 1.0, %v3904_v62 }
0x3910   :  { %v3906_v19 = vmul.f32 %v4497_v32, %v3905_v7 }
0x3912   :  { %v3907_v58 = vadd.f32 %v4497_v32, %v3906_v19 }
0x3913   :  { %v4499_v54 = vpop.eup %4498 }
0x3914   :  { %v3838_v37 = vadd.f32 1.0, %v4499_v54  ;;  %v3911_v35 = vsel %vm3910_vm7, %v4497_v32, %v3907_v58  ;;  %v4014_v54 = vld [vmem:[%s6568_s18 + $0x18] sm:$0xff] }
0x3915   :  { %v3916_v8 = vsel %vm3913_vm8, %v3915_v9, %v3911_v35  ;;  %4052 = vmatpush.msrb.mxu0 %v4014_v54  ;;  %v4013_v9 = vld [vmem:[%s6568_s18 + $0x10] sm:$0xff] }
0x3916   :  { %4500 = vrcp.f32 %v3838_v37  ;;  %v3918_v40 = vmul.f32 2.0, %v3916_v8  ;;  %v3850_v16 = vand.u32 2147483648, %v3838_v37  ;;  %v3848_v33 = vand.u32 2147483647, %v3838_v37 }
0x3917   :  { %vm3844_vm10 = vweird.f32 %v3838_v37  ;;  %4053 = vmatpush.msrb.mxu0 %v4013_v9 }
0x3918   :  { %v4238_v41 = vadd.f32 -1.0, %v3918_v40  ;;  %v3851_v4 = vor.u32 1.1754944e-38, %v3850_v16  ;;  %vm3849_vm12 = vcmp.eq.f32.partialorder %v3848_v33, 8.507059e+37 }
0x3919   :  { %4054 = vmatpush.msrb.mxu0 %v4012_v51 }
0x391a   :  { %v3920_v0 = vsel %vm4900_vm3, %v4238_v41, %v3916_v8 }
0x391b   :  { %3923 = vrot.lane.b32.xlu0 %v3920_v0, %s4540_s27  ;;  %v3921_v21 = vmul.f32 %v3920_v0, %v6461_v28 }
0x391c   :  { %v4501_v46 = vpop.eup %4500 }
0x391d   :  { %v3840_v18 = vmul.f32 %v4501_v46, %v3838_v37  ;;  %vm3845_vm9 = vweird.f32 %v4501_v46 }
0x391e   :  { %vm3846_vm11 = vmor %vm3844_vm10, %vm3845_vm9 }
0x391f   :  { %v3841_v14 = vsub.f32 1.0, %v3840_v18 }
0x3921   :  { %v3842_v15 = vmul.f32 %v4501_v46, %v3841_v14  ;;  %v4259_v14 = vld [vmem:[%s6569_s19] ss:$0 sm:$0xff] }
0x3923   :  { %v3843_v61 = vadd.f32 %v4501_v46, %v3842_v15 }
0x3925   :  { %v3847_v3 = vsel %vm3846_vm11, %v4501_v46, %v3843_v61 }
0x3926   :  { %v3852_v39 = vsel %vm3849_vm12, %v3851_v4, %v3847_v3 }
0x3927   :  { %v3854_v11 = vmul.f32 2.0, %v3852_v39 }
0x3929   :  { %v4235_v55 = vadd.f32 -1.0, %v3854_v11 }
0x392b   :  { %v3856_v38 = vsel %vm4900_vm3, %v4235_v55, %v3852_v39 }
0x392c   :  { %3859 = vrot.lane.b32.xlu2 %v3856_v38, %s4540_s27  ;;  %v3857_v56 = vmul.f32 %v3856_v38, %v6456_v26 }
0x3986   :  { %v3860_v10 = vpop.permute.xlu2 %3859 }
0x3987   :  { %v3862_v47 = vmul.f32 %v3860_v10, %v3856_v38 }
0x3989   :  { %3864 = vrot.lane.b32.xlu1 %v3862_v47, %s4541_s28 }
0x398d   :  { %v3924_v30 = vpop.permute.xlu0 %3923 }
0x398e   :  { %v3926_v31 = vmul.f32 %v3924_v30, %v3920_v0 }
0x3990   :  { %3928 = vrot.lane.b32.xlu2 %v3926_v31, %s4541_s28 }
0x39ea   :  { %v3929_v60 = vpop.permute.xlu2 %3928 }
0x39eb   :  { %v3931_v59 = vadd.f32 %v3929_v60, %v3921_v21 }
0x39ed   :  { %4502 = vtanh.f32 %v3931_v59 }
0x39f3   :  { %v4503_v44 = vpop.eup %4502 }
0x39f4   :  { %3934 = vrot.lane.b32.xlu1 %v4503_v44, %s4540_s27 }
0x39fb   :  { %v3865_v17 = vpop.permute.xlu1 %3864 }
0x39fc   :  { %v3867_v22 = vadd.f32 %v3865_v17, %v3857_v56 }
0x39fe   :  { %4504 = vtanh.f32 %v3867_v22 }
0x3a04   :  { %v4505_v36 = vpop.eup %4504 }
0x3a05   :  { %3870 = vrot.lane.b32.xlu0 %v4505_v36, %s4540_s27 }
0x3a66   :  { %v3935_v50 = vpop.permute.xlu1 %3934 }
0x3a67   :  { %v3937_v42 = vmul.f32 %v3935_v50, %v3920_v0 }
0x3a69   :  { %3939 = vrot.lane.b32.xlu2 %v3937_v42, %s4541_s28 }
0x3a77   :  { %v3871_v20 = vpop.permute.xlu0 %3870 }
0x3a78   :  { %v3873_v28 = vmul.f32 %v3871_v20, %v3856_v38 }
0x3a7a   :  { %3943 = vrot.lane.b32.xlu0 %v3873_v28, %s4540_s27 }
0x3ac3   :  { %v3940_v29 = vpop.permute.xlu2 %3939 }
0x3aec   :  { %v3944_v57 = vpop.permute.xlu0 %3943 }
0x3aed   :  { %v3946_v27 = vsel %vm395_vm15, %v3940_v29, %v3944_v57 }
0x3aee   :  { %4239 = vmatmul.msk.f32.vlgmr.msrb.gmra.mxu2 %vm247_vm1, %v3946_v27 }
0x3b71   :  { %v3967_v26 = vpop.f32.mrf.mxu2 }
0x3b72   :  { %v3968_v12 = vadd.f32 %v6364_v53, %v3967_v26 }
0x3b74   :  { %v3970_v45 = vmul.f32 2.0, %v3968_v12 }
0x3b76   :  { %v3971_v2 = vsel %vm4900_vm3, %v3970_v45, %v3968_v12 }
0x3b77   :  { %v4240_v1 = vmul.f32 -1.442695, %v3971_v2 }
0x3b79   :  { %4506 = vpow2.f32 %v4240_v1 }
0x3b7f   :  { %v4507_v6 = vpop.eup %4506 }
0x3b80   :  { %v3975_v48 = vadd.f32 1.0, %v4507_v6 }
0x3b82   :  { %4508 = vrcp.f32 %v3975_v48  ;;  %v3987_v13 = vand.u32 2147483648, %v3975_v48  ;;  %v3985_v5 = vand.u32 2147483647, %v3975_v48  ;;  %vm3981_vm1 = vweird.f32 %v3975_v48 }
0x3b84   :  { %v3988_v53 = vor.u32 1.1754944e-38, %v3987_v13  ;;  %vm3986_vm14 = vcmp.eq.f32.partialorder %v3985_v5, 8.507059e+37 }
0x3b88   :  { %v4509_v43 = vpop.eup %4508 }
0x3b89   :  { %v3977_v34 = vmul.f32 %v4509_v43, %v3975_v48  ;;  %vm3982_vm13 = vweird.f32 %v4509_v43 }
0x3b8a   :  { %vm3983_vm6 = vmor %vm3981_vm1, %vm3982_vm13 }
0x3b8b   :  { %v3978_v63 = vsub.f32 1.0, %v3977_v34 }
0x3b8d   :  { %v3979_v32 = vmul.f32 %v4509_v43, %v3978_v63 }
0x3b8f   :  { %v3980_v62 = vadd.f32 %v4509_v43, %v3979_v32 }
0x3b91   :  { %v3984_v7 = vsel %vm3983_vm6, %v4509_v43, %v3980_v62 }
0x3b92   :  { %v3989_v25 = vsel %vm3986_vm14, %v3988_v53, %v3984_v7 }
0x3b93   :  { %v3991_v19 = vmul.f32 2.0, %v3989_v25 }
0x3b95   :  { %v4241_v24 = vadd.f32 -1.0, %v3991_v19 }
0x3b97   :  { %v3993_v58 = vsel %vm4900_vm3, %v4241_v24, %v3989_v25 }
0x3b98   :  { %3996 = vrot.lane.b32.xlu1 %v3993_v58, %s4540_s27  ;;  %v3994_v40 = vmul.f32 %v3993_v58, %v3867_v22 }
0x3ba0   :  { %4020 = vrot.lane.b32.xlu1 %v6393_v23, %s4541_s28  ;;  %v4011_v23 = vld [vmem:[%s6568_s18] sm:$0xff] }
0x3ba1   :  { %4055 = vmatpush.msrb.mxu0 %v4011_v23 }
0x3ba8   :  { %4026 = vrot.lane.b32.xlu1 %v3873_v28, %s4541_s28 }
0x3c0a   :  { %v3997_v37 = vpop.permute.xlu1 %3996 }
0x3c0b   :  { %v3999_v35 = vmul.f32 %v3997_v37, %v3993_v58 }
0x3c0d   :  { %4001 = vrot.lane.b32.xlu2 %v3999_v35, %s4541_s28 }
0x3c12   :  { %v4021_v8 = vpop.permute.xlu1 %4020 }
0x3c13   :  { %4242 = vmatmul.msk.f32.vlgmr.msrb.gmra.mxu0 %vm395_vm15, %v4021_v8 }
0x3c15   :  { %4022 = vrot.lane.b32.xlu2 %v6434_v49, %s4541_s28 }
0x3c67   :  { %v4002_v41 = vpop.permute.xlu2 %4001 }
0x3c68   :  { %v4004_v0 = vadd.f32 %v4002_v41, %v3994_v40 }
0x3c6a   :  { %4510 = vtanh.f32 %v4004_v0 }
0x3c6f   :  { %v4023_v46 = vpop.permute.xlu2 %4022 }
0x3c70   :  { %v4511_v18 = vpop.eup %4510  ;;  %4243 = vmatmul.msk.f32.gmra.mxu0 %vm395_vm15, %v4023_v46 }
0x3c71   :  { %4007 = vrot.lane.b32.xlu0 %v4511_v18, %s4540_s27 }
0x3c79   :  { %4024 = vrot.lane.b32.xlu0 %v6470_v52, %s4541_s28  ;;  %v4027_v52 = vpop.permute.xlu1 %4026 }
0x3c90   :  { %v4057_v16 = vpop.f32.mrf.mxu0 }
0x3c91   :  { %v4058_v15 = vadd.f32 %v4259_v14, %v4057_v16 }
0x3c93   :  { %4072 = vst [vmem:[%s6570_s20] sm:$0xff] %v4058_v15 }
0x3ce3   :  { %v4008_v49 = vpop.permute.xlu0 %4007 }
0x3ce4   :  { %v4010_v33 = vmul.f32 %v4008_v49, %v3993_v58 }
0x3ce6   :  { %4028 = vrot.lane.b32.xlu2 %v4010_v33, %s4541_s28 }
0x3ceb   :  { %v4025_v61 = vpop.permute.xlu0 %4024 }
0x3cec   :  { %4244 = vmatmul.msk.f32.gmra.mxu0 %vm395_vm15, %v4025_v61 }
0x3ced   :  { %v4060_v4 = vpop.f32.mrf.mxu0 }
0x3cee   :  { %v4061_v3 = vadd.f32 %v4259_v14, %v4060_v4 }
0x3cf0   :  { %4073 = vst [vmem:[%s6570_s20 + $0x8] sm:$0xff] %v4061_v3 }
0x3cf4   :  { %4245 = vmatmul.msk.f32.gmra.mxu0 %vm395_vm15, %v4027_v52 }
0x3d40   :  { %v4029_v39 = vpop.permute.xlu2 %4028 }
0x3d41   :  { %4246 = vmatmul.msk.f32.gmra.mxu0 %vm395_vm15, %v4029_v39 }
0x3d69   :  { %v4063_v11 = vpop.f32.mrf.mxu0 }
0x3d6a   :  { %v4064_v55 = vadd.f32 %v4259_v14, %v4063_v11 }
0x3d6c   :  { %4074 = vst [vmem:[%s6570_s20 + $0x10] sm:$0xff] %v4064_v55 }
0x3d71   :  { %v4066_v38 = vpop.f32.mrf.mxu0 }
0x3d72   :  { %v4067_v10 = vadd.f32 %v4259_v14, %v4066_v38 }
0x3d74   :  { %4075 = vst [vmem:[%s6570_s20 + $0x18] sm:$0xff] %v4067_v10 }
0x3dbe   :  { %v4069_v47 = vpop.f32.mrf.mxu0 }
0x3dbf   :  { %v4070_v30 = vadd.f32 %v4259_v14, %v4069_v47 }
0x3dc1   :  { %4076 = vst [vmem:[%s6570_s20 + $0x20] sm:$0xff] %v4070_v30 }

</bundles_post_ra>
